<compile_context>
chip_gen: v6e
topology: v6e:2x2x1
jax: 0.10.0
libtpu: 0.0.40
codegen_flags: <defaults>
</compile_context>

<pallas_src>
import jax
import jax.numpy as jnp
from jax.experimental import pallas as pl
from jax.experimental.pallas import tpu as pltpu


OUT_PAD = 128                      # lane-dense padded output width (true width is 2)
_MIB = 1 << 20
_RESIDENT_VMEM_BUDGET = 40 * _MIB  # if the resident-W1 footprint exceeds this, K-tile
_VMEM_LIMIT_CAP = 48 * _MIB        # leaves headroom on v7x's 64 MiB VMEM


def _round_up(a, m):
    return ((a + m - 1) // m) * m


# ----------------------------------------------------------------------------
# Kernels
# ----------------------------------------------------------------------------
def _finalize_layers(acc_f32, w2_ref, b2_ref, w3_ref, b3_ref, o_ref):
    """ReLU(acc) -> layer 2 -> ReLU -> layer 3 (bf16 MXU, f32 accumulation)."""
    cd = w2_ref.dtype
    h1 = jnp.maximum(acc_f32, 0.0).astype(cd)              # stage h1 in compute dtype
    h2 = jnp.dot(h1, w2_ref[...], preferred_element_type=jnp.float32)
    h2 = jnp.maximum(h2 + b2_ref[...], 0.0).astype(cd)
    o_ref[...] = (jnp.dot(h2, w3_ref[...], preferred_element_type=jnp.float32)
                  + b3_ref[...])


def _mlp_resident_kernel(x_ref, w1_ref, b1_ref, w2_ref, b2_ref, w3_ref, b3_ref,
                         o_ref):
    """Grid = (batch_tiles,). All weights VMEM-resident; layer 1 is one dot."""
    cd = w1_ref.dtype
    acc = jnp.dot(x_ref[...].astype(cd), w1_ref[...],
                  preferred_element_type=jnp.float32) + b1_ref[...]
    _finalize_layers(acc, w2_ref, b2_ref, w3_ref, b3_ref, o_ref)


def _mlp_ktiled_kernel(x_ref, w1_ref, b1_ref, w2_ref, b2_ref, w3_ref, b3_ref,
                       o_ref, acc_ref):
    """Grid = (batch_tiles, k_tiles). Fallback for very large F: accumulate
    layer 1 over K in an f32 VMEM scratch, finalize at the last K step."""
    k = pl.program_id(1)
    cd = w1_ref.dtype

    @pl.when(k == 0)
    def _init():
        # Fold the layer-1 bias into the accumulator init (saves a full pass).
        acc_ref[...] = jnp.broadcast_to(b1_ref[...], acc_ref.shape)

    acc_ref[...] += jnp.dot(x_ref[...].astype(cd), w1_ref[...],
                            preferred_element_type=jnp.float32)

    @pl.when(k == pl.num_programs(1) - 1)
    def _fin():
        _finalize_layers(acc_ref[...], w2_ref, b2_ref, w3_ref, b3_ref, o_ref)


# ----------------------------------------------------------------------------
# Parameter preparation (call once, outside the hot path)
# ----------------------------------------------------------------------------
def prepare_params(params, compute_dtype=jnp.bfloat16):
    """Pre-convert weights to the compute dtype, reshape biases to (1, N) f32,
    and zero-pad the tiny (512, 2) final layer to 128 lanes. Do this ONCE."""
    w1, b1 = params["w1"], params["b1"]
    w2, b2 = params["w2"], params["b2"]
    w3, b3 = params["w3"], params["b3"]
    H1, H2, OUT = w1.shape[1], w2.shape[1], w3.shape[1]

    w3p = jnp.zeros((H2, OUT_PAD), compute_dtype).at[:, :OUT].set(
        w3.astype(compute_dtype))
    b3p = jnp.zeros((1, OUT_PAD), jnp.float32).at[0, :OUT].set(
        b3.astype(jnp.float32))

    return {
        "w1": w1.astype(compute_dtype),
        "b1": b1.reshape(1, H1).astype(jnp.float32),
        "w2": w2.astype(compute_dtype),
        "b2": b2.reshape(1, H2).astype(jnp.float32),
        "w3": w3p,
        "b3": b3p,
    }


# ----------------------------------------------------------------------------
# Forward
# ----------------------------------------------------------------------------
def _pick_tile_k(feat):
    """K tile for the fallback path: large multiple of 128 dividing F."""
    for cand in (4096, 2048, 1024, 512, 256, 128):
        if feat % cand == 0 and cand < feat:
            return cand
    return feat  # F not a multiple of 128 (or tiny): single full-extent K step


def prober_cifar10_forward(x, prepared, *, out_dim=2, tile_b=256):
    """Forward pass matching ProberCIFAR10.forward.

    x: array of shape (B, ...) whose trailing dims flatten to num_hidden.
    prepared: output of prepare_params() (bf16 weights, padded W3/b3).
    Returns: float32 array (B, out_dim).
    """
    B = x.shape[0]
    xf = x.reshape(B, -1)
    if xf.dtype != jnp.float32:
        xf = xf.astype(jnp.float32)          # torch's x.float()
    F = xf.shape[1]

    w1, b1 = prepared["w1"], prepared["b1"]
    w2, b2 = prepared["w2"], prepared["b2"]
    w3, b3 = prepared["w3"], prepared["b3"]
    H1, H2 = w1.shape[1], w2.shape[1]
    csz = jnp.dtype(w1.dtype).itemsize

    # Batch tile: up to 256 rows, multiple of 16 (sublane packing for bf16
    # intermediates); never split the batch just to create extra grid steps.
    tb = min(_round_up(tile_b, 16), _round_up(B, 16))
    B_pad = _round_up(B, tb)
    if B_pad != B:
        xf = jnp.pad(xf, ((0, B_pad - B), (0, 0)))

    n_btiles = B_pad // tb
    flops = 2 * B_pad * (F * H1 + H1 * H2 + H2 * OUT_PAD)

    # Footprint with all weights resident (double-buffered estimate + activations).
    resident_need = (2 * tb * F * 4                 # x tiles (f32, pipelined)
                     + 2 * F * H1 * csz             # W1
                     + 2 * H1 * H2 * csz            # W2
                     + 2 * H2 * OUT_PAD * csz       # W3 (padded)
                     + 2 * (H1 + H2 + OUT_PAD) * 4  # biases
                     + 2 * tb * OUT_PAD * 4         # out tiles
                     + tb * H1 * 4 + tb * H2 * 4)   # h1 / h2 intermediates

    use_resident = resident_need <= _RESIDENT_VMEM_BUDGET

    if use_resident:
        need = resident_need
        grid = (n_btiles,)
        in_specs = [
            pl.BlockSpec((tb, F), lambda i: (i, 0)),           # x tile (f32)
            pl.BlockSpec((F, H1), lambda i: (0, 0)),           # W1 (resident)
            pl.BlockSpec((1, H1), lambda i: (0, 0)),           # b1
            pl.BlockSpec((H1, H2), lambda i: (0, 0)),          # W2
            pl.BlockSpec((1, H2), lambda i: (0, 0)),           # b2
            pl.BlockSpec((H2, OUT_PAD), lambda i: (0, 0)),     # W3 (padded)
            pl.BlockSpec((1, OUT_PAD), lambda i: (0, 0)),      # b3 (padded)
        ]
        out_spec = pl.BlockSpec((tb, OUT_PAD), lambda i: (i, 0))
        scratch = []
        kernel = _mlp_resident_kernel
        dim_sem = ("parallel",)
        w1_bytes = F * H1 * csz                      # W1 fetched from HBM once
    else:
        # Very large F: pipeline W1 over a K ("arbitrary") axis with an f32 acc.
        tk = _pick_tile_k(F)
        need = (2 * tb * tk * 4 + 2 * tk * H1 * csz + 2 * H1 * H2 * csz
                + 2 * H2 * OUT_PAD * csz + 2 * (H1 + H2 + OUT_PAD) * 4
                + 2 * tb * OUT_PAD * 4 + tb * H1 * 4 + tb * H2 * 4)
        grid = (n_btiles, F // tk)
        in_specs = [
            pl.BlockSpec((tb, tk), lambda i, k: (i, k)),           # x tile (f32)
            pl.BlockSpec((tk, H1), lambda i, k: (k, 0)),           # W1 (K-pipelined)
            pl.BlockSpec((1, H1), lambda i, k: (0, 0)),            # b1
            pl.BlockSpec((H1, H2), lambda i, k: (0, 0)),           # W2
            pl.BlockSpec((1, H2), lambda i, k: (0, 0)),            # b2
            pl.BlockSpec((H2, OUT_PAD), lambda i, k: (0, 0)),      # W3 (padded)
            pl.BlockSpec((1, OUT_PAD), lambda i, k: (0, 0)),       # b3 (padded)
        ]
        out_spec = pl.BlockSpec((tb, OUT_PAD), lambda i, k: (i, 0))
        scratch = [pltpu.VMEM((tb, H1), jnp.float32)]
        kernel = _mlp_ktiled_kernel
        dim_sem = ("parallel", "arbitrary")
        w1_bytes = n_btiles * F * H1 * csz           # W1 re-streamed per batch tile

    vmem_limit = int(min(max(need + 8 * _MIB, 32 * _MIB), _VMEM_LIMIT_CAP))
    bytes_accessed = (B_pad * F * 4 + w1_bytes + H1 * H2 * csz
                      + H2 * OUT_PAD * csz + (H1 + H2 + OUT_PAD) * 4
                      + B_pad * OUT_PAD * 4)
    cost = pl.CostEstimate(flops=int(flops), transcendentals=0,
                           bytes_accessed=int(bytes_accessed))

    out_padded = pl.pallas_call(
        kernel,
        out_shape=jax.ShapeDtypeStruct((B_pad, OUT_PAD), jnp.float32),
        grid_spec=pltpu.PrefetchScalarGridSpec(
            num_scalar_prefetch=0,
            grid=grid,
            in_specs=in_specs,
            out_specs=out_spec,
            scratch_shapes=scratch,
        ),
        compiler_params=pltpu.CompilerParams(
            dimension_semantics=dim_sem,
            vmem_limit_bytes=vmem_limit,
        ),
        cost_estimate=cost,
    )(xf, w1, b1, w2, b2, w3, b3)

    return out_padded[:B, :out_dim]


# ----------------------------------------------------------------------------
# Synthetic init + pure-JAX reference
# ----------------------------------------------------------------------------
def init_params(key, num_hidden):
    """Deterministic synthetic init (shapes match the module's nn.Linear layers)."""
    ks = jax.random.split(key, 6)

    def u(k, shape, fan_in):
        bound = 1.0 / jnp.sqrt(fan_in)
        return jax.random.uniform(k, shape, jnp.float32, -bound, bound)

    # Stored (in, out); equivalent to torch weight.T.
    return {
        "w1": u(ks[0], (num_hidden, 2048), num_hidden),
        "b1": u(ks[1], (2048,), num_hidden),
        "w2": u(ks[2], (2048, 512), 2048),
        "b2": u(ks[3], (512,), 2048),
        "w3": u(ks[4], (512, 2), 512),
        "b3": u(ks[5], (2,), 512),
    }


def reference_forward(x, params, compute_dtype=jnp.bfloat16):
    """Pure-JAX reference mirroring the PyTorch forward (same bf16/f32 numerics)."""
    B = x.shape[0]
    h = x.astype(jnp.float32).reshape(B, -1)
    cd = compute_dtype
    h = jnp.maximum(
        jnp.dot(h.astype(cd), params["w1"].astype(cd),
                preferred_element_type=jnp.float32) + params["b1"], 0.0)
    h = jnp.maximum(
        jnp.dot(h.astype(cd), params["w2"].astype(cd),
                preferred_element_type=jnp.float32) + params["b2"], 0.0)
    return (jnp.dot(h.astype(cd), params["w3"].astype(cd),
                    preferred_element_type=jnp.float32) + params["b3"])


if __name__ == "__main__":
    key = jax.random.PRNGKey(0)
    k_x, k_p = jax.random.split(key)

    # Small NCHW input: (B=64, C=4, H=16, W=16) -> flattens to num_hidden = 1024.
    B, C, H, W = 64, 4, 16, 16
    num_hidden = C * H * W
    x = jax.random.normal(k_x, (B, C, H, W), jnp.float32)

    params = init_params(k_p, num_hidden)
    prepared = prepare_params(params)          # one-time bf16 cast + W3/b3 lane-pad

    out = prober_cifar10_forward(x, prepared)
    out = jax.block_until_ready(out)

    ref = reference_forward(x, params, compute_dtype=jnp.bfloat16)
    assert out.shape == (B, 2), out.shape
    max_err = float(jnp.max(jnp.abs(out - ref)))
    assert jnp.allclose(out, ref, atol=2e-2, rtol=2e-2), f"mismatch vs ref: {max_err}"

    print("KERNEL_OK")
</pallas_src>

<mosaic_0001>
module attributes {stable_mosaic.version = 11 : i64} {
  func.func @_mlp_resident_kernel(%arg0: i32, %arg1: memref<64x1024xf32, #tpu.memory_space<vmem>>, %arg2: memref<1024x2048xbf16, #tpu.memory_space<vmem>>, %arg3: memref<1x2048xf32, #tpu.memory_space<vmem>>, %arg4: memref<2048x512xbf16, #tpu.memory_space<vmem>>, %arg5: memref<1x512xf32, #tpu.memory_space<vmem>>, %arg6: memref<512x128xbf16, #tpu.memory_space<vmem>>, %arg7: memref<1x128xf32, #tpu.memory_space<vmem>>, %arg8: memref<64x128xf32, #tpu.memory_space<vmem>>) attributes {dimension_semantics = [#tpu.dimension_semantics<parallel>], iteration_bounds = array<i64: 1>, scalar_prefetch = 0 : i64, scratch_operands = 0 : i64, tpu.core_type = #tpu.core_type<tc>, window_params = [{transform_indices = @transform_0, window_bounds = array<i64: 64, 1024>}, {pipeline_mode = #tpu.pipeline_mode<synchronous>, transform_indices = @transform_1, window_bounds = array<i64: 1024, 2048>}, {pipeline_mode = #tpu.pipeline_mode<synchronous>, transform_indices = @transform_2, window_bounds = array<i64: 1, 2048>}, {pipeline_mode = #tpu.pipeline_mode<synchronous>, transform_indices = @transform_3, window_bounds = array<i64: 2048, 512>}, {pipeline_mode = #tpu.pipeline_mode<synchronous>, transform_indices = @transform_4, window_bounds = array<i64: 1, 512>}, {pipeline_mode = #tpu.pipeline_mode<synchronous>, transform_indices = @transform_5, window_bounds = array<i64: 512, 128>}, {pipeline_mode = #tpu.pipeline_mode<synchronous>, transform_indices = @transform_6, window_bounds = array<i64: 1, 128>}, {transform_indices = @transform_7, window_bounds = array<i64: 64, 128>}]} {
    %c0 = arith.constant 0 : index
    %c0_0 = arith.constant 0 : index
    %0 = vector.load %arg1[%c0, %c0_0] : memref<64x1024xf32, #tpu.memory_space<vmem>>, vector<64x1024xf32>
    %1 = arith.truncf %0 : vector<64x1024xf32> to vector<64x1024xbf16>
    %c0_1 = arith.constant 0 : index
    %c0_2 = arith.constant 0 : index
    %2 = vector.load %arg2[%c0_1, %c0_2] : memref<1024x2048xbf16, #tpu.memory_space<vmem>>, vector<1024x2048xbf16>
    %cst = arith.constant dense<0.000000e+00> : vector<64x2048xf32>
    %3 = tpu.matmul %1, %2, %cst {dimension_numbers = #tpu.dot_dimension_numbers<[1], [0], [0], [1], [0, 0, 1, 1], [], []>} : vector<64x1024xbf16>, vector<1024x2048xbf16>, vector<64x2048xf32> -> vector<64x2048xf32>
    %c0_3 = arith.constant 0 : index
    %c0_4 = arith.constant 0 : index
    %4 = vector.load %arg3[%c0_3, %c0_4] : memref<1x2048xf32, #tpu.memory_space<vmem>>, vector<1x2048xf32>
    %5 = vector.broadcast %4 : vector<1x2048xf32> to vector<64x2048xf32>
    %6 = arith.addf %3, %5 : vector<64x2048xf32>
    %cst_5 = arith.constant 0.000000e+00 : f32
    %7 = vector.broadcast %cst_5 : f32 to vector<64x2048xf32>
    %8 = arith.maximumf %6, %7 : vector<64x2048xf32>
    %9 = arith.truncf %8 : vector<64x2048xf32> to vector<64x2048xbf16>
    %c0_6 = arith.constant 0 : index
    %c0_7 = arith.constant 0 : index
    %10 = vector.load %arg4[%c0_6, %c0_7] : memref<2048x512xbf16, #tpu.memory_space<vmem>>, vector<2048x512xbf16>
    %cst_8 = arith.constant dense<0.000000e+00> : vector<64x512xf32>
    %11 = tpu.matmul %9, %10, %cst_8 {dimension_numbers = #tpu.dot_dimension_numbers<[1], [0], [0], [1], [0, 0, 1, 1], [], []>} : vector<64x2048xbf16>, vector<2048x512xbf16>, vector<64x512xf32> -> vector<64x512xf32>
    %c0_9 = arith.constant 0 : index
    %c0_10 = arith.constant 0 : index
    %12 = vector.load %arg5[%c0_9, %c0_10] : memref<1x512xf32, #tpu.memory_space<vmem>>, vector<1x512xf32>
    %13 = vector.broadcast %12 : vector<1x512xf32> to vector<64x512xf32>
    %14 = arith.addf %11, %13 : vector<64x512xf32>
    %cst_11 = arith.constant 0.000000e+00 : f32
    %15 = vector.broadcast %cst_11 : f32 to vector<64x512xf32>
    %16 = arith.maximumf %14, %15 : vector<64x512xf32>
    %17 = arith.truncf %16 : vector<64x512xf32> to vector<64x512xbf16>
    %c0_12 = arith.constant 0 : index
    %c0_13 = arith.constant 0 : index
    %18 = vector.load %arg6[%c0_12, %c0_13] : memref<512x128xbf16, #tpu.memory_space<vmem>>, vector<512x128xbf16>
    %cst_14 = arith.constant dense<0.000000e+00> : vector<64x128xf32>
    %19 = tpu.matmul %17, %18, %cst_14 {dimension_numbers = #tpu.dot_dimension_numbers<[1], [0], [0], [1], [0, 0, 1, 1], [], []>} : vector<64x512xbf16>, vector<512x128xbf16>, vector<64x128xf32> -> vector<64x128xf32>
    %c0_15 = arith.constant 0 : index
    %c0_16 = arith.constant 0 : index
    %20 = vector.load %arg7[%c0_15, %c0_16] : memref<1x128xf32, #tpu.memory_space<vmem>>, vector<1x128xf32>
    %21 = vector.broadcast %20 : vector<1x128xf32> to vector<64x128xf32>
    %22 = arith.addf %19, %21 : vector<64x128xf32>
    %c0_17 = arith.constant 0 : index
    %c0_18 = arith.constant 0 : index
    %23 = vector.load %arg8[%c0_17, %c0_18] : memref<64x128xf32, #tpu.memory_space<vmem>>, vector<64x128xf32>
    tpu.vector_store %arg8[%c0_17, %c0_18], %22 {strides = array<i32>} : memref<64x128xf32, #tpu.memory_space<vmem>>, vector<64x128xf32>,
    return
  }
  func.func @transform_0(%arg0: i32) -> (i32, i32) {
    %c0_i32 = arith.constant 0 : i32
    %c0_i32_0 = arith.constant 0 : i32
    return %arg0, %c0_i32 : i32, i32
  }
  func.func @transform_1(%arg0: i32) -> (i32, i32) {
    %c0_i32 = arith.constant 0 : i32
    %c0_i32_0 = arith.constant 0 : i32
    %c0_i32_1 = arith.constant 0 : i32
    return %c0_i32, %c0_i32_0 : i32, i32
  }
  func.func @transform_2(%arg0: i32) -> (i32, i32) {
    %c0_i32 = arith.constant 0 : i32
    %c0_i32_0 = arith.constant 0 : i32
    %c0_i32_1 = arith.constant 0 : i32
    return %c0_i32, %c0_i32_0 : i32, i32
  }
  func.func @transform_3(%arg0: i32) -> (i32, i32) {
    %c0_i32 = arith.constant 0 : i32
    %c0_i32_0 = arith.constant 0 : i32
    %c0_i32_1 = arith.constant 0 : i32
    return %c0_i32, %c0_i32_0 : i32, i32
  }
  func.func @transform_4(%arg0: i32) -> (i32, i32) {
    %c0_i32 = arith.constant 0 : i32
    %c0_i32_0 = arith.constant 0 : i32
    %c0_i32_1 = arith.constant 0 : i32
    return %c0_i32, %c0_i32_0 : i32, i32
  }
  func.func @transform_5(%arg0: i32) -> (i32, i32) {
    %c0_i32 = arith.constant 0 : i32
    %c0_i32_0 = arith.constant 0 : i32
    %c0_i32_1 = arith.constant 0 : i32
    return %c0_i32, %c0_i32_0 : i32, i32
  }
  func.func @transform_6(%arg0: i32) -> (i32, i32) {
    %c0_i32 = arith.constant 0 : i32
    %c0_i32_0 = arith.constant 0 : i32
    %c0_i32_1 = arith.constant 0 : i32
    return %c0_i32, %c0_i32_0 : i32, i32
  }
  func.func @transform_7(%arg0: i32) -> (i32, i32) {
    %c0_i32 = arith.constant 0 : i32
    %c0_i32_0 = arith.constant 0 : i32
    return %arg0, %c0_i32 : i32, i32
  }
}

</mosaic_0001>

<bundles_post_ra>
// kernel: tpu_custom_call.1
= control target key start
LH: loop header
LB: loop body
LE: loop exit
PB: predicated region body
PF: predicated region fallthrough
CT: control target
= control target key end

     0   :  { %12 = vsyncpa [#allocation3], 0  ;;  %s18515_s0 = inlined_call_operand.hbm [shape: f32[64,1024], index: 0, kind: input, shape index: {}]   ;;  %s18516_s1 = inlined_call_operand.hbm [shape: bf16[1024,2048], index: 1, kind: input, shape index: {}]   ;;  %s18517_s2 = inlined_call_operand.hbm [shape: f32[1,2048], index: 2, kind: input, shape index: {}]   ;;  %s18518_s3 = inlined_call_operand.hbm [shape: bf16[2048,512], index: 3, kind: input, shape index: {}]   ;;  %s18519_s4 = inlined_call_operand.hbm [shape: f32[1,512], index: 4, kind: input, shape index: {}]   ;;  %s18520_s5 = inlined_call_operand.hbm [shape: bf16[512,128], index: 5, kind: input, shape index: {}]   ;;  %s18521_s6 = inlined_call_operand.hbm [shape: f32[1,128], index: 6, kind: input, shape index: {}]   ;;  %s18522_s7 = inlined_call_operand.hbm [shape: f32[64,128], index: 7, kind: output, shape index: {}]  }
   0x1   :  { %13 = vsyncpa [#allocation6], 0 }
   0x2   :  { %14 = vsyncpa [#allocation9], 0 }
   0x3   :  { %15 = vsyncpa [#allocation12], 0 }
   0x4   :  { %16 = vsyncpa [#allocation4], 0  ;;  %s16341_s24 = smov [#allocation5]   ;;  %s16342_s26 = smov [#allocation8]  }
   0x5   :  { %s34_s25 = sshll.u32 %s16341_s24, 4  ;;  %s56_s27 = sshll.u32 %s16342_s26, 4  ;;  %s35_s25 = int_to_ptr.vmem [resolvable:$true] %s34_s25  ;;  %s57_s27 = int_to_ptr.vmem [resolvable:$true] %s56_s27 }
   0x6   :  { %s16179_s28 = scalar_lea.vmem %s35_s25, 131072  ;;  %p16184_p1 = scmp.lt.s32.totalorder %s35_s25, %s35_s25 }
   0x7   :  { %p16180_p0 = scmp.ne.s32.totalorder %s35_s25, %s16179_s28  ;;  %p16185_p2 = scmp.lt.s32.totalorder %s16179_s28, %s16179_s28 }
   0x9   :  { %p16186_p3 = por %p16185_p2, %p16184_p1 }
   0xb   :  { %p16187_p4 = pnand %p16186_p3, %p16180_p0 }
   0xd   :  { %16190 = shalt.err (!%p16187_p4)
}
   0xe   :  { %s16343_s29 = smov 1024   ;;  %s16344_s30 = smov 64  }
   0xf   :  { %40 = dma.hbm_to_vmem [thread:$0]  %s18516_s1, 131072, %s35_s25, [#allocation6], %s16343_s29, %s16343_s29, %s16344_s30  }
  0x10   :  { %s16199_s10 = scalar_lea.vmem %s57_s27, 65536  ;;  %p16204_p6 = scmp.lt.s32.totalorder %s57_s27, %s57_s27 }
  0x11   :  { %p16200_p5 = scmp.ne.s32.totalorder %s57_s27, %s16199_s10  ;;  %p16205_p7 = scmp.lt.s32.totalorder %s16199_s10, %s16199_s10 }
  0x13   :  { %p16206_p8 = por %p16205_p7, %p16204_p6 }
  0x15   :  { %p16207_p9 = pnand %p16206_p8, %p16200_p5 }
  0x17   :  { %16210 = shalt.err (!%p16207_p9)
}
  0x18   :  { %s16345_s11 = smov 256   ;;  %s16346_s12 = smov 16  }
  0x19   :  { %62 = dma.hbm_to_vmem [thread:$0]  %s18518_s3, 65536, %s57_s27, [#allocation9], %s16345_s11, %s16345_s11, %s16346_s12  }
  0x1a   :  { %s16347_s15 = smov [#allocation11]   ;;  %s16348_s17 = smov [#allocation2]  }
  0x1b   :  { %s78_s16 = sshll.u32 %s16347_s15, 4  ;;  %s22_s18 = sshll.u32 %s16348_s17, 4  ;;  %s79_s16 = int_to_ptr.vmem [resolvable:$true] %s78_s16  ;;  %s23_s18 = int_to_ptr.vmem [resolvable:$true] %s22_s18 }
  0x1c   :  { %s16219_s19 = scalar_lea.vmem %s79_s16, 4096  ;;  %p16224_p11 = scmp.lt.s32.totalorder %s79_s16, %s79_s16 }
  0x1d   :  { %p16220_p10 = scmp.ne.s32.totalorder %s79_s16, %s16219_s19  ;;  %p16225_p12 = scmp.lt.s32.totalorder %s16219_s19, %s16219_s19 }
  0x1f   :  { %p16226_p13 = por %p16225_p12, %p16224_p11 }
  0x21   :  { %p16227_p0 = pnand %p16226_p13, %p16220_p10 }
  0x23   :  { %16230 = shalt.err (!%p16227_p0)
}
  0x24   :  { %s16349_s1 = smov 4   ;;  %s16239_s3 = scalar_lea.vmem %s23_s18, 8192 }
  0x25   :  { %84 = dma.hbm_to_vmem [thread:$0]  %s18520_s5, 4096, %s79_s16, [#allocation12], %s16344_s30, %s16344_s30, %s16349_s1  }
  0x26   :  { %p16240_p1 = scmp.ne.s32.totalorder %s23_s18, %s16239_s3  ;;  %p16244_p2 = scmp.lt.s32.totalorder %s23_s18, %s23_s18 }
  0x27   :  { %p16245_p3 = scmp.lt.s32.totalorder %s16239_s3, %s16239_s3 }
  0x29   :  { %p16246_p4 = por %p16245_p3, %p16244_p2 }
  0x2b   :  { %p16247_p5 = pnand %p16246_p4, %p16240_p1 }
  0x2d   :  { %16250 = shalt.err (!%p16247_p5)
}
  0x2e   :  { %28 = dma.hbm_to_vmem [thread:$0]  %s18515_s0, 8192, %s23_s18, [#allocation3], %s16343_s29, %s16343_s29, %s16344_s30  }
  0x2f   :  { %s16350_s24 = smov [#allocation7]   ;;  %s16351_s26 = smov [#allocation10]  }
  0x30   :  { %s47_s25 = sshll.u32 %s16350_s24, 4  ;;  %s69_s5 = sshll.u32 %s16351_s26, 4  ;;  %s48_s25 = int_to_ptr.vmem [resolvable:$true] %s47_s25  ;;  %s70_s5 = int_to_ptr.vmem [resolvable:$true] %s69_s5 }
  0x31   :  { %s16259_s27 = scalar_lea.vmem %s48_s25, 256  ;;  %p16264_p7 = scmp.lt.s32.totalorder %s48_s25, %s48_s25 }
  0x32   :  { %p16260_p6 = scmp.ne.s32.totalorder %s48_s25, %s16259_s27  ;;  %p16265_p8 = scmp.lt.s32.totalorder %s16259_s27, %s16259_s27 }
  0x34   :  { %p16266_p9 = por %p16265_p8, %p16264_p7 }
  0x36   :  { %p16267_p10 = pnand %p16266_p9, %p16260_p6 }
  0x38   :  { %16270 = shalt.err (!%p16267_p10)
}
  0x39   :  { %50 = dma.hbm_to_vmem [thread:$0]  %s18517_s2, 256, %s48_s25, [#allocation6]  }
  0x3a   :  { %s16279_s9 = scalar_lea.vmem %s70_s5, 64  ;;  %p16284_p12 = scmp.lt.s32.totalorder %s70_s5, %s70_s5 }
  0x3b   :  { %p16280_p11 = scmp.ne.s32.totalorder %s70_s5, %s16279_s9  ;;  %p16285_p13 = scmp.lt.s32.totalorder %s16279_s9, %s16279_s9 }
  0x3d   :  { %p16286_p0 = por %p16285_p13, %p16284_p12 }
  0x3f   :  { %p16287_p1 = pnand %p16286_p0, %p16280_p11 }
  0x41   :  { %16290 = shalt.err (!%p16287_p1)
}
  0x42   :  { %72 = dma.hbm_to_vmem [thread:$0]  %s18519_s4, 64, %s70_s5, [#allocation9]  }
  0x43   :  { %s16352_s30 = smov [#allocation13]  }
  0x44   :  { %s91_s10 = sshll.u32 %s16352_s30, 4  ;;  %s92_s10 = int_to_ptr.vmem [resolvable:$true] %s91_s10 }
  0x45   :  { %s16299_s11 = scalar_lea.vmem %s92_s10, 16  ;;  %s16303_s12 = scalar_lea.vmem %s92_s10, 32 }
  0x46   :  { %p16300_p2 = scmp.ne.s32.totalorder %s92_s10, %s16299_s11  ;;  %p16304_p3 = scmp.lt.s32.totalorder %s92_s10, %s92_s10 }
  0x47   :  { %p16305_p4 = scmp.lt.s32.totalorder %s16303_s12, %s16299_s11 }
  0x49   :  { %p16306_p5 = por %p16305_p4, %p16304_p3 }
  0x4b   :  { %p16307_p6 = pnand %p16306_p5, %p16300_p2 }
  0x4d   :  { %16310 = shalt.err (!%p16307_p6)
}
  0x4e   :  { %94 = dma.hbm_to_vmem [thread:$0]  %s18521_s6, 16, %s92_s10, [#allocation12]  }
  0x4f   :  { %16331 = dma.done.wait [#allocation3], 8192  }
  0x50   :  { %16332 = vsyncadd [#allocation3], 4294959104 }
  0x51   :  { %16333 = dma.done.wait [#allocation6], 131328  }
  0x52   :  { %16334 = vsyncadd [#allocation6], 4294835968 }
  0x53   :  { %16335 = dma.done.wait [#allocation9], 65600  }
  0x54   :  { %16336 = vsyncadd [#allocation9], 4294901696 }
  0x55   :  { %16337 = dma.done.wait [#allocation12], 4112  }
  0x56   :  { %16338 = vsyncadd [#allocation12], 4294963184  ;;  %v325_v0 = vld [vmem:[#allocation5 + $0x380] sm:$0xff]  ;;  %v118_v54 = vld [vmem:[#allocation2 + $0x8] sm:$0xff]  ;;  %s16353_s4 = smov [#allocation14]  }
  0x57   :  { %v333_v1 = vld [vmem:[#allocation5 + $0x3c0] sm:$0xff]  ;;  %v126_v55 = vld [vmem:[#allocation2 + $0x48] sm:$0xff]  ;;  %v120_v59 = vld [vmem:[#allocation2 + $0x18] sm:$0xff]  ;;  %s13685_s6 = sshll.u32 %s16353_s4, 4  ;;  %s13686_s6 = int_to_ptr.vmem [resolvable:$true] %s13685_s6 }
  0x58   :  { %v581_v2 = vld [vmem:[#allocation5 + $0xb80] sm:$0xff]  ;;  %v13813_v3 = vcombine.high %v325_v0, %v333_v1  ;;  %v13812_v5 = vcombine.low %v325_v0, %v333_v1  ;;  %v16425_v58 = vpack.c.bf16 %v126_v55, %v118_v54  ;;  %v128_v60 = vld [vmem:[#allocation2 + $0x58] sm:$0xff]  ;;  %s16311_s14 = scalar_lea.vmem %s13686_s6, 1024  ;;  %p16316_p8 = scmp.lt.s32.totalorder %s13686_s6, %s13686_s6 }
  0x59   :  { %v589_v4 = vld [vmem:[#allocation5 + $0xbc0] sm:$0xff]  ;;  %v16427_v63 = vpack.c.bf16 %v128_v60, %v120_v59  ;;  %p16312_p7 = scmp.ne.s32.totalorder %s13686_s6, %s16311_s14  ;;  %p16317_p9 = scmp.lt.s32.totalorder %s16311_s14, %s16311_s14 }
  0x5a   :  { %v309_v6 = vld [vmem:[#allocation5 + $0x300] sm:$0xff]  ;;  %v14069_v8 = vcombine.high %v581_v2, %v589_v4  ;;  %v14068_v9 = vcombine.low %v581_v2, %v589_v4  ;;  %6441 = vmatprep.subr.bf16.mxu0 %v13813_v3  ;;  %18620 = vst [vmem:[#allocation20_spill] sm:$0xff] %v16425_v58  ;;  %6473 = vmatprep.mubr.bf16.mxu0 %v16425_v58 }
  0x5b   :  { %v317_v7 = vld [vmem:[#allocation5 + $0x340] sm:$0xff]  ;;  %6442 = vmatpush1.bf16.msra.mxu0 %v13812_v5  ;;  %6546 = vmatprep.mubr.bf16.mxu1 %v16427_v63  ;;  %p16318_p10 = por %p16317_p9, %p16316_p8 }
  0x5c   :  { %v13797_v10 = vcombine.high %v309_v6, %v317_v7  ;;  %v565_v11 = vld [vmem:[#allocation5 + $0xb00] sm:$0xff]  ;;  %6514 = vmatprep.subr.bf16.mxu1 %v14069_v8  ;;  %v13796_v18 = vcombine.low %v309_v6, %v317_v7 }
  0x5d   :  { %v573_v12 = vld [vmem:[#allocation5 + $0xb40] sm:$0xff]  ;;  %6515 = vmatpush1.bf16.msra.mxu1 %v14068_v9  ;;  %p16319_p11 = pnand %p16318_p10, %p16312_p7 }
  0x5e   :  { %v293_v13 = vld [vmem:[#allocation5 + $0x280] sm:$0xff]  ;;  %v14053_v14 = vcombine.high %v565_v11, %v573_v12  ;;  %6443 = vmatprep.subr.bf16.mxu0 %v13797_v10  ;;  %v14052_v19 = vcombine.low %v565_v11, %v573_v12 }
  0x5f   :  { %v301_v15 = vld [vmem:[#allocation5 + $0x2c0] sm:$0xff]  ;;  %6444 = vmatpush1.bf16.msra.mxu0 %v13796_v18 }
  0x60   :  { %v549_v16 = vld [vmem:[#allocation5 + $0xa80] sm:$0xff]  ;;  %v13781_v20 = vcombine.high %v293_v13, %v301_v15  ;;  %6516 = vmatprep.subr.bf16.mxu1 %v14053_v14  ;;  %v13780_v26 = vcombine.low %v293_v13, %v301_v15 }
  0x61   :  { %v557_v17 = vld [vmem:[#allocation5 + $0xac0] sm:$0xff]  ;;  %6517 = vmatpush1.bf16.msra.mxu1 %v14052_v19 }
  0x62   :  { %v14037_v21 = vcombine.high %v549_v16, %v557_v17  ;;  %v277_v22 = vld [vmem:[#allocation5 + $0x200] sm:$0xff]  ;;  %6445 = vmatprep.subr.bf16.mxu0 %v13781_v20  ;;  %v14036_v27 = vcombine.low %v549_v16, %v557_v17 }
  0x63   :  { %v285_v23 = vld [vmem:[#allocation5 + $0x240] sm:$0xff]  ;;  %6446 = vmatpush1.bf16.msra.mxu0 %v13780_v26 }
  0x64   :  { %v533_v24 = vld [vmem:[#allocation5 + $0xa00] sm:$0xff]  ;;  %v13765_v28 = vcombine.high %v277_v22, %v285_v23  ;;  %6518 = vmatprep.subr.bf16.mxu1 %v14037_v21  ;;  %v13764_v34 = vcombine.low %v277_v22, %v285_v23 }
  0x65   :  { %v541_v25 = vld [vmem:[#allocation5 + $0xa40] sm:$0xff]  ;;  %6519 = vmatpush1.bf16.msra.mxu1 %v14036_v27 }
  0x66   :  { %v14021_v29 = vcombine.high %v533_v24, %v541_v25  ;;  %v261_v30 = vld [vmem:[#allocation5 + $0x180] sm:$0xff]  ;;  %6447 = vmatprep.subr.bf16.mxu0 %v13765_v28  ;;  %v14020_v35 = vcombine.low %v533_v24, %v541_v25 }
  0x67   :  { %v269_v31 = vld [vmem:[#allocation5 + $0x1c0] sm:$0xff]  ;;  %6448 = vmatpush1.bf16.msra.mxu0 %v13764_v34 }
  0x68   :  { %v517_v32 = vld [vmem:[#allocation5 + $0x980] sm:$0xff]  ;;  %v13749_v36 = vcombine.high %v261_v30, %v269_v31  ;;  %6520 = vmatprep.subr.bf16.mxu1 %v14021_v29  ;;  %v13748_v42 = vcombine.low %v261_v30, %v269_v31 }
  0x69   :  { %v525_v33 = vld [vmem:[#allocation5 + $0x9c0] sm:$0xff]  ;;  %6521 = vmatpush1.bf16.msra.mxu1 %v14020_v35 }
  0x6a   :  { %v14005_v37 = vcombine.high %v517_v32, %v525_v33  ;;  %v245_v38 = vld [vmem:[#allocation5 + $0x100] sm:$0xff]  ;;  %6449 = vmatprep.subr.bf16.mxu0 %v13749_v36  ;;  %v14004_v43 = vcombine.low %v517_v32, %v525_v33 }
  0x6b   :  { %v253_v39 = vld [vmem:[#allocation5 + $0x140] sm:$0xff]  ;;  %6450 = vmatpush1.bf16.msra.mxu0 %v13748_v42 }
  0x6c   :  { %v501_v40 = vld [vmem:[#allocation5 + $0x900] sm:$0xff]  ;;  %v13733_v44 = vcombine.high %v245_v38, %v253_v39  ;;  %6522 = vmatprep.subr.bf16.mxu1 %v14005_v37  ;;  %v13732_v50 = vcombine.low %v245_v38, %v253_v39 }
  0x6d   :  { %v509_v41 = vld [vmem:[#allocation5 + $0x940] sm:$0xff]  ;;  %6523 = vmatpush1.bf16.msra.mxu1 %v14004_v43 }
  0x6e   :  { %v13989_v45 = vcombine.high %v501_v40, %v509_v41  ;;  %v229_v46 = vld [vmem:[#allocation5 + $0x80] sm:$0xff]  ;;  %6451 = vmatprep.subr.bf16.mxu0 %v13733_v44  ;;  %v13988_v51 = vcombine.low %v501_v40, %v509_v41 }
  0x6f   :  { %v237_v47 = vld [vmem:[#allocation5 + $0xc0] sm:$0xff]  ;;  %6452 = vmatpush1.bf16.msra.mxu0 %v13732_v50 }
  0x70   :  { %v485_v48 = vld [vmem:[#allocation5 + $0x880] sm:$0xff]  ;;  %v13717_v52 = vcombine.high %v229_v46, %v237_v47  ;;  %6524 = vmatprep.subr.bf16.mxu1 %v13989_v45  ;;  %v13716_v0 = vcombine.low %v229_v46, %v237_v47 }
  0x71   :  { %v493_v49 = vld [vmem:[#allocation5 + $0x8c0] sm:$0xff]  ;;  %6525 = vmatpush1.bf16.msra.mxu1 %v13988_v51 }
  0x72   :  { %v213_v53 = vld [vmem:[#allocation5] sm:$0xff]  ;;  %v13973_v56 = vcombine.high %v485_v48, %v493_v49  ;;  %6453 = vmatprep.subr.bf16.mxu0 %v13717_v52  ;;  %v13972_v1 = vcombine.low %v485_v48, %v493_v49 }
  0x73   :  { %v221_v57 = vld [vmem:[#allocation5 + $0x40] sm:$0xff]  ;;  %6454 = vmatpush1.bf16.msra.mxu0 %v13716_v0 }
  0x74   :  { %v469_v61 = vld [vmem:[#allocation5 + $0x800] sm:$0xff]  ;;  %v13701_v2 = vcombine.high %v213_v53, %v221_v57  ;;  %6526 = vmatprep.subr.bf16.mxu1 %v13973_v56  ;;  %v13700_v8 = vcombine.low %v213_v53, %v221_v57 }
  0x75   :  { %v477_v62 = vld [vmem:[#allocation5 + $0x840] sm:$0xff]  ;;  %6527 = vmatpush1.bf16.msra.mxu1 %v13972_v1 }
  0x76   :  { %v13957_v3 = vcombine.high %v469_v61, %v477_v62  ;;  %v453_v4 = vld [vmem:[#allocation5 + $0x780] sm:$0xff]  ;;  %6455 = vmatprep.subr.bf16.mxu0 %v13701_v2  ;;  %v13956_v9 = vcombine.low %v469_v61, %v477_v62 }
  0x77   :  { %v461_v5 = vld [vmem:[#allocation5 + $0x7c0] sm:$0xff]  ;;  %6456 = vmatpush1.bf16.msra.mxu0 %v13700_v8 }
  0x78   :  { %v709_v6 = vld [vmem:[#allocation5 + $0xf80] sm:$0xff]  ;;  %v13941_v10 = vcombine.high %v453_v4, %v461_v5  ;;  %6528 = vmatprep.subr.bf16.mxu1 %v13957_v3  ;;  %v13940_v16 = vcombine.low %v453_v4, %v461_v5 }
  0x79   :  { %v717_v7 = vld [vmem:[#allocation5 + $0xfc0] sm:$0xff]  ;;  %6529 = vmatpush1.bf16.msra.mxu1 %v13956_v9 }
  0x7a   :  { %v14197_v11 = vcombine.high %v709_v6, %v717_v7  ;;  %v437_v12 = vld [vmem:[#allocation5 + $0x700] sm:$0xff]  ;;  %6457 = vmatprep.subr.bf16.mxu0 %v13941_v10  ;;  %v14196_v17 = vcombine.low %v709_v6, %v717_v7 }
  0x7b   :  { %v445_v13 = vld [vmem:[#allocation5 + $0x740] sm:$0xff]  ;;  %6458 = vmatpush2.bf16.msra.mxu0 %v13940_v16 }
  0x7c   :  { %v693_v14 = vld [vmem:[#allocation5 + $0xf00] sm:$0xff]  ;;  %v13925_v18 = vcombine.high %v437_v12, %v445_v13  ;;  %6530 = vmatprep.subr.bf16.mxu1 %v14197_v11  ;;  %v13924_v24 = vcombine.low %v437_v12, %v445_v13 }
  0x7d   :  { %v701_v15 = vld [vmem:[#allocation5 + $0xf40] sm:$0xff]  ;;  %6531 = vmatpush2.bf16.msra.mxu1 %v14196_v17 }
  0x7e   :  { %v14181_v19 = vcombine.high %v693_v14, %v701_v15  ;;  %v421_v20 = vld [vmem:[#allocation5 + $0x680] sm:$0xff]  ;;  %6459 = vmatprep.subr.bf16.mxu0 %v13925_v18  ;;  %v14180_v25 = vcombine.low %v693_v14, %v701_v15  ;;  %v119_v14 = vld [vmem:[#allocation2 + $0x10] sm:$0xff] }
  0x7f   :  { %v429_v21 = vld [vmem:[#allocation5 + $0x6c0] sm:$0xff]  ;;  %6460 = vmatpush2.bf16.msra.mxu0 %v13924_v24  ;;  %v127_v15 = vld [vmem:[#allocation2 + $0x50] sm:$0xff]  ;;  %v142_v24 = vld [vmem:[#allocation2 + $0xc8] sm:$0xff] }
  0x80   :  { %v677_v22 = vld [vmem:[#allocation5 + $0xe80] sm:$0xff]  ;;  %v13909_v26 = vcombine.high %v421_v20, %v429_v21  ;;  %6532 = vmatprep.subr.bf16.mxu1 %v14181_v19  ;;  %v13908_v32 = vcombine.low %v421_v20, %v429_v21 }
  0x81   :  { %v685_v23 = vld [vmem:[#allocation5 + $0xec0] sm:$0xff]  ;;  %6533 = vmatpush2.bf16.msra.mxu1 %v14180_v25  ;;  %v16433_v25 = vpack.c.bf16 %v127_v15, %v119_v14 }
  0x82   :  { %v14165_v27 = vcombine.high %v677_v22, %v685_v23  ;;  %v405_v28 = vld [vmem:[#allocation5 + $0x600] sm:$0xff]  ;;  %6461 = vmatprep.subr.bf16.mxu0 %v13909_v26  ;;  %v14164_v33 = vcombine.low %v677_v22, %v685_v23  ;;  %v134_v23 = vld [vmem:[#allocation2 + $0x88] sm:$0xff] }
  0x83   :  { %v413_v29 = vld [vmem:[#allocation5 + $0x640] sm:$0xff]  ;;  %6462 = vmatpush2.bf16.msra.mxu0 %v13908_v32 }
  0x84   :  { %v661_v30 = vld [vmem:[#allocation5 + $0xe00] sm:$0xff]  ;;  %v13893_v34 = vcombine.high %v405_v28, %v413_v29  ;;  %6534 = vmatprep.subr.bf16.mxu1 %v14165_v27  ;;  %v13892_v40 = vcombine.low %v405_v28, %v413_v29  ;;  %v136_v27 = vld [vmem:[#allocation2 + $0x98] sm:$0xff] }
  0x85   :  { %v669_v31 = vld [vmem:[#allocation5 + $0xe40] sm:$0xff]  ;;  %6535 = vmatpush2.bf16.msra.mxu1 %v14164_v33  ;;  %v144_v28 = vld [vmem:[#allocation2 + $0xd8] sm:$0xff] }
  0x86   :  { %v14149_v35 = vcombine.high %v661_v30, %v669_v31  ;;  %v389_v36 = vld [vmem:[#allocation5 + $0x580] sm:$0xff]  ;;  %6463 = vmatprep.subr.bf16.mxu0 %v13893_v34  ;;  %v14148_v41 = vcombine.low %v661_v30, %v669_v31  ;;  %v16435_v34 = vpack.c.bf16 %v142_v24, %v134_v23  ;;  %v176_v23 = vld [vmem:[#allocation2 + $0x1d8] sm:$0xff] }
  0x87   :  { %v397_v37 = vld [vmem:[#allocation5 + $0x5c0] sm:$0xff]  ;;  %6464 = vmatpush2.bf16.msra.mxu0 %v13892_v40 }
  0x88   :  { %v645_v38 = vld [vmem:[#allocation5 + $0xd80] sm:$0xff]  ;;  %v13877_v42 = vcombine.high %v389_v36, %v397_v37  ;;  %6536 = vmatprep.subr.bf16.mxu1 %v14149_v35  ;;  %v13876_v48 = vcombine.low %v389_v36, %v397_v37  ;;  %v16438_v37 = vpack.c.bf16 %v144_v28, %v136_v27 }
  0x89   :  { %v653_v39 = vld [vmem:[#allocation5 + $0xdc0] sm:$0xff]  ;;  %6537 = vmatpush2.bf16.msra.mxu1 %v14148_v41 }
  0x8a   :  { %v14133_v43 = vcombine.high %v645_v38, %v653_v39  ;;  %v373_v44 = vld [vmem:[#allocation5 + $0x500] sm:$0xff]  ;;  %6465 = vmatprep.subr.bf16.mxu0 %v13877_v42  ;;  %v14132_v49 = vcombine.low %v645_v38, %v653_v39 }
  0x8b   :  { %v381_v45 = vld [vmem:[#allocation5 + $0x540] sm:$0xff]  ;;  %6466 = vmatpush2.bf16.msra.mxu0 %v13876_v48 }
  0x8c   :  { %v629_v46 = vld [vmem:[#allocation5 + $0xd00] sm:$0xff]  ;;  %v13861_v50 = vcombine.high %v373_v44, %v381_v45  ;;  %6538 = vmatprep.subr.bf16.mxu1 %v14133_v43  ;;  %v13860_v56 = vcombine.low %v373_v44, %v381_v45  ;;  %v135_v43 = vld [vmem:[#allocation2 + $0x90] sm:$0xff] }
  0x8d   :  { %v637_v47 = vld [vmem:[#allocation5 + $0xd40] sm:$0xff]  ;;  %6539 = vmatpush2.bf16.msra.mxu1 %v14132_v49  ;;  %v143_v44 = vld [vmem:[#allocation2 + $0xd0] sm:$0xff] }
  0x8e   :  { %v14117_v51 = vcombine.high %v629_v46, %v637_v47  ;;  %v357_v52 = vld [vmem:[#allocation5 + $0x480] sm:$0xff]  ;;  %6467 = vmatprep.subr.bf16.mxu0 %v13861_v50  ;;  %v14116_v57 = vcombine.low %v629_v46, %v637_v47 }
  0x8f   :  { %v365_v53 = vld [vmem:[#allocation5 + $0x4c0] sm:$0xff]  ;;  %6468 = vmatpush2.bf16.msra.mxu0 %v13860_v56  ;;  %v160_v56 = vld [vmem:[#allocation2 + $0x158] sm:$0xff] }
  0x90   :  { %v613_v54 = vld [vmem:[#allocation5 + $0xc80] sm:$0xff]  ;;  %v13845_v59 = vcombine.high %v357_v52, %v365_v53  ;;  %6540 = vmatprep.subr.bf16.mxu1 %v14117_v51  ;;  %v13844_v2 = vcombine.low %v357_v52, %v365_v53  ;;  %v150_v51 = vld [vmem:[#allocation2 + $0x108] sm:$0xff] }
  0x91   :  { %v621_v55 = vld [vmem:[#allocation5 + $0xcc0] sm:$0xff]  ;;  %6541 = vmatpush2.bf16.msra.mxu1 %v14116_v57  ;;  %v158_v52 = vld [vmem:[#allocation2 + $0x148] sm:$0xff] }
  0x92   :  { %v14101_v60 = vcombine.high %v613_v54, %v621_v55  ;;  %v341_v61 = vld [vmem:[#allocation5 + $0x400] sm:$0xff]  ;;  %6469 = vmatprep.subr.bf16.mxu0 %v13845_v59  ;;  %v14100_v3 = vcombine.low %v613_v54, %v621_v55  ;;  %v16445_v54 = vpack.c.bf16 %v143_v44, %v135_v43  ;;  %v152_v55 = vld [vmem:[#allocation2 + $0x118] sm:$0xff] }
  0x93   :  { %v349_v62 = vld [vmem:[#allocation5 + $0x440] sm:$0xff]  ;;  %6470 = vmatpush2.bf16.msra.mxu0 %v13844_v2 }
  0x94   :  { %v597_v0 = vld [vmem:[#allocation5 + $0xc00] sm:$0xff]  ;;  %v13829_v4 = vcombine.high %v341_v61, %v349_v62  ;;  %6542 = vmatprep.subr.bf16.mxu1 %v14101_v60  ;;  %v13828_v10 = vcombine.low %v341_v61, %v349_v62 }
  0x95   :  { %v605_v1 = vld [vmem:[#allocation5 + $0xc40] sm:$0xff]  ;;  %6543 = vmatpush2.bf16.msra.mxu1 %v14100_v3  ;;  %v16450_v3 = vpack.c.bf16 %v160_v56, %v152_v55  ;;  %v124_v55 = vld [vmem:[#allocation2 + $0x38] sm:$0xff] }
  0x96   :  { %v14085_v5 = vcombine.high %v597_v0, %v605_v1  ;;  %v837_v6 = vld [vmem:[#allocation5 + $0x1380] sm:$0xff]  ;;  %6471 = vmatprep.subr.bf16.mxu0 %v13829_v4  ;;  %v14084_v13 = vcombine.low %v597_v0, %v605_v1  ;;  %v16447_v0 = vpack.c.bf16 %v158_v52, %v150_v51  ;;  %v130_v51 = vld [vmem:[#allocation2 + $0x68] sm:$0xff]  ;;  %v132_v56 = vld [vmem:[#allocation2 + $0x78] sm:$0xff] }
  0x97   :  { %v845_v7 = vld [vmem:[#allocation5 + $0x13c0] sm:$0xff]  ;;  %6472 = vmatpush2.bf16.msra.mxu0 %v13828_v10  ;;  %v159_v10 = vld [vmem:[#allocation2 + $0x150] sm:$0xff] }
  0x98   :  { %v1093_v8 = vld [vmem:[#allocation5 + $0x1b80] sm:$0xff]  ;;  %v14325_v16 = vcombine.high %v837_v6, %v845_v7  ;;  %6544 = vmatprep.subr.bf16.mxu1 %v14085_v5  ;;  %v14324_v26 = vcombine.low %v837_v6, %v845_v7 }
  0x99   :  { %v1101_v9 = vld [vmem:[#allocation5 + $0x1bc0] sm:$0xff]  ;;  %6545 = vmatpush2.bf16.msra.mxu1 %v14084_v13 }
  0x9a   :  { %v117_v11 = vld [vmem:[#allocation2] sm:$0xff]  ;;  %v14581_v17 = vcombine.high %v1093_v8, %v1101_v9  ;;  %6587 = vmatprep.subr.bf16.mxu0 %v14325_v16  ;;  %v14580_v29 = vcombine.low %v1093_v8, %v1101_v9  ;;  %v151_v9 = vld [vmem:[#allocation2 + $0x110] sm:$0xff] }
  0x9b   :  { %v125_v12 = vld [vmem:[#allocation2 + $0x40] sm:$0xff] }
  0x9c   :  { %v821_v18 = vld [vmem:[#allocation5 + $0x1300] sm:$0xff]  ;;  %v16431_v21 = vpack.c.bf16 %v125_v12, %v117_v11  ;;  %6660 = vmatprep.subr.bf16.mxu1 %v14581_v17  ;;  %6547 = vmatmul.mubr.bf16.vlgmr.msra.gmra.mxu1 %v16433_v25  ;;  %v166_v17 = vld [vmem:[#allocation2 + $0x188] sm:$0xff] }
  0x9d   :  { %v829_v19 = vld [vmem:[#allocation5 + $0x1340] sm:$0xff]  ;;  %6661 = vmatpush1.bf16.msra.mxu1 %v14580_v29  ;;  %6556 = vmatprep.mubr.bf16.mxu1 %v16438_v37 }
  0x9e   :  { %v1077_v20 = vld [vmem:[#allocation5 + $0x1b00] sm:$0xff]  ;;  %v14309_v30 = vcombine.high %v821_v18, %v829_v19  ;;  %6474 = vmatmul.mubr.bf16.vlgmr.msra.gmra.mxu0 %v16431_v21  ;;  %v14308_v38 = vcombine.low %v821_v18, %v829_v19  ;;  %v174_v18 = vld [vmem:[#allocation2 + $0x1c8] sm:$0xff] }
  0x9f   :  { %v1085_v22 = vld [vmem:[#allocation5 + $0x1b40] sm:$0xff]  ;;  %6588 = vmatpush1.bf16.msra.mxu0 %v14324_v26  ;;  %6483 = vmatprep.mubr.bf16.mxu0 %v16435_v34 }
  0xa0   :  { %v14565_v31 = vcombine.high %v1077_v20, %v1085_v22  ;;  %v805_v32 = vld [vmem:[#allocation5 + $0x1280] sm:$0xff]  ;;  %6589 = vmatprep.subr.bf16.mxu0 %v14309_v30  ;;  %v14564_v41 = vcombine.low %v1077_v20, %v1085_v22  ;;  %v16457_v20 = vpack.c.bf16 %v159_v10, %v151_v9  ;;  %v168_v22 = vld [vmem:[#allocation2 + $0x198] sm:$0xff]  ;;  %v16459_v30 = vpack.c.bf16 %v174_v18, %v166_v17 }
  0xa1   :  { %v813_v33 = vld [vmem:[#allocation5 + $0x12c0] sm:$0xff] }
  0xa2   :  { %v1061_v35 = vld [vmem:[#allocation5 + $0x1a80] sm:$0xff]  ;;  %v14293_v42 = vcombine.high %v805_v32, %v813_v33  ;;  %6662 = vmatprep.subr.bf16.mxu1 %v14565_v31  ;;  %v14292_v53 = vcombine.low %v805_v32, %v813_v33  ;;  %v16462_v33 = vpack.c.bf16 %v176_v23, %v168_v22 }
  0xa3   :  { %v1069_v36 = vld [vmem:[#allocation5 + $0x1ac0] sm:$0xff]  ;;  %6590 = vmatpush1.bf16.msra.mxu0 %v14308_v38  ;;  %6663 = vmatpush1.bf16.msra.mxu1 %v14564_v41  ;;  %v167_v41 = vld [vmem:[#allocation2 + $0x190] sm:$0xff] }
  0xa4   :  { %v133_v39 = vld [vmem:[#allocation2 + $0x80] sm:$0xff]  ;;  %v14549_v45 = vcombine.high %v1061_v35, %v1069_v36  ;;  %6591 = vmatprep.subr.bf16.mxu0 %v14293_v42  ;;  %v14548_v57 = vcombine.low %v1061_v35, %v1069_v36  ;;  %6557 = vmatmul.mubr.bf16.gmra.mxu1 %v16445_v54  ;;  %v175_v42 = vld [vmem:[#allocation2 + $0x1d0] sm:$0xff] }
  0xa5   :  { %v141_v40 = vld [vmem:[#allocation2 + $0xc0] sm:$0xff]  ;;  %6566 = vmatprep.mubr.bf16.mxu1 %v16450_v3 }
  0xa6   :  { %v789_v46 = vld [vmem:[#allocation5 + $0x1200] sm:$0xff]  ;;  %v16442_v50 = vpack.c.bf16 %v141_v40, %v133_v39  ;;  %6664 = vmatprep.subr.bf16.mxu1 %v14549_v45 }
  0xa7   :  { %v797_v47 = vld [vmem:[#allocation5 + $0x1240] sm:$0xff]  ;;  %6592 = vmatpush1.bf16.msra.mxu0 %v14292_v53  ;;  %6665 = vmatpush1.bf16.msra.mxu1 %v14548_v57  ;;  %v16469_v53 = vpack.c.bf16 %v175_v42, %v167_v41 }
  0xa8   :  { %v1045_v48 = vld [vmem:[#allocation5 + $0x1a00] sm:$0xff]  ;;  %v14277_v59 = vcombine.high %v789_v46, %v797_v47  ;;  %6484 = vmatmul.mubr.bf16.gmra.mxu0 %v16442_v50  ;;  %v14276_v4 = vcombine.low %v789_v46, %v797_v47 }
  0xa9   :  { %v1053_v49 = vld [vmem:[#allocation5 + $0x1a40] sm:$0xff]  ;;  %6493 = vmatprep.mubr.bf16.mxu0 %v16447_v0 }
  0xaa   :  { %v14533_v60 = vcombine.high %v1045_v48, %v1053_v49  ;;  %v773_v61 = vld [vmem:[#allocation5 + $0x1180] sm:$0xff]  ;;  %6593 = vmatprep.subr.bf16.mxu0 %v14277_v59  ;;  %v14532_v7 = vcombine.low %v1045_v48, %v1053_v49  ;;  %v122_v49 = vld [vmem:[#allocation2 + $0x28] sm:$0xff] }
  0xab   :  { %v781_v62 = vld [vmem:[#allocation5 + $0x11c0] sm:$0xff]  ;;  %6594 = vmatpush1.bf16.msra.mxu0 %v14276_v4 }
  0xac   :  { %v1029_v1 = vld [vmem:[#allocation5 + $0x1980] sm:$0xff]  ;;  %v14261_v8 = vcombine.high %v773_v61, %v781_v62  ;;  %6666 = vmatprep.subr.bf16.mxu1 %v14533_v60  ;;  %v14260_v19 = vcombine.low %v773_v61, %v781_v62  ;;  %6567 = vmatmul.mubr.bf16.gmra.mxu1 %v16457_v20 }
  0xad   :  { %v1037_v2 = vld [vmem:[#allocation5 + $0x19c0] sm:$0xff]  ;;  %6667 = vmatpush1.bf16.msra.mxu1 %v14532_v7  ;;  %6576 = vmatprep.mubr.bf16.mxu1 %v16462_v33 }
  0xae   :  { %v149_v5 = vld [vmem:[#allocation2 + $0x100] sm:$0xff]  ;;  %v14517_v11 = vcombine.high %v1029_v1, %v1037_v2  ;;  %6595 = vmatprep.subr.bf16.mxu0 %v14261_v8  ;;  %v14516_v24 = vcombine.low %v1029_v1, %v1037_v2  ;;  %v16471_v1 = vpack.c.bf16 %v130_v51, %v122_v49 }
  0xaf   :  { %v157_v6 = vld [vmem:[#allocation2 + $0x140] sm:$0xff]  ;;  %6596 = vmatpush1.bf16.msra.mxu0 %v14260_v19 }
  0xb0   :  { %v757_v12 = vld [vmem:[#allocation5 + $0x1100] sm:$0xff]  ;;  %v16454_v16 = vpack.c.bf16 %v157_v6, %v149_v5  ;;  %6668 = vmatprep.subr.bf16.mxu1 %v14517_v11  ;;  %v16474_v5 = vpack.c.bf16 %v132_v56, %v124_v55 }
  0xb1   :  { %v765_v13 = vld [vmem:[#allocation5 + $0x1140] sm:$0xff]  ;;  %6669 = vmatpush1.bf16.msra.mxu1 %v14516_v24 }
  0xb2   :  { %v1013_v14 = vld [vmem:[#allocation5 + $0x1900] sm:$0xff]  ;;  %v14245_v26 = vcombine.high %v757_v12, %v765_v13  ;;  %6494 = vmatmul.mubr.bf16.gmra.mxu0 %v16454_v16  ;;  %v14244_v35 = vcombine.low %v757_v12, %v765_v13 }
  0xb3   :  { %v1021_v15 = vld [vmem:[#allocation5 + $0x1940] sm:$0xff]  ;;  %6503 = vmatprep.mubr.bf16.mxu0 %v16459_v30 }
  0xb4   :  { %v14501_v27 = vcombine.high %v1013_v14, %v1021_v15  ;;  %v741_v28 = vld [vmem:[#allocation5 + $0x1080] sm:$0xff]  ;;  %6597 = vmatprep.subr.bf16.mxu0 %v14245_v26  ;;  %v14500_v39 = vcombine.low %v1013_v14, %v1021_v15  ;;  %6577 = vmatmul.mubr.bf16.gmra.mxu1 %v16469_v53 }
  0xb5   :  { %v749_v29 = vld [vmem:[#allocation5 + $0x10c0] sm:$0xff]  ;;  %6598 = vmatpush1.bf16.msra.mxu0 %v14244_v35  ;;  %6692 = vmatprep.mubr.bf16.mxu1 %v16474_v5 }
  0xb6   :  { %v997_v31 = vld [vmem:[#allocation5 + $0x1880] sm:$0xff]  ;;  %v14229_v40 = vcombine.high %v741_v28, %v749_v29  ;;  %6670 = vmatprep.subr.bf16.mxu1 %v14501_v27  ;;  %v14228_v52 = vcombine.low %v741_v28, %v749_v29 }
  0xb7   :  { %v1005_v32 = vld [vmem:[#allocation5 + $0x18c0] sm:$0xff]  ;;  %6671 = vmatpush1.bf16.msra.mxu1 %v14500_v39 }
  0xb8   :  { %v165_v36 = vld [vmem:[#allocation2 + $0x180] sm:$0xff]  ;;  %v14485_v43 = vcombine.high %v997_v31, %v1005_v32  ;;  %6599 = vmatprep.subr.bf16.mxu0 %v14229_v40  ;;  %v14484_v57 = vcombine.low %v997_v31, %v1005_v32 }
  0xb9   :  { %v173_v38 = vld [vmem:[#allocation2 + $0x1c0] sm:$0xff]  ;;  %6600 = vmatpush1.bf16.msra.mxu0 %v14228_v52 }
  0xba   :  { %v725_v44 = vld [vmem:[#allocation5 + $0x1000] sm:$0xff]  ;;  %v16466_v48 = vpack.c.bf16 %v173_v38, %v165_v36  ;;  %6672 = vmatprep.subr.bf16.mxu1 %v14485_v43 }
  0xbb   :  { %v733_v45 = vld [vmem:[#allocation5 + $0x1040] sm:$0xff]  ;;  %6673 = vmatpush1.bf16.msra.mxu1 %v14484_v57 }
  0xbc   :  { %v981_v46 = vld [vmem:[#allocation5 + $0x1800] sm:$0xff]  ;;  %v14213_v59 = vcombine.high %v725_v44, %v733_v45  ;;  %6504 = vmatmul.mubr.bf16.gmra.mxu0 %v16466_v48  ;;  %v14212_v6 = vcombine.low %v725_v44, %v733_v45 }
  0xbd   :  { %v989_v47 = vld [vmem:[#allocation5 + $0x1840] sm:$0xff]  ;;  %6619 = vmatprep.mubr.bf16.mxu0 %v16471_v1 }
  0xbe   :  { %v14469_v60 = vcombine.high %v981_v46, %v989_v47  ;;  %v965_v61 = vld [vmem:[#allocation5 + $0x1780] sm:$0xff]  ;;  %6601 = vmatprep.subr.bf16.mxu0 %v14213_v59  ;;  %v14468_v7 = vcombine.low %v981_v46, %v989_v47 }
  0xbf   :  { %v973_v62 = vld [vmem:[#allocation5 + $0x17c0] sm:$0xff]  ;;  %6602 = vmatpush1.bf16.msra.mxu0 %v14212_v6 }
  0xc0   :  { %v1221_v2 = vld [vmem:[#allocation5 + $0x1f80] sm:$0xff]  ;;  %v14453_v8 = vcombine.high %v965_v61, %v973_v62  ;;  %6674 = vmatprep.subr.bf16.mxu1 %v14469_v60  ;;  %v14452_v14 = vcombine.low %v965_v61, %v973_v62 }
  0xc1   :  { %v1229_v4 = vld [vmem:[#allocation5 + $0x1fc0] sm:$0xff]  ;;  %6675 = vmatpush1.bf16.msra.mxu1 %v14468_v7 }
  0xc2   :  { %v14709_v9 = vcombine.high %v1221_v2, %v1229_v4  ;;  %v949_v10 = vld [vmem:[#allocation5 + $0x1700] sm:$0xff]  ;;  %6603 = vmatprep.subr.bf16.mxu0 %v14453_v8  ;;  %v14708_v15 = vcombine.low %v1221_v2, %v1229_v4 }
  0xc3   :  { %v957_v11 = vld [vmem:[#allocation5 + $0x1740] sm:$0xff]  ;;  %6604 = vmatpush2.bf16.msra.mxu0 %v14452_v14 }
  0xc4   :  { %v1205_v12 = vld [vmem:[#allocation5 + $0x1f00] sm:$0xff]  ;;  %v14437_v17 = vcombine.high %v949_v10, %v957_v11  ;;  %6676 = vmatprep.subr.bf16.mxu1 %v14709_v9  ;;  %v14436_v26 = vcombine.low %v949_v10, %v957_v11 }
  0xc5   :  { %v1213_v13 = vld [vmem:[#allocation5 + $0x1f40] sm:$0xff]  ;;  %6677 = vmatpush2.bf16.msra.mxu1 %v14708_v15 }
  0xc6   :  { %v933_v18 = vld [vmem:[#allocation5 + $0x1680] sm:$0xff]  ;;  %v14693_v23 = vcombine.high %v1205_v12, %v1213_v13  ;;  %6605 = vmatprep.subr.bf16.mxu0 %v14437_v17  ;;  %v14692_v27 = vcombine.low %v1205_v12, %v1213_v13 }
  0xc7   :  { %v941_v19 = vld [vmem:[#allocation5 + $0x16c0] sm:$0xff]  ;;  %6606 = vmatpush2.bf16.msra.mxu0 %v14436_v26 }
  0xc8   :  { %v1189_v22 = vld [vmem:[#allocation5 + $0x1e80] sm:$0xff]  ;;  %v14421_v28 = vcombine.high %v933_v18, %v941_v19  ;;  %6678 = vmatprep.subr.bf16.mxu1 %v14693_v23  ;;  %v14420_v38 = vcombine.low %v933_v18, %v941_v19  ;;  %v334_v23 = vld [vmem:[#allocation5 + $0x3c8] sm:$0xff] }
  0xc9   :  { %v1197_v24 = vld [vmem:[#allocation5 + $0x1ec0] sm:$0xff]  ;;  %6679 = vmatpush2.bf16.msra.mxu1 %v14692_v27 }
  0xca   :  { %v917_v29 = vld [vmem:[#allocation5 + $0x1600] sm:$0xff]  ;;  %v14677_v35 = vcombine.high %v1189_v22, %v1197_v24  ;;  %6607 = vmatprep.subr.bf16.mxu0 %v14421_v28  ;;  %v14676_v39 = vcombine.low %v1189_v22, %v1197_v24  ;;  %v326_v22 = vld [vmem:[#allocation5 + $0x388] sm:$0xff] }
  0xcb   :  { %v925_v31 = vld [vmem:[#allocation5 + $0x1640] sm:$0xff]  ;;  %6608 = vmatpush2.bf16.msra.mxu0 %v14420_v38  ;;  %v582_v24 = vld [vmem:[#allocation5 + $0xb88] sm:$0xff] }
  0xcc   :  { %v1173_v32 = vld [vmem:[#allocation5 + $0x1e00] sm:$0xff]  ;;  %v14405_v40 = vcombine.high %v917_v29, %v925_v31  ;;  %6680 = vmatprep.subr.bf16.mxu1 %v14677_v35  ;;  %v14404_v46 = vcombine.low %v917_v29, %v925_v31  ;;  %v590_v29 = vld [vmem:[#allocation5 + $0xbc8] sm:$0xff]  ;;  %v123_v31 = vld [vmem:[#allocation2 + $0x30] sm:$0xff] }
  0xcd   :  { %v1181_v36 = vld [vmem:[#allocation5 + $0x1e40] sm:$0xff]  ;;  %6681 = vmatpush2.bf16.msra.mxu1 %v14676_v39  ;;  %v318_v38 = vld [vmem:[#allocation5 + $0x348] sm:$0xff] }
  0xce   :  { %v901_v41 = vld [vmem:[#allocation5 + $0x1580] sm:$0xff]  ;;  %v14661_v44 = vcombine.high %v1173_v32, %v1181_v36  ;;  %6609 = vmatprep.subr.bf16.mxu0 %v14405_v40  ;;  %v14660_v47 = vcombine.low %v1173_v32, %v1181_v36  ;;  %v131_v32 = vld [vmem:[#allocation2 + $0x70] sm:$0xff]  ;;  %v310_v36 = vld [vmem:[#allocation5 + $0x308] sm:$0xff]  ;;  %v13815_v40 = vcombine.high %v326_v22, %v334_v23 }
  0xcf   :  { %v909_v42 = vld [vmem:[#allocation5 + $0x15c0] sm:$0xff]  ;;  %6610 = vmatpush2.bf16.msra.mxu0 %v14404_v46  ;;  %v140_v46 = vld [vmem:[#allocation2 + $0xb8] sm:$0xff] }
  0xd0   :  { %v1157_v43 = vld [vmem:[#allocation5 + $0x1d80] sm:$0xff]  ;;  %v14389_v49 = vcombine.high %v901_v41, %v909_v42  ;;  %6682 = vmatprep.subr.bf16.mxu1 %v14661_v44  ;;  %v14388_v59 = vcombine.low %v901_v41, %v909_v42  ;;  %v566_v41 = vld [vmem:[#allocation5 + $0xb08] sm:$0xff] }
  0xd1   :  { %v1165_v45 = vld [vmem:[#allocation5 + $0x1dc0] sm:$0xff]  ;;  %6683 = vmatpush2.bf16.msra.mxu1 %v14660_v47  ;;  %v574_v42 = vld [vmem:[#allocation5 + $0xb48] sm:$0xff]  ;;  %v148_v47 = vld [vmem:[#allocation2 + $0xf8] sm:$0xff] }
  0xd2   :  { %v885_v51 = vld [vmem:[#allocation5 + $0x1500] sm:$0xff]  ;;  %v14645_v56 = vcombine.high %v1157_v43, %v1165_v45  ;;  %6611 = vmatprep.subr.bf16.mxu0 %v14389_v49  ;;  %v14644_v60 = vcombine.low %v1157_v43, %v1165_v45  ;;  %v138_v43 = vld [vmem:[#allocation2 + $0xa8] sm:$0xff]  ;;  %v14071_v45 = vcombine.high %v582_v24, %v590_v29 }
  0xd3   :  { %v893_v52 = vld [vmem:[#allocation5 + $0x1540] sm:$0xff]  ;;  %6612 = vmatpush2.bf16.msra.mxu0 %v14388_v59  ;;  %v146_v44 = vld [vmem:[#allocation2 + $0xe8] sm:$0xff] }
  0xd4   :  { %v1141_v55 = vld [vmem:[#allocation5 + $0x1d00] sm:$0xff]  ;;  %v14373_v61 = vcombine.high %v885_v51, %v893_v52  ;;  %6684 = vmatprep.subr.bf16.mxu1 %v14645_v56  ;;  %v14372_v8 = vcombine.low %v885_v51, %v893_v52  ;;  %v16481_v51 = vpack.c.bf16 %v131_v32, %v123_v31  ;;  %v13814_v52 = vcombine.low %v326_v22, %v334_v23  ;;  %v302_v59 = vld [vmem:[#allocation5 + $0x2c8] sm:$0xff]  ;;  %v156_v23 = vld [vmem:[#allocation2 + $0x138] sm:$0xff] }
  0xd5   :  { %v1149_v57 = vld [vmem:[#allocation5 + $0x1d40] sm:$0xff]  ;;  %6685 = vmatpush2.bf16.msra.mxu1 %v14644_v60  ;;  %v13799_v56 = vcombine.high %v310_v36, %v318_v38  ;;  %v14055_v60 = vcombine.high %v566_v41, %v574_v42  ;;  %v262_v32 = vld [vmem:[#allocation5 + $0x188] sm:$0xff] }
  0xd6   :  { %v869_v62 = vld [vmem:[#allocation5 + $0x1480] sm:$0xff]  ;;  %v14629_v6 = vcombine.high %v1141_v55, %v1149_v57  ;;  %6613 = vmatprep.subr.bf16.mxu0 %v14373_v61  ;;  %v14628_v9 = vcombine.low %v1141_v55, %v1149_v57  ;;  %v14070_v55 = vcombine.low %v582_v24, %v590_v29  ;;  %v294_v57 = vld [vmem:[#allocation5 + $0x288] sm:$0xff]  ;;  %v16483_v61 = vpack.c.bf16 %v146_v44, %v138_v43  ;;  %v164_v24 = vld [vmem:[#allocation2 + $0x178] sm:$0xff] }
  0xd7   :  { %v877_v2 = vld [vmem:[#allocation5 + $0x14c0] sm:$0xff]  ;;  %6614 = vmatpush2.bf16.msra.mxu0 %v14372_v8  ;;  %v139_v8 = vld [vmem:[#allocation2 + $0xb0] sm:$0xff]  ;;  %v16498_v43 = vpack.c.bf16 %v164_v24, %v156_v23  ;;  %v494_v23 = vld [vmem:[#allocation5 + $0x8c8] sm:$0xff] }
  0xd8   :  { %v1125_v4 = vld [vmem:[#allocation5 + $0x1c80] sm:$0xff]  ;;  %v14357_v10 = vcombine.high %v869_v62, %v877_v2  ;;  %6686 = vmatprep.subr.bf16.mxu1 %v14629_v6  ;;  %v14356_v17 = vcombine.low %v869_v62, %v877_v2  ;;  %v558_v6 = vld [vmem:[#allocation5 + $0xac8] sm:$0xff]  ;;  %v155_v44 = vld [vmem:[#allocation2 + $0x130] sm:$0xff] }
  0xd9   :  { %v1133_v7 = vld [vmem:[#allocation5 + $0x1cc0] sm:$0xff]  ;;  %6687 = vmatpush2.bf16.msra.mxu1 %v14628_v9  ;;  %v147_v9 = vld [vmem:[#allocation2 + $0xf0] sm:$0xff]  ;;  %18623 = vst [vmem:[#allocation23_spill] sm:$0xff] %v16498_v43 }
  0xda   :  { %v853_v11 = vld [vmem:[#allocation5 + $0x1400] sm:$0xff]  ;;  %v14613_v14 = vcombine.high %v1125_v4, %v1133_v7  ;;  %6615 = vmatprep.subr.bf16.mxu0 %v14357_v10  ;;  %v14612_v18 = vcombine.low %v1125_v4, %v1133_v7  ;;  %v550_v4 = vld [vmem:[#allocation5 + $0xa88] sm:$0xff]  ;;  %v16486_v7 = vpack.c.bf16 %v148_v47, %v140_v46  ;;  %v13798_v10 = vcombine.low %v310_v36, %v318_v38 }
  0xdb   :  { %v861_v12 = vld [vmem:[#allocation5 + $0x1440] sm:$0xff]  ;;  %6616 = vmatpush2.bf16.msra.mxu0 %v14356_v17  ;;  %v542_v17 = vld [vmem:[#allocation5 + $0xa48] sm:$0xff]  ;;  %v14039_v22 = vcombine.high %v550_v4, %v558_v6  ;;  %v14038_v29 = vcombine.low %v550_v4, %v558_v6  ;;  %v172_v4 = vld [vmem:[#allocation2 + $0x1b8] sm:$0xff] }
  0xdc   :  { %v1109_v13 = vld [vmem:[#allocation5 + $0x1c00] sm:$0xff]  ;;  %v14341_v19 = vcombine.high %v853_v11, %v861_v12  ;;  %6688 = vmatprep.subr.bf16.mxu1 %v14613_v14  ;;  %v14340_v35 = vcombine.low %v853_v11, %v861_v12  ;;  %v278_v11 = vld [vmem:[#allocation5 + $0x208] sm:$0xff]  ;;  %v13783_v14 = vcombine.high %v294_v57, %v302_v59  ;;  %v180_v6 = vld [vmem:[#allocation2 + $0x1f8] sm:$0xff] }
  0xdd   :  { %v1117_v15 = vld [vmem:[#allocation5 + $0x1c40] sm:$0xff]  ;;  %6689 = vmatpush2.bf16.msra.mxu1 %v14612_v18  ;;  %v286_v12 = vld [vmem:[#allocation5 + $0x248] sm:$0xff]  ;;  %v16510_v24 = vpack.c.bf16 %v180_v6, %v172_v4 }
  0xde   :  { %v14597_v26 = vcombine.high %v1109_v13, %v1117_v15  ;;  %v121_v27 = vld [vmem:[#allocation2 + $0x20] sm:$0xff]  ;;  %6617 = vmatprep.subr.bf16.mxu0 %v14341_v19  ;;  %v14596_v39 = vcombine.low %v1109_v13, %v1117_v15  ;;  %v14054_v13 = vcombine.low %v566_v41, %v574_v42  ;;  %v534_v15 = vld [vmem:[#allocation5 + $0xa08] sm:$0xff]  ;;  %v13767_v31 = vcombine.high %v278_v11, %v286_v12 }
  0xdf   :  { %v129_v28 = vld [vmem:[#allocation2 + $0x60] sm:$0xff]  ;;  %6618 = vmatpush2.bf16.msra.mxu0 %v14340_v35  ;;  %v154_v18 = vld [vmem:[#allocation2 + $0x128] sm:$0xff]  ;;  %v14023_v38 = vcombine.high %v534_v15, %v542_v17  ;;  %v13766_v46 = vcombine.low %v278_v11, %v286_v12  ;;  %18627 = vst [vmem:[#allocation27_spill] sm:$0xff] %v16510_v24 }
  0xe0   :  { %6690 = vmatprep.subr.bf16.mxu1 %v14597_v26  ;;  %v16479_v49 = vpack.c.bf16 %v129_v28, %v121_v27  ;;  %6733 = vmatprep.subr.bf16.mxu0 %v13815_v40  ;;  %v137_v62 = vld [vmem:[#allocation2 + $0xa0] sm:$0xff]  ;;  %v162_v19 = vld [vmem:[#allocation2 + $0x168] sm:$0xff]  ;;  %v13782_v27 = vcombine.low %v294_v57, %v302_v59  ;;  %v16493_v28 = vpack.c.bf16 %v147_v9, %v139_v8 }
  0xe1   :  { %6691 = vmatpush2.bf16.msra.mxu1 %v14596_v39  ;;  %v145_v2 = vld [vmem:[#allocation2 + $0xe0] sm:$0xff]  ;;  %v270_v35 = vld [vmem:[#allocation5 + $0x1c8] sm:$0xff]  ;;  %v16495_v39 = vpack.c.bf16 %v162_v19, %v154_v18 }
  0xe2   :  { %6806 = vmatprep.subr.bf16.mxu1 %v14071_v45  ;;  %6620 = vmatmul.mubr.bf16.vlgmr.msra.gmra.mxu0 %v16479_v49  ;;  %v16490_v26 = vpack.c.bf16 %v145_v2, %v137_v62  ;;  %18621 = vst [vmem:[#allocation21_spill] sm:$0xff] %v16493_v28  ;;  %v518_v36 = vld [vmem:[#allocation5 + $0x988] sm:$0xff]  ;;  %v153_v40 = vld [vmem:[#allocation2 + $0x120] sm:$0xff]  ;;  %v163_v45 = vld [vmem:[#allocation2 + $0x170] sm:$0xff]  ;;  %v13750_v9 = vcombine.low %v262_v32, %v270_v35 }
  0xe3   :  { %6734 = vmatpush1.bf16.msra.mxu0 %v13814_v52  ;;  %6629 = vmatprep.mubr.bf16.mxu0 %v16483_v61  ;;  %18622 = vst [vmem:[#allocation22_spill] sm:$0xff] %v16495_v39  ;;  %v161_v41 = vld [vmem:[#allocation2 + $0x160] sm:$0xff]  ;;  %v526_v42 = vld [vmem:[#allocation5 + $0x9c8] sm:$0xff] }
  0xe4   :  { %6693 = vmatmul.mubr.bf16.vlgmr.msra.gmra.mxu1 %v16481_v51  ;;  %6735 = vmatprep.subr.bf16.mxu0 %v13799_v56  ;;  %v246_v47 = vld [vmem:[#allocation5 + $0x108] sm:$0xff]  ;;  %v13751_v56 = vcombine.high %v262_v32, %v270_v35  ;;  %v14007_v2 = vcombine.high %v518_v36, %v526_v42  ;;  %v16502_v8 = vpack.c.bf16 %v161_v41, %v153_v40  ;;  %v169_v19 = vld [vmem:[#allocation2 + $0x1a0] sm:$0xff] }
  0xe5   :  { %6807 = vmatpush1.bf16.msra.mxu1 %v14070_v55  ;;  %6702 = vmatprep.mubr.bf16.mxu1 %v16486_v7  ;;  %v254_v52 = vld [vmem:[#allocation5 + $0x148] sm:$0xff]  ;;  %v14022_v55 = vcombine.low %v534_v15, %v542_v17  ;;  %v14006_v11 = vcombine.low %v518_v36, %v526_v42 }
  0xe6   :  { %6808 = vmatprep.subr.bf16.mxu1 %v14055_v60  ;;  %v502_v57 = vld [vmem:[#allocation5 + $0x908] sm:$0xff]  ;;  %18624 = vst [vmem:[#allocation24_spill] sm:$0xff] %v16502_v8  ;;  %v13735_v12 = vcombine.high %v246_v47, %v254_v52 }
  0xe7   :  { %6736 = vmatpush1.bf16.msra.mxu0 %v13798_v10  ;;  %v510_v59 = vld [vmem:[#allocation5 + $0x948] sm:$0xff]  ;;  %v16505_v10 = vpack.c.bf16 %v163_v45, %v155_v44 }
  0xe8   :  { %6737 = vmatprep.subr.bf16.mxu0 %v13783_v14  ;;  %v170_v60 = vld [vmem:[#allocation2 + $0x1a8] sm:$0xff]  ;;  %v13991_v17 = vcombine.high %v502_v57, %v510_v59  ;;  %v13990_v32 = vcombine.low %v502_v57, %v510_v59 }
  0xe9   :  { %6809 = vmatpush1.bf16.msra.mxu1 %v14054_v13  ;;  %v178_v62 = vld [vmem:[#allocation2 + $0x1e8] sm:$0xff]  ;;  %18625 = vst [vmem:[#allocation25_spill] sm:$0xff] %v16505_v10 }
  0xea   :  { %6810 = vmatprep.subr.bf16.mxu1 %v14039_v22  ;;  %6630 = vmatmul.mubr.bf16.gmra.mxu0 %v16490_v26  ;;  %v230_v13 = vld [vmem:[#allocation5 + $0x88] sm:$0xff]  ;;  %v16507_v18 = vpack.c.bf16 %v178_v62, %v170_v60  ;;  %v177_v22 = vld [vmem:[#allocation2 + $0x1e0] sm:$0xff] }
  0xeb   :  { %6738 = vmatpush1.bf16.msra.mxu0 %v13782_v27  ;;  %6639 = vmatprep.mubr.bf16.mxu0 %v16495_v39  ;;  %v238_v14 = vld [vmem:[#allocation5 + $0xc8] sm:$0xff]  ;;  %v171_v27 = vld [vmem:[#allocation2 + $0x1b0] sm:$0xff]  ;;  %v16514_v44 = vpack.c.bf16 %v177_v22, %v169_v19 }
  0xec   :  { %6703 = vmatmul.mubr.bf16.gmra.mxu1 %v16493_v28  ;;  %6739 = vmatprep.subr.bf16.mxu0 %v13767_v31  ;;  %v486_v15 = vld [vmem:[#allocation5 + $0x888] sm:$0xff]  ;;  %18626 = vst [vmem:[#allocation26_spill] sm:$0xff] %v16507_v18  ;;  %v13734_v31 = vcombine.low %v246_v47, %v254_v52  ;;  %v13719_v35 = vcombine.high %v230_v13, %v238_v14 }
  0xed   :  { %6811 = vmatpush1.bf16.msra.mxu1 %v14038_v29  ;;  %6712 = vmatprep.mubr.bf16.mxu1 %v16498_v43  ;;  %v179_v29 = vld [vmem:[#allocation2 + $0x1f0] sm:$0xff]  ;;  %v214_v36 = vld [vmem:[#allocation5 + $0x8] sm:$0xff]  ;;  %v13975_v41 = vcombine.high %v486_v15, %v494_v23  ;;  %18628 = vst [vmem:[#allocation28_spill] sm:$0xff] %v16514_v44  ;;  %v13718_v45 = vcombine.low %v230_v13, %v238_v14 }
  0xee   :  { %6812 = vmatprep.subr.bf16.mxu1 %v14023_v38  ;;  %v222_v38 = vld [vmem:[#allocation5 + $0x48] sm:$0xff]  ;;  %v13974_v47 = vcombine.low %v486_v15, %v494_v23 }
  0xef   :  { %6740 = vmatpush1.bf16.msra.mxu0 %v13766_v46  ;;  %v470_v40 = vld [vmem:[#allocation5 + $0x808] sm:$0xff]  ;;  %v16517_v46 = vpack.c.bf16 %v179_v29, %v171_v27  ;;  %v13703_v52 = vcombine.high %v214_v36, %v222_v38  ;;  %v13702_v62 = vcombine.low %v214_v36, %v222_v38 }
  0xf0   :  { %6741 = vmatprep.subr.bf16.mxu0 %v13751_v56  ;;  %v478_v42 = vld [vmem:[#allocation5 + $0x848] sm:$0xff] }
  0xf1   :  { %6813 = vmatpush1.bf16.msra.mxu1 %v14022_v55  ;;  %18629 = vst [vmem:[#allocation29_spill] sm:$0xff] %v16517_v46  ;;  %v454_v55 = vld [vmem:[#allocation5 + $0x788] sm:$0xff]  ;;  %v13959_v59 = vcombine.high %v470_v40, %v478_v42 }
  0xf2   :  { %6814 = vmatprep.subr.bf16.mxu1 %v14007_v2  ;;  %6640 = vmatmul.mubr.bf16.gmra.mxu0 %v16502_v8  ;;  %v462_v56 = vld [vmem:[#allocation5 + $0x7c8] sm:$0xff]  ;;  %v13958_v2 = vcombine.low %v470_v40, %v478_v42 }
  0xf3   :  { %6742 = vmatpush1.bf16.msra.mxu0 %v13750_v9  ;;  %6649 = vmatprep.mubr.bf16.mxu0 %v16507_v18  ;;  %v710_v57 = vld [vmem:[#allocation5 + $0xf88] sm:$0xff]  ;;  %v13943_v4 = vcombine.high %v454_v55, %v462_v56  ;;  %v13942_v14 = vcombine.low %v454_v55, %v462_v56 }
  0xf4   :  { %6713 = vmatmul.mubr.bf16.gmra.mxu1 %v16505_v10  ;;  %6743 = vmatprep.subr.bf16.mxu0 %v13735_v12  ;;  %v718_v60 = vld [vmem:[#allocation5 + $0xfc8] sm:$0xff] }
  0xf5   :  { %6815 = vmatpush1.bf16.msra.mxu1 %v14006_v11  ;;  %6722 = vmatprep.mubr.bf16.mxu1 %v16510_v24  ;;  %v438_v6 = vld [vmem:[#allocation5 + $0x708] sm:$0xff]  ;;  %v14199_v12 = vcombine.high %v710_v57, %v718_v60  ;;  %v14198_v15 = vcombine.low %v710_v57, %v718_v60 }
  0xf6   :  { %6816 = vmatprep.subr.bf16.mxu1 %v13991_v17  ;;  %v446_v9 = vld [vmem:[#allocation5 + $0x748] sm:$0xff] }
  0xf7   :  { %6744 = vmatpush1.bf16.msra.mxu0 %v13734_v31  ;;  %v694_v11 = vld [vmem:[#allocation5 + $0xf08] sm:$0xff]  ;;  %v13927_v17 = vcombine.high %v438_v6, %v446_v9  ;;  %v13926_v31 = vcombine.low %v438_v6, %v446_v9 }
  0xf8   :  { %6745 = vmatprep.subr.bf16.mxu0 %v13719_v35  ;;  %v702_v13 = vld [vmem:[#allocation5 + $0xf48] sm:$0xff] }
  0xf9   :  { %6817 = vmatpush1.bf16.msra.mxu1 %v13990_v32  ;;  %v422_v19 = vld [vmem:[#allocation5 + $0x688] sm:$0xff]  ;;  %v14183_v27 = vcombine.high %v694_v11, %v702_v13  ;;  %v14182_v32 = vcombine.low %v694_v11, %v702_v13 }
  0xfa   :  { %6818 = vmatprep.subr.bf16.mxu1 %v13975_v41  ;;  %6650 = vmatmul.mubr.bf16.gmra.mxu0 %v16514_v44  ;;  %v430_v22 = vld [vmem:[#allocation5 + $0x6c8] sm:$0xff] }
  0xfb   :  { %6746 = vmatpush1.bf16.msra.mxu0 %v13718_v45  ;;  %6765 = vmatprep.mubr.bf16.mxu0 %v16425_v58  ;;  %v678_v23 = vld [vmem:[#allocation5 + $0xe88] sm:$0xff]  ;;  %v13911_v35 = vcombine.high %v422_v19, %v430_v22  ;;  %v13910_v45 = vcombine.low %v422_v19, %v430_v22 }
  0xfc   :  { %6723 = vmatmul.mubr.bf16.gmra.mxu1 %v16517_v46  ;;  %6747 = vmatprep.subr.bf16.mxu0 %v13703_v52  ;;  %v686_v29 = vld [vmem:[#allocation5 + $0xec8] sm:$0xff] }
  0xfd   :  { %6819 = vmatpush1.bf16.msra.mxu1 %v13974_v47  ;;  %6838 = vmatprep.mubr.bf16.mxu1 %v16427_v63  ;;  %v406_v36 = vld [vmem:[#allocation5 + $0x608] sm:$0xff]  ;;  %v14167_v41 = vcombine.high %v678_v23, %v686_v29  ;;  %v14166_v47 = vcombine.low %v678_v23, %v686_v29 }
  0xfe   :  { %6820 = vmatprep.subr.bf16.mxu1 %v13959_v59  ;;  %v414_v38 = vld [vmem:[#allocation5 + $0x648] sm:$0xff] }
  0xff   :  { %6748 = vmatpush1.bf16.msra.mxu0 %v13702_v62  ;;  %v662_v40 = vld [vmem:[#allocation5 + $0xe08] sm:$0xff]  ;;  %v13895_v52 = vcombine.high %v406_v36, %v414_v38  ;;  %v13894_v62 = vcombine.low %v406_v36, %v414_v38 }
 0x100   :  { %6749 = vmatprep.subr.bf16.mxu0 %v13943_v4  ;;  %v670_v42 = vld [vmem:[#allocation5 + $0xe48] sm:$0xff] }
 0x101   :  { %6821 = vmatpush1.bf16.msra.mxu1 %v13958_v2  ;;  %v390_v55 = vld [vmem:[#allocation5 + $0x588] sm:$0xff]  ;;  %v14151_v59 = vcombine.high %v662_v40, %v670_v42  ;;  %v14150_v2 = vcombine.low %v662_v40, %v670_v42 }
 0x102   :  { %6822 = vmatprep.subr.bf16.mxu1 %v14199_v12  ;;  %v398_v56 = vld [vmem:[#allocation5 + $0x5c8] sm:$0xff] }
 0x103   :  { %6750 = vmatpush2.bf16.msra.mxu0 %v13942_v14  ;;  %v646_v57 = vld [vmem:[#allocation5 + $0xd88] sm:$0xff]  ;;  %v13879_v4 = vcombine.high %v390_v55, %v398_v56  ;;  %v13878_v14 = vcombine.low %v390_v55, %v398_v56 }
 0x104   :  { %6751 = vmatprep.subr.bf16.mxu0 %v13927_v17  ;;  %v654_v60 = vld [vmem:[#allocation5 + $0xdc8] sm:$0xff] }
 0x105   :  { %6823 = vmatpush2.bf16.msra.mxu1 %v14198_v15  ;;  %v374_v6 = vld [vmem:[#allocation5 + $0x508] sm:$0xff]  ;;  %v14135_v12 = vcombine.high %v646_v57, %v654_v60  ;;  %v14134_v15 = vcombine.low %v646_v57, %v654_v60 }
 0x106   :  { %6824 = vmatprep.subr.bf16.mxu1 %v14183_v27  ;;  %v382_v9 = vld [vmem:[#allocation5 + $0x548] sm:$0xff] }
 0x107   :  { %6752 = vmatpush2.bf16.msra.mxu0 %v13926_v31  ;;  %v630_v11 = vld [vmem:[#allocation5 + $0xd08] sm:$0xff]  ;;  %v13863_v17 = vcombine.high %v374_v6, %v382_v9  ;;  %v13862_v31 = vcombine.low %v374_v6, %v382_v9 }
 0x108   :  { %6753 = vmatprep.subr.bf16.mxu0 %v13911_v35  ;;  %v638_v13 = vld [vmem:[#allocation5 + $0xd48] sm:$0xff] }
 0x109   :  { %6825 = vmatpush2.bf16.msra.mxu1 %v14182_v32  ;;  %v358_v19 = vld [vmem:[#allocation5 + $0x488] sm:$0xff]  ;;  %v14119_v27 = vcombine.high %v630_v11, %v638_v13  ;;  %v14118_v32 = vcombine.low %v630_v11, %v638_v13 }
 0x10a   :  { %6826 = vmatprep.subr.bf16.mxu1 %v14167_v41  ;;  %v366_v22 = vld [vmem:[#allocation5 + $0x4c8] sm:$0xff] }
 0x10b   :  { %6754 = vmatpush2.bf16.msra.mxu0 %v13910_v45  ;;  %v614_v23 = vld [vmem:[#allocation5 + $0xc88] sm:$0xff]  ;;  %v13847_v35 = vcombine.high %v358_v19, %v366_v22  ;;  %v13846_v45 = vcombine.low %v358_v19, %v366_v22 }
 0x10c   :  { %6755 = vmatprep.subr.bf16.mxu0 %v13895_v52  ;;  %v622_v29 = vld [vmem:[#allocation5 + $0xcc8] sm:$0xff] }
 0x10d   :  { %6827 = vmatpush2.bf16.msra.mxu1 %v14166_v47  ;;  %v342_v36 = vld [vmem:[#allocation5 + $0x408] sm:$0xff]  ;;  %v14103_v41 = vcombine.high %v614_v23, %v622_v29  ;;  %v14102_v47 = vcombine.low %v614_v23, %v622_v29 }
 0x10e   :  { %6828 = vmatprep.subr.bf16.mxu1 %v14151_v59  ;;  %v350_v38 = vld [vmem:[#allocation5 + $0x448] sm:$0xff] }
 0x10f   :  { %6756 = vmatpush2.bf16.msra.mxu0 %v13894_v62  ;;  %v598_v40 = vld [vmem:[#allocation5 + $0xc08] sm:$0xff]  ;;  %v13831_v52 = vcombine.high %v342_v36, %v350_v38  ;;  %v13830_v62 = vcombine.low %v342_v36, %v350_v38 }
 0x110   :  { %6757 = vmatprep.subr.bf16.mxu0 %v13879_v4  ;;  %v606_v42 = vld [vmem:[#allocation5 + $0xc48] sm:$0xff] }
 0x111   :  { %6829 = vmatpush2.bf16.msra.mxu1 %v14150_v2  ;;  %v838_v55 = vld [vmem:[#allocation5 + $0x1388] sm:$0xff]  ;;  %v14087_v59 = vcombine.high %v598_v40, %v606_v42  ;;  %v14086_v2 = vcombine.low %v598_v40, %v606_v42 }
 0x112   :  { %6830 = vmatprep.subr.bf16.mxu1 %v14135_v12  ;;  %v846_v56 = vld [vmem:[#allocation5 + $0x13c8] sm:$0xff] }
 0x113   :  { %6758 = vmatpush2.bf16.msra.mxu0 %v13878_v14  ;;  %v1094_v57 = vld [vmem:[#allocation5 + $0x1b88] sm:$0xff]  ;;  %v14327_v4 = vcombine.high %v838_v55, %v846_v56  ;;  %v14326_v14 = vcombine.low %v838_v55, %v846_v56 }
 0x114   :  { %6759 = vmatprep.subr.bf16.mxu0 %v13863_v17  ;;  %v1102_v60 = vld [vmem:[#allocation5 + $0x1bc8] sm:$0xff] }
 0x115   :  { %6831 = vmatpush2.bf16.msra.mxu1 %v14134_v15  ;;  %v822_v6 = vld [vmem:[#allocation5 + $0x1308] sm:$0xff]  ;;  %v14583_v12 = vcombine.high %v1094_v57, %v1102_v60  ;;  %v14582_v15 = vcombine.low %v1094_v57, %v1102_v60 }
 0x116   :  { %6832 = vmatprep.subr.bf16.mxu1 %v14119_v27  ;;  %v830_v9 = vld [vmem:[#allocation5 + $0x1348] sm:$0xff] }
 0x117   :  { %6760 = vmatpush2.bf16.msra.mxu0 %v13862_v31  ;;  %v1078_v11 = vld [vmem:[#allocation5 + $0x1b08] sm:$0xff]  ;;  %v14311_v17 = vcombine.high %v822_v6, %v830_v9  ;;  %v14310_v31 = vcombine.low %v822_v6, %v830_v9 }
 0x118   :  { %6761 = vmatprep.subr.bf16.mxu0 %v13847_v35  ;;  %v1086_v13 = vld [vmem:[#allocation5 + $0x1b48] sm:$0xff] }
 0x119   :  { %6833 = vmatpush2.bf16.msra.mxu1 %v14118_v32  ;;  %v806_v19 = vld [vmem:[#allocation5 + $0x1288] sm:$0xff]  ;;  %v14567_v27 = vcombine.high %v1078_v11, %v1086_v13  ;;  %v14566_v32 = vcombine.low %v1078_v11, %v1086_v13 }
 0x11a   :  { %6834 = vmatprep.subr.bf16.mxu1 %v14103_v41  ;;  %v814_v22 = vld [vmem:[#allocation5 + $0x12c8] sm:$0xff] }
 0x11b   :  { %6762 = vmatpush2.bf16.msra.mxu0 %v13846_v45  ;;  %v1062_v23 = vld [vmem:[#allocation5 + $0x1a88] sm:$0xff]  ;;  %v14295_v35 = vcombine.high %v806_v19, %v814_v22  ;;  %v14294_v45 = vcombine.low %v806_v19, %v814_v22 }
 0x11c   :  { %6763 = vmatprep.subr.bf16.mxu0 %v13831_v52  ;;  %v1070_v29 = vld [vmem:[#allocation5 + $0x1ac8] sm:$0xff] }
 0x11d   :  { %6835 = vmatpush2.bf16.msra.mxu1 %v14102_v47  ;;  %v790_v36 = vld [vmem:[#allocation5 + $0x1208] sm:$0xff]  ;;  %v14551_v41 = vcombine.high %v1062_v23, %v1070_v29  ;;  %v14550_v47 = vcombine.low %v1062_v23, %v1070_v29 }
 0x11e   :  { %6836 = vmatprep.subr.bf16.mxu1 %v14087_v59  ;;  %v798_v38 = vld [vmem:[#allocation5 + $0x1248] sm:$0xff] }
 0x11f   :  { %6764 = vmatpush2.bf16.msra.mxu0 %v13830_v62  ;;  %v1046_v40 = vld [vmem:[#allocation5 + $0x1a08] sm:$0xff]  ;;  %v14279_v52 = vcombine.high %v790_v36, %v798_v38  ;;  %v14278_v62 = vcombine.low %v790_v36, %v798_v38 }
 0x120   :  { %6879 = vmatprep.subr.bf16.mxu0 %v14327_v4  ;;  %v1054_v42 = vld [vmem:[#allocation5 + $0x1a48] sm:$0xff] }
 0x121   :  { %6837 = vmatpush2.bf16.msra.mxu1 %v14086_v2  ;;  %v774_v55 = vld [vmem:[#allocation5 + $0x1188] sm:$0xff]  ;;  %v14535_v59 = vcombine.high %v1046_v40, %v1054_v42  ;;  %v14534_v2 = vcombine.low %v1046_v40, %v1054_v42 }
 0x122   :  { %6952 = vmatprep.subr.bf16.mxu1 %v14583_v12  ;;  %6766 = vmatmul.mubr.bf16.vlgmr.msra.gmra.mxu0 %v16431_v21  ;;  %v782_v56 = vld [vmem:[#allocation5 + $0x11c8] sm:$0xff] }
 0x123   :  { %6880 = vmatpush1.bf16.msra.mxu0 %v14326_v14  ;;  %6775 = vmatprep.mubr.bf16.mxu0 %v16435_v34  ;;  %v1030_v57 = vld [vmem:[#allocation5 + $0x1988] sm:$0xff]  ;;  %v14263_v4 = vcombine.high %v774_v55, %v782_v56  ;;  %v14262_v14 = vcombine.low %v774_v55, %v782_v56 }
 0x124   :  { %6839 = vmatmul.mubr.bf16.vlgmr.msra.gmra.mxu1 %v16433_v25  ;;  %6881 = vmatprep.subr.bf16.mxu0 %v14311_v17  ;;  %v1038_v60 = vld [vmem:[#allocation5 + $0x19c8] sm:$0xff] }
 0x125   :  { %6953 = vmatpush1.bf16.msra.mxu1 %v14582_v15  ;;  %6848 = vmatprep.mubr.bf16.mxu1 %v16438_v37  ;;  %v758_v6 = vld [vmem:[#allocation5 + $0x1108] sm:$0xff]  ;;  %v14519_v12 = vcombine.high %v1030_v57, %v1038_v60  ;;  %v14518_v15 = vcombine.low %v1030_v57, %v1038_v60 }
 0x126   :  { %6954 = vmatprep.subr.bf16.mxu1 %v14567_v27  ;;  %v766_v9 = vld [vmem:[#allocation5 + $0x1148] sm:$0xff] }
 0x127   :  { %6882 = vmatpush1.bf16.msra.mxu0 %v14310_v31  ;;  %v1014_v11 = vld [vmem:[#allocation5 + $0x1908] sm:$0xff]  ;;  %v14247_v17 = vcombine.high %v758_v6, %v766_v9  ;;  %v14246_v31 = vcombine.low %v758_v6, %v766_v9 }
 0x128   :  { %6883 = vmatprep.subr.bf16.mxu0 %v14295_v35  ;;  %v1022_v13 = vld [vmem:[#allocation5 + $0x1948] sm:$0xff] }
 0x129   :  { %6955 = vmatpush1.bf16.msra.mxu1 %v14566_v32  ;;  %v742_v19 = vld [vmem:[#allocation5 + $0x1088] sm:$0xff]  ;;  %v14503_v27 = vcombine.high %v1014_v11, %v1022_v13  ;;  %v14502_v32 = vcombine.low %v1014_v11, %v1022_v13 }
 0x12a   :  { %6956 = vmatprep.subr.bf16.mxu1 %v14551_v41  ;;  %6776 = vmatmul.mubr.bf16.gmra.mxu0 %v16442_v50  ;;  %v750_v22 = vld [vmem:[#allocation5 + $0x10c8] sm:$0xff] }
 0x12b   :  { %6884 = vmatpush1.bf16.msra.mxu0 %v14294_v45  ;;  %6785 = vmatprep.mubr.bf16.mxu0 %v16447_v0  ;;  %v998_v23 = vld [vmem:[#allocation5 + $0x1888] sm:$0xff]  ;;  %v14231_v35 = vcombine.high %v742_v19, %v750_v22  ;;  %v14230_v45 = vcombine.low %v742_v19, %v750_v22 }
 0x12c   :  { %6849 = vmatmul.mubr.bf16.gmra.mxu1 %v16445_v54  ;;  %6885 = vmatprep.subr.bf16.mxu0 %v14279_v52  ;;  %v1006_v29 = vld [vmem:[#allocation5 + $0x18c8] sm:$0xff] }
 0x12d   :  { %6957 = vmatpush1.bf16.msra.mxu1 %v14550_v47  ;;  %6858 = vmatprep.mubr.bf16.mxu1 %v16450_v3  ;;  %v726_v36 = vld [vmem:[#allocation5 + $0x1008] sm:$0xff]  ;;  %v14487_v41 = vcombine.high %v998_v23, %v1006_v29  ;;  %v14486_v47 = vcombine.low %v998_v23, %v1006_v29 }
 0x12e   :  { %6958 = vmatprep.subr.bf16.mxu1 %v14535_v59  ;;  %v734_v38 = vld [vmem:[#allocation5 + $0x1048] sm:$0xff] }
 0x12f   :  { %6886 = vmatpush1.bf16.msra.mxu0 %v14278_v62  ;;  %v982_v40 = vld [vmem:[#allocation5 + $0x1808] sm:$0xff]  ;;  %v14215_v52 = vcombine.high %v726_v36, %v734_v38  ;;  %v14214_v62 = vcombine.low %v726_v36, %v734_v38 }
 0x130   :  { %6887 = vmatprep.subr.bf16.mxu0 %v14263_v4  ;;  %v990_v42 = vld [vmem:[#allocation5 + $0x1848] sm:$0xff] }
 0x131   :  { %6959 = vmatpush1.bf16.msra.mxu1 %v14534_v2  ;;  %v966_v55 = vld [vmem:[#allocation5 + $0x1788] sm:$0xff]  ;;  %v14471_v59 = vcombine.high %v982_v40, %v990_v42  ;;  %v14470_v2 = vcombine.low %v982_v40, %v990_v42 }
 0x132   :  { %6960 = vmatprep.subr.bf16.mxu1 %v14519_v12  ;;  %6786 = vmatmul.mubr.bf16.gmra.mxu0 %v16454_v16  ;;  %v974_v56 = vld [vmem:[#allocation5 + $0x17c8] sm:$0xff] }
 0x133   :  { %6888 = vmatpush1.bf16.msra.mxu0 %v14262_v14  ;;  %6795 = vmatprep.mubr.bf16.mxu0 %v16459_v30  ;;  %v1222_v57 = vld [vmem:[#allocation5 + $0x1f88] sm:$0xff]  ;;  %v14455_v4 = vcombine.high %v966_v55, %v974_v56  ;;  %v14454_v14 = vcombine.low %v966_v55, %v974_v56 }
 0x134   :  { %6859 = vmatmul.mubr.bf16.gmra.mxu1 %v16457_v20  ;;  %6889 = vmatprep.subr.bf16.mxu0 %v14247_v17  ;;  %v1230_v60 = vld [vmem:[#allocation5 + $0x1fc8] sm:$0xff] }
 0x135   :  { %6961 = vmatpush1.bf16.msra.mxu1 %v14518_v15  ;;  %6868 = vmatprep.mubr.bf16.mxu1 %v16462_v33  ;;  %v950_v6 = vld [vmem:[#allocation5 + $0x1708] sm:$0xff]  ;;  %v14711_v12 = vcombine.high %v1222_v57, %v1230_v60  ;;  %v14710_v15 = vcombine.low %v1222_v57, %v1230_v60 }
 0x136   :  { %6962 = vmatprep.subr.bf16.mxu1 %v14503_v27  ;;  %v958_v9 = vld [vmem:[#allocation5 + $0x1748] sm:$0xff] }
 0x137   :  { %6890 = vmatpush1.bf16.msra.mxu0 %v14246_v31  ;;  %v1206_v11 = vld [vmem:[#allocation5 + $0x1f08] sm:$0xff]  ;;  %v14439_v17 = vcombine.high %v950_v6, %v958_v9  ;;  %v14438_v31 = vcombine.low %v950_v6, %v958_v9 }
 0x138   :  { %6891 = vmatprep.subr.bf16.mxu0 %v14231_v35  ;;  %v1214_v13 = vld [vmem:[#allocation5 + $0x1f48] sm:$0xff] }
 0x139   :  { %6963 = vmatpush1.bf16.msra.mxu1 %v14502_v32  ;;  %v934_v19 = vld [vmem:[#allocation5 + $0x1688] sm:$0xff]  ;;  %v14695_v27 = vcombine.high %v1206_v11, %v1214_v13  ;;  %v14694_v32 = vcombine.low %v1206_v11, %v1214_v13 }
 0x13a   :  { %6964 = vmatprep.subr.bf16.mxu1 %v14487_v41  ;;  %6796 = vmatmul.mubr.bf16.gmra.mxu0 %v16466_v48  ;;  %v942_v22 = vld [vmem:[#allocation5 + $0x16c8] sm:$0xff] }
 0x13b   :  { %6892 = vmatpush1.bf16.msra.mxu0 %v14230_v45  ;;  %6911 = vmatprep.mubr.bf16.mxu0 %v16471_v1  ;;  %v1190_v23 = vld [vmem:[#allocation5 + $0x1e88] sm:$0xff]  ;;  %v14423_v35 = vcombine.high %v934_v19, %v942_v22  ;;  %v14422_v45 = vcombine.low %v934_v19, %v942_v22 }
 0x13c   :  { %6869 = vmatmul.mubr.bf16.gmra.mxu1 %v16469_v53  ;;  %6893 = vmatprep.subr.bf16.mxu0 %v14215_v52  ;;  %v1198_v29 = vld [vmem:[#allocation5 + $0x1ec8] sm:$0xff] }
 0x13d   :  { %6965 = vmatpush1.bf16.msra.mxu1 %v14486_v47  ;;  %6984 = vmatprep.mubr.bf16.mxu1 %v16474_v5  ;;  %v918_v36 = vld [vmem:[#allocation5 + $0x1608] sm:$0xff]  ;;  %v14679_v41 = vcombine.high %v1190_v23, %v1198_v29  ;;  %v14678_v47 = vcombine.low %v1190_v23, %v1198_v29 }
 0x13e   :  { %6966 = vmatprep.subr.bf16.mxu1 %v14471_v59  ;;  %v926_v38 = vld [vmem:[#allocation5 + $0x1648] sm:$0xff] }
 0x13f   :  { %6894 = vmatpush1.bf16.msra.mxu0 %v14214_v62  ;;  %v1174_v40 = vld [vmem:[#allocation5 + $0x1e08] sm:$0xff]  ;;  %v14407_v52 = vcombine.high %v918_v36, %v926_v38  ;;  %v14406_v62 = vcombine.low %v918_v36, %v926_v38 }
 0x140   :  { %6895 = vmatprep.subr.bf16.mxu0 %v14455_v4  ;;  %v1182_v42 = vld [vmem:[#allocation5 + $0x1e48] sm:$0xff] }
 0x141   :  { %6967 = vmatpush1.bf16.msra.mxu1 %v14470_v2  ;;  %v902_v55 = vld [vmem:[#allocation5 + $0x1588] sm:$0xff]  ;;  %v14663_v59 = vcombine.high %v1174_v40, %v1182_v42  ;;  %v14662_v2 = vcombine.low %v1174_v40, %v1182_v42 }
 0x142   :  { %6968 = vmatprep.subr.bf16.mxu1 %v14711_v12  ;;  %v910_v56 = vld [vmem:[#allocation5 + $0x15c8] sm:$0xff] }
 0x143   :  { %6896 = vmatpush2.bf16.msra.mxu0 %v14454_v14  ;;  %v1158_v57 = vld [vmem:[#allocation5 + $0x1d88] sm:$0xff]  ;;  %v14391_v4 = vcombine.high %v902_v55, %v910_v56  ;;  %v14390_v14 = vcombine.low %v902_v55, %v910_v56 }
 0x144   :  { %6897 = vmatprep.subr.bf16.mxu0 %v14439_v17  ;;  %v1166_v60 = vld [vmem:[#allocation5 + $0x1dc8] sm:$0xff] }
 0x145   :  { %6969 = vmatpush2.bf16.msra.mxu1 %v14710_v15  ;;  %v886_v6 = vld [vmem:[#allocation5 + $0x1508] sm:$0xff]  ;;  %v14647_v12 = vcombine.high %v1158_v57, %v1166_v60  ;;  %v14646_v15 = vcombine.low %v1158_v57, %v1166_v60  ;;  %v327_v57 = vld [vmem:[#allocation5 + $0x390] sm:$0xff] }
 0x146   :  { %6970 = vmatprep.subr.bf16.mxu1 %v14695_v27  ;;  %v894_v9 = vld [vmem:[#allocation5 + $0x1548] sm:$0xff]  ;;  %v583_v60 = vld [vmem:[#allocation5 + $0xb90] sm:$0xff] }
 0x147   :  { %6898 = vmatpush2.bf16.msra.mxu0 %v14438_v31  ;;  %v1142_v11 = vld [vmem:[#allocation5 + $0x1d08] sm:$0xff]  ;;  %v14375_v17 = vcombine.high %v886_v6, %v894_v9  ;;  %v14374_v31 = vcombine.low %v886_v6, %v894_v9 }
 0x148   :  { %6899 = vmatprep.subr.bf16.mxu0 %v14423_v35  ;;  %v1150_v13 = vld [vmem:[#allocation5 + $0x1d48] sm:$0xff] }
 0x149   :  { %6971 = vmatpush2.bf16.msra.mxu1 %v14694_v32  ;;  %v870_v19 = vld [vmem:[#allocation5 + $0x1488] sm:$0xff]  ;;  %v14631_v27 = vcombine.high %v1142_v11, %v1150_v13  ;;  %v1241_v32 = vlaneseq  ;;  %v14630_v35 = vcombine.low %v1142_v11, %v1150_v13  ;;  %v311_v13 = vld [vmem:[#allocation5 + $0x310] sm:$0xff] }
 0x14a   :  { %6972 = vmatprep.subr.bf16.mxu1 %v14679_v41  ;;  %v878_v22 = vld [vmem:[#allocation5 + $0x14c8] sm:$0xff] }
 0x14b   :  { %6900 = vmatpush2.bf16.msra.mxu0 %v14422_v45  ;;  %v1126_v23 = vld [vmem:[#allocation5 + $0x1c88] sm:$0xff]  ;;  %v14359_v36 = vcombine.high %v870_v19, %v878_v22 }
 0x14c   :  { %6901 = vmatprep.subr.bf16.mxu0 %v14407_v52  ;;  %v1134_v29 = vld [vmem:[#allocation5 + $0x1cc8] sm:$0xff]  ;;  %v16539_v52 = vshrl.u32 %v1241_v32, 7  ;;  %v295_v32 = vld [vmem:[#allocation5 + $0x290] sm:$0xff] }
 0x14d   :  { %6973 = vmatpush2.bf16.msra.mxu1 %v14678_v47  ;;  %v854_v38 = vld [vmem:[#allocation5 + $0x1408] sm:$0xff]  ;;  %v14615_v42 = vcombine.high %v1126_v23, %v1134_v29  ;;  %v14358_v47 = vcombine.low %v870_v19, %v878_v22  ;;  %v14614_v55 = vcombine.low %v1126_v23, %v1134_v29  ;;  %v575_v22 = vld [vmem:[#allocation5 + $0xb50] sm:$0xff] }
 0x14e   :  { %6974 = vmatprep.subr.bf16.mxu1 %v14663_v59  ;;  %v862_v40 = vld [vmem:[#allocation5 + $0x1448] sm:$0xff]  ;;  %18630 = vst [vmem:[#allocation30_spill] sm:$0xff] %v16539_v52  ;;  %v335_v59 = vld [vmem:[#allocation5 + $0x3d0] sm:$0xff]  ;;  %v16542_v9 = vsub.s32 0, %v16539_v52  ;;  %v16545_v19 = vsub.s32 1, %v16539_v52 }
 0x14f   :  { %6902 = vmatpush2.bf16.msra.mxu0 %v14406_v62  ;;  %v1110_v41 = vld [vmem:[#allocation5 + $0x1c08] sm:$0xff]  ;;  %v14343_v56 = vcombine.high %v854_v38, %v862_v40  ;;  %v14342_v6 = vcombine.low %v854_v38, %v862_v40 }
 0x150   :  { %6903 = vmatprep.subr.bf16.mxu0 %v14391_v4  ;;  %v1118_v45 = vld [vmem:[#allocation5 + $0x1c48] sm:$0xff]  ;;  %v1237_v4 = vld [vmem:[#allocation7] sm:$0xff]  ;;  %18631 = vst [vmem:[#allocation31_spill] sm:$0xff] %v16542_v9  ;;  %18632 = vst [vmem:[#allocation32_spill] sm:$0xff] %v16545_v19 }
 0x151   :  { %6975 = vmatpush2.bf16.msra.mxu1 %v14662_v2  ;;  %v14599_v62 = vcombine.high %v1110_v41, %v1118_v45  ;;  %v591_v2 = vld [vmem:[#allocation5 + $0xbd0] sm:$0xff]  ;;  %v14598_v11 = vcombine.low %v1110_v41, %v1118_v45  ;;  %v16548_v23 = vrot.slane %v1237_v4, %v16542_v9  ;;  %v16551_v38 = vrot.slane %v1237_v4, %v16545_v19 }
 0x152   :  { %6976 = vmatprep.subr.bf16.mxu1 %v14647_v12  ;;  %v13817_v12 = vcombine.high %v327_v57, %v335_v59  ;;  %v14072_v29 = vcombine.low %v583_v60, %v591_v2  ;;  %v559_v41 = vld [vmem:[#allocation5 + $0xad0] sm:$0xff] }
 0x153   :  { %6904 = vmatpush2.bf16.msra.mxu0 %v14390_v14  ;;  %v319_v14 = vld [vmem:[#allocation5 + $0x350] sm:$0xff]  ;;  %18633 = vst [vmem:[#allocation33_spill] sm:$0xff] %v16551_v38 }
 0x154   :  { %6905 = vmatprep.subr.bf16.mxu0 %v14375_v17  ;;  %v14073_v17 = vcombine.high %v583_v60, %v591_v2  ;;  %v279_v60 = vld [vmem:[#allocation5 + $0x210] sm:$0xff] }
 0x155   :  { %6977 = vmatpush2.bf16.msra.mxu1 %v14646_v15  ;;  %v567_v15 = vld [vmem:[#allocation5 + $0xb10] sm:$0xff] }
 0x156   :  { %6978 = vmatprep.subr.bf16.mxu1 %v14631_v27  ;;  %v13816_v27 = vcombine.low %v327_v57, %v335_v59  ;;  %v14057_v40 = vcombine.high %v567_v15, %v575_v22  ;;  %v14056_v57 = vcombine.low %v567_v15, %v575_v22  ;;  %v535_v2 = vld [vmem:[#allocation5 + $0xa10] sm:$0xff] }
 0x157   :  { %6906 = vmatpush2.bf16.msra.mxu0 %v14374_v31  ;;  %v13801_v31 = vcombine.high %v311_v13, %v319_v14  ;;  %v231_v9 = vld [vmem:[#allocation5 + $0x90] sm:$0xff] }
 0x158   :  { %6907 = vmatprep.subr.bf16.mxu0 %v14359_v36  ;;  %v551_v36 = vld [vmem:[#allocation5 + $0xa90] sm:$0xff] }
 0x159   :  { %6979 = vmatpush2.bf16.msra.mxu1 %v14630_v35  ;;  %v303_v35 = vld [vmem:[#allocation5 + $0x2d0] sm:$0xff] }
 0x15a   :  { %6980 = vmatprep.subr.bf16.mxu1 %v14615_v42  ;;  %v13785_v59 = vcombine.high %v295_v32, %v303_v35  ;;  %v13784_v22 = vcombine.low %v295_v32, %v303_v35 }
 0x15b   :  { %6908 = vmatpush2.bf16.msra.mxu0 %v14358_v47 }
 0x15c   :  { %6909 = vmatprep.subr.bf16.mxu0 %v14343_v56  ;;  %v6548_v47 = vpop.f32.mrf.mxu1 }
 0x15d   :  { %6981 = vmatpush2.bf16.msra.mxu1 %v14614_v55  ;;  %v13800_v55 = vcombine.low %v311_v13, %v319_v14 }
 0x15e   :  { %6982 = vmatprep.subr.bf16.mxu1 %v14599_v62  ;;  %v6475_v42 = vpop.f32.mrf.mxu0  ;;  %v287_v62 = vld [vmem:[#allocation5 + $0x250] sm:$0xff] }
 0x15f   :  { %6910 = vmatpush2.bf16.msra.mxu0 %v14342_v6  ;;  %v6476_v45 = vadd.f32 %v6475_v42, %v16548_v23  ;;  %v263_v42 = vld [vmem:[#allocation5 + $0x190] sm:$0xff]  ;;  %v13768_v32 = vcombine.low %v279_v60, %v287_v62 }
 0x160   :  { %7025 = vmatprep.subr.bf16.mxu0 %v13817_v12  ;;  %v6477_v56 = vpop.f32.mrf.mxu0  ;;  %v14041_v12 = vcombine.high %v551_v36, %v559_v41 }
 0x161   :  { %6983 = vmatpush2.bf16.msra.mxu1 %v14598_v11  ;;  %v16556_v4 = vadd.f32 %v6548_v47, %v6476_v45  ;;  %v6478_v6 = vadd.f32 %v6477_v56, %v16551_v38  ;;  %v6550_v11 = vpop.f32.mrf.mxu1  ;;  %v271_v45 = vld [vmem:[#allocation5 + $0x1d0] sm:$0xff] }
 0x162   :  { %7098 = vmatprep.subr.bf16.mxu1 %v14073_v17  ;;  %6912 = vmatmul.mubr.bf16.vlgmr.msra.gmra.mxu0 %v16479_v49  ;;  %v543_v17 = vld [vmem:[#allocation5 + $0xa50] sm:$0xff] }
 0x163   :  { %7026 = vmatpush1.bf16.msra.mxu0 %v13816_v27  ;;  %6921 = vmatprep.mubr.bf16.mxu0 %v16483_v61  ;;  %v6479_v27 = vpop.f32.mrf.mxu0  ;;  %v16561_v13 = vadd.f32 %v6550_v11, %v6478_v6  ;;  %v6552_v15 = vpop.f32.mrf.mxu1  ;;  %v519_v47 = vld [vmem:[#allocation5 + $0x990] sm:$0xff]  ;;  %v14025_v6 = vcombine.high %v535_v2, %v543_v17 }
 0x164   :  { %6985 = vmatmul.mubr.bf16.vlgmr.msra.gmra.mxu1 %v16481_v51  ;;  %7027 = vmatprep.subr.bf16.mxu0 %v13801_v31  ;;  %v6480_v14 = vadd.f32 %v6479_v27, %v16548_v23  ;;  %v14040_v31 = vcombine.low %v551_v36, %v559_v41  ;;  %v527_v11 = vld [vmem:[#allocation5 + $0x9d0] sm:$0xff]  ;;  %v14024_v41 = vcombine.low %v535_v2, %v543_v17 }
 0x165   :  { %7099 = vmatpush1.bf16.msra.mxu1 %v14072_v29  ;;  %6994 = vmatprep.mubr.bf16.mxu1 %v16486_v7  ;;  %v16564_v29 = vpop.f32.mrf.mxu0  ;;  %v16568_v19 = vpop.f32.mrf.mxu1  ;;  %v255_v27 = vld [vmem:[#allocation5 + $0x150] sm:$0xff]  ;;  %v13752_v2 = vcombine.low %v263_v42, %v271_v45 }
 0x166   :  { %7100 = vmatprep.subr.bf16.mxu1 %v14057_v40  ;;  %18634 = vst [vmem:[#allocation34_spill] sm:$0xff] %v16564_v29  ;;  %v13769_v40 = vcombine.high %v279_v60, %v287_v62  ;;  %v16566_v56 = vadd.f32 %v6552_v15, %v6480_v14  ;;  %18635 = vst [vmem:[#allocation35_spill] sm:$0xff] %v16568_v19  ;;  %v503_v14 = vld [vmem:[#allocation5 + $0x910] sm:$0xff]  ;;  %v14009_v15 = vcombine.high %v519_v47, %v527_v11 }
 0x167   :  { %7028 = vmatpush1.bf16.msra.mxu0 %v13800_v55  ;;  %v6558_v36 = vpop.f32.mrf.mxu1  ;;  %v511_v19 = vld [vmem:[#allocation5 + $0x950] sm:$0xff] }
 0x168   :  { %7029 = vmatprep.subr.bf16.mxu0 %v13785_v59  ;;  %v6485_v55 = vpop.f32.mrf.mxu0  ;;  %v247_v59 = vld [vmem:[#allocation5 + $0x110] sm:$0xff] }
 0x169   :  { %7101 = vmatpush1.bf16.msra.mxu1 %v14056_v57  ;;  %v6486_v35 = vadd.f32 %v6485_v55, %v16548_v23  ;;  %v13753_v57 = vcombine.high %v263_v42, %v271_v45  ;;  %v6560_v60 = vpop.f32.mrf.mxu1  ;;  %v13737_v55 = vcombine.high %v247_v59, %v255_v27 }
 0x16a   :  { %7102 = vmatprep.subr.bf16.mxu1 %v14041_v12  ;;  %6922 = vmatmul.mubr.bf16.gmra.mxu0 %v16490_v26  ;;  %v6487_v12 = vpop.f32.mrf.mxu0 }
 0x16b   :  { %7030 = vmatpush1.bf16.msra.mxu0 %v13784_v22  ;;  %6931 = vmatprep.mubr.bf16.mxu0 %v16495_v39  ;;  %v6488_v22 = vadd.f32 %v6487_v12, %v16551_v38  ;;  %v16575_v29 = vadd.f32 %v6558_v36, %v6486_v35  ;;  %v239_v39 = vld [vmem:[#allocation5 + $0xd0] sm:$0xff]  ;;  %v13993_v36 = vcombine.high %v503_v14, %v511_v19 }
 0x16c   :  { %6995 = vmatmul.mubr.bf16.gmra.mxu1 %v16493_v28  ;;  %7031 = vmatprep.subr.bf16.mxu0 %v13769_v40  ;;  %v6489_v62 = vpop.f32.mrf.mxu0  ;;  %v6562_v40 = vpop.f32.mrf.mxu1  ;;  %v487_v12 = vld [vmem:[#allocation5 + $0x890] sm:$0xff] }
 0x16d   :  { %7103 = vmatpush1.bf16.msra.mxu1 %v14040_v31  ;;  %7004 = vmatprep.mubr.bf16.mxu1 %v16498_v43  ;;  %v6490_v17 = vadd.f32 %v6489_v62, %v16548_v23  ;;  %v16579_v31 = vadd.f32 %v6560_v60, %v6488_v22  ;;  %v495_v43 = vld [vmem:[#allocation5 + $0x8d0] sm:$0xff] }
 0x16e   :  { %7104 = vmatprep.subr.bf16.mxu1 %v14025_v6  ;;  %v14008_v6 = vcombine.low %v519_v47, %v527_v11  ;;  %v16581_v35 = vpop.f32.mrf.mxu0  ;;  %v16585_v42 = vpop.f32.mrf.mxu1  ;;  %v13736_v47 = vcombine.low %v247_v59, %v255_v27  ;;  %v223_v22 = vld [vmem:[#allocation5 + $0x50] sm:$0xff] }
 0x16f   :  { %7032 = vmatpush1.bf16.msra.mxu0 %v13768_v32  ;;  %18636 = vst [vmem:[#allocation36_spill] sm:$0xff] %v16581_v35  ;;  %v16583_v28 = vadd.f32 %v6562_v40, %v6490_v17  ;;  %18637 = vst [vmem:[#allocation37_spill] sm:$0xff] %v16585_v42  ;;  %v471_v60 = vld [vmem:[#allocation5 + $0x810] sm:$0xff]  ;;  %v13977_v17 = vcombine.high %v487_v12, %v495_v43 }
 0x170   :  { %7033 = vmatprep.subr.bf16.mxu0 %v13753_v57  ;;  %v6568_v32 = vpop.f32.mrf.mxu1  ;;  %v13721_v57 = vcombine.high %v231_v9, %v239_v39  ;;  %v479_v40 = vld [vmem:[#allocation5 + $0x850] sm:$0xff] }
 0x171   :  { %7105 = vmatpush1.bf16.msra.mxu1 %v14024_v41  ;;  %v13992_v41 = vcombine.low %v503_v14, %v511_v19  ;;  %v13720_v19 = vcombine.low %v231_v9, %v239_v39  ;;  %v455_v35 = vld [vmem:[#allocation5 + $0x790] sm:$0xff] }
 0x172   :  { %7106 = vmatprep.subr.bf16.mxu1 %v14009_v15  ;;  %6932 = vmatmul.mubr.bf16.gmra.mxu0 %v16502_v8  ;;  %v6495_v45 = vpop.f32.mrf.mxu0  ;;  %v215_v15 = vld [vmem:[#allocation5 + $0x10] sm:$0xff]  ;;  %v6570_v59 = vpop.f32.mrf.mxu1 }
 0x173   :  { %7034 = vmatpush1.bf16.msra.mxu0 %v13752_v2  ;;  %v6496_v11 = vadd.f32 %v6495_v45, %v16548_v23  ;;  %6941 = vmatprep.mubr.bf16.mxu0 %v16507_v18  ;;  %v13705_v45 = vcombine.high %v215_v15, %v223_v22  ;;  %v463_v18 = vld [vmem:[#allocation5 + $0x7d0] sm:$0xff] }
 0x174   :  { %7005 = vmatmul.mubr.bf16.gmra.mxu1 %v16505_v10  ;;  %7035 = vmatprep.subr.bf16.mxu0 %v13737_v55  ;;  %v6497_v62 = vpop.f32.mrf.mxu0  ;;  %v6572_v55 = vpop.f32.mrf.mxu1 }
 0x175   :  { %7107 = vmatpush1.bf16.msra.mxu1 %v14008_v6  ;;  %v6498_v2 = vadd.f32 %v6497_v62, %v16551_v38  ;;  %v16592_v42 = vadd.f32 %v6568_v32, %v6496_v11  ;;  %7014 = vmatprep.mubr.bf16.mxu1 %v16510_v24  ;;  %v711_v62 = vld [vmem:[#allocation5 + $0xf90] sm:$0xff]  ;;  %v13961_v32 = vcombine.high %v471_v60, %v479_v40 }
 0x176   :  { %7108 = vmatprep.subr.bf16.mxu1 %v13993_v36  ;;  %v6499_v27 = vpop.f32.mrf.mxu0  ;;  %v13976_v36 = vcombine.low %v487_v12, %v495_v43  ;;  %v719_v24 = vld [vmem:[#allocation5 + $0xfd0] sm:$0xff]  ;;  %v16602_v39 = vpop.f32.mrf.mxu1  ;;  %v13704_v43 = vcombine.low %v215_v15, %v223_v22  ;;  %v13944_v22 = vcombine.low %v455_v35, %v463_v18 }
 0x177   :  { %7036 = vmatpush1.bf16.msra.mxu0 %v13736_v47  ;;  %v6500_v14 = vadd.f32 %v6499_v27, %v16548_v23  ;;  %v16596_v6 = vadd.f32 %v6570_v59, %v6498_v2  ;;  %18639 = vst [vmem:[#allocation39_spill] sm:$0xff] %v16602_v39  ;;  %v447_v2 = vld [vmem:[#allocation5 + $0x750] sm:$0xff] }
 0x178   :  { %7037 = vmatprep.subr.bf16.mxu0 %v13721_v57  ;;  %v16598_v11 = vpop.f32.mrf.mxu0  ;;  %v6578_v47 = vpop.f32.mrf.mxu1  ;;  %v13945_v57 = vcombine.high %v455_v35, %v463_v18  ;;  %v695_v59 = vld [vmem:[#allocation5 + $0xf10] sm:$0xff] }
 0x179   :  { %7109 = vmatpush1.bf16.msra.mxu1 %v13992_v41  ;;  %18638 = vst [vmem:[#allocation38_spill] sm:$0xff] %v16598_v11  ;;  %v16600_v10 = vadd.f32 %v6572_v55, %v6500_v14  ;;  %v13960_v41 = vcombine.low %v471_v60, %v479_v40  ;;  %v14201_v14 = vcombine.high %v711_v62, %v719_v24  ;;  %v703_v55 = vld [vmem:[#allocation5 + $0xf50] sm:$0xff] }
 0x17a   :  { %7110 = vmatprep.subr.bf16.mxu1 %v13977_v17  ;;  %6942 = vmatmul.mubr.bf16.gmra.mxu0 %v16514_v44  ;;  %v439_v17 = vld [vmem:[#allocation5 + $0x710] sm:$0xff]  ;;  %v6580_v11 = vpop.f32.mrf.mxu1  ;;  %v14184_v18 = vcombine.low %v695_v59, %v703_v55 }
 0x17b   :  { %7038 = vmatpush1.bf16.msra.mxu0 %v13720_v19  ;;  %7057 = vmatprep.mubr.bf16.mxu0 %v16425_v58  ;;  %v407_v35 = vld [vmem:[#allocation5 + $0x610] sm:$0xff] }
 0x17c   :  { %v6505_v9 = vpop.f32.mrf.mxu0  ;;  %7015 = vmatmul.mubr.bf16.gmra.mxu1 %v16517_v46  ;;  %7039 = vmatprep.subr.bf16.mxu0 %v13705_v45  ;;  %v13929_v45 = vcombine.high %v439_v17, %v447_v2 }
 0x17d   :  { %v6506_v12 = vadd.f32 %v6505_v9, %v16548_v23  ;;  %7111 = vmatpush1.bf16.msra.mxu1 %v13976_v36  ;;  %7130 = vmatprep.mubr.bf16.mxu1 %v16427_v63  ;;  %v14200_v36 = vcombine.low %v711_v62, %v719_v24  ;;  %v431_v9 = vld [vmem:[#allocation5 + $0x6d0] sm:$0xff] }
 0x17e   :  { %v6507_v27 = vpop.f32.mrf.mxu0  ;;  %7112 = vmatprep.subr.bf16.mxu1 %v13961_v32  ;;  %v423_v32 = vld [vmem:[#allocation5 + $0x690] sm:$0xff] }
 0x17f   :  { %v6508_v39 = vadd.f32 %v6507_v27, %v16551_v38  ;;  %v16608_v19 = vadd.f32 %v6578_v47, %v6506_v12  ;;  %7040 = vmatpush1.bf16.msra.mxu0 %v13704_v43  ;;  %v679_v12 = vld [vmem:[#allocation5 + $0xe90] sm:$0xff]  ;;  %v6582_v47 = vpop.f32.mrf.mxu1  ;;  %v14185_v27 = vcombine.high %v695_v59, %v703_v55  ;;  %v13928_v43 = vcombine.low %v439_v17, %v447_v2 }
 0x180   :  { %v6509_v15 = vpop.f32.mrf.mxu0  ;;  %7041 = vmatprep.subr.bf16.mxu0 %v13945_v57  ;;  %v687_v38 = vld [vmem:[#allocation5 + $0xed0] sm:$0xff] }
 0x181   :  { %v6510_v60 = vadd.f32 %v6509_v15, %v16548_v23  ;;  %v16613_v40 = vadd.f32 %v6580_v11, %v6508_v39  ;;  %7113 = vmatpush1.bf16.msra.mxu1 %v13960_v41  ;;  %v13913_v23 = vcombine.high %v423_v32, %v431_v9  ;;  %v415_v11 = vld [vmem:[#allocation5 + $0x650] sm:$0xff]  ;;  %v14169_v24 = vcombine.high %v679_v12, %v687_v38 }
 0x182   :  { %7114 = vmatprep.subr.bf16.mxu1 %v14201_v14  ;;  %v663_v39 = vld [vmem:[#allocation5 + $0xe10] sm:$0xff]  ;;  %v13912_v41 = vcombine.low %v423_v32, %v431_v9  ;;  %v14168_v57 = vcombine.low %v679_v12, %v687_v38  ;;  %v13897_v14 = vcombine.high %v407_v35, %v415_v11  ;;  %v13896_v59 = vcombine.low %v407_v35, %v415_v11 }
 0x183   :  { %v16615_v58 = vadd.f32 %v6582_v47, %v6510_v60  ;;  %7042 = vmatpush2.bf16.msra.mxu0 %v13944_v22  ;;  %v671_v62 = vld [vmem:[#allocation5 + $0xe50] sm:$0xff] }
 0x184   :  { %7043 = vmatprep.subr.bf16.mxu0 %v13929_v45  ;;  %v391_v15 = vld [vmem:[#allocation5 + $0x590] sm:$0xff]  ;;  %v14153_v17 = vcombine.high %v663_v39, %v671_v62  ;;  %v14152_v55 = vcombine.low %v663_v39, %v671_v62 }
 0x185   :  { %7115 = vmatpush2.bf16.msra.mxu1 %v14200_v36  ;;  %v399_v60 = vld [vmem:[#allocation5 + $0x5d0] sm:$0xff] }
 0x186   :  { %7116 = vmatprep.subr.bf16.mxu1 %v14185_v27  ;;  %v647_v22 = vld [vmem:[#allocation5 + $0xd90] sm:$0xff]  ;;  %v13881_v36 = vcombine.high %v391_v15, %v399_v60  ;;  %v13880_v38 = vcombine.low %v391_v15, %v399_v60 }
 0x187   :  { %7044 = vmatpush2.bf16.msra.mxu0 %v13928_v43  ;;  %v655_v2 = vld [vmem:[#allocation5 + $0xdd0] sm:$0xff] }
 0x188   :  { %7045 = vmatprep.subr.bf16.mxu0 %v13913_v23  ;;  %v375_v45 = vld [vmem:[#allocation5 + $0x510] sm:$0xff]  ;;  %v14137_v32 = vcombine.high %v647_v22, %v655_v2  ;;  %v14136_v12 = vcombine.low %v647_v22, %v655_v2 }
 0x189   :  { %7117 = vmatpush2.bf16.msra.mxu1 %v14184_v18  ;;  %v383_v47 = vld [vmem:[#allocation5 + $0x550] sm:$0xff] }
 0x18a   :  { %7118 = vmatprep.subr.bf16.mxu1 %v14169_v24  ;;  %v631_v27 = vld [vmem:[#allocation5 + $0xd10] sm:$0xff]  ;;  %v13865_v43 = vcombine.high %v375_v45, %v383_v47  ;;  %v13864_v39 = vcombine.low %v375_v45, %v383_v47 }
 0x18b   :  { %7046 = vmatpush2.bf16.msra.mxu0 %v13912_v41  ;;  %v639_v9 = vld [vmem:[#allocation5 + $0xd50] sm:$0xff] }
 0x18c   :  { %7047 = vmatprep.subr.bf16.mxu0 %v13897_v14  ;;  %v359_v18 = vld [vmem:[#allocation5 + $0x490] sm:$0xff]  ;;  %v14121_v35 = vcombine.high %v631_v27, %v639_v9  ;;  %v14120_v62 = vcombine.low %v631_v27, %v639_v9 }
 0x18d   :  { %7119 = vmatpush2.bf16.msra.mxu1 %v14168_v57  ;;  %v367_v23 = vld [vmem:[#allocation5 + $0x4d0] sm:$0xff] }
 0x18e   :  { %7120 = vmatprep.subr.bf16.mxu1 %v14153_v17  ;;  %v615_v24 = vld [vmem:[#allocation5 + $0xc90] sm:$0xff]  ;;  %v13849_v41 = vcombine.high %v359_v18, %v367_v23  ;;  %v13848_v22 = vcombine.low %v359_v18, %v367_v23 }
 0x18f   :  { %7048 = vmatpush2.bf16.msra.mxu0 %v13896_v59  ;;  %v623_v11 = vld [vmem:[#allocation5 + $0xcd0] sm:$0xff] }
 0x190   :  { %7049 = vmatprep.subr.bf16.mxu0 %v13881_v36  ;;  %v343_v57 = vld [vmem:[#allocation5 + $0x410] sm:$0xff]  ;;  %v14105_v15 = vcombine.high %v615_v24, %v623_v11  ;;  %v14104_v2 = vcombine.low %v615_v24, %v623_v11  ;;  %v16617_v11 = vpop.f32.mrf.mxu0 }
 0x191   :  { %7121 = vmatpush2.bf16.msra.mxu1 %v14152_v55  ;;  %v351_v14 = vld [vmem:[#allocation5 + $0x450] sm:$0xff]  ;;  %18640 = vst [vmem:[#allocation40_spill] sm:$0xff] %v16617_v11 }
 0x192   :  { %7122 = vmatprep.subr.bf16.mxu1 %v14137_v32  ;;  %v599_v17 = vld [vmem:[#allocation5 + $0xc10] sm:$0xff]  ;;  %v13833_v59 = vcombine.high %v343_v57, %v351_v14  ;;  %v13832_v27 = vcombine.low %v343_v57, %v351_v14 }
 0x193   :  { %7050 = vmatpush2.bf16.msra.mxu0 %v13880_v38  ;;  %v607_v60 = vld [vmem:[#allocation5 + $0xc50] sm:$0xff] }
 0x194   :  { %7051 = vmatprep.subr.bf16.mxu0 %v13865_v43  ;;  %v839_v55 = vld [vmem:[#allocation5 + $0x1390] sm:$0xff]  ;;  %v14089_v45 = vcombine.high %v599_v17, %v607_v60  ;;  %v14088_v9 = vcombine.low %v599_v17, %v607_v60 }
 0x195   :  { %7123 = vmatpush2.bf16.msra.mxu1 %v14136_v12  ;;  %v847_v36 = vld [vmem:[#allocation5 + $0x13d0] sm:$0xff] }
 0x196   :  { %7124 = vmatprep.subr.bf16.mxu1 %v14121_v35  ;;  %v1095_v32 = vld [vmem:[#allocation5 + $0x1b90] sm:$0xff]  ;;  %v14329_v38 = vcombine.high %v839_v55, %v847_v36  ;;  %v14328_v24 = vcombine.low %v839_v55, %v847_v36 }
 0x197   :  { %7052 = vmatpush2.bf16.msra.mxu0 %v13864_v39  ;;  %v1103_v47 = vld [vmem:[#allocation5 + $0x1bd0] sm:$0xff] }
 0x198   :  { %7053 = vmatprep.subr.bf16.mxu0 %v13849_v41  ;;  %v823_v12 = vld [vmem:[#allocation5 + $0x1310] sm:$0xff]  ;;  %v14585_v18 = vcombine.high %v1095_v32, %v1103_v47  ;;  %v14584_v39 = vcombine.low %v1095_v32, %v1103_v47 }
 0x199   :  { %7125 = vmatpush2.bf16.msra.mxu1 %v14120_v62  ;;  %v831_v43 = vld [vmem:[#allocation5 + $0x1350] sm:$0xff] }
 0x19a   :  { %7126 = vmatprep.subr.bf16.mxu1 %v14105_v15  ;;  %v1079_v35 = vld [vmem:[#allocation5 + $0x1b10] sm:$0xff]  ;;  %v14313_v62 = vcombine.high %v823_v12, %v831_v43  ;;  %v16619_v15 = vpop.f32.mrf.mxu1  ;;  %v14312_v55 = vcombine.low %v823_v12, %v831_v43 }
 0x19b   :  { %7054 = vmatpush2.bf16.msra.mxu0 %v13848_v22  ;;  %v1087_v23 = vld [vmem:[#allocation5 + $0x1b50] sm:$0xff]  ;;  %18641 = vst [vmem:[#allocation41_spill] sm:$0xff] %v16619_v15 }
 0x19c   :  { %7055 = vmatprep.subr.bf16.mxu0 %v13833_v59  ;;  %v807_v41 = vld [vmem:[#allocation5 + $0x1290] sm:$0xff]  ;;  %v14569_v17 = vcombine.high %v1079_v35, %v1087_v23  ;;  %v14568_v32 = vcombine.low %v1079_v35, %v1087_v23 }
 0x19d   :  { %7127 = vmatpush2.bf16.msra.mxu1 %v14104_v2  ;;  %v815_v57 = vld [vmem:[#allocation5 + $0x12d0] sm:$0xff] }
 0x19e   :  { %7128 = vmatprep.subr.bf16.mxu1 %v14089_v45  ;;  %v1063_v14 = vld [vmem:[#allocation5 + $0x1a90] sm:$0xff]  ;;  %v14297_v45 = vcombine.high %v807_v41, %v815_v57  ;;  %v14296_v23 = vcombine.low %v807_v41, %v815_v57 }
 0x19f   :  { %7056 = vmatpush2.bf16.msra.mxu0 %v13832_v27  ;;  %v1071_v60 = vld [vmem:[#allocation5 + $0x1ad0] sm:$0xff] }
 0x1a0   :  { %7171 = vmatprep.subr.bf16.mxu0 %v14329_v38  ;;  %v791_v47 = vld [vmem:[#allocation5 + $0x1210] sm:$0xff]  ;;  %v14553_v11 = vcombine.high %v1063_v14, %v1071_v60 }
 0x1a1   :  { %7129 = vmatpush2.bf16.msra.mxu1 %v14088_v9  ;;  %v799_v27 = vld [vmem:[#allocation5 + $0x1250] sm:$0xff] }
 0x1a2   :  { %7244 = vmatprep.subr.bf16.mxu1 %v14585_v18  ;;  %v6621_v22 = vpop.f32.mrf.mxu0  ;;  %7058 = vmatmul.mubr.bf16.vlgmr.msra.gmra.mxu0 %v16431_v21  ;;  %v1047_v9 = vld [vmem:[#allocation5 + $0x1a10] sm:$0xff] }
 0x1a3   :  { %v6622_v2 = vadd.f32 %v6621_v22, %v16556_v4  ;;  %7172 = vmatpush1.bf16.msra.mxu0 %v14328_v24  ;;  %v1055_v4 = vld [vmem:[#allocation5 + $0x1a50] sm:$0xff]  ;;  %7067 = vmatprep.mubr.bf16.mxu0 %v16435_v34 }
 0x1a4   :  { %v6694_v59 = vpop.f32.mrf.mxu1  ;;  %7131 = vmatmul.mubr.bf16.vlgmr.msra.gmra.mxu1 %v16433_v25  ;;  %v6623_v36 = vpop.f32.mrf.mxu0  ;;  %7173 = vmatprep.subr.bf16.mxu0 %v14313_v62  ;;  %v775_v62 = vld [vmem:[#allocation5 + $0x1190] sm:$0xff] }
 0x1a5   :  { %7245 = vmatpush1.bf16.msra.mxu1 %v14584_v39  ;;  %v6695_v38 = vadd.f32 %v6694_v59, %v6622_v2  ;;  %v6624_v18 = vadd.f32 %v6623_v36, %v16561_v13  ;;  %7140 = vmatprep.mubr.bf16.mxu1 %v16438_v37  ;;  %v14552_v13 = vcombine.low %v1063_v14, %v1071_v60  ;;  %v1031_v2 = vld [vmem:[#allocation5 + $0x1990] sm:$0xff] }
 0x1a6   :  { %v6696_v15 = vpop.f32.mrf.mxu1  ;;  %7246 = vmatprep.subr.bf16.mxu1 %v14569_v17  ;;  %v6625_v22 = vpop.f32.mrf.mxu0  ;;  %v14281_v39 = vcombine.high %v791_v47, %v799_v27  ;;  %v783_v17 = vld [vmem:[#allocation5 + $0x11d0] sm:$0xff]  ;;  %v14280_v14 = vcombine.low %v791_v47, %v799_v27 }
 0x1a7   :  { %v16627_v12 = vadd.f32 %v6696_v15, %v6624_v18  ;;  %v6626_v43 = vadd.f32 %v6625_v22, %v16566_v56  ;;  %7174 = vmatpush1.bf16.msra.mxu0 %v14312_v55  ;;  %v14537_v15 = vcombine.high %v1047_v9, %v1055_v4  ;;  %v1039_v18 = vld [vmem:[#allocation5 + $0x19d0] sm:$0xff]  ;;  %v8777_v56 = vmax.f32 %v6695_v38, 0.0 }
 0x1a8   :  { %v6698_v35 = vpop.f32.mrf.mxu1  ;;  %v16630_v24 = vpop.f32.mrf.mxu0  ;;  %7175 = vmatprep.subr.bf16.mxu0 %v14297_v45  ;;  %v14265_v45 = vcombine.high %v775_v62, %v783_v17  ;;  %v759_v22 = vld [vmem:[#allocation5 + $0x1110] sm:$0xff] }
 0x1a9   :  { %18642 = vst [vmem:[#allocation42_spill] sm:$0xff] %v16627_v12  ;;  %7247 = vmatpush1.bf16.msra.mxu1 %v14568_v32  ;;  %18643 = vst [vmem:[#allocation43_spill] sm:$0xff] %v16630_v24  ;;  %v6699_v59 = vadd.f32 %v6698_v35, %v6626_v43  ;;  %v14536_v32 = vcombine.low %v1047_v9, %v1055_v4  ;;  %v767_v43 = vld [vmem:[#allocation5 + $0x1150] sm:$0xff]  ;;  %v240_v24 = vld [vmem:[#allocation5 + $0xd8] sm:$0xff] }
 0x1aa   :  { %v16632_v36 = vpop.f32.mrf.mxu1  ;;  %7248 = vmatprep.subr.bf16.mxu1 %v14553_v11  ;;  %v6631_v12 = vpop.f32.mrf.mxu0  ;;  %7068 = vmatmul.mubr.bf16.gmra.mxu0 %v16442_v50  ;;  %v14521_v11 = vcombine.high %v1031_v2, %v1039_v18  ;;  %v1015_v35 = vld [vmem:[#allocation5 + $0x1910] sm:$0xff] }
 0x1ab   :  { %18644 = vst [vmem:[#allocation44_spill] sm:$0xff] %v16632_v36  ;;  %v8793_v41 = vmax.f32 %v6699_v59, 0.0  ;;  %v6632_v57 = vadd.f32 %v6631_v12, %v16575_v29  ;;  %7176 = vmatpush1.bf16.msra.mxu0 %v14296_v23  ;;  %v1023_v12 = vld [vmem:[#allocation5 + $0x1950] sm:$0xff]  ;;  %7077 = vmatprep.mubr.bf16.mxu0 %v16447_v0  ;;  %v14264_v23 = vcombine.low %v775_v62, %v783_v17 }
 0x1ac   :  { %v6704_v55 = vpop.f32.mrf.mxu1  ;;  %7141 = vmatmul.mubr.bf16.gmra.mxu1 %v16445_v54  ;;  %v6633_v60 = vpop.f32.mrf.mxu0  ;;  %7177 = vmatprep.subr.bf16.mxu0 %v14281_v39  ;;  %v14249_v39 = vcombine.high %v759_v22, %v767_v43 }
 0x1ad   :  { %7249 = vmatpush1.bf16.msra.mxu1 %v14552_v13  ;;  %v16637_v36 = vpack.c.bf16 %v8793_v41, %v8777_v56  ;;  %v6634_v38 = vadd.f32 %v6633_v60, %v16579_v31  ;;  %v6705_v59 = vadd.f32 %v6704_v55, %v6632_v57  ;;  %7150 = vmatprep.mubr.bf16.mxu1 %v16450_v3  ;;  %v751_v56 = vld [vmem:[#allocation5 + $0x10d0] sm:$0xff] }
 0x1ae   :  { %v6706_v29 = vpop.f32.mrf.mxu1  ;;  %7250 = vmatprep.subr.bf16.mxu1 %v14537_v15  ;;  %v6635_v47 = vpop.f32.mrf.mxu0  ;;  %v14520_v31 = vcombine.low %v1031_v2, %v1039_v18  ;;  %v743_v15 = vld [vmem:[#allocation5 + $0x1090] sm:$0xff]  ;;  %v14505_v60 = vcombine.high %v1015_v35, %v1023_v12  ;;  %v14248_v2 = vcombine.low %v759_v22, %v767_v43 }
 0x1af   :  { %18645 = vst [vmem:[#allocation45_spill] sm:$0xff] %v16637_v36  ;;  %v6636_v27 = vadd.f32 %v6635_v47, %v16583_v28  ;;  %v16643_v9 = vadd.f32 %v6706_v29, %v6634_v38  ;;  %7178 = vmatpush1.bf16.msra.mxu0 %v14280_v14  ;;  %v999_v41 = vld [vmem:[#allocation5 + $0x1890] sm:$0xff]  ;;  %v8809_v14 = vmax.f32 %v6705_v59, 0.0  ;;  %v14233_v29 = vcombine.high %v743_v15, %v751_v56 }
 0x1b0   :  { %v6708_v4 = vpop.f32.mrf.mxu1  ;;  %v16645_v13 = vpop.f32.mrf.mxu0  ;;  %7179 = vmatprep.subr.bf16.mxu0 %v14265_v45  ;;  %v1007_v28 = vld [vmem:[#allocation5 + $0x18d0] sm:$0xff]  ;;  %v14504_v45 = vcombine.low %v1015_v35, %v1023_v12 }
 0x1b1   :  { %18646 = vst [vmem:[#allocation46_spill] sm:$0xff] %v16643_v9  ;;  %7251 = vmatpush1.bf16.msra.mxu1 %v14536_v32  ;;  %18647 = vst [vmem:[#allocation47_spill] sm:$0xff] %v16645_v13  ;;  %v6709_v57 = vadd.f32 %v6708_v4, %v6636_v27  ;;  %v727_v47 = vld [vmem:[#allocation5 + $0x1010] sm:$0xff] }
 0x1b2   :  { %v16647_v55 = vpop.f32.mrf.mxu1  ;;  %7252 = vmatprep.subr.bf16.mxu1 %v14521_v11  ;;  %v6641_v38 = vpop.f32.mrf.mxu0  ;;  %7078 = vmatmul.mubr.bf16.gmra.mxu0 %v16454_v16  ;;  %v14489_v11 = vcombine.high %v999_v41, %v1007_v28  ;;  %v735_v27 = vld [vmem:[#allocation5 + $0x1050] sm:$0xff] }
 0x1b3   :  { %18648 = vst [vmem:[#allocation48_spill] sm:$0xff] %v16647_v55  ;;  %v8825_v62 = vmax.f32 %v6709_v57, 0.0  ;;  %v6642_v17 = vadd.f32 %v6641_v38, %v16592_v42  ;;  %7180 = vmatpush1.bf16.msra.mxu0 %v14264_v23  ;;  %v983_v4 = vld [vmem:[#allocation5 + $0x1810] sm:$0xff]  ;;  %7087 = vmatprep.mubr.bf16.mxu0 %v16459_v30  ;;  %v14217_v38 = vcombine.high %v727_v47, %v735_v27 }
 0x1b4   :  { %v6714_v32 = vpop.f32.mrf.mxu1  ;;  %7151 = vmatmul.mubr.bf16.gmra.mxu1 %v16457_v20  ;;  %v6643_v18 = vpop.f32.mrf.mxu0  ;;  %7181 = vmatprep.subr.bf16.mxu0 %v14249_v39  ;;  %v991_v23 = vld [vmem:[#allocation5 + $0x1850] sm:$0xff] }
 0x1b5   :  { %7253 = vmatpush1.bf16.msra.mxu1 %v14520_v31  ;;  %v16652_v36 = vpack.c.bf16 %v8825_v62, %v8809_v14  ;;  %v6644_v59 = vadd.f32 %v6643_v18, %v16596_v6  ;;  %v6715_v57 = vadd.f32 %v6714_v32, %v6642_v17  ;;  %7160 = vmatprep.mubr.bf16.mxu1 %v16462_v33  ;;  %v975_v14 = vld [vmem:[#allocation5 + $0x17d0] sm:$0xff] }
 0x1b6   :  { %v6716_v42 = vpop.f32.mrf.mxu1  ;;  %7254 = vmatprep.subr.bf16.mxu1 %v14505_v60  ;;  %v6645_v22 = vpop.f32.mrf.mxu0  ;;  %v14232_v31 = vcombine.low %v743_v15, %v751_v56  ;;  %v14488_v6 = vcombine.low %v999_v41, %v1007_v28  ;;  %v967_v60 = vld [vmem:[#allocation5 + $0x1790] sm:$0xff]  ;;  %v14473_v18 = vcombine.high %v983_v4, %v991_v23  ;;  %v14216_v41 = vcombine.low %v727_v47, %v735_v27 }
 0x1b7   :  { %18649 = vst [vmem:[#allocation49_spill] sm:$0xff] %v16652_v36  ;;  %v6646_v43 = vadd.f32 %v6645_v22, %v16600_v10  ;;  %v16658_v35 = vadd.f32 %v6716_v42, %v6644_v59  ;;  %7182 = vmatpush1.bf16.msra.mxu0 %v14248_v2  ;;  %v1223_v62 = vld [vmem:[#allocation5 + $0x1f90] sm:$0xff]  ;;  %v8841_v2 = vmax.f32 %v6715_v57, 0.0  ;;  %v14457_v42 = vcombine.high %v967_v60, %v975_v14 }
 0x1b8   :  { %v6718_v12 = vpop.f32.mrf.mxu1  ;;  %v16660_v39 = vpop.f32.mrf.mxu0  ;;  %7183 = vmatprep.subr.bf16.mxu0 %v14233_v29  ;;  %v1231_v10 = vld [vmem:[#allocation5 + $0x1fd0] sm:$0xff]  ;;  %v14472_v29 = vcombine.low %v983_v4, %v991_v23 }
 0x1b9   :  { %18650 = vst [vmem:[#allocation50_spill] sm:$0xff] %v16658_v35  ;;  %7255 = vmatpush1.bf16.msra.mxu1 %v14504_v45  ;;  %18651 = vst [vmem:[#allocation51_spill] sm:$0xff] %v16660_v39  ;;  %v6719_v17 = vadd.f32 %v6718_v12, %v6646_v43  ;;  %v951_v22 = vld [vmem:[#allocation5 + $0x1710] sm:$0xff]  ;;  %v264_v35 = vld [vmem:[#allocation5 + $0x198] sm:$0xff] }
 0x1ba   :  { %v16662_v32 = vpop.f32.mrf.mxu1  ;;  %7256 = vmatprep.subr.bf16.mxu1 %v14489_v11  ;;  %v6651_v59 = vpop.f32.mrf.mxu0  ;;  %7088 = vmatmul.mubr.bf16.gmra.mxu0 %v16466_v48  ;;  %v14713_v11 = vcombine.high %v1223_v62, %v1231_v10  ;;  %v959_v43 = vld [vmem:[#allocation5 + $0x1750] sm:$0xff] }
 0x1bb   :  { %18652 = vst [vmem:[#allocation52_spill] sm:$0xff] %v16662_v32  ;;  %v8857_v15 = vmax.f32 %v6719_v17, 0.0  ;;  %v6652_v56 = vadd.f32 %v6651_v59, %v16608_v19  ;;  %7184 = vmatpush1.bf16.msra.mxu0 %v14232_v31  ;;  %v1207_v12 = vld [vmem:[#allocation5 + $0x1f10] sm:$0xff]  ;;  %7203 = vmatprep.mubr.bf16.mxu0 %v16471_v1  ;;  %v256_v32 = vld [vmem:[#allocation5 + $0x158] sm:$0xff] }
 0x1bc   :  { %v6724_v45 = vpop.f32.mrf.mxu1  ;;  %7161 = vmatmul.mubr.bf16.gmra.mxu1 %v16469_v53  ;;  %v6653_v28 = vpop.f32.mrf.mxu0  ;;  %7185 = vmatprep.subr.bf16.mxu0 %v14217_v38  ;;  %v1215_v31 = vld [vmem:[#allocation5 + $0x1f50] sm:$0xff]  ;;  %v14712_v38 = vcombine.low %v1223_v62, %v1231_v10 }
 0x1bd   :  { %7257 = vmatpush1.bf16.msra.mxu1 %v14488_v6  ;;  %v16667_v36 = vpack.c.bf16 %v8857_v15, %v8841_v2  ;;  %v6654_v57 = vadd.f32 %v6653_v28, %v16613_v40  ;;  %v6725_v17 = vadd.f32 %v6724_v45, %v6652_v56  ;;  %7276 = vmatprep.mubr.bf16.mxu1 %v16474_v5  ;;  %v935_v59 = vld [vmem:[#allocation5 + $0x1690] sm:$0xff] }
 0x1be   :  { %v6726_v19 = vpop.f32.mrf.mxu1  ;;  %7258 = vmatprep.subr.bf16.mxu1 %v14473_v18  ;;  %v6655_v47 = vpop.f32.mrf.mxu0  ;;  %v14456_v6 = vcombine.low %v967_v60, %v975_v14  ;;  %v14441_v40 = vcombine.high %v951_v22, %v959_v43  ;;  %v943_v2 = vld [vmem:[#allocation5 + $0x16d0] sm:$0xff]  ;;  %v14697_v56 = vcombine.high %v1207_v12, %v1215_v31 }
 0x1bf   :  { %18653 = vst [vmem:[#allocation53_spill] sm:$0xff] %v16667_v36  ;;  %v6656_v27 = vadd.f32 %v6655_v47, %v16615_v58  ;;  %v16673_v4 = vadd.f32 %v6726_v19, %v6654_v57  ;;  %7186 = vmatpush1.bf16.msra.mxu0 %v14216_v41  ;;  %v1191_v18 = vld [vmem:[#allocation5 + $0x1e90] sm:$0xff]  ;;  %v8873_v28 = vmax.f32 %v6725_v17, 0.0  ;;  %v14440_v58 = vcombine.low %v951_v22, %v959_v43 }
 0x1c0   :  { %v6728_v23 = vpop.f32.mrf.mxu1  ;;  %7187 = vmatprep.subr.bf16.mxu0 %v14457_v42  ;;  %v1199_v45 = vld [vmem:[#allocation5 + $0x1ed0] sm:$0xff]  ;;  %v14696_v41 = vcombine.low %v1207_v12, %v1215_v31  ;;  %v14425_v57 = vcombine.high %v935_v59, %v943_v2 }
 0x1c1   :  { %18654 = vst [vmem:[#allocation54_spill] sm:$0xff] %v16673_v4  ;;  %7259 = vmatpush1.bf16.msra.mxu1 %v14472_v29  ;;  %v6729_v15 = vadd.f32 %v6728_v23, %v6656_v27  ;;  %v919_v60 = vld [vmem:[#allocation5 + $0x1610] sm:$0xff]  ;;  %v14681_v10 = vcombine.high %v1191_v18, %v1199_v45  ;;  %v14680_v17 = vcombine.low %v1191_v18, %v1199_v45 }
 0x1c2   :  { %7260 = vmatprep.subr.bf16.mxu1 %v14713_v11  ;;  %v927_v14 = vld [vmem:[#allocation5 + $0x1650] sm:$0xff]  ;;  %v14424_v11 = vcombine.low %v935_v59, %v943_v2 }
 0x1c3   :  { %v8889_v36 = vmax.f32 %v6729_v15, 0.0  ;;  %7188 = vmatpush2.bf16.msra.mxu0 %v14456_v6  ;;  %v1175_v29 = vld [vmem:[#allocation5 + $0x1e10] sm:$0xff]  ;;  %v14409_v19 = vcombine.high %v919_v60, %v927_v14  ;;  %v14408_v27 = vcombine.low %v919_v60, %v927_v14 }
 0x1c4   :  { %7189 = vmatprep.subr.bf16.mxu0 %v14441_v40  ;;  %v1183_v42 = vld [vmem:[#allocation5 + $0x1e50] sm:$0xff] }
 0x1c5   :  { %7261 = vmatpush2.bf16.msra.mxu1 %v14712_v38  ;;  %v16675_v62 = vpack.c.bf16 %v8889_v36, %v8873_v28  ;;  %v903_v47 = vld [vmem:[#allocation5 + $0x1590] sm:$0xff]  ;;  %v14665_v12 = vcombine.high %v1175_v29, %v1183_v42  ;;  %v14664_v36 = vcombine.low %v1175_v29, %v1183_v42 }
 0x1c6   :  { %7262 = vmatprep.subr.bf16.mxu1 %v14697_v56  ;;  %v911_v22 = vld [vmem:[#allocation5 + $0x15d0] sm:$0xff] }
 0x1c7   :  { %18655 = vst [vmem:[#allocation55_spill] sm:$0xff] %v16675_v62  ;;  %7190 = vmatpush2.bf16.msra.mxu0 %v14440_v58  ;;  %v1159_v43 = vld [vmem:[#allocation5 + $0x1d90] sm:$0xff]  ;;  %v14393_v23 = vcombine.high %v903_v47, %v911_v22  ;;  %v14392_v18 = vcombine.low %v903_v47, %v911_v22  ;;  %v288_v62 = vld [vmem:[#allocation5 + $0x258] sm:$0xff] }
 0x1c8   :  { %7191 = vmatprep.subr.bf16.mxu0 %v14425_v57  ;;  %v1167_v31 = vld [vmem:[#allocation5 + $0x1dd0] sm:$0xff] }
 0x1c9   :  { %7263 = vmatpush2.bf16.msra.mxu1 %v14696_v41  ;;  %v887_v6 = vld [vmem:[#allocation5 + $0x1510] sm:$0xff]  ;;  %v14649_v59 = vcombine.high %v1159_v43, %v1167_v31  ;;  %v14648_v15 = vcombine.low %v1159_v43, %v1167_v31  ;;  %v336_v31 = vld [vmem:[#allocation5 + $0x3d8] sm:$0xff] }
 0x1ca   :  { %7264 = vmatprep.subr.bf16.mxu1 %v14681_v10  ;;  %v895_v38 = vld [vmem:[#allocation5 + $0x1550] sm:$0xff] }
 0x1cb   :  { %7192 = vmatpush2.bf16.msra.mxu0 %v14424_v11  ;;  %v1143_v40 = vld [vmem:[#allocation5 + $0x1d10] sm:$0xff]  ;;  %v14377_v56 = vcombine.high %v887_v6, %v895_v38  ;;  %v14376_v60 = vcombine.low %v887_v6, %v895_v38  ;;  %v592_v6 = vld [vmem:[#allocation5 + $0xbd8] sm:$0xff] }
 0x1cc   :  { %7193 = vmatprep.subr.bf16.mxu0 %v14409_v19  ;;  %v1151_v2 = vld [vmem:[#allocation5 + $0x1d50] sm:$0xff] }
 0x1cd   :  { %7265 = vmatpush2.bf16.msra.mxu1 %v14680_v17  ;;  %v871_v45 = vld [vmem:[#allocation5 + $0x1490] sm:$0xff]  ;;  %v14633_v41 = vcombine.high %v1143_v40, %v1151_v2  ;;  %v14632_v14 = vcombine.low %v1143_v40, %v1151_v2  ;;  %v312_v2 = vld [vmem:[#allocation5 + $0x318] sm:$0xff] }
 0x1ce   :  { %7266 = vmatprep.subr.bf16.mxu1 %v14665_v12  ;;  %v879_v28 = vld [vmem:[#allocation5 + $0x14d0] sm:$0xff]  ;;  %v328_v12 = vld [vmem:[#allocation5 + $0x398] sm:$0xff] }
 0x1cf   :  { %7194 = vmatpush2.bf16.msra.mxu0 %v14408_v27  ;;  %v1127_v58 = vld [vmem:[#allocation5 + $0x1c90] sm:$0xff]  ;;  %v14361_v29 = vcombine.high %v871_v45, %v879_v28  ;;  %v14360_v47 = vcombine.low %v871_v45, %v879_v28  ;;  %v584_v27 = vld [vmem:[#allocation5 + $0xb98] sm:$0xff]  ;;  %v16681_v45 = vsub.s32 3, %v16539_v52 }
 0x1d0   :  { %7195 = vmatprep.subr.bf16.mxu0 %v14393_v23  ;;  %v1135_v57 = vld [vmem:[#allocation5 + $0x1cd0] sm:$0xff]  ;;  %v16678_v23 = vsub.s32 2, %v16539_v52  ;;  %v576_v28 = vld [vmem:[#allocation5 + $0xb58] sm:$0xff] }
 0x1d1   :  { %7267 = vmatpush2.bf16.msra.mxu1 %v14664_v36  ;;  %v855_v10 = vld [vmem:[#allocation5 + $0x1410] sm:$0xff]  ;;  %v14617_v17 = vcombine.high %v1127_v58, %v1135_v57  ;;  %v14616_v22 = vcombine.low %v1127_v58, %v1135_v57  ;;  %18657 = vst [vmem:[#allocation57_spill] sm:$0xff] %v16681_v45  ;;  %v16164_v58 = vld [vmem:[#allocation7] sm:$0xff]  ;;  %v13818_v57 = vcombine.low %v328_v12, %v336_v31 }
 0x1d2   :  { %7268 = vmatprep.subr.bf16.mxu1 %v14649_v59  ;;  %v863_v42 = vld [vmem:[#allocation5 + $0x1450] sm:$0xff]  ;;  %18656 = vst [vmem:[#allocation56_spill] sm:$0xff] %v16678_v23  ;;  %v13819_v59 = vcombine.high %v328_v12, %v336_v31 }
 0x1d3   :  { %7196 = vmatpush2.bf16.msra.mxu0 %v14392_v18  ;;  %v1111_v11 = vld [vmem:[#allocation5 + $0x1c10] sm:$0xff]  ;;  %v14345_v43 = vcombine.high %v855_v10, %v863_v42  ;;  %v14344_v38 = vcombine.low %v855_v10, %v863_v42  ;;  %v320_v18 = vld [vmem:[#allocation5 + $0x358] sm:$0xff]  ;;  %v16688_v10 = vpop.f32.mrf.mxu1  ;;  %v16691_v42 = vrot.slane %v16164_v58, %v16681_v45 }
 0x1d4   :  { %7197 = vmatprep.subr.bf16.mxu0 %v14377_v56  ;;  %v1119_v19 = vld [vmem:[#allocation5 + $0x1c50] sm:$0xff]  ;;  %v14075_v56 = vcombine.high %v584_v27, %v592_v6  ;;  %18659 = vst [vmem:[#allocation59_spill] sm:$0xff] %v16688_v10 }
 0x1d5   :  { %7269 = vmatpush2.bf16.msra.mxu1 %v14648_v15  ;;  %v14601_v36 = vcombine.high %v1111_v11, %v1119_v19  ;;  %v14600_v40 = vcombine.low %v1111_v11, %v1119_v19  ;;  %v568_v15 = vld [vmem:[#allocation5 + $0xb18] sm:$0xff]  ;;  %18660 = vst [vmem:[#allocation60_spill] sm:$0xff] %v16691_v42 }
 0x1d6   :  { %7270 = vmatprep.subr.bf16.mxu1 %v14633_v41  ;;  %v16684_v41 = vrot.slane %v16164_v58, %v16678_v23  ;;  %v14059_v11 = vcombine.high %v568_v15, %v576_v28  ;;  %v304_v19 = vld [vmem:[#allocation5 + $0x2d8] sm:$0xff] }
 0x1d7   :  { %7198 = vmatpush2.bf16.msra.mxu0 %v14376_v60  ;;  %v16686_v60 = vpop.f32.mrf.mxu0 }
 0x1d8   :  { %7199 = vmatprep.subr.bf16.mxu0 %v14361_v29  ;;  %18658 = vst [vmem:[#allocation58_spill] sm:$0xff] %v16686_v60  ;;  %v13803_v29 = vcombine.high %v312_v2, %v320_v18  ;;  %v248_v60 = vld [vmem:[#allocation5 + $0x118] sm:$0xff] }
 0x1d9   :  { %7271 = vmatpush2.bf16.msra.mxu1 %v14632_v14  ;;  %v14074_v14 = vcombine.low %v584_v27, %v592_v6  ;;  %v13802_v27 = vcombine.low %v312_v2, %v320_v18  ;;  %v14058_v6 = vcombine.low %v568_v15, %v576_v28  ;;  %v536_v2 = vld [vmem:[#allocation5 + $0xa18] sm:$0xff]  ;;  %v13739_v13 = vcombine.high %v248_v60, %v256_v32 }
 0x1da   :  { %7272 = vmatprep.subr.bf16.mxu1 %v14617_v17  ;;  %v296_v17 = vld [vmem:[#allocation5 + $0x298] sm:$0xff] }
 0x1db   :  { %7200 = vmatpush2.bf16.msra.mxu0 %v14360_v47  ;;  %v544_v18 = vld [vmem:[#allocation5 + $0xa58] sm:$0xff] }
 0x1dc   :  { %7201 = vmatprep.subr.bf16.mxu0 %v14345_v43  ;;  %v560_v43 = vld [vmem:[#allocation5 + $0xad8] sm:$0xff]  ;;  %v14027_v10 = vcombine.high %v536_v2, %v544_v18 }
 0x1dd   :  { %7273 = vmatpush2.bf16.msra.mxu1 %v14616_v22  ;;  %v552_v22 = vld [vmem:[#allocation5 + $0xa98] sm:$0xff] }
 0x1de   :  { %7274 = vmatprep.subr.bf16.mxu1 %v14601_v36  ;;  %v14043_v58 = vcombine.high %v552_v22, %v560_v43 }
 0x1df   :  { %7202 = vmatpush2.bf16.msra.mxu0 %v14344_v38  ;;  %v13787_v38 = vcombine.high %v296_v17, %v304_v19 }
 0x1e0   :  { %7317 = vmatprep.subr.bf16.mxu0 %v13819_v59 }
 0x1e1   :  { %7275 = vmatpush2.bf16.msra.mxu1 %v14600_v40 }
 0x1e2   :  { %7390 = vmatprep.subr.bf16.mxu1 %v14075_v56  ;;  %v6767_v47 = vpop.f32.mrf.mxu0  ;;  %7204 = vmatmul.mubr.bf16.vlgmr.msra.gmra.mxu0 %v16479_v49 }
 0x1e3   :  { %v6768_v12 = vadd.f32 %v6767_v47, %v16684_v41  ;;  %7318 = vmatpush1.bf16.msra.mxu0 %v13818_v57  ;;  %7213 = vmatprep.mubr.bf16.mxu0 %v16483_v61  ;;  %v280_v47 = vld [vmem:[#allocation5 + $0x218] sm:$0xff] }
 0x1e4   :  { %v6840_v31 = vpop.f32.mrf.mxu1  ;;  %7277 = vmatmul.mubr.bf16.vlgmr.msra.gmra.mxu1 %v16481_v51  ;;  %v6769_v36 = vpop.f32.mrf.mxu0  ;;  %7319 = vmatprep.subr.bf16.mxu0 %v13803_v29 }
 0x1e5   :  { %7391 = vmatpush1.bf16.msra.mxu1 %v14074_v14  ;;  %v16696_v40 = vadd.f32 %v6840_v31, %v6768_v12  ;;  %v6770_v59 = vadd.f32 %v6769_v36, %v16691_v42  ;;  %7286 = vmatprep.mubr.bf16.mxu1 %v16486_v7  ;;  %v13786_v14 = vcombine.low %v296_v17, %v304_v19  ;;  %v18663_v17 = vld [vmem:[#allocation21_spill] sm:$0xff] }
 0x1e6   :  { %v6842_v56 = vpop.f32.mrf.mxu1  ;;  %7392 = vmatprep.subr.bf16.mxu1 %v14059_v11  ;;  %v6771_v4 = vpop.f32.mrf.mxu0  ;;  %v14042_v11 = vcombine.low %v552_v22, %v560_v43  ;;  %v13771_v12 = vcombine.high %v280_v47, %v288_v62  ;;  %v13770_v19 = vcombine.low %v280_v47, %v288_v62  ;;  %v18665_v62 = vld [vmem:[#allocation23_spill] sm:$0xff]  ;;  %v504_v47 = vld [vmem:[#allocation5 + $0x918] sm:$0xff] }
 0x1e7   :  { %v16701_v57 = vadd.f32 %v6842_v56, %v6770_v59  ;;  %v6772_v15 = vadd.f32 %v6771_v4, %v16684_v41  ;;  %7320 = vmatpush1.bf16.msra.mxu0 %v13802_v27  ;;  %v272_v59 = vld [vmem:[#allocation5 + $0x1d8] sm:$0xff] }
 0x1e8   :  { %v6844_v28 = vpop.f32.mrf.mxu1  ;;  %v16704_v29 = vpop.f32.mrf.mxu0  ;;  %7321 = vmatprep.subr.bf16.mxu0 %v13787_v38  ;;  %v520_v4 = vld [vmem:[#allocation5 + $0x998] sm:$0xff]  ;;  %v13755_v38 = vcombine.high %v264_v35, %v272_v59 }
 0x1e9   :  { %7393 = vmatpush1.bf16.msra.mxu1 %v14058_v6  ;;  %18661 = vst [vmem:[#allocation61_spill] sm:$0xff] %v16704_v29  ;;  %v16706_v31 = vadd.f32 %v6844_v28, %v6772_v15  ;;  %v528_v56 = vld [vmem:[#allocation5 + $0x9d8] sm:$0xff]  ;;  %v14026_v6 = vcombine.low %v536_v2, %v544_v18  ;;  %v18664_v15 = vld [vmem:[#allocation22_spill] sm:$0xff]  ;;  %v13754_v2 = vcombine.low %v264_v35, %v272_v59 }
 0x1ea   :  { %v16708_v36 = vpop.f32.mrf.mxu1  ;;  %7394 = vmatprep.subr.bf16.mxu1 %v14043_v58  ;;  %7214 = vmatmul.mubr.bf16.gmra.mxu0 %v16490_v26  ;;  %v6777_v27 = vpop.f32.mrf.mxu0  ;;  %v14011_v28 = vcombine.high %v520_v4, %v528_v56  ;;  %v14010_v55 = vcombine.low %v520_v4, %v528_v56  ;;  %v488_v35 = vld [vmem:[#allocation5 + $0x898] sm:$0xff]  ;;  %v13738_v4 = vcombine.low %v248_v60, %v256_v32  ;;  %v18670_v32 = vld [vmem:[#allocation27_spill] sm:$0xff] }
 0x1eb   :  { %18662 = vst [vmem:[#allocation62_spill] sm:$0xff] %v16708_v36  ;;  %7322 = vmatpush1.bf16.msra.mxu0 %v13786_v14  ;;  %v6778_v22 = vadd.f32 %v6777_v27, %v16684_v41  ;;  %7223 = vmatprep.mubr.bf16.mxu0 %v18664_v15  ;;  %v512_v27 = vld [vmem:[#allocation5 + $0x958] sm:$0xff] }
 0x1ec   :  { %7287 = vmatmul.mubr.bf16.gmra.mxu1 %v18663_v17  ;;  %v6850_v43 = vpop.f32.mrf.mxu1  ;;  %7323 = vmatprep.subr.bf16.mxu0 %v13771_v12  ;;  %v6779_v58 = vpop.f32.mrf.mxu0  ;;  %v18668_v59 = vld [vmem:[#allocation25_spill] sm:$0xff] }
 0x1ed   :  { %7395 = vmatpush1.bf16.msra.mxu1 %v14042_v11  ;;  %v6780_v9 = vadd.f32 %v6779_v58, %v16691_v42  ;;  %v16715_v14 = vadd.f32 %v6850_v43, %v6778_v22  ;;  %7296 = vmatprep.mubr.bf16.mxu1 %v18665_v62  ;;  %v13995_v22 = vcombine.high %v504_v47, %v512_v27  ;;  %v232_v43 = vld [vmem:[#allocation5 + $0x98] sm:$0xff] }
 0x1ee   :  { %7396 = vmatprep.subr.bf16.mxu1 %v14027_v10  ;;  %v6852_v39 = vpop.f32.mrf.mxu1  ;;  %v6781_v11 = vpop.f32.mrf.mxu0  ;;  %v472_v60 = vld [vmem:[#allocation5 + $0x818] sm:$0xff] }
 0x1ef   :  { %7324 = vmatpush1.bf16.msra.mxu0 %v13770_v19  ;;  %v6782_v18 = vadd.f32 %v6781_v11, %v16684_v41  ;;  %v16719_v10 = vadd.f32 %v6852_v39, %v6780_v9  ;;  %v496_v9 = vld [vmem:[#allocation5 + $0x8d8] sm:$0xff]  ;;  %v18669_v11 = vld [vmem:[#allocation26_spill] sm:$0xff] }
 0x1f0   :  { %v6854_v12 = vpop.f32.mrf.mxu1  ;;  %7325 = vmatprep.subr.bf16.mxu0 %v13755_v38  ;;  %v16721_v58 = vpop.f32.mrf.mxu0  ;;  %v13723_v38 = vcombine.high %v232_v43, %v240_v24  ;;  %v13978_v23 = vcombine.low %v488_v35, %v496_v9 }
 0x1f1   :  { %7397 = vmatpush1.bf16.msra.mxu1 %v14026_v6  ;;  %18666 = vst [vmem:[#allocation21_spill] sm:$0xff] %v16721_v58  ;;  %v16723_v36 = vadd.f32 %v6854_v12, %v6782_v18  ;;  %v13994_v6 = vcombine.low %v504_v47, %v512_v27  ;;  %v13979_v18 = vcombine.high %v488_v35, %v496_v9  ;;  %v216_v12 = vld [vmem:[#allocation5 + $0x18] sm:$0xff] }
 0x1f2   :  { %7398 = vmatprep.subr.bf16.mxu1 %v14011_v28  ;;  %v16725_v29 = vpop.f32.mrf.mxu1  ;;  %7224 = vmatmul.mubr.bf16.gmra.mxu0 %v16502_v8  ;;  %v6787_v39 = vpop.f32.mrf.mxu0 }
 0x1f3   :  { %18667 = vst [vmem:[#allocation22_spill] sm:$0xff] %v16725_v29  ;;  %7326 = vmatpush1.bf16.msra.mxu0 %v13754_v2  ;;  %v6788_v56 = vadd.f32 %v6787_v39, %v16684_v41  ;;  %7233 = vmatprep.mubr.bf16.mxu0 %v18669_v11  ;;  %v224_v29 = vld [vmem:[#allocation5 + $0x58] sm:$0xff] }
 0x1f4   :  { %7297 = vmatmul.mubr.bf16.gmra.mxu1 %v18668_v59  ;;  %v6860_v19 = vpop.f32.mrf.mxu1  ;;  %7327 = vmatprep.subr.bf16.mxu0 %v13739_v13  ;;  %v6789_v28 = vpop.f32.mrf.mxu0  ;;  %v480_v39 = vld [vmem:[#allocation5 + $0x858] sm:$0xff]  ;;  %v13722_v13 = vcombine.low %v232_v43, %v240_v24  ;;  %v13707_v11 = vcombine.high %v216_v12, %v224_v29  ;;  %v13706_v43 = vcombine.low %v216_v12, %v224_v29 }
 0x1f5   :  { %7399 = vmatpush1.bf16.msra.mxu1 %v14010_v55  ;;  %v6790_v58 = vadd.f32 %v6789_v28, %v16691_v42  ;;  %v16732_v2 = vadd.f32 %v6860_v19, %v6788_v56  ;;  %7306 = vmatprep.mubr.bf16.mxu1 %v18670_v32  ;;  %v13963_v56 = vcombine.high %v472_v60, %v480_v39  ;;  %v456_v19 = vld [vmem:[#allocation5 + $0x798] sm:$0xff] }
 0x1f6   :  { %7400 = vmatprep.subr.bf16.mxu1 %v13995_v22  ;;  %v6862_v45 = vpop.f32.mrf.mxu1  ;;  %v6791_v55 = vpop.f32.mrf.mxu0  ;;  %v464_v32 = vld [vmem:[#allocation5 + $0x7d8] sm:$0xff] }
 0x1f7   :  { %7328 = vmatpush1.bf16.msra.mxu0 %v13738_v4  ;;  %v6792_v47 = vadd.f32 %v6791_v55, %v16684_v41  ;;  %v16736_v27 = vadd.f32 %v6862_v45, %v6790_v58  ;;  %v712_v24 = vld [vmem:[#allocation5 + $0xf98] sm:$0xff]  ;;  %v13962_v4 = vcombine.low %v472_v60, %v480_v39 }
 0x1f8   :  { %v6864_v22 = vpop.f32.mrf.mxu1  ;;  %7329 = vmatprep.subr.bf16.mxu0 %v13723_v38  ;;  %v16738_v28 = vpop.f32.mrf.mxu0  ;;  %v720_v45 = vld [vmem:[#allocation5 + $0xfd8] sm:$0xff] }
 0x1f9   :  { %7401 = vmatpush1.bf16.msra.mxu1 %v13994_v6  ;;  %18671 = vst [vmem:[#allocation23_spill] sm:$0xff] %v16738_v28  ;;  %v16740_v59 = vadd.f32 %v6864_v22, %v6792_v47  ;;  %v13947_v6 = vcombine.high %v456_v19, %v464_v32  ;;  %v440_v55 = vld [vmem:[#allocation5 + $0x718] sm:$0xff]  ;;  %v14202_v39 = vcombine.low %v712_v24, %v720_v45 }
 0x1fa   :  { %7402 = vmatprep.subr.bf16.mxu1 %v13979_v18  ;;  %v16742_v8 = vpop.f32.mrf.mxu1  ;;  %7234 = vmatmul.mubr.bf16.gmra.mxu0 %v16514_v44  ;;  %v6797_v58 = vpop.f32.mrf.mxu0  ;;  %v14203_v18 = vcombine.high %v712_v24, %v720_v45  ;;  %v448_v47 = vld [vmem:[#allocation5 + $0x758] sm:$0xff] }
 0x1fb   :  { %18672 = vst [vmem:[#allocation63_spill] sm:$0xff] %v16742_v8  ;;  %7330 = vmatpush1.bf16.msra.mxu0 %v13722_v13  ;;  %v6798_v35 = vadd.f32 %v6797_v58, %v16684_v41  ;;  %v18673_v28 = vld [vmem:[#allocation20_spill] sm:$0xff] }
 0x1fc   :  { %7307 = vmatmul.mubr.bf16.gmra.mxu1 %v16517_v46  ;;  %v6870_v9 = vpop.f32.mrf.mxu1  ;;  %7331 = vmatprep.subr.bf16.mxu0 %v13707_v11  ;;  %v6799_v38 = vpop.f32.mrf.mxu0  ;;  %v696_v29 = vld [vmem:[#allocation5 + $0xf18] sm:$0xff] }
 0x1fd   :  { %7403 = vmatpush1.bf16.msra.mxu1 %v13978_v23  ;;  %v6800_v22 = vadd.f32 %v6799_v38, %v16691_v42  ;;  %v16748_v8 = vadd.f32 %v6870_v9, %v6798_v35  ;;  %7349 = vmatprep.mubr.bf16.mxu0 %v18673_v28  ;;  %v704_v12 = vld [vmem:[#allocation5 + $0xf58] sm:$0xff]  ;;  %v13946_v23 = vcombine.low %v456_v19, %v464_v32 }
 0x1fe   :  { %7404 = vmatprep.subr.bf16.mxu1 %v13963_v56  ;;  %v6872_v13 = vpop.f32.mrf.mxu1  ;;  %v6801_v58 = vpop.f32.mrf.mxu0  ;;  %7422 = vmatprep.mubr.bf16.mxu1 %v16427_v63  ;;  %v13931_v56 = vcombine.high %v440_v55, %v448_v47  ;;  %v14187_v9 = vcombine.high %v696_v29, %v704_v12  ;;  %v424_v38 = vld [vmem:[#allocation5 + $0x698] sm:$0xff] }
 0x1ff   :  { %7332 = vmatpush1.bf16.msra.mxu0 %v13706_v43  ;;  %v6802_v11 = vadd.f32 %v6801_v58, %v16684_v41  ;;  %v16753_v60 = vadd.f32 %v6872_v13, %v6800_v22  ;;  %v432_v42 = vld [vmem:[#allocation5 + $0x6d8] sm:$0xff]  ;;  %v13930_v43 = vcombine.low %v440_v55, %v448_v47  ;;  %v14186_v41 = vcombine.low %v696_v29, %v704_v12 }
 0x200   :  { %7333 = vmatprep.subr.bf16.mxu0 %v13947_v6  ;;  %v6874_v35 = vpop.f32.mrf.mxu1  ;;  %v680_v46 = vld [vmem:[#allocation5 + $0xe98] sm:$0xff]  ;;  %v13915_v32 = vcombine.high %v424_v38, %v432_v42 }
 0x201   :  { %7405 = vmatpush1.bf16.msra.mxu1 %v13962_v4  ;;  %v16755_v28 = vadd.f32 %v6874_v35, %v6802_v11  ;;  %v688_v44 = vld [vmem:[#allocation5 + $0xed8] sm:$0xff] }
 0x202   :  { %7406 = vmatprep.subr.bf16.mxu1 %v14203_v18  ;;  %v14171_v19 = vcombine.high %v680_v46, %v688_v44  ;;  %v408_v4 = vld [vmem:[#allocation5 + $0x618] sm:$0xff]  ;;  %v13914_v18 = vcombine.low %v424_v38, %v432_v42  ;;  %v14170_v22 = vcombine.low %v680_v46, %v688_v44 }
 0x203   :  { %7334 = vmatpush2.bf16.msra.mxu0 %v13946_v23  ;;  %v416_v24 = vld [vmem:[#allocation5 + $0x658] sm:$0xff] }
 0x204   :  { %7335 = vmatprep.subr.bf16.mxu0 %v13931_v56  ;;  %v664_v45 = vld [vmem:[#allocation5 + $0xe18] sm:$0xff]  ;;  %v13899_v13 = vcombine.high %v408_v4, %v416_v24  ;;  %v13898_v29 = vcombine.low %v408_v4, %v416_v24 }
 0x205   :  { %7407 = vmatpush2.bf16.msra.mxu1 %v14202_v39  ;;  %v672_v6 = vld [vmem:[#allocation5 + $0xe58] sm:$0xff] }
 0x206   :  { %7408 = vmatprep.subr.bf16.mxu1 %v14187_v9  ;;  %v14155_v58 = vcombine.high %v664_v45, %v672_v6  ;;  %v392_v23 = vld [vmem:[#allocation5 + $0x598] sm:$0xff]  ;;  %v14154_v12 = vcombine.low %v664_v45, %v672_v6 }
 0x207   :  { %7336 = vmatpush2.bf16.msra.mxu0 %v13930_v43  ;;  %v400_v55 = vld [vmem:[#allocation5 + $0x5d8] sm:$0xff] }
 0x208   :  { %7337 = vmatprep.subr.bf16.mxu0 %v13915_v32  ;;  %v648_v47 = vld [vmem:[#allocation5 + $0xd98] sm:$0xff]  ;;  %v13883_v39 = vcombine.high %v392_v23, %v400_v55  ;;  %v13882_v44 = vcombine.low %v392_v23, %v400_v55 }
 0x209   :  { %7409 = vmatpush2.bf16.msra.mxu1 %v14186_v41  ;;  %v656_v11 = vld [vmem:[#allocation5 + $0xdd8] sm:$0xff] }
 0x20a   :  { %7410 = vmatprep.subr.bf16.mxu1 %v14171_v19  ;;  %v14139_v56 = vcombine.high %v648_v47, %v656_v11  ;;  %v376_v35 = vld [vmem:[#allocation5 + $0x518] sm:$0xff]  ;;  %v14138_v46 = vcombine.low %v648_v47, %v656_v11 }
 0x20b   :  { %7338 = vmatpush2.bf16.msra.mxu0 %v13914_v18  ;;  %v384_v42 = vld [vmem:[#allocation5 + $0x558] sm:$0xff] }
 0x20c   :  { %7339 = vmatprep.subr.bf16.mxu0 %v13899_v13  ;;  %v632_v9 = vld [vmem:[#allocation5 + $0xd18] sm:$0xff]  ;;  %v13867_v43 = vcombine.high %v376_v35, %v384_v42  ;;  %v13866_v45 = vcombine.low %v376_v35, %v384_v42 }
 0x20d   :  { %7411 = vmatpush2.bf16.msra.mxu1 %v14170_v22  ;;  %v640_v38 = vld [vmem:[#allocation5 + $0xd58] sm:$0xff] }
 0x20e   :  { %7412 = vmatprep.subr.bf16.mxu1 %v14155_v58  ;;  %v14123_v41 = vcombine.high %v632_v9, %v640_v38  ;;  %v360_v32 = vld [vmem:[#allocation5 + $0x498] sm:$0xff]  ;;  %v14122_v6 = vcombine.low %v632_v9, %v640_v38 }
 0x20f   :  { %7340 = vmatpush2.bf16.msra.mxu0 %v13898_v29  ;;  %v368_v19 = vld [vmem:[#allocation5 + $0x4d8] sm:$0xff] }
 0x210   :  { %7341 = vmatprep.subr.bf16.mxu0 %v13883_v39  ;;  %v616_v4 = vld [vmem:[#allocation5 + $0xc98] sm:$0xff]  ;;  %v13851_v18 = vcombine.high %v360_v32, %v368_v19  ;;  %v13850_v47 = vcombine.low %v360_v32, %v368_v19 }
 0x211   :  { %7413 = vmatpush2.bf16.msra.mxu1 %v14154_v12  ;;  %v624_v24 = vld [vmem:[#allocation5 + $0xcd8] sm:$0xff] }
 0x212   :  { %7414 = vmatprep.subr.bf16.mxu1 %v14139_v56  ;;  %v14107_v22 = vcombine.high %v616_v4, %v624_v24  ;;  %v344_v13 = vld [vmem:[#allocation5 + $0x418] sm:$0xff]  ;;  %v14106_v11 = vcombine.low %v616_v4, %v624_v24  ;;  %v16757_v24 = vpop.f32.mrf.mxu0 }
 0x213   :  { %7342 = vmatpush2.bf16.msra.mxu0 %v13882_v44  ;;  %v352_v58 = vld [vmem:[#allocation5 + $0x458] sm:$0xff]  ;;  %18674 = vst [vmem:[#allocation64_spill] sm:$0xff] %v16757_v24 }
 0x214   :  { %7343 = vmatprep.subr.bf16.mxu0 %v13867_v43  ;;  %v600_v23 = vld [vmem:[#allocation5 + $0xc18] sm:$0xff]  ;;  %v13835_v29 = vcombine.high %v344_v13, %v352_v58  ;;  %v13834_v9 = vcombine.low %v344_v13, %v352_v58 }
 0x215   :  { %7415 = vmatpush2.bf16.msra.mxu1 %v14138_v46  ;;  %v608_v55 = vld [vmem:[#allocation5 + $0xc58] sm:$0xff] }
 0x216   :  { %7416 = vmatprep.subr.bf16.mxu1 %v14123_v41  ;;  %v14091_v12 = vcombine.high %v600_v23, %v608_v55  ;;  %v840_v39 = vld [vmem:[#allocation5 + $0x1398] sm:$0xff]  ;;  %v14090_v38 = vcombine.low %v600_v23, %v608_v55 }
 0x217   :  { %7344 = vmatpush2.bf16.msra.mxu0 %v13866_v45  ;;  %v848_v56 = vld [vmem:[#allocation5 + $0x13d8] sm:$0xff] }
 0x218   :  { %7345 = vmatprep.subr.bf16.mxu0 %v13851_v18  ;;  %v1096_v35 = vld [vmem:[#allocation5 + $0x1b98] sm:$0xff]  ;;  %v14331_v44 = vcombine.high %v840_v39, %v848_v56  ;;  %v14330_v4 = vcombine.low %v840_v39, %v848_v56  ;;  %v16759_v18 = vpop.f32.mrf.mxu1 }
 0x219   :  { %7417 = vmatpush2.bf16.msra.mxu1 %v14122_v6  ;;  %v1104_v42 = vld [vmem:[#allocation5 + $0x1bd8] sm:$0xff]  ;;  %18675 = vst [vmem:[#allocation65_spill] sm:$0xff] %v16759_v18 }
 0x21a   :  { %7418 = vmatprep.subr.bf16.mxu1 %v14107_v22  ;;  %v14587_v46 = vcombine.high %v1096_v35, %v1104_v42  ;;  %v824_v43 = vld [vmem:[#allocation5 + $0x1318] sm:$0xff]  ;;  %v14586_v45 = vcombine.low %v1096_v35, %v1104_v42 }
 0x21b   :  { %7346 = vmatpush2.bf16.msra.mxu0 %v13850_v47  ;;  %v832_v41 = vld [vmem:[#allocation5 + $0x1358] sm:$0xff] }
 0x21c   :  { %7347 = vmatprep.subr.bf16.mxu0 %v13835_v29  ;;  %v1080_v32 = vld [vmem:[#allocation5 + $0x1b18] sm:$0xff]  ;;  %v14315_v6 = vcombine.high %v824_v43, %v832_v41 }
 0x21d   :  { %7419 = vmatpush2.bf16.msra.mxu1 %v14106_v11  ;;  %v1088_v19 = vld [vmem:[#allocation5 + $0x1b58] sm:$0xff] }
 0x21e   :  { %7420 = vmatprep.subr.bf16.mxu1 %v14091_v12  ;;  %v14571_v22 = vcombine.high %v1080_v32, %v1088_v19  ;;  %v808_v13 = vld [vmem:[#allocation5 + $0x1298] sm:$0xff]  ;;  %v14314_v12 = vcombine.low %v824_v43, %v832_v41  ;;  %v14570_v56 = vcombine.low %v1080_v32, %v1088_v19 }
 0x21f   :  { %7348 = vmatpush2.bf16.msra.mxu0 %v13834_v9  ;;  %v816_v58 = vld [vmem:[#allocation5 + $0x12d8] sm:$0xff] }
 0x220   :  { %7463 = vmatprep.subr.bf16.mxu0 %v14331_v44  ;;  %v1064_v55 = vld [vmem:[#allocation5 + $0x1a98] sm:$0xff]  ;;  %v14299_v35 = vcombine.high %v808_v13, %v816_v58  ;;  %v14298_v19 = vcombine.low %v808_v13, %v816_v58 }
 0x221   :  { %7421 = vmatpush2.bf16.msra.mxu1 %v14090_v38  ;;  %v1072_v47 = vld [vmem:[#allocation5 + $0x1ad8] sm:$0xff] }
 0x222   :  { %7536 = vmatprep.subr.bf16.mxu1 %v14587_v46  ;;  %v6913_v23 = vpop.f32.mrf.mxu0  ;;  %7350 = vmatmul.mubr.bf16.vlgmr.msra.gmra.mxu0 %v16431_v21  ;;  %v14555_v44 = vcombine.high %v1064_v55, %v1072_v47  ;;  %v792_v46 = vld [vmem:[#allocation5 + $0x1218] sm:$0xff] }
 0x223   :  { %v6914_v11 = vadd.f32 %v6913_v23, %v16696_v40  ;;  %7464 = vmatpush1.bf16.msra.mxu0 %v14330_v4  ;;  %v800_v18 = vld [vmem:[#allocation5 + $0x1258] sm:$0xff]  ;;  %7359 = vmatprep.mubr.bf16.mxu0 %v16435_v34  ;;  %v14554_v4 = vcombine.low %v1064_v55, %v1072_v47 }
 0x224   :  { %v6986_v29 = vpop.f32.mrf.mxu1  ;;  %7423 = vmatmul.mubr.bf16.vlgmr.msra.gmra.mxu1 %v16433_v25  ;;  %v6915_v39 = vpop.f32.mrf.mxu0  ;;  %7465 = vmatprep.subr.bf16.mxu0 %v14315_v6  ;;  %v1048_v23 = vld [vmem:[#allocation5 + $0x1a18] sm:$0xff]  ;;  %v14282_v55 = vcombine.low %v792_v46, %v800_v18 }
 0x225   :  { %7537 = vmatpush1.bf16.msra.mxu1 %v14586_v45  ;;  %v6987_v42 = vadd.f32 %v6986_v29, %v6914_v11  ;;  %v6916_v9 = vadd.f32 %v6915_v39, %v16701_v57  ;;  %v1056_v24 = vld [vmem:[#allocation5 + $0x1a58] sm:$0xff]  ;;  %7432 = vmatprep.mubr.bf16.mxu1 %v16438_v37  ;;  %v14283_v45 = vcombine.high %v792_v46, %v800_v18 }
 0x226   :  { %v6988_v38 = vpop.f32.mrf.mxu1  ;;  %7538 = vmatprep.subr.bf16.mxu1 %v14571_v22  ;;  %v6917_v40 = vpop.f32.mrf.mxu0  ;;  %v776_v6 = vld [vmem:[#allocation5 + $0x1198] sm:$0xff]  ;;  %v14539_v29 = vcombine.high %v1048_v23, %v1056_v24 }
 0x227   :  { %v16767_v43 = vadd.f32 %v6988_v38, %v6916_v9  ;;  %v6918_v41 = vadd.f32 %v6917_v40, %v16706_v31  ;;  %7466 = vmatpush1.bf16.msra.mxu0 %v14314_v12  ;;  %v784_v39 = vld [vmem:[#allocation5 + $0x11d8] sm:$0xff]  ;;  %v8779_v31 = vmax.f32 %v6987_v42, 0.0 }
 0x228   :  { %v6990_v32 = vpop.f32.mrf.mxu1  ;;  %v16770_v57 = vpop.f32.mrf.mxu0  ;;  %7467 = vmatprep.subr.bf16.mxu0 %v14299_v35  ;;  %v1032_v9 = vld [vmem:[#allocation5 + $0x1998] sm:$0xff]  ;;  %v14267_v35 = vcombine.high %v776_v6, %v784_v39 }
 0x229   :  { %18676 = vst [vmem:[#allocation66_spill] sm:$0xff] %v16767_v43  ;;  %7539 = vmatpush1.bf16.msra.mxu1 %v14570_v56  ;;  %18677 = vst [vmem:[#allocation67_spill] sm:$0xff] %v16770_v57  ;;  %v6991_v22 = vadd.f32 %v6990_v32, %v6918_v41  ;;  %v1040_v38 = vld [vmem:[#allocation5 + $0x19d8] sm:$0xff]  ;;  %v14538_v56 = vcombine.low %v1048_v23, %v1056_v24  ;;  %v465_v57 = vld [vmem:[#allocation5 + $0x7e0] sm:$0xff] }
 0x22a   :  { %v16772_v11 = vpop.f32.mrf.mxu1  ;;  %7540 = vmatprep.subr.bf16.mxu1 %v14555_v44  ;;  %v6923_v43 = vpop.f32.mrf.mxu0  ;;  %7360 = vmatmul.mubr.bf16.gmra.mxu0 %v16442_v50  ;;  %v14523_v44 = vcombine.high %v1032_v9, %v1040_v38  ;;  %v1016_v46 = vld [vmem:[#allocation5 + $0x1918] sm:$0xff] }
 0x22b   :  { %18678 = vst [vmem:[#allocation68_spill] sm:$0xff] %v16772_v11  ;;  %v8795_v13 = vmax.f32 %v6991_v22, 0.0  ;;  %v6924_v58 = vadd.f32 %v6923_v43, %v16715_v14  ;;  %7468 = vmatpush1.bf16.msra.mxu0 %v14298_v19  ;;  %v760_v22 = vld [vmem:[#allocation5 + $0x1118] sm:$0xff]  ;;  %7369 = vmatprep.mubr.bf16.mxu0 %v16447_v0 }
 0x22c   :  { %v6996_v12 = vpop.f32.mrf.mxu1  ;;  %7433 = vmatmul.mubr.bf16.gmra.mxu1 %v16445_v54  ;;  %v6925_v47 = vpop.f32.mrf.mxu0  ;;  %7469 = vmatprep.subr.bf16.mxu0 %v14283_v45  ;;  %v768_v14 = vld [vmem:[#allocation5 + $0x1158] sm:$0xff]  ;;  %v14522_v45 = vcombine.low %v1032_v9, %v1040_v38 }
 0x22d   :  { %7541 = vmatpush1.bf16.msra.mxu1 %v14554_v4  ;;  %v16777_v40 = vpack.c.bf16 %v8795_v13, %v8779_v31  ;;  %v6926_v41 = vadd.f32 %v6925_v47, %v16719_v10  ;;  %v6997_v32 = vadd.f32 %v6996_v12, %v6924_v58  ;;  %v1024_v43 = vld [vmem:[#allocation5 + $0x1958] sm:$0xff]  ;;  %7442 = vmatprep.mubr.bf16.mxu1 %v16450_v3 }
 0x22e   :  { %v6998_v42 = vpop.f32.mrf.mxu1  ;;  %7542 = vmatprep.subr.bf16.mxu1 %v14539_v29  ;;  %v6927_v18 = vpop.f32.mrf.mxu0  ;;  %v14266_v4 = vcombine.low %v776_v6, %v784_v39  ;;  %v14251_v29 = vcombine.high %v760_v22, %v768_v14  ;;  %v744_v31 = vld [vmem:[#allocation5 + $0x1098] sm:$0xff]  ;;  %v14507_v12 = vcombine.high %v1016_v46, %v1024_v43  ;;  %v14250_v9 = vcombine.low %v760_v22, %v768_v14 }
 0x22f   :  { %18679 = vst [vmem:[#allocation69_spill] sm:$0xff] %v16777_v40  ;;  %v6928_v24 = vadd.f32 %v6927_v18, %v16723_v36  ;;  %v16783_v23 = vadd.f32 %v6998_v42, %v6926_v41  ;;  %7470 = vmatpush1.bf16.msra.mxu0 %v14282_v55  ;;  %v752_v47 = vld [vmem:[#allocation5 + $0x10d8] sm:$0xff]  ;;  %v8811_v55 = vmax.f32 %v6997_v32, 0.0 }
 0x230   :  { %v7000_v19 = vpop.f32.mrf.mxu1  ;;  %v16785_v10 = vpop.f32.mrf.mxu0  ;;  %7471 = vmatprep.subr.bf16.mxu0 %v14267_v35  ;;  %v1000_v40 = vld [vmem:[#allocation5 + $0x1898] sm:$0xff]  ;;  %v14506_v35 = vcombine.low %v1016_v46, %v1024_v43 }
 0x231   :  { %18680 = vst [vmem:[#allocation70_spill] sm:$0xff] %v16783_v23  ;;  %7543 = vmatpush1.bf16.msra.mxu1 %v14538_v56  ;;  %18681 = vst [vmem:[#allocation71_spill] sm:$0xff] %v16785_v10  ;;  %v7001_v13 = vadd.f32 %v7000_v19, %v6928_v24  ;;  %v1008_v36 = vld [vmem:[#allocation5 + $0x18d8] sm:$0xff] }
 0x232   :  { %v16787_v58 = vpop.f32.mrf.mxu1  ;;  %7544 = vmatprep.subr.bf16.mxu1 %v14523_v44  ;;  %v6933_v41 = vpop.f32.mrf.mxu0  ;;  %7370 = vmatmul.mubr.bf16.gmra.mxu0 %v16454_v16  ;;  %v14235_v44 = vcombine.high %v744_v31, %v752_v47  ;;  %v14491_v42 = vcombine.high %v1000_v40, %v1008_v36  ;;  %v984_v14 = vld [vmem:[#allocation5 + $0x1818] sm:$0xff] }
 0x233   :  { %18682 = vst [vmem:[#allocation72_spill] sm:$0xff] %v16787_v58  ;;  %v8827_v6 = vmax.f32 %v7001_v13, 0.0  ;;  %v6934_v39 = vadd.f32 %v6933_v41, %v16732_v2  ;;  %7472 = vmatpush1.bf16.msra.mxu0 %v14266_v4  ;;  %v728_v13 = vld [vmem:[#allocation5 + $0x1018] sm:$0xff]  ;;  %7379 = vmatprep.mubr.bf16.mxu0 %v16459_v30 }
 0x234   :  { %v7006_v56 = vpop.f32.mrf.mxu1  ;;  %7443 = vmatmul.mubr.bf16.gmra.mxu1 %v16457_v20  ;;  %v6935_v38 = vpop.f32.mrf.mxu0  ;;  %7473 = vmatprep.subr.bf16.mxu0 %v14251_v29  ;;  %v736_v2 = vld [vmem:[#allocation5 + $0x1058] sm:$0xff]  ;;  %v14234_v29 = vcombine.low %v744_v31, %v752_v47 }
 0x235   :  { %7545 = vmatpush1.bf16.msra.mxu1 %v14522_v45  ;;  %v16792_v18 = vpack.c.bf16 %v8827_v6, %v8811_v55  ;;  %v6936_v24 = vadd.f32 %v6935_v38, %v16736_v27  ;;  %v7007_v19 = vadd.f32 %v7006_v56, %v6934_v39  ;;  %v992_v4 = vld [vmem:[#allocation5 + $0x1858] sm:$0xff]  ;;  %7452 = vmatprep.mubr.bf16.mxu1 %v16462_v33 }
 0x236   :  { %v7008_v32 = vpop.f32.mrf.mxu1  ;;  %7546 = vmatprep.subr.bf16.mxu1 %v14507_v12  ;;  %v6937_v22 = vpop.f32.mrf.mxu0  ;;  %v14490_v12 = vcombine.low %v1000_v40, %v1008_v36  ;;  %v14219_v41 = vcombine.high %v728_v13, %v736_v2  ;;  %v968_v55 = vld [vmem:[#allocation5 + $0x1798] sm:$0xff]  ;;  %v14475_v56 = vcombine.high %v984_v14, %v992_v4  ;;  %v14218_v40 = vcombine.low %v728_v13, %v736_v2 }
 0x237   :  { %18683 = vst [vmem:[#allocation73_spill] sm:$0xff] %v16792_v18  ;;  %v6938_v46 = vadd.f32 %v6937_v22, %v16740_v59  ;;  %v16798_v43 = vadd.f32 %v7008_v32, %v6936_v24  ;;  %7474 = vmatpush1.bf16.msra.mxu0 %v14250_v9  ;;  %v976_v38 = vld [vmem:[#allocation5 + $0x17d8] sm:$0xff]  ;;  %v8843_v9 = vmax.f32 %v7007_v19, 0.0 }
 0x238   :  { %v7010_v45 = vpop.f32.mrf.mxu1  ;;  %v16800_v27 = vpop.f32.mrf.mxu0  ;;  %7475 = vmatprep.subr.bf16.mxu0 %v14235_v44  ;;  %v1224_v18 = vld [vmem:[#allocation5 + $0x1f98] sm:$0xff]  ;;  %v14474_v44 = vcombine.low %v984_v14, %v992_v4 }
 0x239   :  { %18684 = vst [vmem:[#allocation74_spill] sm:$0xff] %v16798_v43  ;;  %7547 = vmatpush1.bf16.msra.mxu1 %v14506_v35  ;;  %18685 = vst [vmem:[#allocation75_spill] sm:$0xff] %v16800_v27  ;;  %v7011_v6 = vadd.f32 %v7010_v45, %v6938_v46  ;;  %v1232_v59 = vld [vmem:[#allocation5 + $0x1fd8] sm:$0xff] }
 0x23a   :  { %v16802_v39 = vpop.f32.mrf.mxu1  ;;  %7548 = vmatprep.subr.bf16.mxu1 %v14491_v42  ;;  %v6943_v24 = vpop.f32.mrf.mxu0  ;;  %7380 = vmatmul.mubr.bf16.gmra.mxu0 %v16466_v48  ;;  %v14459_v42 = vcombine.high %v968_v55, %v976_v38  ;;  %v14715_v32 = vcombine.high %v1224_v18, %v1232_v59  ;;  %v1208_v2 = vld [vmem:[#allocation5 + $0x1f18] sm:$0xff] }
 0x23b   :  { %18686 = vst [vmem:[#allocation76_spill] sm:$0xff] %v16802_v39  ;;  %v8859_v31 = vmax.f32 %v7011_v6, 0.0  ;;  %v6944_v47 = vadd.f32 %v6943_v24, %v16748_v8  ;;  %7476 = vmatpush1.bf16.msra.mxu0 %v14234_v29  ;;  %v952_v6 = vld [vmem:[#allocation5 + $0x1718] sm:$0xff]  ;;  %7495 = vmatprep.mubr.bf16.mxu0 %v16471_v1 }
 0x23c   :  { %v7016_v35 = vpop.f32.mrf.mxu1  ;;  %7453 = vmatmul.mubr.bf16.gmra.mxu1 %v16469_v53  ;;  %v6945_v36 = vpop.f32.mrf.mxu0  ;;  %7477 = vmatprep.subr.bf16.mxu0 %v14219_v41  ;;  %v960_v8 = vld [vmem:[#allocation5 + $0x1758] sm:$0xff]  ;;  %v14458_v41 = vcombine.low %v968_v55, %v976_v38 }
 0x23d   :  { %7549 = vmatpush1.bf16.msra.mxu1 %v14490_v12  ;;  %v16807_v22 = vpack.c.bf16 %v8859_v31, %v8843_v9  ;;  %v6946_v46 = vadd.f32 %v6945_v36, %v16753_v60  ;;  %v7017_v45 = vadd.f32 %v7016_v35, %v6944_v47  ;;  %v1216_v29 = vld [vmem:[#allocation5 + $0x1f58] sm:$0xff]  ;;  %7568 = vmatprep.mubr.bf16.mxu1 %v16474_v5 }
 0x23e   :  { %v7018_v19 = vpop.f32.mrf.mxu1  ;;  %7550 = vmatprep.subr.bf16.mxu1 %v14475_v56  ;;  %v6947_v13 = vpop.f32.mrf.mxu0  ;;  %v14714_v60 = vcombine.low %v1224_v18, %v1232_v59  ;;  %v14443_v56 = vcombine.high %v952_v6, %v960_v8  ;;  %v14699_v9 = vcombine.high %v1208_v2, %v1216_v29  ;;  %v936_v31 = vld [vmem:[#allocation5 + $0x1698] sm:$0xff] }
 0x23f   :  { %18687 = vst [vmem:[#allocation77_spill] sm:$0xff] %v16807_v22  ;;  %v6948_v14 = vadd.f32 %v6947_v13, %v16755_v28  ;;  %v16813_v4 = vadd.f32 %v7018_v19, %v6946_v46  ;;  %7478 = vmatpush1.bf16.msra.mxu0 %v14218_v40  ;;  %v944_v47 = vld [vmem:[#allocation5 + $0x16d8] sm:$0xff]  ;;  %v8875_v22 = vmax.f32 %v7017_v45, 0.0  ;;  %v14442_v28 = vcombine.low %v952_v6, %v960_v8 }
 0x240   :  { %v7020_v12 = vpop.f32.mrf.mxu1  ;;  %7479 = vmatprep.subr.bf16.mxu0 %v14459_v42  ;;  %v1192_v35 = vld [vmem:[#allocation5 + $0x1e98] sm:$0xff]  ;;  %v14698_v40 = vcombine.low %v1208_v2, %v1216_v29  ;;  %v14427_v46 = vcombine.high %v936_v31, %v944_v47 }
 0x241   :  { %18688 = vst [vmem:[#allocation78_spill] sm:$0xff] %v16813_v4  ;;  %7551 = vmatpush1.bf16.msra.mxu1 %v14474_v44  ;;  %v7021_v24 = vadd.f32 %v7020_v12, %v6948_v14  ;;  %v1200_v36 = vld [vmem:[#allocation5 + $0x1ed8] sm:$0xff]  ;;  %v265_v4 = vld [vmem:[#allocation5 + $0x1a0] sm:$0xff] }
 0x242   :  { %7552 = vmatprep.subr.bf16.mxu1 %v14715_v32  ;;  %v14683_v18 = vcombine.high %v1192_v35, %v1200_v36  ;;  %v920_v38 = vld [vmem:[#allocation5 + $0x1618] sm:$0xff]  ;;  %v14426_v32 = vcombine.low %v936_v31, %v944_v47  ;;  %v14682_v45 = vcombine.low %v1192_v35, %v1200_v36 }
 0x243   :  { %v8891_v43 = vmax.f32 %v7021_v24, 0.0  ;;  %7480 = vmatpush2.bf16.msra.mxu0 %v14458_v41  ;;  %v928_v59 = vld [vmem:[#allocation5 + $0x1658] sm:$0xff] }
 0x244   :  { %7481 = vmatprep.subr.bf16.mxu0 %v14443_v56  ;;  %v1176_v44 = vld [vmem:[#allocation5 + $0x1e18] sm:$0xff]  ;;  %v14411_v19 = vcombine.high %v920_v38, %v928_v59 }
 0x245   :  { %7553 = vmatpush2.bf16.msra.mxu1 %v14714_v60  ;;  %v16815_v55 = vpack.c.bf16 %v8891_v43, %v8875_v22  ;;  %v1184_v42 = vld [vmem:[#allocation5 + $0x1e58] sm:$0xff]  ;;  %v14410_v43 = vcombine.low %v920_v38, %v928_v59 }
 0x246   :  { %7554 = vmatprep.subr.bf16.mxu1 %v14699_v9  ;;  %v14667_v6 = vcombine.high %v1176_v44, %v1184_v42  ;;  %v904_v8 = vld [vmem:[#allocation5 + $0x1598] sm:$0xff]  ;;  %v14666_v22 = vcombine.low %v1176_v44, %v1184_v42 }
 0x247   :  { %18689 = vst [vmem:[#allocation79_spill] sm:$0xff] %v16815_v55  ;;  %7482 = vmatpush2.bf16.msra.mxu0 %v14442_v28  ;;  %v912_v13 = vld [vmem:[#allocation5 + $0x15d8] sm:$0xff] }
 0x248   :  { %7483 = vmatprep.subr.bf16.mxu0 %v14427_v46  ;;  %v1160_v2 = vld [vmem:[#allocation5 + $0x1d98] sm:$0xff]  ;;  %v14395_v14 = vcombine.high %v904_v8, %v912_v13  ;;  %v14394_v9 = vcombine.low %v904_v8, %v912_v13 }
 0x249   :  { %7555 = vmatpush2.bf16.msra.mxu1 %v14698_v40  ;;  %v1168_v29 = vld [vmem:[#allocation5 + $0x1dd8] sm:$0xff] }
 0x24a   :  { %7556 = vmatprep.subr.bf16.mxu1 %v14683_v18  ;;  %v14651_v12 = vcombine.high %v1160_v2, %v1168_v29  ;;  %v888_v41 = vld [vmem:[#allocation5 + $0x1518] sm:$0xff]  ;;  %v14650_v31 = vcombine.low %v1160_v2, %v1168_v29  ;;  %v329_v29 = vld [vmem:[#allocation5 + $0x3a0] sm:$0xff] }
 0x24b   :  { %7484 = vmatpush2.bf16.msra.mxu0 %v14426_v32  ;;  %v896_v60 = vld [vmem:[#allocation5 + $0x1558] sm:$0xff] }
 0x24c   :  { %7485 = vmatprep.subr.bf16.mxu0 %v14411_v19  ;;  %v1144_v56 = vld [vmem:[#allocation5 + $0x1d18] sm:$0xff]  ;;  %v14379_v47 = vcombine.high %v888_v41, %v896_v60  ;;  %v14378_v18 = vcombine.low %v888_v41, %v896_v60  ;;  %v18563_v41 = vsub.s32 4, %v16539_v52 }
 0x24d   :  { %7557 = vmatpush2.bf16.msra.mxu1 %v14682_v45  ;;  %v1152_v24 = vld [vmem:[#allocation5 + $0x1d58] sm:$0xff] }
 0x24e   :  { %7558 = vmatprep.subr.bf16.mxu1 %v14667_v6  ;;  %v14635_v35 = vcombine.high %v1144_v56, %v1152_v24  ;;  %v872_v36 = vld [vmem:[#allocation5 + $0x1498] sm:$0xff]  ;;  %v14634_v38 = vcombine.low %v1144_v56, %v1152_v24 }
 0x24f   :  { %7486 = vmatpush2.bf16.msra.mxu0 %v14410_v43  ;;  %v880_v28 = vld [vmem:[#allocation5 + $0x14d8] sm:$0xff]  ;;  %v337_v43 = vld [vmem:[#allocation5 + $0x3e0] sm:$0xff] }
 0x250   :  { %7487 = vmatprep.subr.bf16.mxu0 %v14395_v14  ;;  %v1128_v40 = vld [vmem:[#allocation5 + $0x1c98] sm:$0xff]  ;;  %v14363_v59 = vcombine.high %v872_v36, %v880_v28  ;;  %v14362_v6 = vcombine.low %v872_v36, %v880_v28  ;;  %v593_v14 = vld [vmem:[#allocation5 + $0xbe0] sm:$0xff]  ;;  %v13821_v56 = vcombine.high %v329_v29, %v337_v43 }
 0x251   :  { %7559 = vmatpush2.bf16.msra.mxu1 %v14666_v22  ;;  %v1136_v46 = vld [vmem:[#allocation5 + $0x1cd8] sm:$0xff]  ;;  %v585_v22 = vld [vmem:[#allocation5 + $0xba0] sm:$0xff] }
 0x252   :  { %7560 = vmatprep.subr.bf16.mxu1 %v14651_v12  ;;  %v14619_v44 = vcombine.high %v1128_v40, %v1136_v46  ;;  %v856_v42 = vld [vmem:[#allocation5 + $0x1418] sm:$0xff]  ;;  %v14618_v8 = vcombine.low %v1128_v40, %v1136_v46  ;;  %v14077_v24 = vcombine.high %v585_v22, %v593_v14  ;;  %v577_v36 = vld [vmem:[#allocation5 + $0xb60] sm:$0xff]  ;;  %v13820_v46 = vcombine.low %v329_v29, %v337_v43 }
 0x253   :  { %7488 = vmatpush2.bf16.msra.mxu0 %v14394_v9  ;;  %v864_v32 = vld [vmem:[#allocation5 + $0x1458] sm:$0xff]  ;;  %v18562_v9 = vsub.s32 5, %v16539_v52  ;;  %v16165_v28 = vld [vmem:[#allocation7] sm:$0xff] }
 0x254   :  { %7489 = vmatprep.subr.bf16.mxu0 %v14379_v47  ;;  %v1112_v45 = vld [vmem:[#allocation5 + $0x1c18] sm:$0xff]  ;;  %v14347_v13 = vcombine.high %v856_v42, %v864_v32  ;;  %v14346_v12 = vcombine.low %v856_v42, %v864_v32  ;;  %v321_v47 = vld [vmem:[#allocation5 + $0x360] sm:$0xff]  ;;  %v16821_v40 = vrot.slane %v16165_v28, %v18563_v41 }
 0x255   :  { %7561 = vmatpush2.bf16.msra.mxu1 %v14650_v31  ;;  %v1120_v19 = vld [vmem:[#allocation5 + $0x1c58] sm:$0xff]  ;;  %v313_v31 = vld [vmem:[#allocation5 + $0x320] sm:$0xff]  ;;  %v16829_v42 = vrot.slane %v16165_v28, %v18562_v9 }
 0x256   :  { %7562 = vmatprep.subr.bf16.mxu1 %v14635_v35  ;;  %v14603_v2 = vcombine.high %v1112_v45, %v1120_v19  ;;  %v14602_v60 = vcombine.low %v1112_v45, %v1120_v19  ;;  %v569_v35 = vld [vmem:[#allocation5 + $0xb20] sm:$0xff]  ;;  %v13804_v43 = vcombine.low %v313_v31, %v321_v47 }
 0x257   :  { %7490 = vmatpush2.bf16.msra.mxu0 %v14378_v18  ;;  %v16823_v18 = vpop.f32.mrf.mxu0  ;;  %18692 = vst [vmem:[#allocation82_spill] sm:$0xff] %v16829_v42  ;;  %v14061_v32 = vcombine.high %v569_v35, %v577_v36  ;;  %v297_v45 = vld [vmem:[#allocation5 + $0x2a0] sm:$0xff] }
 0x258   :  { %7491 = vmatprep.subr.bf16.mxu0 %v14363_v59  ;;  %18690 = vst [vmem:[#allocation80_spill] sm:$0xff] %v16823_v18  ;;  %v13805_v59 = vcombine.high %v313_v31, %v321_v47  ;;  %v305_v19 = vld [vmem:[#allocation5 + $0x2e0] sm:$0xff] }
 0x259   :  { %7563 = vmatpush2.bf16.msra.mxu1 %v14634_v38  ;;  %v14076_v38 = vcombine.low %v585_v22, %v593_v14  ;;  %v14060_v14 = vcombine.low %v569_v35, %v577_v36  ;;  %v289_v9 = vld [vmem:[#allocation5 + $0x260] sm:$0xff] }
 0x25a   :  { %7564 = vmatprep.subr.bf16.mxu1 %v14619_v44  ;;  %v16825_v44 = vpop.f32.mrf.mxu1  ;;  %v537_v31 = vld [vmem:[#allocation5 + $0xa20] sm:$0xff] }
 0x25b   :  { %7492 = vmatpush2.bf16.msra.mxu0 %v14362_v6  ;;  %18691 = vst [vmem:[#allocation81_spill] sm:$0xff] %v16825_v44  ;;  %v545_v47 = vld [vmem:[#allocation5 + $0xa60] sm:$0xff] }
 0x25c   :  { %7493 = vmatprep.subr.bf16.mxu0 %v14347_v13  ;;  %v561_v13 = vld [vmem:[#allocation5 + $0xae0] sm:$0xff]  ;;  %v14029_v55 = vcombine.high %v537_v31, %v545_v47 }
 0x25d   :  { %7565 = vmatpush2.bf16.msra.mxu1 %v14618_v8  ;;  %v553_v8 = vld [vmem:[#allocation5 + $0xaa0] sm:$0xff] }
 0x25e   :  { %7566 = vmatprep.subr.bf16.mxu1 %v14603_v2  ;;  %v14045_v28 = vcombine.high %v553_v8, %v561_v13  ;;  %v241_v18 = vld [vmem:[#allocation5 + $0xe0] sm:$0xff] }
 0x25f   :  { %7494 = vmatpush2.bf16.msra.mxu0 %v14346_v12  ;;  %v13789_v12 = vcombine.high %v297_v45, %v305_v19 }
 0x260   :  { %7609 = vmatprep.subr.bf16.mxu0 %v13821_v56 }
 0x261   :  { %7567 = vmatpush2.bf16.msra.mxu1 %v14602_v60 }
 0x262   :  { %7682 = vmatprep.subr.bf16.mxu1 %v14077_v24  ;;  %v7059_v6 = vpop.f32.mrf.mxu0  ;;  %7496 = vmatmul.mubr.bf16.vlgmr.msra.gmra.mxu0 %v16479_v49 }
 0x263   :  { %v7060_v2 = vadd.f32 %v7059_v6, %v16821_v40  ;;  %7610 = vmatpush1.bf16.msra.mxu0 %v13820_v46  ;;  %7505 = vmatprep.mubr.bf16.mxu0 %v16483_v61  ;;  %v281_v6 = vld [vmem:[#allocation5 + $0x220] sm:$0xff] }
 0x264   :  { %v7132_v29 = vpop.f32.mrf.mxu1  ;;  %7569 = vmatmul.mubr.bf16.vlgmr.msra.gmra.mxu1 %v16481_v51  ;;  %v7061_v22 = vpop.f32.mrf.mxu0  ;;  %7611 = vmatprep.subr.bf16.mxu0 %v13805_v59 }
 0x265   :  { %7683 = vmatpush1.bf16.msra.mxu1 %v14076_v38  ;;  %v16834_v60 = vadd.f32 %v7132_v29, %v7060_v2  ;;  %v7062_v56 = vadd.f32 %v7061_v22, %v16829_v42  ;;  %7578 = vmatprep.mubr.bf16.mxu1 %v16486_v7  ;;  %v13788_v38 = vcombine.low %v297_v45, %v305_v19 }
 0x266   :  { %v7134_v24 = vpop.f32.mrf.mxu1  ;;  %7684 = vmatprep.subr.bf16.mxu1 %v14061_v32  ;;  %v7063_v41 = vpop.f32.mrf.mxu0  ;;  %v14044_v32 = vcombine.low %v553_v8, %v561_v13  ;;  %v13773_v2 = vcombine.high %v281_v6, %v289_v9  ;;  %v13772_v45 = vcombine.low %v281_v6, %v289_v9  ;;  %v14028_v13 = vcombine.low %v537_v31, %v545_v47  ;;  %v505_v9 = vld [vmem:[#allocation5 + $0x920] sm:$0xff] }
 0x267   :  { %v16839_v46 = vadd.f32 %v7134_v24, %v7062_v56  ;;  %v7064_v35 = vadd.f32 %v7063_v41, %v16821_v40  ;;  %7612 = vmatpush1.bf16.msra.mxu0 %v13804_v43  ;;  %v273_v56 = vld [vmem:[#allocation5 + $0x1e0] sm:$0xff] }
 0x268   :  { %v7136_v36 = vpop.f32.mrf.mxu1  ;;  %v16842_v59 = vpop.f32.mrf.mxu0  ;;  %7613 = vmatprep.subr.bf16.mxu0 %v13789_v12  ;;  %v521_v41 = vld [vmem:[#allocation5 + $0x9a0] sm:$0xff]  ;;  %v13756_v31 = vcombine.low %v265_v4, %v273_v56 }
 0x269   :  { %7685 = vmatpush1.bf16.msra.mxu1 %v14060_v14  ;;  %18693 = vst [vmem:[#allocation83_spill] sm:$0xff] %v16842_v59  ;;  %v16844_v29 = vadd.f32 %v7136_v36, %v7064_v35  ;;  %v529_v24 = vld [vmem:[#allocation5 + $0x9e0] sm:$0xff]  ;;  %v13757_v14 = vcombine.high %v265_v4, %v273_v56  ;;  %v18697_v4 = vld [vmem:[#allocation24_spill] sm:$0xff] }
 0x26a   :  { %v16846_v22 = vpop.f32.mrf.mxu1  ;;  %7686 = vmatprep.subr.bf16.mxu1 %v14045_v28  ;;  %7506 = vmatmul.mubr.bf16.gmra.mxu0 %v16490_v26  ;;  %v7069_v43 = vpop.f32.mrf.mxu0  ;;  %v14013_v28 = vcombine.high %v521_v41, %v529_v24  ;;  %v249_v35 = vld [vmem:[#allocation5 + $0x120] sm:$0xff] }
 0x26b   :  { %18694 = vst [vmem:[#allocation84_spill] sm:$0xff] %v16846_v22  ;;  %7614 = vmatpush1.bf16.msra.mxu0 %v13788_v38  ;;  %v7070_v19 = vadd.f32 %v7069_v43, %v16821_v40  ;;  %7515 = vmatprep.mubr.bf16.mxu0 %v18664_v15  ;;  %v257_v36 = vld [vmem:[#allocation5 + $0x160] sm:$0xff]  ;;  %v14012_v43 = vcombine.low %v521_v41, %v529_v24 }
 0x26c   :  { %7579 = vmatmul.mubr.bf16.gmra.mxu1 %v18663_v17  ;;  %v7142_v8 = vpop.f32.mrf.mxu1  ;;  %7615 = vmatprep.subr.bf16.mxu0 %v13773_v2  ;;  %v7071_v12 = vpop.f32.mrf.mxu0  ;;  %v513_v6 = vld [vmem:[#allocation5 + $0x960] sm:$0xff]  ;;  %v13741_v59 = vcombine.high %v249_v35, %v257_v36  ;;  %v13740_v41 = vcombine.low %v249_v35, %v257_v36  ;;  %v18700_v35 = vld [vmem:[#allocation27_spill] sm:$0xff] }
 0x26d   :  { %7687 = vmatpush1.bf16.msra.mxu1 %v14044_v32  ;;  %v7072_v22 = vadd.f32 %v7071_v12, %v16829_v42  ;;  %v16853_v38 = vadd.f32 %v7142_v8, %v7070_v19  ;;  %7588 = vmatprep.mubr.bf16.mxu1 %v18665_v62  ;;  %v13997_v19 = vcombine.high %v505_v9, %v513_v6  ;;  %v233_v8 = vld [vmem:[#allocation5 + $0xa0] sm:$0xff] }
 0x26e   :  { %7688 = vmatprep.subr.bf16.mxu1 %v14029_v55  ;;  %v7144_v44 = vpop.f32.mrf.mxu1  ;;  %v7073_v32 = vpop.f32.mrf.mxu0  ;;  %v489_v56 = vld [vmem:[#allocation5 + $0x8a0] sm:$0xff] }
 0x26f   :  { %7616 = vmatpush1.bf16.msra.mxu0 %v13772_v45  ;;  %v7074_v47 = vadd.f32 %v7073_v32, %v16821_v40  ;;  %v16857_v55 = vadd.f32 %v7144_v44, %v7072_v22  ;;  %v497_v44 = vld [vmem:[#allocation5 + $0x8e0] sm:$0xff] }
 0x270   :  { %v7146_v2 = vpop.f32.mrf.mxu1  ;;  %7617 = vmatprep.subr.bf16.mxu0 %v13757_v14  ;;  %v16859_v12 = vpop.f32.mrf.mxu0  ;;  %v18698_v45 = vld [vmem:[#allocation25_spill] sm:$0xff]  ;;  %v13996_v14 = vcombine.low %v505_v9, %v513_v6  ;;  %v13980_v10 = vcombine.low %v489_v56, %v497_v44 }
 0x271   :  { %7689 = vmatpush1.bf16.msra.mxu1 %v14028_v13  ;;  %18695 = vst [vmem:[#allocation85_spill] sm:$0xff] %v16859_v12  ;;  %v16861_v39 = vadd.f32 %v7146_v2, %v7074_v47  ;;  %v18699_v47 = vld [vmem:[#allocation26_spill] sm:$0xff]  ;;  %v13981_v2 = vcombine.high %v489_v56, %v497_v44 }
 0x272   :  { %7690 = vmatprep.subr.bf16.mxu1 %v14013_v28  ;;  %v16863_v23 = vpop.f32.mrf.mxu1  ;;  %7516 = vmatmul.mubr.bf16.gmra.mxu0 %v18697_v4  ;;  %v7079_v22 = vpop.f32.mrf.mxu0  ;;  %v13725_v28 = vcombine.high %v233_v8, %v241_v18  ;;  %v225_v12 = vld [vmem:[#allocation5 + $0x60] sm:$0xff] }
 0x273   :  { %18696 = vst [vmem:[#allocation86_spill] sm:$0xff] %v16863_v23  ;;  %7618 = vmatpush1.bf16.msra.mxu0 %v13756_v31  ;;  %v7080_v24 = vadd.f32 %v7079_v22, %v16821_v40  ;;  %7525 = vmatprep.mubr.bf16.mxu0 %v18699_v47  ;;  %v217_v23 = vld [vmem:[#allocation5 + $0x20] sm:$0xff] }
 0x274   :  { %7589 = vmatmul.mubr.bf16.gmra.mxu1 %v18698_v45  ;;  %v7152_v13 = vpop.f32.mrf.mxu1  ;;  %7619 = vmatprep.subr.bf16.mxu0 %v13741_v59  ;;  %v7081_v32 = vpop.f32.mrf.mxu0  ;;  %v473_v36 = vld [vmem:[#allocation5 + $0x820] sm:$0xff]  ;;  %v13724_v59 = vcombine.low %v233_v8, %v241_v18  ;;  %v13709_v11 = vcombine.high %v217_v23, %v225_v12  ;;  %v18703_v18 = vld [vmem:[#allocation28_spill] sm:$0xff]  ;;  %v13708_v56 = vcombine.low %v217_v23, %v225_v12 }
 0x275   :  { %7691 = vmatpush1.bf16.msra.mxu1 %v14012_v43  ;;  %v7082_v27 = vadd.f32 %v7081_v32, %v16829_v42  ;;  %v16870_v31 = vadd.f32 %v7152_v13, %v7080_v24  ;;  %7598 = vmatprep.mubr.bf16.mxu1 %v18700_v35  ;;  %v481_v22 = vld [vmem:[#allocation5 + $0x860] sm:$0xff]  ;;  %v18705_v45 = vld [vmem:[#allocation20_spill] sm:$0xff] }
 0x276   :  { %7692 = vmatprep.subr.bf16.mxu1 %v13997_v19  ;;  %v7154_v58 = vpop.f32.mrf.mxu1  ;;  %v7083_v43 = vpop.f32.mrf.mxu0  ;;  %v13965_v24 = vcombine.high %v473_v36, %v481_v22  ;;  %v457_v13 = vld [vmem:[#allocation5 + $0x7a0] sm:$0xff] }
 0x277   :  { %7620 = vmatpush1.bf16.msra.mxu0 %v13740_v41  ;;  %v7084_v9 = vadd.f32 %v7083_v43, %v16821_v40  ;;  %v16874_v6 = vadd.f32 %v7154_v58, %v7082_v27  ;;  %v713_v8 = vld [vmem:[#allocation5 + $0xfa0] sm:$0xff] }
 0x278   :  { %v7156_v19 = vpop.f32.mrf.mxu1  ;;  %7621 = vmatprep.subr.bf16.mxu0 %v13725_v28  ;;  %v16876_v32 = vpop.f32.mrf.mxu0  ;;  %v721_v58 = vld [vmem:[#allocation5 + $0xfe0] sm:$0xff]  ;;  %v13964_v28 = vcombine.low %v473_v36, %v481_v22 }
 0x279   :  { %7693 = vmatpush1.bf16.msra.mxu1 %v13996_v14  ;;  %18701 = vst [vmem:[#allocation87_spill] sm:$0xff] %v16876_v32  ;;  %v16878_v35 = vadd.f32 %v7156_v19, %v7084_v9  ;;  %v18704_v41 = vld [vmem:[#allocation29_spill] sm:$0xff]  ;;  %v14205_v9 = vcombine.high %v713_v8, %v721_v58  ;;  %v14204_v22 = vcombine.low %v713_v8, %v721_v58 }
 0x27a   :  { %7694 = vmatprep.subr.bf16.mxu1 %v13981_v2  ;;  %v16880_v47 = vpop.f32.mrf.mxu1  ;;  %7526 = vmatmul.mubr.bf16.gmra.mxu0 %v18703_v18  ;;  %v7089_v27 = vpop.f32.mrf.mxu0  ;;  %v13949_v2 = vcombine.high %v457_v13, %v465_v57  ;;  %v441_v19 = vld [vmem:[#allocation5 + $0x720] sm:$0xff] }
 0x27b   :  { %18702 = vst [vmem:[#allocation88_spill] sm:$0xff] %v16880_v47  ;;  %7622 = vmatpush1.bf16.msra.mxu0 %v13724_v59  ;;  %v7090_v44 = vadd.f32 %v7089_v27, %v16821_v40  ;;  %v449_v47 = vld [vmem:[#allocation5 + $0x760] sm:$0xff]  ;;  %7641 = vmatprep.mubr.bf16.mxu0 %v18705_v45 }
 0x27c   :  { %7599 = vmatmul.mubr.bf16.gmra.mxu1 %v18704_v41  ;;  %v7162_v14 = vpop.f32.mrf.mxu1  ;;  %7623 = vmatprep.subr.bf16.mxu0 %v13709_v11  ;;  %v7091_v43 = vpop.f32.mrf.mxu0  ;;  %v697_v23 = vld [vmem:[#allocation5 + $0xf20] sm:$0xff]  ;;  %v13948_v11 = vcombine.low %v457_v13, %v465_v57 }
 0x27d   :  { %7695 = vmatpush1.bf16.msra.mxu1 %v13980_v10  ;;  %v7092_v32 = vadd.f32 %v7091_v43, %v16829_v42  ;;  %v16886_v18 = vadd.f32 %v7162_v14, %v7090_v44  ;;  %v705_v12 = vld [vmem:[#allocation5 + $0xf60] sm:$0xff]  ;;  %7714 = vmatprep.mubr.bf16.mxu1 %v16427_v63 }
 0x27e   :  { %7696 = vmatprep.subr.bf16.mxu1 %v13965_v24  ;;  %v7164_v59 = vpop.f32.mrf.mxu1  ;;  %v7093_v27 = vpop.f32.mrf.mxu0  ;;  %v13933_v24 = vcombine.high %v441_v19, %v449_v47  ;;  %v14189_v14 = vcombine.high %v697_v23, %v705_v12  ;;  %v425_v43 = vld [vmem:[#allocation5 + $0x6a0] sm:$0xff]  ;;  %v14188_v57 = vcombine.low %v697_v23, %v705_v12 }
 0x27f   :  { %7624 = vmatpush1.bf16.msra.mxu0 %v13708_v56  ;;  %v7094_v10 = vadd.f32 %v7093_v27, %v16821_v40  ;;  %v16891_v36 = vadd.f32 %v7164_v59, %v7092_v32  ;;  %v433_v42 = vld [vmem:[#allocation5 + $0x6e0] sm:$0xff]  ;;  %v13932_v56 = vcombine.low %v441_v19, %v449_v47 }
 0x280   :  { %7625 = vmatprep.subr.bf16.mxu0 %v13949_v2  ;;  %v7166_v44 = vpop.f32.mrf.mxu1  ;;  %v681_v41 = vld [vmem:[#allocation5 + $0xea0] sm:$0xff]  ;;  %v13917_v40 = vcombine.high %v425_v43, %v433_v42  ;;  %v13916_v2 = vcombine.low %v425_v43, %v433_v42 }
 0x281   :  { %7697 = vmatpush1.bf16.msra.mxu1 %v13964_v28  ;;  %v16893_v45 = vadd.f32 %v7166_v44, %v7094_v10  ;;  %v689_v4 = vld [vmem:[#allocation5 + $0xee0] sm:$0xff] }
 0x282   :  { %7698 = vmatprep.subr.bf16.mxu1 %v14205_v9  ;;  %v14173_v32 = vcombine.high %v681_v41, %v689_v4  ;;  %v409_v13 = vld [vmem:[#allocation5 + $0x620] sm:$0xff]  ;;  %v14172_v9 = vcombine.low %v681_v41, %v689_v4 }
 0x283   :  { %7626 = vmatpush2.bf16.msra.mxu0 %v13948_v11  ;;  %v417_v8 = vld [vmem:[#allocation5 + $0x660] sm:$0xff] }
 0x284   :  { %7627 = vmatprep.subr.bf16.mxu0 %v13933_v24  ;;  %v665_v58 = vld [vmem:[#allocation5 + $0xe20] sm:$0xff]  ;;  %v13901_v59 = vcombine.high %v409_v13, %v417_v8  ;;  %v13900_v23 = vcombine.low %v409_v13, %v417_v8 }
 0x285   :  { %7699 = vmatpush2.bf16.msra.mxu1 %v14204_v22  ;;  %v673_v28 = vld [vmem:[#allocation5 + $0xe60] sm:$0xff] }
 0x286   :  { %7700 = vmatprep.subr.bf16.mxu1 %v14189_v14  ;;  %v14157_v27 = vcombine.high %v665_v58, %v673_v28  ;;  %v393_v11 = vld [vmem:[#allocation5 + $0x5a0] sm:$0xff]  ;;  %v14156_v12 = vcombine.low %v665_v58, %v673_v28 }
 0x287   :  { %7628 = vmatpush2.bf16.msra.mxu0 %v13932_v56  ;;  %v401_v47 = vld [vmem:[#allocation5 + $0x5e0] sm:$0xff] }
 0x288   :  { %7629 = vmatprep.subr.bf16.mxu0 %v13917_v40  ;;  %v649_v19 = vld [vmem:[#allocation5 + $0xda0] sm:$0xff]  ;;  %v13885_v22 = vcombine.high %v393_v11, %v401_v47  ;;  %v13884_v4 = vcombine.low %v393_v11, %v401_v47 }
 0x289   :  { %7701 = vmatpush2.bf16.msra.mxu1 %v14188_v57  ;;  %v657_v10 = vld [vmem:[#allocation5 + $0xde0] sm:$0xff] }
 0x28a   :  { %7702 = vmatprep.subr.bf16.mxu1 %v14173_v32  ;;  %v14141_v24 = vcombine.high %v649_v19, %v657_v10  ;;  %v377_v44 = vld [vmem:[#allocation5 + $0x520] sm:$0xff]  ;;  %v14140_v41 = vcombine.low %v649_v19, %v657_v10 }
 0x28b   :  { %7630 = vmatpush2.bf16.msra.mxu0 %v13916_v2  ;;  %v385_v42 = vld [vmem:[#allocation5 + $0x560] sm:$0xff] }
 0x28c   :  { %7631 = vmatprep.subr.bf16.mxu0 %v13901_v59  ;;  %v633_v14 = vld [vmem:[#allocation5 + $0xd20] sm:$0xff]  ;;  %v13869_v56 = vcombine.high %v377_v44, %v385_v42  ;;  %v13868_v58 = vcombine.low %v377_v44, %v385_v42 }
 0x28d   :  { %7703 = vmatpush2.bf16.msra.mxu1 %v14172_v9  ;;  %v641_v43 = vld [vmem:[#allocation5 + $0xd60] sm:$0xff] }
 0x28e   :  { %7704 = vmatprep.subr.bf16.mxu1 %v14157_v27  ;;  %v14125_v57 = vcombine.high %v633_v14, %v641_v43  ;;  %v361_v40 = vld [vmem:[#allocation5 + $0x4a0] sm:$0xff]  ;;  %v14124_v28 = vcombine.low %v633_v14, %v641_v43 }
 0x28f   :  { %7632 = vmatpush2.bf16.msra.mxu0 %v13900_v23  ;;  %v369_v32 = vld [vmem:[#allocation5 + $0x4e0] sm:$0xff] }
 0x290   :  { %7633 = vmatprep.subr.bf16.mxu0 %v13885_v22  ;;  %v617_v13 = vld [vmem:[#allocation5 + $0xca0] sm:$0xff]  ;;  %v13853_v2 = vcombine.high %v361_v40, %v369_v32  ;;  %v13852_v19 = vcombine.low %v361_v40, %v369_v32 }
 0x291   :  { %7705 = vmatpush2.bf16.msra.mxu1 %v14156_v12  ;;  %v625_v8 = vld [vmem:[#allocation5 + $0xce0] sm:$0xff] }
 0x292   :  { %7706 = vmatprep.subr.bf16.mxu1 %v14141_v24  ;;  %v14109_v9 = vcombine.high %v617_v13, %v625_v8  ;;  %v345_v59 = vld [vmem:[#allocation5 + $0x420] sm:$0xff]  ;;  %v14108_v10 = vcombine.low %v617_v13, %v625_v8  ;;  %v16895_v8 = vpop.f32.mrf.mxu0 }
 0x293   :  { %7634 = vmatpush2.bf16.msra.mxu0 %v13884_v4  ;;  %v353_v27 = vld [vmem:[#allocation5 + $0x460] sm:$0xff]  ;;  %18706 = vst [vmem:[#allocation89_spill] sm:$0xff] %v16895_v8 }
 0x294   :  { %7635 = vmatprep.subr.bf16.mxu0 %v13869_v56  ;;  %v601_v11 = vld [vmem:[#allocation5 + $0xc20] sm:$0xff]  ;;  %v13837_v23 = vcombine.high %v345_v59, %v353_v27  ;;  %v13836_v14 = vcombine.low %v345_v59, %v353_v27 }
 0x295   :  { %7707 = vmatpush2.bf16.msra.mxu1 %v14140_v41  ;;  %v609_v47 = vld [vmem:[#allocation5 + $0xc60] sm:$0xff] }
 0x296   :  { %7708 = vmatprep.subr.bf16.mxu1 %v14125_v57  ;;  %v14093_v12 = vcombine.high %v601_v11, %v609_v47  ;;  %v841_v22 = vld [vmem:[#allocation5 + $0x13a0] sm:$0xff]  ;;  %v14092_v43 = vcombine.low %v601_v11, %v609_v47 }
 0x297   :  { %7636 = vmatpush2.bf16.msra.mxu0 %v13868_v58  ;;  %v849_v24 = vld [vmem:[#allocation5 + $0x13e0] sm:$0xff] }
 0x298   :  { %7637 = vmatprep.subr.bf16.mxu0 %v13853_v2  ;;  %v1097_v44 = vld [vmem:[#allocation5 + $0x1ba0] sm:$0xff]  ;;  %v14333_v4 = vcombine.high %v841_v22, %v849_v24  ;;  %v14332_v13 = vcombine.low %v841_v22, %v849_v24  ;;  %v16897_v2 = vpop.f32.mrf.mxu1 }
 0x299   :  { %7709 = vmatpush2.bf16.msra.mxu1 %v14124_v28  ;;  %v1105_v42 = vld [vmem:[#allocation5 + $0x1be0] sm:$0xff]  ;;  %18707 = vst [vmem:[#allocation90_spill] sm:$0xff] %v16897_v2 }
 0x29a   :  { %7710 = vmatprep.subr.bf16.mxu1 %v14109_v9  ;;  %v14589_v41 = vcombine.high %v1097_v44, %v1105_v42  ;;  %v825_v56 = vld [vmem:[#allocation5 + $0x1320] sm:$0xff]  ;;  %v14588_v58 = vcombine.low %v1097_v44, %v1105_v42 }
 0x29b   :  { %7638 = vmatpush2.bf16.msra.mxu0 %v13852_v19  ;;  %v833_v57 = vld [vmem:[#allocation5 + $0x1360] sm:$0xff] }
 0x29c   :  { %7639 = vmatprep.subr.bf16.mxu0 %v13837_v23  ;;  %v1081_v40 = vld [vmem:[#allocation5 + $0x1b20] sm:$0xff]  ;;  %v14317_v28 = vcombine.high %v825_v56, %v833_v57 }
 0x29d   :  { %7711 = vmatpush2.bf16.msra.mxu1 %v14108_v10  ;;  %v1089_v32 = vld [vmem:[#allocation5 + $0x1b60] sm:$0xff] }
 0x29e   :  { %7712 = vmatprep.subr.bf16.mxu1 %v14093_v12  ;;  %v14573_v9 = vcombine.high %v1081_v40, %v1089_v32  ;;  %v809_v59 = vld [vmem:[#allocation5 + $0x12a0] sm:$0xff]  ;;  %v14316_v12 = vcombine.low %v825_v56, %v833_v57  ;;  %v14572_v24 = vcombine.low %v1081_v40, %v1089_v32 }
 0x29f   :  { %7640 = vmatpush2.bf16.msra.mxu0 %v13836_v14  ;;  %v817_v27 = vld [vmem:[#allocation5 + $0x12e0] sm:$0xff] }
 0x2a0   :  { %7755 = vmatprep.subr.bf16.mxu0 %v14333_v4  ;;  %v1065_v47 = vld [vmem:[#allocation5 + $0x1aa0] sm:$0xff]  ;;  %v14301_v44 = vcombine.high %v809_v59, %v817_v27  ;;  %v14300_v32 = vcombine.low %v809_v59, %v817_v27 }
 0x2a1   :  { %7713 = vmatpush2.bf16.msra.mxu1 %v14092_v43  ;;  %v1073_v19 = vld [vmem:[#allocation5 + $0x1ae0] sm:$0xff] }
 0x2a2   :  { %7828 = vmatprep.subr.bf16.mxu1 %v14589_v41  ;;  %v7205_v11 = vpop.f32.mrf.mxu0  ;;  %7642 = vmatmul.mubr.bf16.vlgmr.msra.gmra.mxu0 %v16431_v21  ;;  %v14557_v4 = vcombine.high %v1065_v47, %v1073_v19  ;;  %v793_v41 = vld [vmem:[#allocation5 + $0x1220] sm:$0xff] }
 0x2a3   :  { %v7206_v10 = vadd.f32 %v7205_v11, %v16834_v60  ;;  %7756 = vmatpush1.bf16.msra.mxu0 %v14332_v13  ;;  %v801_v2 = vld [vmem:[#allocation5 + $0x1260] sm:$0xff]  ;;  %7651 = vmatprep.mubr.bf16.mxu0 %v16435_v34  ;;  %v14556_v13 = vcombine.low %v1065_v47, %v1073_v19 }
 0x2a4   :  { %v7278_v23 = vpop.f32.mrf.mxu1  ;;  %7715 = vmatmul.mubr.bf16.vlgmr.msra.gmra.mxu1 %v16433_v25  ;;  %v7207_v22 = vpop.f32.mrf.mxu0  ;;  %7757 = vmatprep.subr.bf16.mxu0 %v14317_v28  ;;  %v1049_v11 = vld [vmem:[#allocation5 + $0x1a20] sm:$0xff]  ;;  %v14284_v47 = vcombine.low %v793_v41, %v801_v2 }
 0x2a5   :  { %7829 = vmatpush1.bf16.msra.mxu1 %v14588_v58  ;;  %v7279_v42 = vadd.f32 %v7278_v23, %v7206_v10  ;;  %v7208_v14 = vadd.f32 %v7207_v22, %v16839_v46  ;;  %v1057_v8 = vld [vmem:[#allocation5 + $0x1a60] sm:$0xff]  ;;  %7724 = vmatprep.mubr.bf16.mxu1 %v16438_v37  ;;  %v14285_v58 = vcombine.high %v793_v41, %v801_v2 }
 0x2a6   :  { %v7280_v43 = vpop.f32.mrf.mxu1  ;;  %7830 = vmatprep.subr.bf16.mxu1 %v14573_v9  ;;  %v7209_v60 = vpop.f32.mrf.mxu0  ;;  %v777_v28 = vld [vmem:[#allocation5 + $0x11a0] sm:$0xff]  ;;  %v14541_v23 = vcombine.high %v1049_v11, %v1057_v8 }
 0x2a7   :  { %v16905_v56 = vadd.f32 %v7280_v43, %v7208_v14  ;;  %v7210_v57 = vadd.f32 %v7209_v60, %v16844_v29  ;;  %7758 = vmatpush1.bf16.msra.mxu0 %v14316_v12  ;;  %v785_v22 = vld [vmem:[#allocation5 + $0x11e0] sm:$0xff]  ;;  %v8781_v29 = vmax.f32 %v7279_v42, 0.0 }
 0x2a8   :  { %v7282_v40 = vpop.f32.mrf.mxu1  ;;  %v16908_v46 = vpop.f32.mrf.mxu0  ;;  %7759 = vmatprep.subr.bf16.mxu0 %v14301_v44  ;;  %v1033_v14 = vld [vmem:[#allocation5 + $0x19a0] sm:$0xff]  ;;  %v14269_v44 = vcombine.high %v777_v28, %v785_v22 }
 0x2a9   :  { %18708 = vst [vmem:[#allocation91_spill] sm:$0xff] %v16905_v56  ;;  %7831 = vmatpush1.bf16.msra.mxu1 %v14572_v24  ;;  %18709 = vst [vmem:[#allocation92_spill] sm:$0xff] %v16908_v46  ;;  %v7283_v9 = vadd.f32 %v7282_v40, %v7210_v57  ;;  %v1041_v43 = vld [vmem:[#allocation5 + $0x19e0] sm:$0xff]  ;;  %v14540_v24 = vcombine.low %v1049_v11, %v1057_v8 }
 0x2aa   :  { %v16910_v10 = vpop.f32.mrf.mxu1  ;;  %7832 = vmatprep.subr.bf16.mxu1 %v14557_v4  ;;  %v7215_v56 = vpop.f32.mrf.mxu0  ;;  %7652 = vmatmul.mubr.bf16.gmra.mxu0 %v16442_v50  ;;  %v14525_v4 = vcombine.high %v1033_v14, %v1041_v43  ;;  %v1017_v41 = vld [vmem:[#allocation5 + $0x1920] sm:$0xff] }
 0x2ab   :  { %18710 = vst [vmem:[#allocation93_spill] sm:$0xff] %v16910_v10  ;;  %v8797_v59 = vmax.f32 %v7283_v9, 0.0  ;;  %v7216_v27 = vadd.f32 %v7215_v56, %v16853_v38  ;;  %7760 = vmatpush1.bf16.msra.mxu0 %v14300_v32  ;;  %v761_v9 = vld [vmem:[#allocation5 + $0x1120] sm:$0xff]  ;;  %7661 = vmatprep.mubr.bf16.mxu0 %v16447_v0 }
 0x2ac   :  { %v7288_v12 = vpop.f32.mrf.mxu1  ;;  %7725 = vmatmul.mubr.bf16.gmra.mxu1 %v16445_v54  ;;  %v7217_v19 = vpop.f32.mrf.mxu0  ;;  %7761 = vmatprep.subr.bf16.mxu0 %v14285_v58  ;;  %v769_v38 = vld [vmem:[#allocation5 + $0x1160] sm:$0xff]  ;;  %v14524_v58 = vcombine.low %v1033_v14, %v1041_v43 }
 0x2ad   :  { %7833 = vmatpush1.bf16.msra.mxu1 %v14556_v13  ;;  %v16915_v60 = vpack.c.bf16 %v8797_v59, %v8781_v29  ;;  %v7218_v57 = vadd.f32 %v7217_v19, %v16857_v55  ;;  %v7289_v40 = vadd.f32 %v7288_v12, %v7216_v27  ;;  %v1025_v56 = vld [vmem:[#allocation5 + $0x1960] sm:$0xff]  ;;  %7734 = vmatprep.mubr.bf16.mxu1 %v16450_v3 }
 0x2ae   :  { %v7290_v42 = vpop.f32.mrf.mxu1  ;;  %7834 = vmatprep.subr.bf16.mxu1 %v14541_v23  ;;  %v7219_v2 = vpop.f32.mrf.mxu0  ;;  %v14268_v13 = vcombine.low %v777_v28, %v785_v22  ;;  %v14253_v23 = vcombine.high %v761_v9, %v769_v38  ;;  %v745_v29 = vld [vmem:[#allocation5 + $0x10a0] sm:$0xff]  ;;  %v14509_v12 = vcombine.high %v1017_v41, %v1025_v56  ;;  %v14252_v14 = vcombine.low %v761_v9, %v769_v38 }
 0x2af   :  { %18711 = vst [vmem:[#allocation94_spill] sm:$0xff] %v16915_v60  ;;  %v7220_v8 = vadd.f32 %v7219_v2, %v16861_v39  ;;  %v16921_v11 = vadd.f32 %v7290_v42, %v7218_v57  ;;  %7762 = vmatpush1.bf16.msra.mxu0 %v14284_v47  ;;  %v753_v19 = vld [vmem:[#allocation5 + $0x10e0] sm:$0xff]  ;;  %v8813_v47 = vmax.f32 %v7289_v40, 0.0 }
 0x2b0   :  { %v7292_v32 = vpop.f32.mrf.mxu1  ;;  %v16923_v55 = vpop.f32.mrf.mxu0  ;;  %7763 = vmatprep.subr.bf16.mxu0 %v14269_v44  ;;  %v1001_v60 = vld [vmem:[#allocation5 + $0x18a0] sm:$0xff]  ;;  %v14508_v44 = vcombine.low %v1017_v41, %v1025_v56 }
 0x2b1   :  { %18712 = vst [vmem:[#allocation95_spill] sm:$0xff] %v16921_v11  ;;  %7835 = vmatpush1.bf16.msra.mxu1 %v14540_v24  ;;  %18713 = vst [vmem:[#allocation96_spill] sm:$0xff] %v16923_v55  ;;  %v7293_v59 = vadd.f32 %v7292_v32, %v7220_v8  ;;  %v1009_v39 = vld [vmem:[#allocation5 + $0x18e0] sm:$0xff]  ;;  %v242_v11 = vld [vmem:[#allocation5 + $0xe8] sm:$0xff] }
 0x2b2   :  { %v16925_v27 = vpop.f32.mrf.mxu1  ;;  %7836 = vmatprep.subr.bf16.mxu1 %v14525_v4  ;;  %v7225_v57 = vpop.f32.mrf.mxu0  ;;  %7662 = vmatmul.mubr.bf16.gmra.mxu0 %v16454_v16  ;;  %v14237_v4 = vcombine.high %v745_v29, %v753_v19  ;;  %v14493_v42 = vcombine.high %v1001_v60, %v1009_v39  ;;  %v985_v38 = vld [vmem:[#allocation5 + $0x1820] sm:$0xff]  ;;  %v218_v55 = vld [vmem:[#allocation5 + $0x28] sm:$0xff] }
 0x2b3   :  { %18714 = vst [vmem:[#allocation97_spill] sm:$0xff] %v16925_v27  ;;  %v8829_v28 = vmax.f32 %v7293_v59, 0.0  ;;  %v7226_v22 = vadd.f32 %v7225_v57, %v16870_v31  ;;  %7764 = vmatpush1.bf16.msra.mxu0 %v14268_v13  ;;  %v729_v59 = vld [vmem:[#allocation5 + $0x1020] sm:$0xff]  ;;  %7671 = vmatprep.mubr.bf16.mxu0 %v16459_v30 }
 0x2b4   :  { %v7298_v24 = vpop.f32.mrf.mxu1  ;;  %7735 = vmatmul.mubr.bf16.gmra.mxu1 %v16457_v20  ;;  %v7227_v43 = vpop.f32.mrf.mxu0  ;;  %7765 = vmatprep.subr.bf16.mxu0 %v14253_v23  ;;  %v737_v31 = vld [vmem:[#allocation5 + $0x1060] sm:$0xff]  ;;  %v14236_v23 = vcombine.low %v745_v29, %v753_v19 }
 0x2b5   :  { %7837 = vmatpush1.bf16.msra.mxu1 %v14524_v58  ;;  %v16930_v2 = vpack.c.bf16 %v8829_v28, %v8813_v47  ;;  %v7228_v8 = vadd.f32 %v7227_v43, %v16874_v6  ;;  %v7299_v32 = vadd.f32 %v7298_v24, %v7226_v22  ;;  %v993_v13 = vld [vmem:[#allocation5 + $0x1860] sm:$0xff]  ;;  %7744 = vmatprep.mubr.bf16.mxu1 %v16462_v33 }
 0x2b6   :  { %v7300_v40 = vpop.f32.mrf.mxu1  ;;  %7838 = vmatprep.subr.bf16.mxu1 %v14509_v12  ;;  %v7229_v9 = vpop.f32.mrf.mxu0  ;;  %v14492_v12 = vcombine.low %v1001_v60, %v1009_v39  ;;  %v14221_v57 = vcombine.high %v729_v59, %v737_v31  ;;  %v969_v47 = vld [vmem:[#allocation5 + $0x17a0] sm:$0xff]  ;;  %v14477_v24 = vcombine.high %v985_v38, %v993_v13  ;;  %v14220_v60 = vcombine.low %v729_v59, %v737_v31 }
 0x2b7   :  { %18715 = vst [vmem:[#allocation98_spill] sm:$0xff] %v16930_v2  ;;  %v7230_v41 = vadd.f32 %v7229_v9, %v16878_v35  ;;  %v16936_v56 = vadd.f32 %v7300_v40, %v7228_v8  ;;  %7766 = vmatpush1.bf16.msra.mxu0 %v14252_v14  ;;  %v977_v43 = vld [vmem:[#allocation5 + $0x17e0] sm:$0xff]  ;;  %v8845_v14 = vmax.f32 %v7299_v32, 0.0 }
 0x2b8   :  { %v7302_v58 = vpop.f32.mrf.mxu1  ;;  %v16938_v6 = vpop.f32.mrf.mxu0  ;;  %7767 = vmatprep.subr.bf16.mxu0 %v14237_v4  ;;  %v1225_v2 = vld [vmem:[#allocation5 + $0x1fa0] sm:$0xff]  ;;  %v14476_v4 = vcombine.low %v985_v38, %v993_v13 }
 0x2b9   :  { %18716 = vst [vmem:[#allocation99_spill] sm:$0xff] %v16936_v56  ;;  %7839 = vmatpush1.bf16.msra.mxu1 %v14508_v44  ;;  %18717 = vst [vmem:[#allocation100_spill] sm:$0xff] %v16938_v6  ;;  %v7303_v28 = vadd.f32 %v7302_v58, %v7230_v41  ;;  %v1233_v35 = vld [vmem:[#allocation5 + $0x1fe0] sm:$0xff] }
 0x2ba   :  { %v16940_v22 = vpop.f32.mrf.mxu1  ;;  %7840 = vmatprep.subr.bf16.mxu1 %v14493_v42  ;;  %v7235_v8 = vpop.f32.mrf.mxu0  ;;  %7672 = vmatmul.mubr.bf16.gmra.mxu0 %v16466_v48  ;;  %v14461_v42 = vcombine.high %v969_v47, %v977_v43  ;;  %v14717_v40 = vcombine.high %v1225_v2, %v1233_v35  ;;  %v1209_v31 = vld [vmem:[#allocation5 + $0x1f20] sm:$0xff] }
 0x2bb   :  { %18718 = vst [vmem:[#allocation101_spill] sm:$0xff] %v16940_v22  ;;  %v8861_v29 = vmax.f32 %v7303_v28, 0.0  ;;  %v7236_v19 = vadd.f32 %v7235_v8, %v16886_v18  ;;  %7768 = vmatpush1.bf16.msra.mxu0 %v14236_v23  ;;  %v953_v28 = vld [vmem:[#allocation5 + $0x1720] sm:$0xff]  ;;  %7787 = vmatprep.mubr.bf16.mxu0 %v16471_v1 }
 0x2bc   :  { %v7308_v44 = vpop.f32.mrf.mxu1  ;;  %7745 = vmatmul.mubr.bf16.gmra.mxu1 %v16469_v53  ;;  %v7237_v39 = vpop.f32.mrf.mxu0  ;;  %7769 = vmatprep.subr.bf16.mxu0 %v14221_v57  ;;  %v961_v18 = vld [vmem:[#allocation5 + $0x1760] sm:$0xff]  ;;  %v14460_v57 = vcombine.low %v969_v47, %v977_v43 }
 0x2bd   :  { %7841 = vmatpush1.bf16.msra.mxu1 %v14492_v12  ;;  %v16945_v9 = vpack.c.bf16 %v8861_v29, %v8845_v14  ;;  %v7238_v41 = vadd.f32 %v7237_v39, %v16891_v36  ;;  %v7309_v58 = vadd.f32 %v7308_v44, %v7236_v19  ;;  %v1217_v23 = vld [vmem:[#allocation5 + $0x1f60] sm:$0xff]  ;;  %7860 = vmatprep.mubr.bf16.mxu1 %v16474_v5 }
 0x2be   :  { %v7310_v32 = vpop.f32.mrf.mxu1  ;;  %7842 = vmatprep.subr.bf16.mxu1 %v14477_v24  ;;  %v7239_v59 = vpop.f32.mrf.mxu0  ;;  %v14716_v36 = vcombine.low %v1225_v2, %v1233_v35  ;;  %v14445_v24 = vcombine.high %v953_v28, %v961_v18  ;;  %v14701_v14 = vcombine.high %v1209_v31, %v1217_v23  ;;  %v937_v29 = vld [vmem:[#allocation5 + $0x16a0] sm:$0xff] }
 0x2bf   :  { %18719 = vst [vmem:[#allocation102_spill] sm:$0xff] %v16945_v9  ;;  %v7240_v38 = vadd.f32 %v7239_v59, %v16893_v45  ;;  %v16951_v13 = vadd.f32 %v7310_v32, %v7238_v41  ;;  %7770 = vmatpush1.bf16.msra.mxu0 %v14220_v60  ;;  %v945_v19 = vld [vmem:[#allocation5 + $0x16e0] sm:$0xff]  ;;  %v8877_v9 = vmax.f32 %v7309_v58, 0.0  ;;  %v14444_v45 = vcombine.low %v953_v28, %v961_v18 }
 0x2c0   :  { %v7312_v12 = vpop.f32.mrf.mxu1  ;;  %7771 = vmatprep.subr.bf16.mxu0 %v14461_v42  ;;  %v1193_v44 = vld [vmem:[#allocation5 + $0x1ea0] sm:$0xff]  ;;  %v14700_v60 = vcombine.low %v1209_v31, %v1217_v23  ;;  %v14429_v41 = vcombine.high %v937_v29, %v945_v19 }
 0x2c1   :  { %18720 = vst [vmem:[#allocation103_spill] sm:$0xff] %v16951_v13  ;;  %7843 = vmatpush1.bf16.msra.mxu1 %v14476_v4  ;;  %v7313_v8 = vadd.f32 %v7312_v12, %v7240_v38  ;;  %v1201_v39 = vld [vmem:[#allocation5 + $0x1ee0] sm:$0xff]  ;;  %v266_v13 = vld [vmem:[#allocation5 + $0x1a8] sm:$0xff] }
 0x2c2   :  { %7844 = vmatprep.subr.bf16.mxu1 %v14717_v40  ;;  %v14685_v2 = vcombine.high %v1193_v44, %v1201_v39  ;;  %v921_v43 = vld [vmem:[#allocation5 + $0x1620] sm:$0xff]  ;;  %v14428_v40 = vcombine.low %v937_v29, %v945_v19  ;;  %v14684_v58 = vcombine.low %v1193_v44, %v1201_v39 }
 0x2c3   :  { %v8893_v56 = vmax.f32 %v7313_v8, 0.0  ;;  %7772 = vmatpush2.bf16.msra.mxu0 %v14460_v57  ;;  %v929_v35 = vld [vmem:[#allocation5 + $0x1660] sm:$0xff] }
 0x2c4   :  { %7773 = vmatprep.subr.bf16.mxu0 %v14445_v24  ;;  %v1177_v4 = vld [vmem:[#allocation5 + $0x1e20] sm:$0xff]  ;;  %v14413_v32 = vcombine.high %v921_v43, %v929_v35 }
 0x2c5   :  { %7845 = vmatpush2.bf16.msra.mxu1 %v14716_v36  ;;  %v16953_v47 = vpack.c.bf16 %v8893_v56, %v8877_v9  ;;  %v1185_v42 = vld [vmem:[#allocation5 + $0x1e60] sm:$0xff]  ;;  %v14412_v56 = vcombine.low %v921_v43, %v929_v35 }
 0x2c6   :  { %7846 = vmatprep.subr.bf16.mxu1 %v14701_v14  ;;  %v14669_v28 = vcombine.high %v1177_v4, %v1185_v42  ;;  %v905_v18 = vld [vmem:[#allocation5 + $0x15a0] sm:$0xff]  ;;  %v14668_v9 = vcombine.low %v1177_v4, %v1185_v42 }
 0x2c7   :  { %18721 = vst [vmem:[#allocation104_spill] sm:$0xff] %v16953_v47  ;;  %7774 = vmatpush2.bf16.msra.mxu0 %v14444_v45  ;;  %v913_v59 = vld [vmem:[#allocation5 + $0x15e0] sm:$0xff] }
 0x2c8   :  { %7775 = vmatprep.subr.bf16.mxu0 %v14429_v41  ;;  %v1161_v31 = vld [vmem:[#allocation5 + $0x1da0] sm:$0xff]  ;;  %v14397_v38 = vcombine.high %v905_v18, %v913_v59  ;;  %v14396_v14 = vcombine.low %v905_v18, %v913_v59 }
 0x2c9   :  { %7847 = vmatpush2.bf16.msra.mxu1 %v14700_v60  ;;  %v1169_v23 = vld [vmem:[#allocation5 + $0x1de0] sm:$0xff] }
 0x2ca   :  { %7848 = vmatprep.subr.bf16.mxu1 %v14685_v2  ;;  %v14653_v12 = vcombine.high %v1161_v31, %v1169_v23  ;;  %v889_v57 = vld [vmem:[#allocation5 + $0x1520] sm:$0xff]  ;;  %v14652_v29 = vcombine.low %v1161_v31, %v1169_v23  ;;  %v330_v23 = vld [vmem:[#allocation5 + $0x3a8] sm:$0xff] }
 0x2cb   :  { %7776 = vmatpush2.bf16.msra.mxu0 %v14428_v40  ;;  %v897_v36 = vld [vmem:[#allocation5 + $0x1560] sm:$0xff] }
 0x2cc   :  { %7777 = vmatprep.subr.bf16.mxu0 %v14413_v32  ;;  %v1145_v24 = vld [vmem:[#allocation5 + $0x1d20] sm:$0xff]  ;;  %v14381_v19 = vcombine.high %v889_v57, %v897_v36  ;;  %v14380_v2 = vcombine.low %v889_v57, %v897_v36  ;;  %v18571_v57 = vsub.s32 6, %v16539_v52 }
 0x2cd   :  { %7849 = vmatpush2.bf16.msra.mxu1 %v14684_v58  ;;  %v1153_v8 = vld [vmem:[#allocation5 + $0x1d60] sm:$0xff] }
 0x2ce   :  { %7850 = vmatprep.subr.bf16.mxu1 %v14669_v28  ;;  %v14637_v44 = vcombine.high %v1145_v24, %v1153_v8  ;;  %v873_v39 = vld [vmem:[#allocation5 + $0x14a0] sm:$0xff]  ;;  %v14636_v43 = vcombine.low %v1145_v24, %v1153_v8 }
 0x2cf   :  { %7778 = vmatpush2.bf16.msra.mxu0 %v14412_v56  ;;  %v881_v45 = vld [vmem:[#allocation5 + $0x14e0] sm:$0xff]  ;;  %v338_v56 = vld [vmem:[#allocation5 + $0x3e8] sm:$0xff] }
 0x2d0   :  { %7779 = vmatprep.subr.bf16.mxu0 %v14397_v38  ;;  %v1129_v60 = vld [vmem:[#allocation5 + $0x1ca0] sm:$0xff]  ;;  %v14365_v35 = vcombine.high %v873_v39, %v881_v45  ;;  %v14364_v28 = vcombine.low %v873_v39, %v881_v45  ;;  %v594_v38 = vld [vmem:[#allocation5 + $0xbe8] sm:$0xff]  ;;  %v13823_v24 = vcombine.high %v330_v23, %v338_v56 }
 0x2d1   :  { %7851 = vmatpush2.bf16.msra.mxu1 %v14668_v9  ;;  %v1137_v41 = vld [vmem:[#allocation5 + $0x1ce0] sm:$0xff]  ;;  %v586_v9 = vld [vmem:[#allocation5 + $0xba8] sm:$0xff] }
 0x2d2   :  { %7852 = vmatprep.subr.bf16.mxu1 %v14653_v12  ;;  %v14621_v4 = vcombine.high %v1129_v60, %v1137_v41  ;;  %v857_v42 = vld [vmem:[#allocation5 + $0x1420] sm:$0xff]  ;;  %v14620_v18 = vcombine.low %v1129_v60, %v1137_v41  ;;  %v14079_v8 = vcombine.high %v586_v9, %v594_v38  ;;  %v578_v39 = vld [vmem:[#allocation5 + $0xb68] sm:$0xff]  ;;  %v13822_v41 = vcombine.low %v330_v23, %v338_v56 }
 0x2d3   :  { %7780 = vmatpush2.bf16.msra.mxu0 %v14396_v14  ;;  %v865_v40 = vld [vmem:[#allocation5 + $0x1460] sm:$0xff]  ;;  %v18570_v14 = vsub.s32 7, %v16539_v52 }
 0x2d4   :  { %7781 = vmatprep.subr.bf16.mxu0 %v14381_v19  ;;  %v1113_v58 = vld [vmem:[#allocation5 + $0x1c20] sm:$0xff]  ;;  %v14349_v59 = vcombine.high %v857_v42, %v865_v40  ;;  %v14348_v12 = vcombine.low %v857_v42, %v865_v40  ;;  %v322_v19 = vld [vmem:[#allocation5 + $0x368] sm:$0xff] }
 0x2d5   :  { %7853 = vmatpush2.bf16.msra.mxu1 %v14652_v29  ;;  %v1121_v32 = vld [vmem:[#allocation5 + $0x1c60] sm:$0xff]  ;;  %v314_v29 = vld [vmem:[#allocation5 + $0x328] sm:$0xff] }
 0x2d6   :  { %7854 = vmatprep.subr.bf16.mxu1 %v14637_v44  ;;  %v14605_v31 = vcombine.high %v1113_v58, %v1121_v32  ;;  %v14604_v36 = vcombine.low %v1113_v58, %v1121_v32  ;;  %v570_v44 = vld [vmem:[#allocation5 + $0xb28] sm:$0xff]  ;;  %v16166_v45 = vld [vmem:[#allocation7] sm:$0xff]  ;;  %v13806_v56 = vcombine.low %v314_v29, %v322_v19 }
 0x2d7   :  { %7782 = vmatpush2.bf16.msra.mxu0 %v14380_v2  ;;  %v16959_v60 = vrot.slane %v16166_v45, %v18571_v57  ;;  %v16961_v2 = vpop.f32.mrf.mxu0  ;;  %v16967_v42 = vrot.slane %v16166_v45, %v18570_v14  ;;  %v14063_v40 = vcombine.high %v570_v44, %v578_v39  ;;  %v298_v58 = vld [vmem:[#allocation5 + $0x2a8] sm:$0xff] }
 0x2d8   :  { %7783 = vmatprep.subr.bf16.mxu0 %v14365_v35  ;;  %18722 = vst [vmem:[#allocation105_spill] sm:$0xff] %v16961_v2  ;;  %v13807_v35 = vcombine.high %v314_v29, %v322_v19  ;;  %v306_v32 = vld [vmem:[#allocation5 + $0x2e8] sm:$0xff] }
 0x2d9   :  { %7855 = vmatpush2.bf16.msra.mxu1 %v14636_v43  ;;  %v14078_v43 = vcombine.low %v586_v9, %v594_v38  ;;  %18724 = vst [vmem:[#allocation107_spill] sm:$0xff] %v16967_v42  ;;  %v14062_v38 = vcombine.low %v570_v44, %v578_v39  ;;  %v290_v14 = vld [vmem:[#allocation5 + $0x268] sm:$0xff] }
 0x2da   :  { %7856 = vmatprep.subr.bf16.mxu1 %v14621_v4  ;;  %v16963_v4 = vpop.f32.mrf.mxu1  ;;  %v538_v29 = vld [vmem:[#allocation5 + $0xa28] sm:$0xff] }
 0x2db   :  { %7784 = vmatpush2.bf16.msra.mxu0 %v14364_v28  ;;  %18723 = vst [vmem:[#allocation106_spill] sm:$0xff] %v16963_v4  ;;  %v546_v19 = vld [vmem:[#allocation5 + $0xa68] sm:$0xff] }
 0x2dc   :  { %7785 = vmatprep.subr.bf16.mxu0 %v14349_v59  ;;  %v562_v59 = vld [vmem:[#allocation5 + $0xae8] sm:$0xff]  ;;  %v14031_v47 = vcombine.high %v538_v29, %v546_v19 }
 0x2dd   :  { %7857 = vmatpush2.bf16.msra.mxu1 %v14620_v18  ;;  %v554_v18 = vld [vmem:[#allocation5 + $0xaa8] sm:$0xff] }
 0x2de   :  { %7858 = vmatprep.subr.bf16.mxu1 %v14605_v31  ;;  %v14047_v45 = vcombine.high %v554_v18, %v562_v59 }
 0x2df   :  { %7786 = vmatpush2.bf16.msra.mxu0 %v14348_v12  ;;  %v13791_v12 = vcombine.high %v298_v58, %v306_v32 }
 0x2e0   :  { %7901 = vmatprep.subr.bf16.mxu0 %v13823_v24 }
 0x2e1   :  { %7859 = vmatpush2.bf16.msra.mxu1 %v14604_v36 }
 0x2e2   :  { %7974 = vmatprep.subr.bf16.mxu1 %v14079_v8  ;;  %v7351_v28 = vpop.f32.mrf.mxu0  ;;  %7788 = vmatmul.mubr.bf16.vlgmr.msra.gmra.mxu0 %v16479_v49 }
 0x2e3   :  { %v7352_v31 = vadd.f32 %v7351_v28, %v16959_v60  ;;  %7902 = vmatpush1.bf16.msra.mxu0 %v13822_v41  ;;  %7797 = vmatprep.mubr.bf16.mxu0 %v16483_v61  ;;  %v282_v28 = vld [vmem:[#allocation5 + $0x228] sm:$0xff] }
 0x2e4   :  { %v7424_v23 = vpop.f32.mrf.mxu1  ;;  %7861 = vmatmul.mubr.bf16.vlgmr.msra.gmra.mxu1 %v16481_v51  ;;  %v7353_v9 = vpop.f32.mrf.mxu0  ;;  %7903 = vmatprep.subr.bf16.mxu0 %v13807_v35 }
 0x2e5   :  { %7975 = vmatpush1.bf16.msra.mxu1 %v14078_v43  ;;  %v16972_v36 = vadd.f32 %v7424_v23, %v7352_v31  ;;  %v7354_v24 = vadd.f32 %v7353_v9, %v16967_v42  ;;  %7870 = vmatprep.mubr.bf16.mxu1 %v16486_v7  ;;  %v13790_v43 = vcombine.low %v298_v58, %v306_v32 }
 0x2e6   :  { %v7426_v8 = vpop.f32.mrf.mxu1  ;;  %7976 = vmatprep.subr.bf16.mxu1 %v14063_v40  ;;  %v7355_v57 = vpop.f32.mrf.mxu0  ;;  %v14046_v40 = vcombine.low %v554_v18, %v562_v59  ;;  %v13775_v31 = vcombine.high %v282_v28, %v290_v14  ;;  %v13774_v58 = vcombine.low %v282_v28, %v290_v14  ;;  %v14030_v59 = vcombine.low %v538_v29, %v546_v19  ;;  %v506_v14 = vld [vmem:[#allocation5 + $0x928] sm:$0xff] }
 0x2e7   :  { %v16977_v41 = vadd.f32 %v7426_v8, %v7354_v24  ;;  %v7356_v44 = vadd.f32 %v7355_v57, %v16959_v60  ;;  %7904 = vmatpush1.bf16.msra.mxu0 %v13806_v56  ;;  %v274_v24 = vld [vmem:[#allocation5 + $0x1e8] sm:$0xff] }
 0x2e8   :  { %v7428_v39 = vpop.f32.mrf.mxu1  ;;  %v16980_v35 = vpop.f32.mrf.mxu0  ;;  %7905 = vmatprep.subr.bf16.mxu0 %v13791_v12  ;;  %v522_v57 = vld [vmem:[#allocation5 + $0x9a8] sm:$0xff]  ;;  %v13758_v29 = vcombine.low %v266_v13, %v274_v24 }
 0x2e9   :  { %7977 = vmatpush1.bf16.msra.mxu1 %v14062_v38  ;;  %18725 = vst [vmem:[#allocation108_spill] sm:$0xff] %v16980_v35  ;;  %v16982_v23 = vadd.f32 %v7428_v39, %v7356_v44  ;;  %v530_v8 = vld [vmem:[#allocation5 + $0x9e8] sm:$0xff]  ;;  %v13759_v38 = vcombine.high %v266_v13, %v274_v24  ;;  %v18729_v13 = vld [vmem:[#allocation24_spill] sm:$0xff] }
 0x2ea   :  { %v16984_v9 = vpop.f32.mrf.mxu1  ;;  %7978 = vmatprep.subr.bf16.mxu1 %v14047_v45  ;;  %7798 = vmatmul.mubr.bf16.gmra.mxu0 %v16490_v26  ;;  %v7361_v56 = vpop.f32.mrf.mxu0  ;;  %v14015_v45 = vcombine.high %v522_v57, %v530_v8  ;;  %v250_v44 = vld [vmem:[#allocation5 + $0x128] sm:$0xff] }
 0x2eb   :  { %18726 = vst [vmem:[#allocation109_spill] sm:$0xff] %v16984_v9  ;;  %7906 = vmatpush1.bf16.msra.mxu0 %v13790_v43  ;;  %v7362_v32 = vadd.f32 %v7361_v56, %v16959_v60  ;;  %7807 = vmatprep.mubr.bf16.mxu0 %v18664_v15  ;;  %v258_v39 = vld [vmem:[#allocation5 + $0x168] sm:$0xff]  ;;  %v14014_v56 = vcombine.low %v522_v57, %v530_v8 }
 0x2ec   :  { %7871 = vmatmul.mubr.bf16.gmra.mxu1 %v18663_v17  ;;  %v7434_v18 = vpop.f32.mrf.mxu1  ;;  %7907 = vmatprep.subr.bf16.mxu0 %v13775_v31  ;;  %v7363_v12 = vpop.f32.mrf.mxu0  ;;  %v514_v28 = vld [vmem:[#allocation5 + $0x968] sm:$0xff]  ;;  %v13743_v22 = vcombine.high %v250_v44, %v258_v39  ;;  %v13742_v57 = vcombine.low %v250_v44, %v258_v39 }
 0x2ed   :  { %7979 = vmatpush1.bf16.msra.mxu1 %v14046_v40  ;;  %v7364_v4 = vadd.f32 %v7363_v12, %v16967_v42  ;;  %v16991_v43 = vadd.f32 %v7434_v18, %v7362_v32  ;;  %7880 = vmatprep.mubr.bf16.mxu1 %v18665_v62  ;;  %v13999_v32 = vcombine.high %v506_v14, %v514_v28  ;;  %v234_v18 = vld [vmem:[#allocation5 + $0xa8] sm:$0xff] }
 0x2ee   :  { %7980 = vmatprep.subr.bf16.mxu1 %v14031_v47  ;;  %v7436_v2 = vpop.f32.mrf.mxu1  ;;  %v7365_v40 = vpop.f32.mrf.mxu0  ;;  %v490_v24 = vld [vmem:[#allocation5 + $0x8a8] sm:$0xff] }
 0x2ef   :  { %7908 = vmatpush1.bf16.msra.mxu0 %v13774_v58  ;;  %v7366_v19 = vadd.f32 %v7365_v40, %v16959_v60  ;;  %v16995_v47 = vadd.f32 %v7436_v2, %v7364_v4  ;;  %v498_v2 = vld [vmem:[#allocation5 + $0x8e8] sm:$0xff]  ;;  %v18730_v58 = vld [vmem:[#allocation25_spill] sm:$0xff] }
 0x2f0   :  { %v7438_v31 = vpop.f32.mrf.mxu1  ;;  %7909 = vmatprep.subr.bf16.mxu0 %v13759_v38  ;;  %v16997_v12 = vpop.f32.mrf.mxu0  ;;  %v13998_v38 = vcombine.low %v506_v14, %v514_v28  ;;  %v18732_v44 = vld [vmem:[#allocation27_spill] sm:$0xff]  ;;  %v13982_v9 = vcombine.low %v490_v24, %v498_v2 }
 0x2f1   :  { %7981 = vmatpush1.bf16.msra.mxu1 %v14030_v59  ;;  %18727 = vst [vmem:[#allocation110_spill] sm:$0xff] %v16997_v12  ;;  %v16999_v6 = vadd.f32 %v7438_v31, %v7366_v19  ;;  %v18731_v19 = vld [vmem:[#allocation26_spill] sm:$0xff]  ;;  %v13983_v31 = vcombine.high %v490_v24, %v498_v2 }
 0x2f2   :  { %7982 = vmatprep.subr.bf16.mxu1 %v14015_v45  ;;  %v17001_v27 = vpop.f32.mrf.mxu1  ;;  %7808 = vmatmul.mubr.bf16.gmra.mxu0 %v18729_v13  ;;  %v7371_v4 = vpop.f32.mrf.mxu0  ;;  %v13727_v45 = vcombine.high %v234_v18, %v242_v11  ;;  %v474_v39 = vld [vmem:[#allocation5 + $0x828] sm:$0xff] }
 0x2f3   :  { %18728 = vst [vmem:[#allocation111_spill] sm:$0xff] %v17001_v27  ;;  %7910 = vmatpush1.bf16.msra.mxu0 %v13758_v29  ;;  %v7372_v8 = vadd.f32 %v7371_v4, %v16959_v60  ;;  %7817 = vmatprep.mubr.bf16.mxu0 %v18731_v19  ;;  %v226_v27 = vld [vmem:[#allocation5 + $0x68] sm:$0xff]  ;;  %v18737_v19 = vld [vmem:[#allocation20_spill] sm:$0xff] }
 0x2f4   :  { %7881 = vmatmul.mubr.bf16.gmra.mxu1 %v18730_v58  ;;  %v7444_v59 = vpop.f32.mrf.mxu1  ;;  %7911 = vmatprep.subr.bf16.mxu0 %v13743_v22  ;;  %v7373_v40 = vpop.f32.mrf.mxu0  ;;  %v482_v4 = vld [vmem:[#allocation5 + $0x868] sm:$0xff]  ;;  %v13726_v22 = vcombine.low %v234_v18, %v242_v11  ;;  %v13711_v46 = vcombine.high %v218_v55, %v226_v27  ;;  %v18735_v11 = vld [vmem:[#allocation28_spill] sm:$0xff]  ;;  %v13710_v24 = vcombine.low %v218_v55, %v226_v27 }
 0x2f5   :  { %7983 = vmatpush1.bf16.msra.mxu1 %v14014_v56  ;;  %v7374_v12 = vadd.f32 %v7373_v40, %v16967_v42  ;;  %v17008_v29 = vadd.f32 %v7444_v59, %v7372_v8  ;;  %7890 = vmatprep.mubr.bf16.mxu1 %v18732_v44  ;;  %v13967_v8 = vcombine.high %v474_v39, %v482_v4  ;;  %v458_v59 = vld [vmem:[#allocation5 + $0x7a8] sm:$0xff] }
 0x2f6   :  { %7984 = vmatprep.subr.bf16.mxu1 %v13999_v32  ;;  %v7446_v10 = vpop.f32.mrf.mxu1  ;;  %v7375_v56 = vpop.f32.mrf.mxu0  ;;  %v466_v35 = vld [vmem:[#allocation5 + $0x7e8] sm:$0xff] }
 0x2f7   :  { %7912 = vmatpush1.bf16.msra.mxu0 %v13742_v57  ;;  %v7376_v14 = vadd.f32 %v7375_v56, %v16959_v60  ;;  %v17012_v28 = vadd.f32 %v7446_v10, %v7374_v12  ;;  %v714_v18 = vld [vmem:[#allocation5 + $0xfa8] sm:$0xff]  ;;  %v18736_v57 = vld [vmem:[#allocation29_spill] sm:$0xff] }
 0x2f8   :  { %v7448_v32 = vpop.f32.mrf.mxu1  ;;  %7913 = vmatprep.subr.bf16.mxu0 %v13727_v45  ;;  %v17014_v40 = vpop.f32.mrf.mxu0  ;;  %v722_v10 = vld [vmem:[#allocation5 + $0xfe8] sm:$0xff]  ;;  %v13966_v45 = vcombine.low %v474_v39, %v482_v4 }
 0x2f9   :  { %7985 = vmatpush1.bf16.msra.mxu1 %v13998_v38  ;;  %18733 = vst [vmem:[#allocation24_spill] sm:$0xff] %v17014_v40  ;;  %v17016_v52 = vadd.f32 %v7448_v32, %v7376_v14  ;;  %v14207_v14 = vcombine.high %v714_v18, %v722_v10  ;;  %v442_v32 = vld [vmem:[#allocation5 + $0x728] sm:$0xff]  ;;  %v14206_v4 = vcombine.low %v714_v18, %v722_v10 }
 0x2fa   :  { %7986 = vmatprep.subr.bf16.mxu1 %v13983_v31  ;;  %v17018_v44 = vpop.f32.mrf.mxu1  ;;  %7818 = vmatmul.mubr.bf16.gmra.mxu0 %v18735_v11  ;;  %v7381_v12 = vpop.f32.mrf.mxu0  ;;  %v13951_v31 = vcombine.high %v458_v59, %v466_v35  ;;  %v698_v55 = vld [vmem:[#allocation5 + $0xf28] sm:$0xff] }
 0x2fb   :  { %18734 = vst [vmem:[#allocation112_spill] sm:$0xff] %v17018_v44  ;;  %7914 = vmatpush1.bf16.msra.mxu0 %v13726_v22  ;;  %v7382_v2 = vadd.f32 %v7381_v12, %v16959_v60  ;;  %v450_v44 = vld [vmem:[#allocation5 + $0x768] sm:$0xff]  ;;  %7933 = vmatprep.mubr.bf16.mxu0 %v18737_v19 }
 0x2fc   :  { %7891 = vmatmul.mubr.bf16.gmra.mxu1 %v18736_v57  ;;  %v7454_v38 = vpop.f32.mrf.mxu1  ;;  %7915 = vmatprep.subr.bf16.mxu0 %v13711_v46  ;;  %v7383_v56 = vpop.f32.mrf.mxu0  ;;  %v706_v27 = vld [vmem:[#allocation5 + $0xf68] sm:$0xff]  ;;  %v13950_v46 = vcombine.low %v458_v59, %v466_v35 }
 0x2fd   :  { %7987 = vmatpush1.bf16.msra.mxu1 %v13982_v9  ;;  %v7384_v40 = vadd.f32 %v7383_v56, %v16967_v42  ;;  %v17024_v11 = vadd.f32 %v7454_v38, %v7382_v2  ;;  %8006 = vmatprep.mubr.bf16.mxu1 %v16427_v63  ;;  %v14191_v38 = vcombine.high %v698_v55, %v706_v27  ;;  %v426_v56 = vld [vmem:[#allocation5 + $0x6a8] sm:$0xff] }
 0x2fe   :  { %7988 = vmatprep.subr.bf16.mxu1 %v13967_v8  ;;  %v7456_v22 = vpop.f32.mrf.mxu1  ;;  %v7385_v12 = vpop.f32.mrf.mxu0  ;;  %v13935_v8 = vcombine.high %v442_v32, %v450_v44  ;;  %v434_v42 = vld [vmem:[#allocation5 + $0x6e8] sm:$0xff] }
 0x2ff   :  { %7916 = vmatpush1.bf16.msra.mxu0 %v13710_v24  ;;  %v7386_v9 = vadd.f32 %v7385_v12, %v16959_v60  ;;  %v17029_v39 = vadd.f32 %v7456_v22, %v7384_v40  ;;  %v682_v57 = vld [vmem:[#allocation5 + $0xea8] sm:$0xff]  ;;  %v13934_v24 = vcombine.low %v442_v32, %v450_v44  ;;  %v14190_v60 = vcombine.low %v698_v55, %v706_v27 }
 0x300   :  { %7917 = vmatprep.subr.bf16.mxu0 %v13951_v31  ;;  %v7458_v2 = vpop.f32.mrf.mxu1  ;;  %v690_v58 = vld [vmem:[#allocation5 + $0xee8] sm:$0xff]  ;;  %v13919_v35 = vcombine.high %v426_v56, %v434_v42  ;;  %v13918_v31 = vcombine.low %v426_v56, %v434_v42 }
 0x301   :  { %7989 = vmatpush1.bf16.msra.mxu1 %v13966_v45  ;;  %v17031_v19 = vadd.f32 %v7458_v2, %v7386_v9  ;;  %v14175_v40 = vcombine.high %v682_v57, %v690_v58  ;;  %v410_v59 = vld [vmem:[#allocation5 + $0x628] sm:$0xff] }
 0x302   :  { %7990 = vmatprep.subr.bf16.mxu1 %v14207_v14  ;;  %v418_v18 = vld [vmem:[#allocation5 + $0x668] sm:$0xff]  ;;  %v14174_v14 = vcombine.low %v682_v57, %v690_v58 }
 0x303   :  { %7918 = vmatpush2.bf16.msra.mxu0 %v13950_v46  ;;  %v666_v10 = vld [vmem:[#allocation5 + $0xe28] sm:$0xff]  ;;  %v13903_v22 = vcombine.high %v410_v59, %v418_v18  ;;  %v13902_v55 = vcombine.low %v410_v59, %v418_v18 }
 0x304   :  { %7919 = vmatprep.subr.bf16.mxu0 %v13935_v8  ;;  %v674_v45 = vld [vmem:[#allocation5 + $0xe68] sm:$0xff] }
 0x305   :  { %7991 = vmatpush2.bf16.msra.mxu1 %v14206_v4  ;;  %v14159_v12 = vcombine.high %v666_v10, %v674_v45  ;;  %v394_v46 = vld [vmem:[#allocation5 + $0x5a8] sm:$0xff]  ;;  %v14158_v27 = vcombine.low %v666_v10, %v674_v45 }
 0x306   :  { %7992 = vmatprep.subr.bf16.mxu1 %v14191_v38  ;;  %v402_v44 = vld [vmem:[#allocation5 + $0x5e8] sm:$0xff] }
 0x307   :  { %7920 = vmatpush2.bf16.msra.mxu0 %v13934_v24  ;;  %v650_v32 = vld [vmem:[#allocation5 + $0xda8] sm:$0xff]  ;;  %v13887_v4 = vcombine.high %v394_v46, %v402_v44  ;;  %v13886_v58 = vcombine.low %v394_v46, %v402_v44 }
 0x308   :  { %7921 = vmatprep.subr.bf16.mxu0 %v13919_v35  ;;  %v658_v9 = vld [vmem:[#allocation5 + $0xde8] sm:$0xff] }
 0x309   :  { %7993 = vmatpush2.bf16.msra.mxu1 %v14190_v60  ;;  %v14143_v8 = vcombine.high %v650_v32, %v658_v9  ;;  %v378_v2 = vld [vmem:[#allocation5 + $0x528] sm:$0xff]  ;;  %v14142_v57 = vcombine.low %v650_v32, %v658_v9 }
 0x30a   :  { %7994 = vmatprep.subr.bf16.mxu1 %v14175_v40  ;;  %v386_v42 = vld [vmem:[#allocation5 + $0x568] sm:$0xff] }
 0x30b   :  { %7922 = vmatpush2.bf16.msra.mxu0 %v13918_v31  ;;  %v634_v38 = vld [vmem:[#allocation5 + $0xd28] sm:$0xff]  ;;  %v13871_v24 = vcombine.high %v378_v2, %v386_v42  ;;  %v13870_v10 = vcombine.low %v378_v2, %v386_v42 }
 0x30c   :  { %7923 = vmatprep.subr.bf16.mxu0 %v13903_v22  ;;  %v642_v56 = vld [vmem:[#allocation5 + $0xd68] sm:$0xff] }
 0x30d   :  { %7995 = vmatpush2.bf16.msra.mxu1 %v14174_v14  ;;  %v14127_v60 = vcombine.high %v634_v38, %v642_v56  ;;  %v362_v35 = vld [vmem:[#allocation5 + $0x4a8] sm:$0xff]  ;;  %v14126_v45 = vcombine.low %v634_v38, %v642_v56 }
 0x30e   :  { %7996 = vmatprep.subr.bf16.mxu1 %v14159_v12  ;;  %v370_v40 = vld [vmem:[#allocation5 + $0x4e8] sm:$0xff] }
 0x30f   :  { %7924 = vmatpush2.bf16.msra.mxu0 %v13902_v55  ;;  %v618_v59 = vld [vmem:[#allocation5 + $0xca8] sm:$0xff]  ;;  %v13855_v31 = vcombine.high %v362_v35, %v370_v40  ;;  %v13854_v32 = vcombine.low %v362_v35, %v370_v40 }
 0x310   :  { %7925 = vmatprep.subr.bf16.mxu0 %v13887_v4  ;;  %v626_v18 = vld [vmem:[#allocation5 + $0xce8] sm:$0xff] }
 0x311   :  { %7997 = vmatpush2.bf16.msra.mxu1 %v14158_v27  ;;  %v14111_v14 = vcombine.high %v618_v59, %v626_v18  ;;  %v346_v22 = vld [vmem:[#allocation5 + $0x428] sm:$0xff]  ;;  %v14110_v9 = vcombine.low %v618_v59, %v626_v18  ;;  %v17033_v18 = vpop.f32.mrf.mxu0 }
 0x312   :  { %7998 = vmatprep.subr.bf16.mxu1 %v14143_v8  ;;  %v354_v12 = vld [vmem:[#allocation5 + $0x468] sm:$0xff]  ;;  %18738 = vst [vmem:[#allocation113_spill] sm:$0xff] %v17033_v18 }
 0x313   :  { %7926 = vmatpush2.bf16.msra.mxu0 %v13886_v58  ;;  %v602_v46 = vld [vmem:[#allocation5 + $0xc28] sm:$0xff]  ;;  %v13839_v55 = vcombine.high %v346_v22, %v354_v12  ;;  %v13838_v38 = vcombine.low %v346_v22, %v354_v12 }
 0x314   :  { %7927 = vmatprep.subr.bf16.mxu0 %v13871_v24  ;;  %v610_v44 = vld [vmem:[#allocation5 + $0xc68] sm:$0xff] }
 0x315   :  { %7999 = vmatpush2.bf16.msra.mxu1 %v14142_v57  ;;  %v14095_v27 = vcombine.high %v602_v46, %v610_v44  ;;  %v842_v4 = vld [vmem:[#allocation5 + $0x13a8] sm:$0xff]  ;;  %v14094_v56 = vcombine.low %v602_v46, %v610_v44 }
 0x316   :  { %8000 = vmatprep.subr.bf16.mxu1 %v14127_v60  ;;  %v850_v8 = vld [vmem:[#allocation5 + $0x13e8] sm:$0xff] }
 0x317   :  { %7928 = vmatpush2.bf16.msra.mxu0 %v13870_v10  ;;  %v1098_v2 = vld [vmem:[#allocation5 + $0x1ba8] sm:$0xff]  ;;  %v14335_v58 = vcombine.high %v842_v4, %v850_v8  ;;  %v14334_v59 = vcombine.low %v842_v4, %v850_v8 }
 0x318   :  { %7929 = vmatprep.subr.bf16.mxu0 %v13855_v31  ;;  %v1106_v42 = vld [vmem:[#allocation5 + $0x1be8] sm:$0xff]  ;;  %v17035_v31 = vpop.f32.mrf.mxu1 }
 0x319   :  { %8001 = vmatpush2.bf16.msra.mxu1 %v14126_v45  ;;  %v14591_v57 = vcombine.high %v1098_v2, %v1106_v42  ;;  %v826_v24 = vld [vmem:[#allocation5 + $0x1328] sm:$0xff]  ;;  %v14590_v10 = vcombine.low %v1098_v2, %v1106_v42  ;;  %18739 = vst [vmem:[#allocation114_spill] sm:$0xff] %v17035_v31 }
 0x31a   :  { %8002 = vmatprep.subr.bf16.mxu1 %v14111_v14  ;;  %v834_v60 = vld [vmem:[#allocation5 + $0x1368] sm:$0xff] }
 0x31b   :  { %7930 = vmatpush2.bf16.msra.mxu0 %v13854_v32  ;;  %v1082_v35 = vld [vmem:[#allocation5 + $0x1b28] sm:$0xff]  ;;  %v14319_v45 = vcombine.high %v826_v24, %v834_v60 }
 0x31c   :  { %7931 = vmatprep.subr.bf16.mxu0 %v13839_v55  ;;  %v1090_v40 = vld [vmem:[#allocation5 + $0x1b68] sm:$0xff] }
 0x31d   :  { %8003 = vmatpush2.bf16.msra.mxu1 %v14110_v9  ;;  %v14575_v14 = vcombine.high %v1082_v35, %v1090_v40  ;;  %v810_v22 = vld [vmem:[#allocation5 + $0x12a8] sm:$0xff]  ;;  %v14574_v8 = vcombine.low %v1082_v35, %v1090_v40 }
 0x31e   :  { %8004 = vmatprep.subr.bf16.mxu1 %v14095_v27  ;;  %v818_v12 = vld [vmem:[#allocation5 + $0x12e8] sm:$0xff]  ;;  %v14318_v27 = vcombine.low %v826_v24, %v834_v60 }
 0x31f   :  { %7932 = vmatpush2.bf16.msra.mxu0 %v13838_v38  ;;  %v1066_v44 = vld [vmem:[#allocation5 + $0x1aa8] sm:$0xff]  ;;  %v14303_v2 = vcombine.high %v810_v22, %v818_v12  ;;  %v14302_v40 = vcombine.low %v810_v22, %v818_v12 }
 0x320   :  { %8047 = vmatprep.subr.bf16.mxu0 %v14335_v58  ;;  %v1074_v32 = vld [vmem:[#allocation5 + $0x1ae8] sm:$0xff] }
 0x321   :  { %8005 = vmatpush2.bf16.msra.mxu1 %v14094_v56  ;;  %v14559_v58 = vcombine.high %v1066_v44, %v1074_v32  ;;  %v802_v31 = vld [vmem:[#allocation5 + $0x1268] sm:$0xff] }
 0x322   :  { %8120 = vmatprep.subr.bf16.mxu1 %v14591_v57  ;;  %v7497_v46 = vpop.f32.mrf.mxu0  ;;  %7934 = vmatmul.mubr.bf16.vlgmr.msra.gmra.mxu0 %v16431_v21  ;;  %v794_v57 = vld [vmem:[#allocation5 + $0x1228] sm:$0xff] }
 0x323   :  { %v7498_v9 = vadd.f32 %v7497_v46, %v16972_v36  ;;  %8048 = vmatpush1.bf16.msra.mxu0 %v14334_v59  ;;  %7943 = vmatprep.mubr.bf16.mxu0 %v16435_v34  ;;  %v1050_v46 = vld [vmem:[#allocation5 + $0x1a28] sm:$0xff]  ;;  %v14558_v59 = vcombine.low %v1066_v44, %v1074_v32  ;;  %v14286_v44 = vcombine.low %v794_v57, %v802_v31 }
 0x324   :  { %v7570_v55 = vpop.f32.mrf.mxu1  ;;  %8007 = vmatmul.mubr.bf16.vlgmr.msra.gmra.mxu1 %v16433_v25  ;;  %v7499_v4 = vpop.f32.mrf.mxu0  ;;  %8049 = vmatprep.subr.bf16.mxu0 %v14319_v45  ;;  %v1058_v18 = vld [vmem:[#allocation5 + $0x1a68] sm:$0xff] }
 0x325   :  { %8121 = vmatpush1.bf16.msra.mxu1 %v14590_v10  ;;  %v7571_v42 = vadd.f32 %v7570_v55, %v7498_v9  ;;  %v7500_v38 = vadd.f32 %v7499_v4, %v16977_v41  ;;  %8016 = vmatprep.mubr.bf16.mxu1 %v16438_v37  ;;  %v14287_v10 = vcombine.high %v794_v57, %v802_v31  ;;  %v778_v45 = vld [vmem:[#allocation5 + $0x11a8] sm:$0xff] }
 0x326   :  { %v7572_v56 = vpop.f32.mrf.mxu1  ;;  %8122 = vmatprep.subr.bf16.mxu1 %v14575_v14  ;;  %v7501_v36 = vpop.f32.mrf.mxu0  ;;  %v14543_v55 = vcombine.high %v1050_v46, %v1058_v18  ;;  %v786_v4 = vld [vmem:[#allocation5 + $0x11e8] sm:$0xff] }
 0x327   :  { %v17043_v24 = vadd.f32 %v7572_v56, %v7500_v38  ;;  %v7502_v60 = vadd.f32 %v7501_v36, %v16982_v23  ;;  %8050 = vmatpush1.bf16.msra.mxu0 %v14318_v27  ;;  %v1034_v38 = vld [vmem:[#allocation5 + $0x19a8] sm:$0xff]  ;;  %v8783_v23 = vmax.f32 %v7571_v42, 0.0 }
 0x328   :  { %v7574_v35 = vpop.f32.mrf.mxu1  ;;  %v17046_v41 = vpop.f32.mrf.mxu0  ;;  %8051 = vmatprep.subr.bf16.mxu0 %v14303_v2  ;;  %v1042_v56 = vld [vmem:[#allocation5 + $0x19e8] sm:$0xff]  ;;  %v14271_v2 = vcombine.high %v778_v45, %v786_v4 }
 0x329   :  { %18740 = vst [vmem:[#allocation115_spill] sm:$0xff] %v17043_v24  ;;  %8123 = vmatpush1.bf16.msra.mxu1 %v14574_v8  ;;  %18741 = vst [vmem:[#allocation116_spill] sm:$0xff] %v17046_v41  ;;  %v7575_v14 = vadd.f32 %v7574_v35, %v7502_v60  ;;  %v14542_v8 = vcombine.low %v1050_v46, %v1058_v18  ;;  %v1018_v57 = vld [vmem:[#allocation5 + $0x1928] sm:$0xff] }
 0x32a   :  { %v17048_v9 = vpop.f32.mrf.mxu1  ;;  %8124 = vmatprep.subr.bf16.mxu1 %v14559_v58  ;;  %v7507_v24 = vpop.f32.mrf.mxu0  ;;  %7944 = vmatmul.mubr.bf16.gmra.mxu0 %v16442_v50  ;;  %v14527_v58 = vcombine.high %v1034_v38, %v1042_v56 }
 0x32b   :  { %18742 = vst [vmem:[#allocation117_spill] sm:$0xff] %v17048_v9  ;;  %v8799_v22 = vmax.f32 %v7575_v14, 0.0  ;;  %v7508_v12 = vadd.f32 %v7507_v24, %v16991_v43  ;;  %8052 = vmatpush1.bf16.msra.mxu0 %v14302_v40  ;;  %v762_v14 = vld [vmem:[#allocation5 + $0x1128] sm:$0xff]  ;;  %7953 = vmatprep.mubr.bf16.mxu0 %v16447_v0  ;;  %v467_v9 = vld [vmem:[#allocation5 + $0x7f0] sm:$0xff] }
 0x32c   :  { %v7580_v27 = vpop.f32.mrf.mxu1  ;;  %8017 = vmatmul.mubr.bf16.gmra.mxu1 %v16445_v54  ;;  %v7509_v32 = vpop.f32.mrf.mxu0  ;;  %8053 = vmatprep.subr.bf16.mxu0 %v14287_v10  ;;  %v770_v43 = vld [vmem:[#allocation5 + $0x1168] sm:$0xff]  ;;  %v14526_v10 = vcombine.low %v1034_v38, %v1042_v56 }
 0x32d   :  { %8125 = vmatpush1.bf16.msra.mxu1 %v14558_v59  ;;  %v17053_v36 = vpack.c.bf16 %v8799_v22, %v8783_v23  ;;  %v7510_v60 = vadd.f32 %v7509_v32, %v16995_v47  ;;  %v7581_v35 = vadd.f32 %v7580_v27, %v7508_v12  ;;  %v1026_v24 = vld [vmem:[#allocation5 + $0x1968] sm:$0xff]  ;;  %8026 = vmatprep.mubr.bf16.mxu1 %v16450_v3 }
 0x32e   :  { %v7582_v42 = vpop.f32.mrf.mxu1  ;;  %8126 = vmatprep.subr.bf16.mxu1 %v14543_v55  ;;  %v7511_v31 = vpop.f32.mrf.mxu0  ;;  %v14270_v59 = vcombine.low %v778_v45, %v786_v4  ;;  %v14255_v55 = vcombine.high %v762_v14, %v770_v43  ;;  %v746_v23 = vld [vmem:[#allocation5 + $0x10a8] sm:$0xff]  ;;  %v14511_v27 = vcombine.high %v1018_v57, %v1026_v24  ;;  %v14254_v38 = vcombine.low %v762_v14, %v770_v43 }
 0x32f   :  { %18743 = vst [vmem:[#allocation118_spill] sm:$0xff] %v17053_v36  ;;  %v7512_v18 = vadd.f32 %v7511_v31, %v16999_v6  ;;  %v17059_v46 = vadd.f32 %v7582_v42, %v7510_v60  ;;  %8054 = vmatpush1.bf16.msra.mxu0 %v14286_v44  ;;  %v754_v32 = vld [vmem:[#allocation5 + $0x10e8] sm:$0xff]  ;;  %v8815_v44 = vmax.f32 %v7581_v35, 0.0 }
 0x330   :  { %v7584_v40 = vpop.f32.mrf.mxu1  ;;  %v17061_v47 = vpop.f32.mrf.mxu0  ;;  %8055 = vmatprep.subr.bf16.mxu0 %v14271_v2  ;;  %v1002_v36 = vld [vmem:[#allocation5 + $0x18a8] sm:$0xff]  ;;  %v14510_v2 = vcombine.low %v1018_v57, %v1026_v24 }
 0x331   :  { %18744 = vst [vmem:[#allocation119_spill] sm:$0xff] %v17059_v46  ;;  %8127 = vmatpush1.bf16.msra.mxu1 %v14542_v8  ;;  %18745 = vst [vmem:[#allocation120_spill] sm:$0xff] %v17061_v47  ;;  %v7585_v22 = vadd.f32 %v7584_v40, %v7512_v18  ;;  %v1010_v6 = vld [vmem:[#allocation5 + $0x18e8] sm:$0xff] }
 0x332   :  { %v17063_v12 = vpop.f32.mrf.mxu1  ;;  %8128 = vmatprep.subr.bf16.mxu1 %v14527_v58  ;;  %v7517_v60 = vpop.f32.mrf.mxu0  ;;  %7954 = vmatmul.mubr.bf16.gmra.mxu0 %v16454_v16  ;;  %v14239_v58 = vcombine.high %v746_v23, %v754_v32  ;;  %v14495_v42 = vcombine.high %v1002_v36, %v1010_v6  ;;  %v986_v43 = vld [vmem:[#allocation5 + $0x1828] sm:$0xff] }
 0x333   :  { %18746 = vst [vmem:[#allocation121_spill] sm:$0xff] %v17063_v12  ;;  %v8831_v45 = vmax.f32 %v7585_v22, 0.0  ;;  %v7518_v4 = vadd.f32 %v7517_v60, %v17008_v29  ;;  %8056 = vmatpush1.bf16.msra.mxu0 %v14270_v59  ;;  %v730_v22 = vld [vmem:[#allocation5 + $0x1028] sm:$0xff]  ;;  %7963 = vmatprep.mubr.bf16.mxu0 %v16459_v30 }
 0x334   :  { %v7590_v8 = vpop.f32.mrf.mxu1  ;;  %8027 = vmatmul.mubr.bf16.gmra.mxu1 %v16457_v20  ;;  %v7519_v56 = vpop.f32.mrf.mxu0  ;;  %8057 = vmatprep.subr.bf16.mxu0 %v14255_v55  ;;  %v738_v29 = vld [vmem:[#allocation5 + $0x1068] sm:$0xff]  ;;  %v14238_v55 = vcombine.low %v746_v23, %v754_v32 }
 0x335   :  { %8129 = vmatpush1.bf16.msra.mxu1 %v14526_v10  ;;  %v17068_v31 = vpack.c.bf16 %v8831_v45, %v8815_v44  ;;  %v7520_v18 = vadd.f32 %v7519_v56, %v17012_v28  ;;  %v7591_v40 = vadd.f32 %v7590_v8, %v7518_v4  ;;  %v994_v59 = vld [vmem:[#allocation5 + $0x1868] sm:$0xff]  ;;  %8036 = vmatprep.mubr.bf16.mxu1 %v16462_v33 }
 0x336   :  { %v7592_v35 = vpop.f32.mrf.mxu1  ;;  %8130 = vmatprep.subr.bf16.mxu1 %v14511_v27  ;;  %v7521_v14 = vpop.f32.mrf.mxu0  ;;  %v14494_v27 = vcombine.low %v1002_v36, %v1010_v6  ;;  %v14223_v60 = vcombine.high %v730_v22, %v738_v29  ;;  %v970_v44 = vld [vmem:[#allocation5 + $0x17a8] sm:$0xff]  ;;  %v14479_v8 = vcombine.high %v986_v43, %v994_v59  ;;  %v14222_v36 = vcombine.low %v730_v22, %v738_v29 }
 0x337   :  { %18747 = vst [vmem:[#allocation122_spill] sm:$0xff] %v17068_v31  ;;  %v7522_v57 = vadd.f32 %v7521_v14, %v17016_v52  ;;  %v17074_v24 = vadd.f32 %v7592_v35, %v7520_v18  ;;  %8058 = vmatpush1.bf16.msra.mxu0 %v14254_v38  ;;  %v978_v56 = vld [vmem:[#allocation5 + $0x17e8] sm:$0xff]  ;;  %v8847_v38 = vmax.f32 %v7591_v40, 0.0 }
 0x338   :  { %v7594_v10 = vpop.f32.mrf.mxu1  ;;  %v17076_v28 = vpop.f32.mrf.mxu0  ;;  %8059 = vmatprep.subr.bf16.mxu0 %v14239_v58  ;;  %v1226_v31 = vld [vmem:[#allocation5 + $0x1fa8] sm:$0xff]  ;;  %v14478_v58 = vcombine.low %v986_v43, %v994_v59 }
 0x339   :  { %18748 = vst [vmem:[#allocation123_spill] sm:$0xff] %v17074_v24  ;;  %8131 = vmatpush1.bf16.msra.mxu1 %v14510_v2  ;;  %18749 = vst [vmem:[#allocation124_spill] sm:$0xff] %v17076_v28  ;;  %v7595_v45 = vadd.f32 %v7594_v10, %v7522_v57  ;;  %v1234_v52 = vld [vmem:[#allocation5 + $0x1fe8] sm:$0xff] }
 0x33a   :  { %v17078_v4 = vpop.f32.mrf.mxu1  ;;  %8132 = vmatprep.subr.bf16.mxu1 %v14495_v42  ;;  %v7527_v18 = vpop.f32.mrf.mxu0  ;;  %7964 = vmatmul.mubr.bf16.gmra.mxu0 %v16466_v48  ;;  %v14463_v42 = vcombine.high %v970_v44, %v978_v56  ;;  %v14719_v35 = vcombine.high %v1226_v31, %v1234_v52  ;;  %v1210_v29 = vld [vmem:[#allocation5 + $0x1f28] sm:$0xff] }
 0x33b   :  { %18750 = vst [vmem:[#allocation125_spill] sm:$0xff] %v17078_v4  ;;  %v8863_v23 = vmax.f32 %v7595_v45, 0.0  ;;  %v7528_v32 = vadd.f32 %v7527_v18, %v17024_v11  ;;  %8060 = vmatpush1.bf16.msra.mxu0 %v14238_v55  ;;  %v954_v45 = vld [vmem:[#allocation5 + $0x1728] sm:$0xff]  ;;  %8079 = vmatprep.mubr.bf16.mxu0 %v16471_v1 }
 0x33c   :  { %v7600_v2 = vpop.f32.mrf.mxu1  ;;  %8037 = vmatmul.mubr.bf16.gmra.mxu1 %v16469_v53  ;;  %v7529_v6 = vpop.f32.mrf.mxu0  ;;  %8061 = vmatprep.subr.bf16.mxu0 %v14223_v60  ;;  %v962_v11 = vld [vmem:[#allocation5 + $0x1768] sm:$0xff]  ;;  %v14462_v60 = vcombine.low %v970_v44, %v978_v56 }
 0x33d   :  { %8133 = vmatpush1.bf16.msra.mxu1 %v14494_v27  ;;  %v17083_v14 = vpack.c.bf16 %v8863_v23, %v8847_v38  ;;  %v7530_v57 = vadd.f32 %v7529_v6, %v17029_v39  ;;  %v7601_v10 = vadd.f32 %v7600_v2, %v7528_v32  ;;  %v1218_v55 = vld [vmem:[#allocation5 + $0x1f68] sm:$0xff]  ;;  %8152 = vmatprep.mubr.bf16.mxu1 %v16474_v5 }
 0x33e   :  { %v7602_v40 = vpop.f32.mrf.mxu1  ;;  %8134 = vmatprep.subr.bf16.mxu1 %v14479_v8  ;;  %v7531_v22 = vpop.f32.mrf.mxu0  ;;  %v14718_v39 = vcombine.low %v1226_v31, %v1234_v52  ;;  %v14447_v8 = vcombine.high %v954_v45, %v962_v11  ;;  %v14703_v38 = vcombine.high %v1210_v29, %v1218_v55  ;;  %v938_v23 = vld [vmem:[#allocation5 + $0x16a8] sm:$0xff] }
 0x33f   :  { %18751 = vst [vmem:[#allocation126_spill] sm:$0xff] %v17083_v14  ;;  %v7532_v43 = vadd.f32 %v7531_v22, %v17031_v19  ;;  %v17089_v59 = vadd.f32 %v7602_v40, %v7530_v57  ;;  %8062 = vmatpush1.bf16.msra.mxu0 %v14222_v36  ;;  %v946_v32 = vld [vmem:[#allocation5 + $0x16e8] sm:$0xff]  ;;  %v8879_v14 = vmax.f32 %v7601_v10, 0.0  ;;  %v14446_v19 = vcombine.low %v954_v45, %v962_v11 }
 0x340   :  { %v7604_v27 = vpop.f32.mrf.mxu1  ;;  %8063 = vmatprep.subr.bf16.mxu0 %v14463_v42  ;;  %v1194_v2 = vld [vmem:[#allocation5 + $0x1ea8] sm:$0xff]  ;;  %v14702_v36 = vcombine.low %v1210_v29, %v1218_v55  ;;  %v14431_v57 = vcombine.high %v938_v23, %v946_v32 }
 0x341   :  { %18752 = vst [vmem:[#allocation127_spill] sm:$0xff] %v17089_v59  ;;  %8135 = vmatpush1.bf16.msra.mxu1 %v14478_v58  ;;  %v7605_v18 = vadd.f32 %v7604_v27, %v7532_v43  ;;  %v1202_v6 = vld [vmem:[#allocation5 + $0x1ee8] sm:$0xff]  ;;  %v267_v59 = vld [vmem:[#allocation5 + $0x1b0] sm:$0xff] }
 0x342   :  { %8136 = vmatprep.subr.bf16.mxu1 %v14719_v35  ;;  %v14687_v31 = vcombine.high %v1194_v2, %v1202_v6  ;;  %v922_v56 = vld [vmem:[#allocation5 + $0x1628] sm:$0xff]  ;;  %v14430_v35 = vcombine.low %v938_v23, %v946_v32  ;;  %v14686_v10 = vcombine.low %v1194_v2, %v1202_v6 }
 0x343   :  { %v8895_v24 = vmax.f32 %v7605_v18, 0.0  ;;  %8064 = vmatpush2.bf16.msra.mxu0 %v14462_v60  ;;  %v930_v52 = vld [vmem:[#allocation5 + $0x1668] sm:$0xff] }
 0x344   :  { %8065 = vmatprep.subr.bf16.mxu0 %v14447_v8  ;;  %v1178_v58 = vld [vmem:[#allocation5 + $0x1e28] sm:$0xff]  ;;  %v14415_v40 = vcombine.high %v922_v56, %v930_v52 }
 0x345   :  { %8137 = vmatpush2.bf16.msra.mxu1 %v14718_v39  ;;  %v17091_v44 = vpack.c.bf16 %v8895_v24, %v8879_v14  ;;  %v1186_v42 = vld [vmem:[#allocation5 + $0x1e68] sm:$0xff]  ;;  %v14414_v24 = vcombine.low %v922_v56, %v930_v52 }
 0x346   :  { %8138 = vmatprep.subr.bf16.mxu1 %v14703_v38  ;;  %v14671_v45 = vcombine.high %v1178_v58, %v1186_v42  ;;  %v906_v11 = vld [vmem:[#allocation5 + $0x15a8] sm:$0xff]  ;;  %v14670_v14 = vcombine.low %v1178_v58, %v1186_v42 }
 0x347   :  { %18753 = vst [vmem:[#allocation128_spill] sm:$0xff] %v17091_v44  ;;  %8066 = vmatpush2.bf16.msra.mxu0 %v14446_v19  ;;  %v914_v22 = vld [vmem:[#allocation5 + $0x15e8] sm:$0xff] }
 0x348   :  { %8067 = vmatprep.subr.bf16.mxu0 %v14431_v57  ;;  %v1162_v29 = vld [vmem:[#allocation5 + $0x1da8] sm:$0xff]  ;;  %v14399_v43 = vcombine.high %v906_v11, %v914_v22  ;;  %v14398_v38 = vcombine.low %v906_v11, %v914_v22 }
 0x349   :  { %8139 = vmatpush2.bf16.msra.mxu1 %v14702_v36  ;;  %v1170_v55 = vld [vmem:[#allocation5 + $0x1de8] sm:$0xff] }
 0x34a   :  { %8140 = vmatprep.subr.bf16.mxu1 %v14687_v31  ;;  %v14655_v27 = vcombine.high %v1162_v29, %v1170_v55  ;;  %v890_v60 = vld [vmem:[#allocation5 + $0x1528] sm:$0xff]  ;;  %v14654_v23 = vcombine.low %v1162_v29, %v1170_v55  ;;  %v331_v55 = vld [vmem:[#allocation5 + $0x3b0] sm:$0xff] }
 0x34b   :  { %8068 = vmatpush2.bf16.msra.mxu0 %v14430_v35  ;;  %v898_v39 = vld [vmem:[#allocation5 + $0x1568] sm:$0xff] }
 0x34c   :  { %8069 = vmatprep.subr.bf16.mxu0 %v14415_v40  ;;  %v1146_v8 = vld [vmem:[#allocation5 + $0x1d28] sm:$0xff]  ;;  %v14383_v32 = vcombine.high %v890_v60, %v898_v39  ;;  %v14382_v31 = vcombine.low %v890_v60, %v898_v39 }
 0x34d   :  { %8141 = vmatpush2.bf16.msra.mxu1 %v14686_v10  ;;  %v1154_v18 = vld [vmem:[#allocation5 + $0x1d68] sm:$0xff] }
 0x34e   :  { %8142 = vmatprep.subr.bf16.mxu1 %v14671_v45  ;;  %v14639_v2 = vcombine.high %v1146_v8, %v1154_v18  ;;  %v874_v6 = vld [vmem:[#allocation5 + $0x14a8] sm:$0xff]  ;;  %v14638_v56 = vcombine.low %v1146_v8, %v1154_v18 }
 0x34f   :  { %8070 = vmatpush2.bf16.msra.mxu0 %v14414_v24  ;;  %v882_v19 = vld [vmem:[#allocation5 + $0x14e8] sm:$0xff]  ;;  %v339_v24 = vld [vmem:[#allocation5 + $0x3f0] sm:$0xff] }
 0x350   :  { %8071 = vmatprep.subr.bf16.mxu0 %v14399_v43  ;;  %v1130_v36 = vld [vmem:[#allocation5 + $0x1ca8] sm:$0xff]  ;;  %v14367_v52 = vcombine.high %v874_v6, %v882_v19  ;;  %v14366_v45 = vcombine.low %v874_v6, %v882_v19  ;;  %v595_v43 = vld [vmem:[#allocation5 + $0xbf0] sm:$0xff]  ;;  %v13825_v8 = vcombine.high %v331_v55, %v339_v24 }
 0x351   :  { %8143 = vmatpush2.bf16.msra.mxu1 %v14670_v14  ;;  %v1138_v57 = vld [vmem:[#allocation5 + $0x1ce8] sm:$0xff]  ;;  %v587_v14 = vld [vmem:[#allocation5 + $0xbb0] sm:$0xff] }
 0x352   :  { %8144 = vmatprep.subr.bf16.mxu1 %v14655_v27  ;;  %v14623_v58 = vcombine.high %v1130_v36, %v1138_v57  ;;  %v858_v42 = vld [vmem:[#allocation5 + $0x1428] sm:$0xff]  ;;  %v14622_v11 = vcombine.low %v1130_v36, %v1138_v57  ;;  %v14081_v18 = vcombine.high %v587_v14, %v595_v43  ;;  %v13824_v36 = vcombine.low %v331_v55, %v339_v24  ;;  %v17096_v57 = vpop.f32.mrf.mxu0 }
 0x353   :  { %8072 = vmatpush2.bf16.msra.mxu0 %v14398_v38  ;;  %v866_v35 = vld [vmem:[#allocation5 + $0x1468] sm:$0xff]  ;;  %v315_v38 = vld [vmem:[#allocation5 + $0x330] sm:$0xff]  ;;  %18755 = vst [vmem:[#allocation129_spill] sm:$0xff] %v17096_v57 }
 0x354   :  { %8073 = vmatprep.subr.bf16.mxu0 %v14383_v32  ;;  %v1114_v10 = vld [vmem:[#allocation5 + $0x1c28] sm:$0xff]  ;;  %v14351_v22 = vcombine.high %v858_v42, %v866_v35  ;;  %v14350_v27 = vcombine.low %v858_v42, %v866_v35  ;;  %v571_v32 = vld [vmem:[#allocation5 + $0xb30] sm:$0xff] }
 0x355   :  { %8145 = vmatpush2.bf16.msra.mxu1 %v14654_v23  ;;  %v1122_v40 = vld [vmem:[#allocation5 + $0x1c68] sm:$0xff]  ;;  %v323_v23 = vld [vmem:[#allocation5 + $0x370] sm:$0xff] }
 0x356   :  { %8146 = vmatprep.subr.bf16.mxu1 %v14639_v2  ;;  %v14607_v29 = vcombine.high %v1114_v10, %v1122_v40  ;;  %v14606_v60 = vcombine.low %v1114_v10, %v1122_v40  ;;  %v1238_v39 = vld [vmem:[#allocation7 + $0x8] sm:$0xff]  ;;  %v579_v2 = vld [vmem:[#allocation5 + $0xb70] sm:$0xff]  ;;  %v13808_v24 = vcombine.low %v315_v38, %v323_v23 }
 0x357   :  { %8074 = vmatpush2.bf16.msra.mxu0 %v14382_v31  ;;  %v18754_v6 = vld [vmem:[#allocation31_spill] sm:$0xff]  ;;  %v14080_v31 = vcombine.low %v587_v14, %v595_v43  ;;  %v14065_v35 = vcombine.high %v571_v32, %v579_v2  ;;  %v14064_v43 = vcombine.low %v571_v32, %v579_v2 }
 0x358   :  { %8075 = vmatprep.subr.bf16.mxu0 %v14367_v52  ;;  %v17094_v19 = vrot.slane %v1238_v39, %v18754_v6  ;;  %v17098_v52 = vpop.f32.mrf.mxu1  ;;  %v299_v10 = vld [vmem:[#allocation5 + $0x2b0] sm:$0xff] }
 0x359   :  { %8147 = vmatpush2.bf16.msra.mxu1 %v14638_v56  ;;  %v13809_v56 = vcombine.high %v315_v38, %v323_v23  ;;  %18756 = vst [vmem:[#allocation130_spill] sm:$0xff] %v17098_v52  ;;  %v307_v40 = vld [vmem:[#allocation5 + $0x2f0] sm:$0xff] }
 0x35a   :  { %8148 = vmatprep.subr.bf16.mxu1 %v14623_v58  ;;  %v18757_v58 = vld [vmem:[#allocation32_spill] sm:$0xff] }
 0x35b   :  { %8076 = vmatpush2.bf16.msra.mxu0 %v14366_v45  ;;  %v17101_v42 = vrot.slane %v1238_v39, %v18757_v58  ;;  %v291_v58 = vld [vmem:[#allocation5 + $0x270] sm:$0xff] }
 0x35c   :  { %8077 = vmatprep.subr.bf16.mxu0 %v14351_v22  ;;  %v563_v22 = vld [vmem:[#allocation5 + $0xaf0] sm:$0xff] }
 0x35d   :  { %8149 = vmatpush2.bf16.msra.mxu1 %v14622_v11  ;;  %18758 = vst [vmem:[#allocation131_spill] sm:$0xff] %v17101_v42  ;;  %v555_v11 = vld [vmem:[#allocation5 + $0xab0] sm:$0xff] }
 0x35e   :  { %8150 = vmatprep.subr.bf16.mxu1 %v14607_v29  ;;  %v539_v38 = vld [vmem:[#allocation5 + $0xa30] sm:$0xff] }
 0x35f   :  { %8078 = vmatpush2.bf16.msra.mxu0 %v14350_v27  ;;  %v13793_v27 = vcombine.high %v299_v10, %v307_v40  ;;  %v547_v23 = vld [vmem:[#allocation5 + $0xa70] sm:$0xff] }
 0x360   :  { %8193 = vmatprep.subr.bf16.mxu0 %v13825_v8  ;;  %v14033_v44 = vcombine.high %v539_v38, %v547_v23  ;;  %v243_v57 = vld [vmem:[#allocation5 + $0xf0] sm:$0xff] }
 0x361   :  { %8151 = vmatpush2.bf16.msra.mxu1 %v14606_v60 }
 0x362   :  { %8266 = vmatprep.subr.bf16.mxu1 %v14081_v18  ;;  %v7643_v45 = vpop.f32.mrf.mxu0  ;;  %8080 = vmatmul.mubr.bf16.vlgmr.msra.gmra.mxu0 %v16479_v49  ;;  %v14049_v18 = vcombine.high %v555_v11, %v563_v22 }
 0x363   :  { %v7644_v29 = vadd.f32 %v7643_v45, %v17094_v19  ;;  %8194 = vmatpush1.bf16.msra.mxu0 %v13824_v36  ;;  %8089 = vmatprep.mubr.bf16.mxu0 %v16483_v61  ;;  %v283_v45 = vld [vmem:[#allocation5 + $0x230] sm:$0xff] }
 0x364   :  { %v7716_v55 = vpop.f32.mrf.mxu1  ;;  %8153 = vmatmul.mubr.bf16.vlgmr.msra.gmra.mxu1 %v16481_v51  ;;  %v7645_v14 = vpop.f32.mrf.mxu0  ;;  %8195 = vmatprep.subr.bf16.mxu0 %v13809_v56 }
 0x365   :  { %8267 = vmatpush1.bf16.msra.mxu1 %v14080_v31  ;;  %v17106_v60 = vadd.f32 %v7716_v55, %v7644_v29  ;;  %v7646_v39 = vadd.f32 %v7645_v14, %v17101_v42  ;;  %8162 = vmatprep.mubr.bf16.mxu1 %v16486_v7  ;;  %v13792_v31 = vcombine.low %v299_v10, %v307_v40 }
 0x366   :  { %v7718_v8 = vpop.f32.mrf.mxu1  ;;  %8268 = vmatprep.subr.bf16.mxu1 %v14065_v35  ;;  %v7647_v6 = vpop.f32.mrf.mxu0  ;;  %v14048_v35 = vcombine.low %v555_v11, %v563_v22  ;;  %v13777_v29 = vcombine.high %v283_v45, %v291_v58  ;;  %v13776_v10 = vcombine.low %v283_v45, %v291_v58  ;;  %v14032_v22 = vcombine.low %v539_v38, %v547_v23  ;;  %v507_v58 = vld [vmem:[#allocation5 + $0x930] sm:$0xff] }
 0x367   :  { %v17111_v36 = vadd.f32 %v7718_v8, %v7646_v39  ;;  %v7648_v32 = vadd.f32 %v7647_v6, %v17094_v19  ;;  %8196 = vmatpush1.bf16.msra.mxu0 %v13808_v24  ;;  %v275_v39 = vld [vmem:[#allocation5 + $0x1f0] sm:$0xff] }
 0x368   :  { %v7720_v2 = vpop.f32.mrf.mxu1  ;;  %v17114_v56 = vpop.f32.mrf.mxu0  ;;  %8197 = vmatprep.subr.bf16.mxu0 %v13793_v27  ;;  %v523_v6 = vld [vmem:[#allocation5 + $0x9b0] sm:$0xff]  ;;  %v13760_v38 = vcombine.low %v267_v59, %v275_v39 }
 0x369   :  { %8269 = vmatpush1.bf16.msra.mxu1 %v14064_v43  ;;  %18759 = vst [vmem:[#allocation132_spill] sm:$0xff] %v17114_v56  ;;  %v17116_v55 = vadd.f32 %v7720_v2, %v7648_v32  ;;  %v531_v8 = vld [vmem:[#allocation5 + $0x9f0] sm:$0xff]  ;;  %v13761_v43 = vcombine.high %v267_v59, %v275_v39  ;;  %v18763_v39 = vld [vmem:[#allocation25_spill] sm:$0xff] }
 0x36a   :  { %v17118_v14 = vpop.f32.mrf.mxu1  ;;  %8270 = vmatprep.subr.bf16.mxu1 %v14049_v18  ;;  %8090 = vmatmul.mubr.bf16.gmra.mxu0 %v16490_v26  ;;  %v7653_v24 = vpop.f32.mrf.mxu0  ;;  %v14017_v18 = vcombine.high %v523_v6, %v531_v8  ;;  %v251_v32 = vld [vmem:[#allocation5 + $0x130] sm:$0xff] }
 0x36b   :  { %18760 = vst [vmem:[#allocation133_spill] sm:$0xff] %v17118_v14  ;;  %8198 = vmatpush1.bf16.msra.mxu0 %v13792_v31  ;;  %v7654_v40 = vadd.f32 %v7653_v24, %v17094_v19  ;;  %8099 = vmatprep.mubr.bf16.mxu0 %v18664_v15  ;;  %v259_v2 = vld [vmem:[#allocation5 + $0x170] sm:$0xff]  ;;  %v14016_v24 = vcombine.low %v523_v6, %v531_v8 }
 0x36c   :  { %8163 = vmatmul.mubr.bf16.gmra.mxu1 %v18663_v17  ;;  %v7726_v11 = vpop.f32.mrf.mxu1  ;;  %8199 = vmatprep.subr.bf16.mxu0 %v13777_v29  ;;  %v7655_v27 = vpop.f32.mrf.mxu0  ;;  %v515_v45 = vld [vmem:[#allocation5 + $0x970] sm:$0xff]  ;;  %v13745_v56 = vcombine.high %v251_v32, %v259_v2  ;;  %v13744_v6 = vcombine.low %v251_v32, %v259_v2 }
 0x36d   :  { %8271 = vmatpush1.bf16.msra.mxu1 %v14048_v35  ;;  %v7656_v14 = vadd.f32 %v7655_v27, %v17101_v42  ;;  %v17125_v31 = vadd.f32 %v7726_v11, %v7654_v40  ;;  %8172 = vmatprep.mubr.bf16.mxu1 %v18665_v62  ;;  %v14001_v40 = vcombine.high %v507_v58, %v515_v45  ;;  %v235_v11 = vld [vmem:[#allocation5 + $0xb0] sm:$0xff] }
 0x36e   :  { %8272 = vmatprep.subr.bf16.mxu1 %v14033_v44  ;;  %v7728_v52 = vpop.f32.mrf.mxu1  ;;  %v7657_v35 = vpop.f32.mrf.mxu0  ;;  %v491_v59 = vld [vmem:[#allocation5 + $0x8b0] sm:$0xff] }
 0x36f   :  { %8200 = vmatpush1.bf16.msra.mxu0 %v13776_v10  ;;  %v7658_v23 = vadd.f32 %v7657_v35, %v17094_v19  ;;  %v17129_v44 = vadd.f32 %v7728_v52, %v7656_v14  ;;  %v499_v52 = vld [vmem:[#allocation5 + $0x8f0] sm:$0xff]  ;;  %v18764_v35 = vld [vmem:[#allocation26_spill] sm:$0xff] }
 0x370   :  { %v7730_v29 = vpop.f32.mrf.mxu1  ;;  %8201 = vmatprep.subr.bf16.mxu0 %v13761_v43  ;;  %v17131_v27 = vpop.f32.mrf.mxu0  ;;  %v13729_v43 = vcombine.high %v235_v11, %v243_v57  ;;  %v18765_v32 = vld [vmem:[#allocation27_spill] sm:$0xff]  ;;  %v13984_v12 = vcombine.low %v491_v59, %v499_v52 }
 0x371   :  { %8273 = vmatpush1.bf16.msra.mxu1 %v14032_v22  ;;  %18761 = vst [vmem:[#allocation134_spill] sm:$0xff] %v17131_v27  ;;  %v17133_v4 = vadd.f32 %v7730_v29, %v7658_v23  ;;  %v14000_v22 = vcombine.low %v507_v58, %v515_v45  ;;  %v13985_v23 = vcombine.high %v491_v59, %v499_v52  ;;  %v219_v29 = vld [vmem:[#allocation5 + $0x30] sm:$0xff] }
 0x372   :  { %8274 = vmatprep.subr.bf16.mxu1 %v14017_v18  ;;  %v17135_v46 = vpop.f32.mrf.mxu1  ;;  %8100 = vmatmul.mubr.bf16.gmra.mxu0 %v18729_v13  ;;  %v7663_v14 = vpop.f32.mrf.mxu0  ;;  %v475_v2 = vld [vmem:[#allocation5 + $0x830] sm:$0xff] }
 0x373   :  { %18762 = vst [vmem:[#allocation135_spill] sm:$0xff] %v17135_v46  ;;  %8202 = vmatpush1.bf16.msra.mxu0 %v13760_v38  ;;  %v7664_v8 = vadd.f32 %v7663_v14, %v17094_v19  ;;  %8109 = vmatprep.mubr.bf16.mxu0 %v18764_v35  ;;  %v227_v46 = vld [vmem:[#allocation5 + $0x70] sm:$0xff] }
 0x374   :  { %8173 = vmatmul.mubr.bf16.gmra.mxu1 %v18763_v39  ;;  %v7736_v10 = vpop.f32.mrf.mxu1  ;;  %8203 = vmatprep.subr.bf16.mxu0 %v13745_v56  ;;  %v7665_v18 = vpop.f32.mrf.mxu0  ;;  %v483_v14 = vld [vmem:[#allocation5 + $0x870] sm:$0xff]  ;;  %v13728_v56 = vcombine.low %v235_v11, %v243_v57  ;;  %v13713_v47 = vcombine.high %v219_v29, %v227_v46  ;;  %v13712_v59 = vcombine.low %v219_v29, %v227_v46 }
 0x375   :  { %8275 = vmatpush1.bf16.msra.mxu1 %v14016_v24  ;;  %v7666_v27 = vadd.f32 %v7665_v18, %v17101_v42  ;;  %v17142_v38 = vadd.f32 %v7736_v10, %v7664_v8  ;;  %8182 = vmatprep.mubr.bf16.mxu1 %v18765_v32  ;;  %v13969_v8 = vcombine.high %v475_v2, %v483_v14  ;;  %v459_v10 = vld [vmem:[#allocation5 + $0x7b0] sm:$0xff] }
 0x376   :  { %8276 = vmatprep.subr.bf16.mxu1 %v14001_v40  ;;  %v7738_v28 = vpop.f32.mrf.mxu1  ;;  %v7667_v24 = vpop.f32.mrf.mxu0  ;;  %v18768_v57 = vld [vmem:[#allocation28_spill] sm:$0xff] }
 0x377   :  { %8204 = vmatpush1.bf16.msra.mxu0 %v13744_v6  ;;  %v7668_v58 = vadd.f32 %v7667_v24, %v17094_v19  ;;  %v17146_v45 = vadd.f32 %v7738_v28, %v7666_v27  ;;  %v715_v11 = vld [vmem:[#allocation5 + $0xfb0] sm:$0xff]  ;;  %v18769_v6 = vld [vmem:[#allocation29_spill] sm:$0xff] }
 0x378   :  { %v7740_v40 = vpop.f32.mrf.mxu1  ;;  %8205 = vmatprep.subr.bf16.mxu0 %v13729_v43  ;;  %v17148_v18 = vpop.f32.mrf.mxu0  ;;  %v723_v28 = vld [vmem:[#allocation5 + $0xff0] sm:$0xff]  ;;  %v13968_v43 = vcombine.low %v475_v2, %v483_v14 }
 0x379   :  { %8277 = vmatpush1.bf16.msra.mxu1 %v14000_v22  ;;  %18766 = vst [vmem:[#allocation136_spill] sm:$0xff] %v17148_v18  ;;  %v17150_v41 = vadd.f32 %v7740_v40, %v7668_v58  ;;  %v14209_v58 = vcombine.high %v715_v11, %v723_v28  ;;  %v443_v40 = vld [vmem:[#allocation5 + $0x730] sm:$0xff]  ;;  %v14208_v14 = vcombine.low %v715_v11, %v723_v28 }
 0x37a   :  { %8278 = vmatprep.subr.bf16.mxu1 %v13985_v23  ;;  %v17152_v32 = vpop.f32.mrf.mxu1  ;;  %8110 = vmatmul.mubr.bf16.gmra.mxu0 %v18768_v57  ;;  %v7673_v27 = vpop.f32.mrf.mxu0  ;;  %v13953_v23 = vcombine.high %v459_v10, %v467_v9  ;;  %v18770_v35 = vld [vmem:[#allocation20_spill] sm:$0xff] }
 0x37b   :  { %18767 = vst [vmem:[#allocation137_spill] sm:$0xff] %v17152_v32  ;;  %8206 = vmatpush1.bf16.msra.mxu0 %v13728_v56  ;;  %v7674_v52 = vadd.f32 %v7673_v27, %v17094_v19  ;;  %v451_v32 = vld [vmem:[#allocation5 + $0x770] sm:$0xff]  ;;  %8225 = vmatprep.mubr.bf16.mxu0 %v18770_v35 }
 0x37c   :  { %8183 = vmatmul.mubr.bf16.gmra.mxu1 %v18769_v6  ;;  %v7746_v22 = vpop.f32.mrf.mxu1  ;;  %8207 = vmatprep.subr.bf16.mxu0 %v13713_v47  ;;  %v7675_v24 = vpop.f32.mrf.mxu0  ;;  %v699_v46 = vld [vmem:[#allocation5 + $0xf30] sm:$0xff]  ;;  %v13952_v47 = vcombine.low %v459_v10, %v467_v9 }
 0x37d   :  { %8279 = vmatpush1.bf16.msra.mxu1 %v13984_v12  ;;  %v7676_v18 = vadd.f32 %v7675_v24, %v17101_v42  ;;  %v17158_v57 = vadd.f32 %v7746_v22, %v7674_v52  ;;  %v707_v29 = vld [vmem:[#allocation5 + $0xf70] sm:$0xff]  ;;  %8298 = vmatprep.mubr.bf16.mxu1 %v16427_v63 }
 0x37e   :  { %8280 = vmatprep.subr.bf16.mxu1 %v13969_v8  ;;  %v7748_v56 = vpop.f32.mrf.mxu1  ;;  %v7677_v27 = vpop.f32.mrf.mxu0  ;;  %v13937_v8 = vcombine.high %v443_v40, %v451_v32  ;;  %v14193_v22 = vcombine.high %v699_v46, %v707_v29  ;;  %v427_v24 = vld [vmem:[#allocation5 + $0x6b0] sm:$0xff]  ;;  %v14192_v9 = vcombine.low %v699_v46, %v707_v29 }
 0x37f   :  { %8208 = vmatpush1.bf16.msra.mxu0 %v13712_v59  ;;  %v7678_v12 = vadd.f32 %v7677_v27, %v17094_v19  ;;  %v17163_v2 = vadd.f32 %v7748_v56, %v7676_v18  ;;  %v435_v42 = vld [vmem:[#allocation5 + $0x6f0] sm:$0xff]  ;;  %v13936_v59 = vcombine.low %v443_v40, %v451_v32 }
 0x380   :  { %8209 = vmatprep.subr.bf16.mxu0 %v13953_v23  ;;  %v7750_v52 = vpop.f32.mrf.mxu1  ;;  %v683_v6 = vld [vmem:[#allocation5 + $0xeb0] sm:$0xff]  ;;  %v13921_v19 = vcombine.high %v427_v24, %v435_v42  ;;  %v13920_v23 = vcombine.low %v427_v24, %v435_v42 }
 0x381   :  { %8281 = vmatpush1.bf16.msra.mxu1 %v13968_v43  ;;  %v17165_v35 = vadd.f32 %v7750_v52, %v7678_v12  ;;  %v691_v39 = vld [vmem:[#allocation5 + $0xef0] sm:$0xff] }
 0x382   :  { %8282 = vmatprep.subr.bf16.mxu1 %v14209_v58  ;;  %v14177_v18 = vcombine.high %v683_v6, %v691_v39  ;;  %v411_v10 = vld [vmem:[#allocation5 + $0x630] sm:$0xff]  ;;  %v14176_v58 = vcombine.low %v683_v6, %v691_v39 }
 0x383   :  { %8210 = vmatpush2.bf16.msra.mxu0 %v13952_v47  ;;  %v419_v11 = vld [vmem:[#allocation5 + $0x670] sm:$0xff] }
 0x384   :  { %8211 = vmatprep.subr.bf16.mxu0 %v13937_v8  ;;  %v667_v28 = vld [vmem:[#allocation5 + $0xe30] sm:$0xff]  ;;  %v13905_v56 = vcombine.high %v411_v10, %v419_v11  ;;  %v13904_v46 = vcombine.low %v411_v10, %v419_v11 }
 0x385   :  { %8283 = vmatpush2.bf16.msra.mxu1 %v14208_v14  ;;  %v675_v43 = vld [vmem:[#allocation5 + $0xe70] sm:$0xff] }
 0x386   :  { %8284 = vmatprep.subr.bf16.mxu1 %v14193_v22  ;;  %v14161_v27 = vcombine.high %v667_v28, %v675_v43  ;;  %v395_v47 = vld [vmem:[#allocation5 + $0x5b0] sm:$0xff]  ;;  %v14160_v29 = vcombine.low %v667_v28, %v675_v43 }
 0x387   :  { %8212 = vmatpush2.bf16.msra.mxu0 %v13936_v59  ;;  %v403_v32 = vld [vmem:[#allocation5 + $0x5f0] sm:$0xff] }
 0x388   :  { %8213 = vmatprep.subr.bf16.mxu0 %v13921_v19  ;;  %v651_v40 = vld [vmem:[#allocation5 + $0xdb0] sm:$0xff]  ;;  %v13889_v14 = vcombine.high %v395_v47, %v403_v32  ;;  %v13888_v39 = vcombine.low %v395_v47, %v403_v32 }
 0x389   :  { %8285 = vmatpush2.bf16.msra.mxu1 %v14192_v9  ;;  %v659_v12 = vld [vmem:[#allocation5 + $0xdf0] sm:$0xff] }
 0x38a   :  { %8286 = vmatprep.subr.bf16.mxu1 %v14177_v18  ;;  %v14145_v8 = vcombine.high %v651_v40, %v659_v12  ;;  %v379_v52 = vld [vmem:[#allocation5 + $0x530] sm:$0xff]  ;;  %v14144_v6 = vcombine.low %v651_v40, %v659_v12 }
 0x38b   :  { %8214 = vmatpush2.bf16.msra.mxu0 %v13920_v23  ;;  %v387_v42 = vld [vmem:[#allocation5 + $0x570] sm:$0xff] }
 0x38c   :  { %8215 = vmatprep.subr.bf16.mxu0 %v13905_v56  ;;  %v635_v22 = vld [vmem:[#allocation5 + $0xd30] sm:$0xff]  ;;  %v13873_v59 = vcombine.high %v379_v52, %v387_v42  ;;  %v13872_v28 = vcombine.low %v379_v52, %v387_v42 }
 0x38d   :  { %8287 = vmatpush2.bf16.msra.mxu1 %v14176_v58  ;;  %v643_v24 = vld [vmem:[#allocation5 + $0xd70] sm:$0xff] }
 0x38e   :  { %8288 = vmatprep.subr.bf16.mxu1 %v14161_v27  ;;  %v14129_v9 = vcombine.high %v635_v22, %v643_v24  ;;  %v363_v19 = vld [vmem:[#allocation5 + $0x4b0] sm:$0xff]  ;;  %v14128_v43 = vcombine.low %v635_v22, %v643_v24 }
 0x38f   :  { %8216 = vmatpush2.bf16.msra.mxu0 %v13904_v46  ;;  %v371_v18 = vld [vmem:[#allocation5 + $0x4f0] sm:$0xff] }
 0x390   :  { %8217 = vmatprep.subr.bf16.mxu0 %v13889_v14  ;;  %v619_v10 = vld [vmem:[#allocation5 + $0xcb0] sm:$0xff]  ;;  %v13857_v23 = vcombine.high %v363_v19, %v371_v18  ;;  %v13856_v40 = vcombine.low %v363_v19, %v371_v18 }
 0x391   :  { %8289 = vmatpush2.bf16.msra.mxu1 %v14160_v29  ;;  %v627_v11 = vld [vmem:[#allocation5 + $0xcf0] sm:$0xff] }
 0x392   :  { %8290 = vmatprep.subr.bf16.mxu1 %v14145_v8  ;;  %v14113_v58 = vcombine.high %v619_v10, %v627_v11  ;;  %v347_v56 = vld [vmem:[#allocation5 + $0x430] sm:$0xff]  ;;  %v14112_v12 = vcombine.low %v619_v10, %v627_v11  ;;  %v17167_v11 = vpop.f32.mrf.mxu0 }
 0x393   :  { %8218 = vmatpush2.bf16.msra.mxu0 %v13888_v39  ;;  %v355_v27 = vld [vmem:[#allocation5 + $0x470] sm:$0xff]  ;;  %18771 = vst [vmem:[#allocation138_spill] sm:$0xff] %v17167_v11 }
 0x394   :  { %8219 = vmatprep.subr.bf16.mxu0 %v13873_v59  ;;  %v603_v47 = vld [vmem:[#allocation5 + $0xc30] sm:$0xff]  ;;  %v13841_v46 = vcombine.high %v347_v56, %v355_v27  ;;  %v13840_v22 = vcombine.low %v347_v56, %v355_v27 }
 0x395   :  { %8291 = vmatpush2.bf16.msra.mxu1 %v14144_v6  ;;  %v611_v32 = vld [vmem:[#allocation5 + $0xc70] sm:$0xff] }
 0x396   :  { %8292 = vmatprep.subr.bf16.mxu1 %v14129_v9  ;;  %v14097_v29 = vcombine.high %v603_v47, %v611_v32  ;;  %v843_v14 = vld [vmem:[#allocation5 + $0x13b0] sm:$0xff]  ;;  %v14096_v24 = vcombine.low %v603_v47, %v611_v32 }
 0x397   :  { %8220 = vmatpush2.bf16.msra.mxu0 %v13872_v28  ;;  %v851_v8 = vld [vmem:[#allocation5 + $0x13f0] sm:$0xff] }
 0x398   :  { %8221 = vmatprep.subr.bf16.mxu0 %v13857_v23  ;;  %v1099_v52 = vld [vmem:[#allocation5 + $0x1bb0] sm:$0xff]  ;;  %v14337_v39 = vcombine.high %v843_v14, %v851_v8  ;;  %v14336_v10 = vcombine.low %v843_v14, %v851_v8  ;;  %v17169_v23 = vpop.f32.mrf.mxu1 }
 0x399   :  { %8293 = vmatpush2.bf16.msra.mxu1 %v14128_v43  ;;  %v1107_v42 = vld [vmem:[#allocation5 + $0x1bf0] sm:$0xff]  ;;  %18772 = vst [vmem:[#allocation139_spill] sm:$0xff] %v17169_v23 }
 0x39a   :  { %8294 = vmatprep.subr.bf16.mxu1 %v14113_v58  ;;  %v14593_v6 = vcombine.high %v1099_v52, %v1107_v42  ;;  %v827_v59 = vld [vmem:[#allocation5 + $0x1330] sm:$0xff]  ;;  %v14592_v28 = vcombine.low %v1099_v52, %v1107_v42 }
 0x39b   :  { %8222 = vmatpush2.bf16.msra.mxu0 %v13856_v40  ;;  %v835_v9 = vld [vmem:[#allocation5 + $0x1370] sm:$0xff] }
 0x39c   :  { %8223 = vmatprep.subr.bf16.mxu0 %v13841_v46  ;;  %v1083_v19 = vld [vmem:[#allocation5 + $0x1b30] sm:$0xff]  ;;  %v14321_v43 = vcombine.high %v827_v59, %v835_v9 }
 0x39d   :  { %8295 = vmatpush2.bf16.msra.mxu1 %v14112_v12  ;;  %v1091_v18 = vld [vmem:[#allocation5 + $0x1b70] sm:$0xff] }
 0x39e   :  { %8296 = vmatprep.subr.bf16.mxu1 %v14097_v29  ;;  %v14577_v58 = vcombine.high %v1083_v19, %v1091_v18  ;;  %v811_v56 = vld [vmem:[#allocation5 + $0x12b0] sm:$0xff]  ;;  %v14320_v29 = vcombine.low %v827_v59, %v835_v9  ;;  %v14576_v8 = vcombine.low %v1083_v19, %v1091_v18 }
 0x39f   :  { %8224 = vmatpush2.bf16.msra.mxu0 %v13840_v22  ;;  %v819_v27 = vld [vmem:[#allocation5 + $0x12f0] sm:$0xff] }
 0x3a0   :  { %8339 = vmatprep.subr.bf16.mxu0 %v14337_v39  ;;  %v1067_v32 = vld [vmem:[#allocation5 + $0x1ab0] sm:$0xff]  ;;  %v14305_v52 = vcombine.high %v811_v56, %v819_v27  ;;  %v14304_v18 = vcombine.low %v811_v56, %v819_v27 }
 0x3a1   :  { %8297 = vmatpush2.bf16.msra.mxu1 %v14096_v24  ;;  %v1075_v40 = vld [vmem:[#allocation5 + $0x1af0] sm:$0xff] }
 0x3a2   :  { %8412 = vmatprep.subr.bf16.mxu1 %v14593_v6  ;;  %v7789_v47 = vpop.f32.mrf.mxu0  ;;  %8226 = vmatmul.mubr.bf16.vlgmr.msra.gmra.mxu0 %v16431_v21  ;;  %v14561_v39 = vcombine.high %v1067_v32, %v1075_v40  ;;  %v795_v6 = vld [vmem:[#allocation5 + $0x1230] sm:$0xff] }
 0x3a3   :  { %v7790_v12 = vadd.f32 %v7789_v47, %v17106_v60  ;;  %8340 = vmatpush1.bf16.msra.mxu0 %v14336_v10  ;;  %v803_v23 = vld [vmem:[#allocation5 + $0x1270] sm:$0xff]  ;;  %8235 = vmatprep.mubr.bf16.mxu0 %v16435_v34  ;;  %v14560_v10 = vcombine.low %v1067_v32, %v1075_v40 }
 0x3a4   :  { %v7862_v46 = vpop.f32.mrf.mxu1  ;;  %8299 = vmatmul.mubr.bf16.vlgmr.msra.gmra.mxu1 %v16433_v25  ;;  %v7791_v14 = vpop.f32.mrf.mxu0  ;;  %8341 = vmatprep.subr.bf16.mxu0 %v14321_v43  ;;  %v1051_v47 = vld [vmem:[#allocation5 + $0x1a30] sm:$0xff]  ;;  %v14288_v32 = vcombine.low %v795_v6, %v803_v23 }
 0x3a5   :  { %8413 = vmatpush1.bf16.msra.mxu1 %v14592_v28  ;;  %v7863_v42 = vadd.f32 %v7862_v46, %v7790_v12  ;;  %v7792_v22 = vadd.f32 %v7791_v14, %v17111_v36  ;;  %v1059_v11 = vld [vmem:[#allocation5 + $0x1a70] sm:$0xff]  ;;  %8308 = vmatprep.mubr.bf16.mxu1 %v16438_v37  ;;  %v14289_v28 = vcombine.high %v795_v6, %v803_v23 }
 0x3a6   :  { %v7864_v24 = vpop.f32.mrf.mxu1  ;;  %8414 = vmatprep.subr.bf16.mxu1 %v14577_v58  ;;  %v7793_v60 = vpop.f32.mrf.mxu0  ;;  %v779_v43 = vld [vmem:[#allocation5 + $0x11b0] sm:$0xff]  ;;  %v14545_v46 = vcombine.high %v1051_v47, %v1059_v11 }
 0x3a7   :  { %v17177_v59 = vadd.f32 %v7864_v24, %v7792_v22  ;;  %v7794_v9 = vadd.f32 %v7793_v60, %v17116_v55  ;;  %8342 = vmatpush1.bf16.msra.mxu0 %v14320_v29  ;;  %v787_v14 = vld [vmem:[#allocation5 + $0x11f0] sm:$0xff]  ;;  %v8785_v55 = vmax.f32 %v7863_v42, 0.0 }
 0x3a8   :  { %v7866_v19 = vpop.f32.mrf.mxu1  ;;  %v17180_v36 = vpop.f32.mrf.mxu0  ;;  %8343 = vmatprep.subr.bf16.mxu0 %v14305_v52  ;;  %v1035_v22 = vld [vmem:[#allocation5 + $0x19b0] sm:$0xff]  ;;  %v14273_v52 = vcombine.high %v779_v43, %v787_v14 }
 0x3a9   :  { %18773 = vst [vmem:[#allocation140_spill] sm:$0xff] %v17177_v59  ;;  %8415 = vmatpush1.bf16.msra.mxu1 %v14576_v8  ;;  %18774 = vst [vmem:[#allocation141_spill] sm:$0xff] %v17180_v36  ;;  %v7867_v58 = vadd.f32 %v7866_v19, %v7794_v9  ;;  %v1043_v24 = vld [vmem:[#allocation5 + $0x19f0] sm:$0xff]  ;;  %v14544_v8 = vcombine.low %v1051_v47, %v1059_v11 }
 0x3aa   :  { %v17182_v12 = vpop.f32.mrf.mxu1  ;;  %8416 = vmatprep.subr.bf16.mxu1 %v14561_v39  ;;  %v7799_v59 = vpop.f32.mrf.mxu0  ;;  %8236 = vmatmul.mubr.bf16.gmra.mxu0 %v16442_v50  ;;  %v14529_v39 = vcombine.high %v1035_v22, %v1043_v24  ;;  %v1019_v6 = vld [vmem:[#allocation5 + $0x1930] sm:$0xff] }
 0x3ab   :  { %18775 = vst [vmem:[#allocation142_spill] sm:$0xff] %v17182_v12  ;;  %v8801_v56 = vmax.f32 %v7867_v58, 0.0  ;;  %v7800_v27 = vadd.f32 %v7799_v59, %v17125_v31  ;;  %8344 = vmatpush1.bf16.msra.mxu0 %v14304_v18  ;;  %v763_v58 = vld [vmem:[#allocation5 + $0x1130] sm:$0xff]  ;;  %8245 = vmatprep.mubr.bf16.mxu0 %v16447_v0 }
 0x3ac   :  { %v7872_v29 = vpop.f32.mrf.mxu1  ;;  %8309 = vmatmul.mubr.bf16.gmra.mxu1 %v16445_v54  ;;  %v7801_v40 = vpop.f32.mrf.mxu0  ;;  %8345 = vmatprep.subr.bf16.mxu0 %v14289_v28  ;;  %v771_v31 = vld [vmem:[#allocation5 + $0x1170] sm:$0xff]  ;;  %v14528_v28 = vcombine.low %v1035_v22, %v1043_v24 }
 0x3ad   :  { %8417 = vmatpush1.bf16.msra.mxu1 %v14560_v10  ;;  %v17187_v60 = vpack.c.bf16 %v8801_v56, %v8785_v55  ;;  %v7802_v9 = vadd.f32 %v7801_v40, %v17129_v44  ;;  %v7873_v19 = vadd.f32 %v7872_v29, %v7800_v27  ;;  %v1027_v59 = vld [vmem:[#allocation5 + $0x1970] sm:$0xff]  ;;  %8318 = vmatprep.mubr.bf16.mxu1 %v16450_v3 }
 0x3ae   :  { %v7874_v42 = vpop.f32.mrf.mxu1  ;;  %8418 = vmatprep.subr.bf16.mxu1 %v14545_v46  ;;  %v7803_v23 = vpop.f32.mrf.mxu0  ;;  %v14272_v10 = vcombine.low %v779_v43, %v787_v14  ;;  %v14257_v46 = vcombine.high %v763_v58, %v771_v31  ;;  %v747_v55 = vld [vmem:[#allocation5 + $0x10b0] sm:$0xff]  ;;  %v14513_v29 = vcombine.high %v1019_v6, %v1027_v59  ;;  %v14256_v22 = vcombine.low %v763_v58, %v771_v31 }
 0x3af   :  { %18776 = vst [vmem:[#allocation143_spill] sm:$0xff] %v17187_v60  ;;  %v7804_v11 = vadd.f32 %v7803_v23, %v17133_v4  ;;  %v17193_v47 = vadd.f32 %v7874_v42, %v7802_v9  ;;  %8346 = vmatpush1.bf16.msra.mxu0 %v14288_v32  ;;  %v755_v40 = vld [vmem:[#allocation5 + $0x10f0] sm:$0xff]  ;;  %v8817_v32 = vmax.f32 %v7873_v19, 0.0 }
 0x3b0   :  { %v7876_v18 = vpop.f32.mrf.mxu1  ;;  %v17195_v44 = vpop.f32.mrf.mxu0  ;;  %8347 = vmatprep.subr.bf16.mxu0 %v14273_v52  ;;  %v1003_v60 = vld [vmem:[#allocation5 + $0x18b0] sm:$0xff]  ;;  %v14512_v52 = vcombine.low %v1019_v6, %v1027_v59 }
 0x3b1   :  { %18777 = vst [vmem:[#allocation144_spill] sm:$0xff] %v17193_v47  ;;  %8419 = vmatpush1.bf16.msra.mxu1 %v14544_v8  ;;  %18778 = vst [vmem:[#allocation145_spill] sm:$0xff] %v17195_v44  ;;  %v7877_v56 = vadd.f32 %v7876_v18, %v7804_v11  ;;  %v1011_v4 = vld [vmem:[#allocation5 + $0x18f0] sm:$0xff]  ;;  %v244_v47 = vld [vmem:[#allocation5 + $0xf8] sm:$0xff] }
 0x3b2   :  { %v17197_v27 = vpop.f32.mrf.mxu1  ;;  %8420 = vmatprep.subr.bf16.mxu1 %v14529_v39  ;;  %v7809_v9 = vpop.f32.mrf.mxu0  ;;  %8246 = vmatmul.mubr.bf16.gmra.mxu0 %v16454_v16  ;;  %v14241_v39 = vcombine.high %v747_v55, %v755_v40  ;;  %v14497_v42 = vcombine.high %v1003_v60, %v1011_v4  ;;  %v987_v31 = vld [vmem:[#allocation5 + $0x1830] sm:$0xff]  ;;  %v228_v44 = vld [vmem:[#allocation5 + $0x78] sm:$0xff] }
 0x3b3   :  { %18779 = vst [vmem:[#allocation146_spill] sm:$0xff] %v17197_v27  ;;  %v8833_v43 = vmax.f32 %v7877_v56, 0.0  ;;  %v7810_v14 = vadd.f32 %v7809_v9, %v17142_v38  ;;  %8348 = vmatpush1.bf16.msra.mxu0 %v14272_v10  ;;  %v731_v56 = vld [vmem:[#allocation5 + $0x1030] sm:$0xff]  ;;  %8255 = vmatprep.mubr.bf16.mxu0 %v16459_v30 }
 0x3b4   :  { %v7882_v8 = vpop.f32.mrf.mxu1  ;;  %8319 = vmatmul.mubr.bf16.gmra.mxu1 %v16457_v20  ;;  %v7811_v24 = vpop.f32.mrf.mxu0  ;;  %8349 = vmatprep.subr.bf16.mxu0 %v14257_v46  ;;  %v739_v38 = vld [vmem:[#allocation5 + $0x1070] sm:$0xff]  ;;  %v14240_v46 = vcombine.low %v747_v55, %v755_v40 }
 0x3b5   :  { %8421 = vmatpush1.bf16.msra.mxu1 %v14528_v28  ;;  %v17202_v23 = vpack.c.bf16 %v8833_v43, %v8817_v32  ;;  %v7812_v11 = vadd.f32 %v7811_v24, %v17146_v45  ;;  %v7883_v18 = vadd.f32 %v7882_v8, %v7810_v14  ;;  %v995_v10 = vld [vmem:[#allocation5 + $0x1870] sm:$0xff]  ;;  %8328 = vmatprep.mubr.bf16.mxu1 %v16462_v33 }
 0x3b6   :  { %v7884_v19 = vpop.f32.mrf.mxu1  ;;  %8422 = vmatprep.subr.bf16.mxu1 %v14513_v29  ;;  %v7813_v58 = vpop.f32.mrf.mxu0  ;;  %v14496_v29 = vcombine.low %v1003_v60, %v1011_v4  ;;  %v14225_v9 = vcombine.high %v731_v56, %v739_v38  ;;  %v971_v32 = vld [vmem:[#allocation5 + $0x17b0] sm:$0xff]  ;;  %v14481_v8 = vcombine.high %v987_v31, %v995_v10  ;;  %v14224_v60 = vcombine.low %v731_v56, %v739_v38 }
 0x3b7   :  { %18780 = vst [vmem:[#allocation147_spill] sm:$0xff] %v17202_v23  ;;  %v7814_v6 = vadd.f32 %v7813_v58, %v17150_v41  ;;  %v17208_v59 = vadd.f32 %v7884_v19, %v7812_v11  ;;  %8350 = vmatpush1.bf16.msra.mxu0 %v14256_v22  ;;  %v979_v24 = vld [vmem:[#allocation5 + $0x17f0] sm:$0xff]  ;;  %v8849_v22 = vmax.f32 %v7883_v18, 0.0 }
 0x3b8   :  { %v7886_v28 = vpop.f32.mrf.mxu1  ;;  %v17210_v45 = vpop.f32.mrf.mxu0  ;;  %8351 = vmatprep.subr.bf16.mxu0 %v14241_v39  ;;  %v1227_v23 = vld [vmem:[#allocation5 + $0x1fb0] sm:$0xff]  ;;  %v14480_v39 = vcombine.low %v987_v31, %v995_v10 }
 0x3b9   :  { %18781 = vst [vmem:[#allocation148_spill] sm:$0xff] %v17208_v59  ;;  %8423 = vmatpush1.bf16.msra.mxu1 %v14512_v52  ;;  %18782 = vst [vmem:[#allocation149_spill] sm:$0xff] %v17210_v45  ;;  %v7887_v43 = vadd.f32 %v7886_v28, %v7814_v6  ;;  %v1235_v41 = vld [vmem:[#allocation5 + $0x1ff0] sm:$0xff] }
 0x3ba   :  { %v17212_v14 = vpop.f32.mrf.mxu1  ;;  %8424 = vmatprep.subr.bf16.mxu1 %v14497_v42  ;;  %v7819_v11 = vpop.f32.mrf.mxu0  ;;  %8256 = vmatmul.mubr.bf16.gmra.mxu0 %v16466_v48  ;;  %v14465_v42 = vcombine.high %v971_v32, %v979_v24  ;;  %v14721_v19 = vcombine.high %v1227_v23, %v1235_v41  ;;  %v1211_v38 = vld [vmem:[#allocation5 + $0x1f30] sm:$0xff] }
 0x3bb   :  { %18783 = vst [vmem:[#allocation150_spill] sm:$0xff] %v17212_v14  ;;  %v8865_v55 = vmax.f32 %v7887_v43, 0.0  ;;  %v7820_v40 = vadd.f32 %v7819_v11, %v17158_v57  ;;  %8352 = vmatpush1.bf16.msra.mxu0 %v14240_v46  ;;  %v955_v43 = vld [vmem:[#allocation5 + $0x1730] sm:$0xff]  ;;  %8371 = vmatprep.mubr.bf16.mxu0 %v16471_v1 }
 0x3bc   :  { %v7892_v52 = vpop.f32.mrf.mxu1  ;;  %8329 = vmatmul.mubr.bf16.gmra.mxu1 %v16469_v53  ;;  %v7821_v4 = vpop.f32.mrf.mxu0  ;;  %8353 = vmatprep.subr.bf16.mxu0 %v14225_v9  ;;  %v963_v57 = vld [vmem:[#allocation5 + $0x1770] sm:$0xff]  ;;  %v14464_v9 = vcombine.low %v971_v32, %v979_v24 }
 0x3bd   :  { %8425 = vmatpush1.bf16.msra.mxu1 %v14496_v29  ;;  %v17217_v58 = vpack.c.bf16 %v8865_v55, %v8849_v22  ;;  %v7822_v6 = vadd.f32 %v7821_v4, %v17163_v2  ;;  %v7893_v28 = vadd.f32 %v7892_v52, %v7820_v40  ;;  %v1219_v46 = vld [vmem:[#allocation5 + $0x1f70] sm:$0xff]  ;;  %8444 = vmatprep.mubr.bf16.mxu1 %v16474_v5 }
 0x3be   :  { %v7894_v18 = vpop.f32.mrf.mxu1  ;;  %8426 = vmatprep.subr.bf16.mxu1 %v14481_v8  ;;  %v7823_v56 = vpop.f32.mrf.mxu0  ;;  %v14720_v2 = vcombine.low %v1227_v23, %v1235_v41  ;;  %v14449_v8 = vcombine.high %v955_v43, %v963_v57  ;;  %v14705_v22 = vcombine.high %v1211_v38, %v1219_v46  ;;  %v939_v55 = vld [vmem:[#allocation5 + $0x16b0] sm:$0xff] }
 0x3bf   :  { %18784 = vst [vmem:[#allocation151_spill] sm:$0xff] %v17217_v58  ;;  %v7824_v31 = vadd.f32 %v7823_v56, %v17165_v35  ;;  %v17223_v10 = vadd.f32 %v7894_v18, %v7822_v6  ;;  %8354 = vmatpush1.bf16.msra.mxu0 %v14224_v60  ;;  %v947_v40 = vld [vmem:[#allocation5 + $0x16f0] sm:$0xff]  ;;  %v8881_v58 = vmax.f32 %v7893_v28, 0.0  ;;  %v14448_v35 = vcombine.low %v955_v43, %v963_v57 }
 0x3c0   :  { %v7896_v29 = vpop.f32.mrf.mxu1  ;;  %8355 = vmatprep.subr.bf16.mxu0 %v14465_v42  ;;  %v1195_v52 = vld [vmem:[#allocation5 + $0x1eb0] sm:$0xff]  ;;  %v14704_v60 = vcombine.low %v1211_v38, %v1219_v46  ;;  %v14433_v6 = vcombine.high %v939_v55, %v947_v40 }
 0x3c1   :  { %18785 = vst [vmem:[#allocation152_spill] sm:$0xff] %v17223_v10  ;;  %8427 = vmatpush1.bf16.msra.mxu1 %v14480_v39  ;;  %v7897_v11 = vadd.f32 %v7896_v29, %v7824_v31  ;;  %v1203_v4 = vld [vmem:[#allocation5 + $0x1ef0] sm:$0xff]  ;;  %v268_v10 = vld [vmem:[#allocation5 + $0x1b8] sm:$0xff] }
 0x3c2   :  { %8428 = vmatprep.subr.bf16.mxu1 %v14721_v19  ;;  %v14689_v23 = vcombine.high %v1195_v52, %v1203_v4  ;;  %v923_v24 = vld [vmem:[#allocation5 + $0x1630] sm:$0xff]  ;;  %v14432_v19 = vcombine.low %v939_v55, %v947_v40  ;;  %v14688_v28 = vcombine.low %v1195_v52, %v1203_v4 }
 0x3c3   :  { %v8897_v59 = vmax.f32 %v7897_v11, 0.0  ;;  %8356 = vmatpush2.bf16.msra.mxu0 %v14464_v9  ;;  %v931_v41 = vld [vmem:[#allocation5 + $0x1670] sm:$0xff] }
 0x3c4   :  { %8357 = vmatprep.subr.bf16.mxu0 %v14449_v8  ;;  %v1179_v39 = vld [vmem:[#allocation5 + $0x1e30] sm:$0xff]  ;;  %v14417_v18 = vcombine.high %v923_v24, %v931_v41 }
 0x3c5   :  { %8429 = vmatpush2.bf16.msra.mxu1 %v14720_v2  ;;  %v17225_v32 = vpack.c.bf16 %v8897_v59, %v8881_v58  ;;  %v1187_v42 = vld [vmem:[#allocation5 + $0x1e70] sm:$0xff]  ;;  %v14416_v59 = vcombine.low %v923_v24, %v931_v41 }
 0x3c6   :  { %8430 = vmatprep.subr.bf16.mxu1 %v14705_v22  ;;  %v14673_v43 = vcombine.high %v1179_v39, %v1187_v42  ;;  %v907_v57 = vld [vmem:[#allocation5 + $0x15b0] sm:$0xff]  ;;  %v14672_v58 = vcombine.low %v1179_v39, %v1187_v42 }
 0x3c7   :  { %18786 = vst [vmem:[#allocation153_spill] sm:$0xff] %v17225_v32  ;;  %8358 = vmatpush2.bf16.msra.mxu0 %v14448_v35  ;;  %v915_v56 = vld [vmem:[#allocation5 + $0x15f0] sm:$0xff] }
 0x3c8   :  { %8359 = vmatprep.subr.bf16.mxu0 %v14433_v6  ;;  %v1163_v38 = vld [vmem:[#allocation5 + $0x1db0] sm:$0xff]  ;;  %v14401_v31 = vcombine.high %v907_v57, %v915_v56  ;;  %v14400_v22 = vcombine.low %v907_v57, %v915_v56 }
 0x3c9   :  { %8431 = vmatpush2.bf16.msra.mxu1 %v14704_v60  ;;  %v1171_v46 = vld [vmem:[#allocation5 + $0x1df0] sm:$0xff] }
 0x3ca   :  { %8432 = vmatprep.subr.bf16.mxu1 %v14689_v23  ;;  %v14657_v29 = vcombine.high %v1163_v38, %v1171_v46  ;;  %v891_v9 = vld [vmem:[#allocation5 + $0x1530] sm:$0xff]  ;;  %v14656_v55 = vcombine.low %v1163_v38, %v1171_v46  ;;  %v332_v46 = vld [vmem:[#allocation5 + $0x3b8] sm:$0xff] }
 0x3cb   :  { %8360 = vmatpush2.bf16.msra.mxu0 %v14432_v19  ;;  %v899_v2 = vld [vmem:[#allocation5 + $0x1570] sm:$0xff] }
 0x3cc   :  { %8361 = vmatprep.subr.bf16.mxu0 %v14417_v18  ;;  %v1147_v8 = vld [vmem:[#allocation5 + $0x1d30] sm:$0xff]  ;;  %v14385_v40 = vcombine.high %v891_v9, %v899_v2  ;;  %v14384_v23 = vcombine.low %v891_v9, %v899_v2 }
 0x3cd   :  { %8433 = vmatpush2.bf16.msra.mxu1 %v14688_v28  ;;  %v1155_v11 = vld [vmem:[#allocation5 + $0x1d70] sm:$0xff] }
 0x3ce   :  { %8434 = vmatprep.subr.bf16.mxu1 %v14673_v43  ;;  %v14641_v52 = vcombine.high %v1147_v8, %v1155_v11  ;;  %v875_v4 = vld [vmem:[#allocation5 + $0x14b0] sm:$0xff]  ;;  %v14640_v24 = vcombine.low %v1147_v8, %v1155_v11  ;;  %v316_v11 = vld [vmem:[#allocation5 + $0x338] sm:$0xff] }
 0x3cf   :  { %8362 = vmatpush2.bf16.msra.mxu0 %v14416_v59  ;;  %v883_v35 = vld [vmem:[#allocation5 + $0x14f0] sm:$0xff]  ;;  %v340_v59 = vld [vmem:[#allocation5 + $0x3f8] sm:$0xff] }
 0x3d0   :  { %8363 = vmatprep.subr.bf16.mxu0 %v14401_v31  ;;  %v1131_v60 = vld [vmem:[#allocation5 + $0x1cb0] sm:$0xff]  ;;  %v14369_v41 = vcombine.high %v875_v4, %v883_v35  ;;  %v14368_v43 = vcombine.low %v875_v4, %v883_v35  ;;  %v596_v31 = vld [vmem:[#allocation5 + $0xbf8] sm:$0xff]  ;;  %v13827_v2 = vcombine.high %v332_v46, %v340_v59 }
 0x3d1   :  { %8435 = vmatpush2.bf16.msra.mxu1 %v14672_v58  ;;  %v1139_v6 = vld [vmem:[#allocation5 + $0x1cf0] sm:$0xff]  ;;  %v588_v58 = vld [vmem:[#allocation5 + $0xbb8] sm:$0xff] }
 0x3d2   :  { %8436 = vmatprep.subr.bf16.mxu1 %v14657_v29  ;;  %v14625_v39 = vcombine.high %v1131_v60, %v1139_v6  ;;  %v859_v42 = vld [vmem:[#allocation5 + $0x1430] sm:$0xff]  ;;  %v14624_v57 = vcombine.low %v1131_v60, %v1139_v6  ;;  %v14083_v8 = vcombine.high %v588_v58, %v596_v31  ;;  %v13826_v60 = vcombine.low %v332_v46, %v340_v59  ;;  %v17230_v6 = vpop.f32.mrf.mxu0 }
 0x3d3   :  { %8364 = vmatpush2.bf16.msra.mxu0 %v14400_v22  ;;  %v867_v19 = vld [vmem:[#allocation5 + $0x1470] sm:$0xff]  ;;  %v324_v22 = vld [vmem:[#allocation5 + $0x378] sm:$0xff]  ;;  %18788 = vst [vmem:[#allocation154_spill] sm:$0xff] %v17230_v6 }
 0x3d4   :  { %8365 = vmatprep.subr.bf16.mxu0 %v14385_v40  ;;  %v1115_v28 = vld [vmem:[#allocation5 + $0x1c30] sm:$0xff]  ;;  %v14353_v56 = vcombine.high %v859_v42, %v867_v19  ;;  %v14352_v29 = vcombine.low %v859_v42, %v867_v19  ;;  %v580_v40 = vld [vmem:[#allocation5 + $0xb78] sm:$0xff]  ;;  %v13810_v59 = vcombine.low %v316_v11, %v324_v22 }
 0x3d5   :  { %8437 = vmatpush2.bf16.msra.mxu1 %v14656_v55  ;;  %v1123_v18 = vld [vmem:[#allocation5 + $0x1c70] sm:$0xff]  ;;  %v572_v55 = vld [vmem:[#allocation5 + $0xb38] sm:$0xff] }
 0x3d6   :  { %8438 = vmatprep.subr.bf16.mxu1 %v14641_v52  ;;  %v14609_v38 = vcombine.high %v1115_v28, %v1123_v18  ;;  %v14608_v9 = vcombine.low %v1115_v28, %v1123_v18  ;;  %v16167_v52 = vld [vmem:[#allocation7 + $0x8] sm:$0xff]  ;;  %v18787_v4 = vld [vmem:[#allocation56_spill] sm:$0xff]  ;;  %v14067_v19 = vcombine.high %v572_v55, %v580_v40 }
 0x3d7   :  { %8366 = vmatpush2.bf16.msra.mxu0 %v14384_v23  ;;  %v17228_v35 = vrot.slane %v16167_v52, %v18787_v4  ;;  %v14082_v23 = vcombine.low %v588_v58, %v596_v31  ;;  %v300_v28 = vld [vmem:[#allocation5 + $0x2b8] sm:$0xff]  ;;  %v14066_v31 = vcombine.low %v572_v55, %v580_v40 }
 0x3d8   :  { %8367 = vmatprep.subr.bf16.mxu0 %v14369_v41  ;;  %v17232_v41 = vpop.f32.mrf.mxu1  ;;  %v308_v18 = vld [vmem:[#allocation5 + $0x2f8] sm:$0xff] }
 0x3d9   :  { %8439 = vmatpush2.bf16.msra.mxu1 %v14640_v24  ;;  %v13811_v24 = vcombine.high %v316_v11, %v324_v22  ;;  %18789 = vst [vmem:[#allocation155_spill] sm:$0xff] %v17232_v41  ;;  %v540_v11 = vld [vmem:[#allocation5 + $0xa38] sm:$0xff] }
 0x3da   :  { %8440 = vmatprep.subr.bf16.mxu1 %v14625_v39  ;;  %v18790_v39 = vld [vmem:[#allocation57_spill] sm:$0xff] }
 0x3db   :  { %8368 = vmatpush2.bf16.msra.mxu0 %v14368_v43  ;;  %v17235_v42 = vrot.slane %v16167_v52, %v18790_v39  ;;  %v292_v39 = vld [vmem:[#allocation5 + $0x278] sm:$0xff] }
 0x3dc   :  { %8369 = vmatprep.subr.bf16.mxu0 %v14353_v56  ;;  %v564_v56 = vld [vmem:[#allocation5 + $0xaf8] sm:$0xff] }
 0x3dd   :  { %8441 = vmatpush2.bf16.msra.mxu1 %v14624_v57  ;;  %18791 = vst [vmem:[#allocation156_spill] sm:$0xff] %v17235_v42  ;;  %v556_v57 = vld [vmem:[#allocation5 + $0xab8] sm:$0xff] }
 0x3de   :  { %8442 = vmatprep.subr.bf16.mxu1 %v14609_v38  ;;  %v14051_v52 = vcombine.high %v556_v57, %v564_v56  ;;  %v548_v22 = vld [vmem:[#allocation5 + $0xa78] sm:$0xff] }
 0x3df   :  { %8370 = vmatpush2.bf16.msra.mxu0 %v14352_v29  ;;  %v13795_v29 = vcombine.high %v300_v28, %v308_v18  ;;  %v14035_v32 = vcombine.high %v540_v11, %v548_v22 }
 0x3e0   :  { %8485 = vmatprep.subr.bf16.mxu0 %v13827_v2 }
 0x3e1   :  { %8443 = vmatpush2.bf16.msra.mxu1 %v14608_v9 }
 0x3e2   :  { %8558 = vmatprep.subr.bf16.mxu1 %v14083_v8  ;;  %v7935_v43 = vpop.f32.mrf.mxu0  ;;  %8372 = vmatmul.mubr.bf16.vlgmr.msra.gmra.mxu0 %v16479_v49 }
 0x3e3   :  { %v7936_v38 = vadd.f32 %v7935_v43, %v17228_v35  ;;  %8486 = vmatpush1.bf16.msra.mxu0 %v13826_v60  ;;  %8381 = vmatprep.mubr.bf16.mxu0 %v16483_v61  ;;  %v284_v43 = vld [vmem:[#allocation5 + $0x238] sm:$0xff] }
 0x3e4   :  { %v8008_v46 = vpop.f32.mrf.mxu1  ;;  %8445 = vmatmul.mubr.bf16.vlgmr.msra.gmra.mxu1 %v16481_v51  ;;  %v7937_v58 = vpop.f32.mrf.mxu0  ;;  %8487 = vmatprep.subr.bf16.mxu0 %v13811_v24 }
 0x3e5   :  { %8559 = vmatpush1.bf16.msra.mxu1 %v14082_v23  ;;  %v17240_v9 = vadd.f32 %v8008_v46, %v7936_v38  ;;  %v7938_v2 = vadd.f32 %v7937_v58, %v17235_v42  ;;  %8454 = vmatprep.mubr.bf16.mxu1 %v16486_v7  ;;  %v13794_v23 = vcombine.low %v300_v28, %v308_v18 }
 0x3e6   :  { %v8010_v8 = vpop.f32.mrf.mxu1  ;;  %8560 = vmatprep.subr.bf16.mxu1 %v14067_v19  ;;  %v7939_v4 = vpop.f32.mrf.mxu0  ;;  %v14050_v19 = vcombine.low %v556_v57, %v564_v56  ;;  %v13779_v38 = vcombine.high %v284_v43, %v292_v39  ;;  %v13778_v28 = vcombine.low %v284_v43, %v292_v39  ;;  %v14034_v56 = vcombine.low %v540_v11, %v548_v22  ;;  %v508_v39 = vld [vmem:[#allocation5 + $0x938] sm:$0xff] }
 0x3e7   :  { %v17245_v60 = vadd.f32 %v8010_v8, %v7938_v2  ;;  %v7940_v55 = vadd.f32 %v7939_v4, %v17228_v35  ;;  %8488 = vmatpush1.bf16.msra.mxu0 %v13810_v59  ;;  %v276_v2 = vld [vmem:[#allocation5 + $0x1f8] sm:$0xff] }
 0x3e8   :  { %v8012_v40 = vpop.f32.mrf.mxu1  ;;  %v17248_v24 = vpop.f32.mrf.mxu0  ;;  %8489 = vmatprep.subr.bf16.mxu0 %v13795_v29  ;;  %v524_v4 = vld [vmem:[#allocation5 + $0x9b8] sm:$0xff]  ;;  %v13762_v11 = vcombine.low %v268_v10, %v276_v2 }
 0x3e9   :  { %8561 = vmatpush1.bf16.msra.mxu1 %v14066_v31  ;;  %18792 = vst [vmem:[#allocation157_spill] sm:$0xff] %v17248_v24  ;;  %v17250_v46 = vadd.f32 %v8012_v40, %v7940_v55  ;;  %v532_v8 = vld [vmem:[#allocation5 + $0x9f8] sm:$0xff]  ;;  %v13763_v31 = vcombine.high %v268_v10, %v276_v2 }
 0x3ea   :  { %v17252_v58 = vpop.f32.mrf.mxu1  ;;  %8562 = vmatprep.subr.bf16.mxu1 %v14051_v52  ;;  %8382 = vmatmul.mubr.bf16.gmra.mxu0 %v16490_v26  ;;  %v7945_v59 = vpop.f32.mrf.mxu0  ;;  %v14019_v52 = vcombine.high %v524_v4, %v532_v8  ;;  %v252_v55 = vld [vmem:[#allocation5 + $0x138] sm:$0xff] }
 0x3eb   :  { %18793 = vst [vmem:[#allocation158_spill] sm:$0xff] %v17252_v58  ;;  %8490 = vmatpush1.bf16.msra.mxu0 %v13794_v23  ;;  %v7946_v18 = vadd.f32 %v7945_v59, %v17228_v35  ;;  %8391 = vmatprep.mubr.bf16.mxu0 %v18664_v15  ;;  %v260_v40 = vld [vmem:[#allocation5 + $0x178] sm:$0xff]  ;;  %v14018_v59 = vcombine.low %v524_v4, %v532_v8 }
 0x3ec   :  { %8455 = vmatmul.mubr.bf16.gmra.mxu1 %v18663_v17  ;;  %v8018_v57 = vpop.f32.mrf.mxu1  ;;  %8491 = vmatprep.subr.bf16.mxu0 %v13779_v38  ;;  %v7947_v29 = vpop.f32.mrf.mxu0  ;;  %v516_v43 = vld [vmem:[#allocation5 + $0x978] sm:$0xff]  ;;  %v13747_v14 = vcombine.high %v252_v55, %v260_v40  ;;  %v13746_v4 = vcombine.low %v252_v55, %v260_v40  ;;  %v18798_v55 = vld [vmem:[#allocation27_spill] sm:$0xff] }
 0x3ed   :  { %8563 = vmatpush1.bf16.msra.mxu1 %v14050_v19  ;;  %v7948_v41 = vadd.f32 %v7947_v29, %v17235_v42  ;;  %v17259_v23 = vadd.f32 %v8018_v57, %v7946_v18  ;;  %8464 = vmatprep.mubr.bf16.mxu1 %v18665_v62  ;;  %v14003_v18 = vcombine.high %v508_v39, %v516_v43  ;;  %v236_v57 = vld [vmem:[#allocation5 + $0xb8] sm:$0xff] }
 0x3ee   :  { %8564 = vmatprep.subr.bf16.mxu1 %v14035_v32  ;;  %v8020_v6 = vpop.f32.mrf.mxu1  ;;  %v7949_v19 = vpop.f32.mrf.mxu0  ;;  %v492_v10 = vld [vmem:[#allocation5 + $0x8b8] sm:$0xff] }
 0x3ef   :  { %8492 = vmatpush1.bf16.msra.mxu0 %v13778_v28  ;;  %v7950_v22 = vadd.f32 %v7949_v19, %v17228_v35  ;;  %v17263_v32 = vadd.f32 %v8020_v6, %v7948_v41  ;;  %v500_v6 = vld [vmem:[#allocation5 + $0x8f8] sm:$0xff]  ;;  %v18797_v19 = vld [vmem:[#allocation26_spill] sm:$0xff] }
 0x3f0   :  { %v8022_v38 = vpop.f32.mrf.mxu1  ;;  %8493 = vmatprep.subr.bf16.mxu0 %v13763_v31  ;;  %v17265_v29 = vpop.f32.mrf.mxu0  ;;  %v18796_v2 = vld [vmem:[#allocation25_spill] sm:$0xff]  ;;  %v13731_v31 = vcombine.high %v236_v57, %v244_v47  ;;  %v13986_v12 = vcombine.low %v492_v10, %v500_v6 }
 0x3f1   :  { %8565 = vmatpush1.bf16.msra.mxu1 %v14034_v56  ;;  %18794 = vst [vmem:[#allocation159_spill] sm:$0xff] %v17265_v29  ;;  %v17267_v45 = vadd.f32 %v8022_v38, %v7950_v22  ;;  %v14002_v56 = vcombine.low %v508_v39, %v516_v43  ;;  %v13987_v22 = vcombine.high %v492_v10, %v500_v6  ;;  %v220_v38 = vld [vmem:[#allocation5 + $0x38] sm:$0xff] }
 0x3f2   :  { %8566 = vmatprep.subr.bf16.mxu1 %v14019_v52  ;;  %v17269_v27 = vpop.f32.mrf.mxu1  ;;  %8392 = vmatmul.mubr.bf16.gmra.mxu0 %v18729_v13  ;;  %v7955_v41 = vpop.f32.mrf.mxu0  ;;  %v476_v40 = vld [vmem:[#allocation5 + $0x838] sm:$0xff]  ;;  %v13715_v36 = vcombine.high %v220_v38, %v228_v44  ;;  %v13714_v10 = vcombine.low %v220_v38, %v228_v44 }
 0x3f3   :  { %18795 = vst [vmem:[#allocation160_spill] sm:$0xff] %v17269_v27  ;;  %8494 = vmatpush1.bf16.msra.mxu0 %v13762_v11  ;;  %v7956_v8 = vadd.f32 %v7955_v41, %v17228_v35  ;;  %8401 = vmatprep.mubr.bf16.mxu0 %v18797_v19  ;;  %v484_v41 = vld [vmem:[#allocation5 + $0x878] sm:$0xff] }
 0x3f4   :  { %8465 = vmatmul.mubr.bf16.gmra.mxu1 %v18796_v2  ;;  %v8028_v28 = vpop.f32.mrf.mxu1  ;;  %8495 = vmatprep.subr.bf16.mxu0 %v13747_v14  ;;  %v7957_v52 = vpop.f32.mrf.mxu0  ;;  %v13730_v14 = vcombine.low %v236_v57, %v244_v47  ;;  %v468_v58 = vld [vmem:[#allocation5 + $0x7f8] sm:$0xff] }
 0x3f5   :  { %8567 = vmatpush1.bf16.msra.mxu1 %v14018_v59  ;;  %v7958_v27 = vadd.f32 %v7957_v52, %v17235_v42  ;;  %v17276_v11 = vadd.f32 %v8028_v28, %v7956_v8  ;;  %8474 = vmatprep.mubr.bf16.mxu1 %v18798_v55  ;;  %v13971_v8 = vcombine.high %v476_v40, %v484_v41  ;;  %v460_v28 = vld [vmem:[#allocation5 + $0x7b8] sm:$0xff] }
 0x3f6   :  { %8568 = vmatprep.subr.bf16.mxu1 %v14003_v18  ;;  %v8030_v29 = vpop.f32.mrf.mxu1  ;;  %v7959_v59 = vpop.f32.mrf.mxu0  ;;  %v18801_v47 = vld [vmem:[#allocation28_spill] sm:$0xff] }
 0x3f7   :  { %8496 = vmatpush1.bf16.msra.mxu0 %v13746_v4  ;;  %v7960_v39 = vadd.f32 %v7959_v59, %v17228_v35  ;;  %v17280_v43 = vadd.f32 %v8030_v29, %v7958_v27  ;;  %v716_v57 = vld [vmem:[#allocation5 + $0xfb8] sm:$0xff] }
 0x3f8   :  { %v8032_v18 = vpop.f32.mrf.mxu1  ;;  %8497 = vmatprep.subr.bf16.mxu0 %v13731_v31  ;;  %v17282_v52 = vpop.f32.mrf.mxu0  ;;  %v724_v27 = vld [vmem:[#allocation5 + $0xff8] sm:$0xff]  ;;  %v13970_v31 = vcombine.low %v476_v40, %v484_v41 }
 0x3f9   :  { %8569 = vmatpush1.bf16.msra.mxu1 %v14002_v56  ;;  %18799 = vst [vmem:[#allocation161_spill] sm:$0xff] %v17282_v52  ;;  %v17284_v24 = vadd.f32 %v8032_v18, %v7960_v39  ;;  %v18802_v4 = vld [vmem:[#allocation29_spill] sm:$0xff]  ;;  %v14211_v39 = vcombine.high %v716_v57, %v724_v27  ;;  %v18803_v19 = vld [vmem:[#allocation20_spill] sm:$0xff]  ;;  %v14210_v41 = vcombine.low %v716_v57, %v724_v27 }
 0x3fa   :  { %8570 = vmatprep.subr.bf16.mxu1 %v13987_v22  ;;  %v17286_v55 = vpop.f32.mrf.mxu1  ;;  %8402 = vmatmul.mubr.bf16.gmra.mxu0 %v18801_v47  ;;  %v7965_v29 = vpop.f32.mrf.mxu0  ;;  %v13955_v22 = vcombine.high %v460_v28, %v468_v58  ;;  %v444_v18 = vld [vmem:[#allocation5 + $0x738] sm:$0xff] }
 0x3fb   :  { %18800 = vst [vmem:[#allocation162_spill] sm:$0xff] %v17286_v55  ;;  %8498 = vmatpush1.bf16.msra.mxu0 %v13730_v14  ;;  %v7966_v6 = vadd.f32 %v7965_v29, %v17228_v35  ;;  %v452_v55 = vld [vmem:[#allocation5 + $0x778] sm:$0xff]  ;;  %8517 = vmatprep.mubr.bf16.mxu0 %v18803_v19 }
 0x3fc   :  { %8475 = vmatmul.mubr.bf16.gmra.mxu1 %v18802_v4  ;;  %v8038_v56 = vpop.f32.mrf.mxu1  ;;  %8499 = vmatprep.subr.bf16.mxu0 %v13715_v36  ;;  %v7967_v59 = vpop.f32.mrf.mxu0  ;;  %v700_v44 = vld [vmem:[#allocation5 + $0xf38] sm:$0xff]  ;;  %v13954_v36 = vcombine.low %v460_v28, %v468_v58 }
 0x3fd   :  { %8571 = vmatpush1.bf16.msra.mxu1 %v13986_v12  ;;  %v7968_v52 = vadd.f32 %v7967_v59, %v17235_v42  ;;  %v17292_v47 = vadd.f32 %v8038_v56, %v7966_v6  ;;  %v708_v38 = vld [vmem:[#allocation5 + $0xf78] sm:$0xff]  ;;  %8590 = vmatprep.mubr.bf16.mxu1 %v16427_v63  ;;  %v13938_v63 = vcombine.low %v444_v18, %v452_v55 }
 0x3fe   :  { %8572 = vmatprep.subr.bf16.mxu1 %v13971_v8  ;;  %v8040_v14 = vpop.f32.mrf.mxu1  ;;  %v7969_v29 = vpop.f32.mrf.mxu0  ;;  %v13939_v8 = vcombine.high %v444_v18, %v452_v55  ;;  %v14195_v56 = vcombine.high %v700_v44, %v708_v38  ;;  %v428_v59 = vld [vmem:[#allocation5 + $0x6b8] sm:$0xff] }
 0x3ff   :  { %8500 = vmatpush1.bf16.msra.mxu0 %v13714_v10  ;;  %v7970_v12 = vadd.f32 %v7969_v29, %v17228_v35  ;;  %v17297_v40 = vadd.f32 %v8040_v14, %v7968_v52  ;;  %v436_v19 = vld [vmem:[#allocation5 + $0x6f8] sm:$0xff]  ;;  %v14194_v35 = vcombine.low %v700_v44, %v708_v38 }
 0x400   :  { %8501 = vmatprep.subr.bf16.mxu0 %v13955_v22  ;;  %v8042_v6 = vpop.f32.mrf.mxu1  ;;  %v684_v4 = vld [vmem:[#allocation5 + $0xeb8] sm:$0xff]  ;;  %v13923_v58 = vcombine.high %v428_v59, %v436_v19 }
 0x401   :  { %8573 = vmatpush1.bf16.msra.mxu1 %v13970_v31  ;;  %v17299_v42 = vadd.f32 %v8042_v6, %v7970_v12  ;;  %v692_v2 = vld [vmem:[#allocation5 + $0xef8] sm:$0xff]  ;;  %v13922_v31 = vcombine.low %v428_v59, %v436_v19 }
 0x402   :  { %8574 = vmatprep.subr.bf16.mxu1 %v14211_v39  ;;  %v14179_v52 = vcombine.high %v684_v4, %v692_v2  ;;  %v412_v28 = vld [vmem:[#allocation5 + $0x638] sm:$0xff]  ;;  %v14178_v22 = vcombine.low %v684_v4, %v692_v2 }
 0x403   :  { %8502 = vmatpush2.bf16.msra.mxu0 %v13954_v36  ;;  %v420_v57 = vld [vmem:[#allocation5 + $0x678] sm:$0xff] }
 0x404   :  { %8503 = vmatprep.subr.bf16.mxu0 %v13939_v8  ;;  %v668_v27 = vld [vmem:[#allocation5 + $0xe38] sm:$0xff]  ;;  %v13907_v39 = vcombine.high %v412_v28, %v420_v57  ;;  %v13906_v44 = vcombine.low %v412_v28, %v420_v57 }
 0x405   :  { %8575 = vmatpush2.bf16.msra.mxu1 %v14210_v41  ;;  %v676_v10 = vld [vmem:[#allocation5 + $0xe78] sm:$0xff] }
 0x406   :  { %8576 = vmatprep.subr.bf16.mxu1 %v14195_v56  ;;  %v14163_v14 = vcombine.high %v668_v27, %v676_v10  ;;  %v396_v29 = vld [vmem:[#allocation5 + $0x5b8] sm:$0xff]  ;;  %v14162_v38 = vcombine.low %v668_v27, %v676_v10 }
 0x407   :  { %8504 = vmatpush2.bf16.msra.mxu0 %v13938_v63  ;;  %v404_v55 = vld [vmem:[#allocation5 + $0x5f8] sm:$0xff] }
 0x408   :  { %8505 = vmatprep.subr.bf16.mxu0 %v13923_v58  ;;  %v652_v18 = vld [vmem:[#allocation5 + $0xdb8] sm:$0xff]  ;;  %v13891_v12 = vcombine.high %v396_v29, %v404_v55  ;;  %v13890_v2 = vcombine.low %v396_v29, %v404_v55 }
 0x409   :  { %8577 = vmatpush2.bf16.msra.mxu1 %v14194_v35  ;;  %v660_v36 = vld [vmem:[#allocation5 + $0xdf8] sm:$0xff] }
 0x40a   :  { %8578 = vmatprep.subr.bf16.mxu1 %v14179_v52  ;;  %v14147_v41 = vcombine.high %v652_v18, %v660_v36  ;;  %v380_v8 = vld [vmem:[#allocation5 + $0x538] sm:$0xff]  ;;  %v14146_v4 = vcombine.low %v652_v18, %v660_v36 }
 0x40b   :  { %8506 = vmatpush2.bf16.msra.mxu0 %v13922_v31  ;;  %v388_v6 = vld [vmem:[#allocation5 + $0x578] sm:$0xff] }
 0x40c   :  { %8507 = vmatprep.subr.bf16.mxu0 %v13907_v39  ;;  %v636_v56 = vld [vmem:[#allocation5 + $0xd38] sm:$0xff]  ;;  %v13875_v19 = vcombine.high %v380_v8, %v388_v6  ;;  %v13874_v57 = vcombine.low %v380_v8, %v388_v6 }
 0x40d   :  { %8579 = vmatpush2.bf16.msra.mxu1 %v14178_v22  ;;  %v644_v59 = vld [vmem:[#allocation5 + $0xd78] sm:$0xff] }
 0x40e   :  { %8580 = vmatprep.subr.bf16.mxu1 %v14163_v14  ;;  %v14131_v63 = vcombine.high %v636_v56, %v644_v59  ;;  %v364_v35 = vld [vmem:[#allocation5 + $0x4b8] sm:$0xff]  ;;  %v14130_v27 = vcombine.low %v636_v56, %v644_v59 }
 0x40f   :  { %8508 = vmatpush2.bf16.msra.mxu0 %v13906_v44  ;;  %v372_v58 = vld [vmem:[#allocation5 + $0x4f8] sm:$0xff] }
 0x410   :  { %8509 = vmatprep.subr.bf16.mxu0 %v13891_v12  ;;  %v620_v52 = vld [vmem:[#allocation5 + $0xcb8] sm:$0xff]  ;;  %v13859_v10 = vcombine.high %v364_v35, %v372_v58  ;;  %v13858_v55 = vcombine.low %v364_v35, %v372_v58 }
 0x411   :  { %8581 = vmatpush2.bf16.msra.mxu1 %v14162_v38  ;;  %v628_v28 = vld [vmem:[#allocation5 + $0xcf8] sm:$0xff] }
 0x412   :  { %8582 = vmatprep.subr.bf16.mxu1 %v14147_v41  ;;  %v14115_v31 = vcombine.high %v620_v52, %v628_v28  ;;  %v348_v22 = vld [vmem:[#allocation5 + $0x438] sm:$0xff]  ;;  %v14114_v18 = vcombine.low %v620_v52, %v628_v28  ;;  %v17301_v52 = vpop.f32.mrf.mxu0 }
 0x413   :  { %8510 = vmatpush2.bf16.msra.mxu0 %v13890_v2  ;;  %v356_v39 = vld [vmem:[#allocation5 + $0x478] sm:$0xff] }
 0x414   :  { %8511 = vmatprep.subr.bf16.mxu0 %v13875_v19  ;;  %v604_v14 = vld [vmem:[#allocation5 + $0xc38] sm:$0xff]  ;;  %v13843_v36 = vcombine.high %v348_v22, %v356_v39  ;;  %v13842_v6 = vcombine.low %v348_v22, %v356_v39 }
 0x415   :  { %8583 = vmatpush2.bf16.msra.mxu1 %v14146_v4  ;;  %v612_v29 = vld [vmem:[#allocation5 + $0xc78] sm:$0xff] }
 0x416   :  { %8584 = vmatprep.subr.bf16.mxu1 %v14131_v63  ;;  %v14099_v44 = vcombine.high %v604_v14, %v612_v29  ;;  %v844_v38 = vld [vmem:[#allocation5 + $0x13b8] sm:$0xff]  ;;  %v14098_v56 = vcombine.low %v604_v14, %v612_v29 }
 0x417   :  { %8512 = vmatpush2.bf16.msra.mxu0 %v13874_v57  ;;  %v852_v12 = vld [vmem:[#allocation5 + $0x13f8] sm:$0xff] }
 0x418   :  { %8513 = vmatprep.subr.bf16.mxu0 %v13859_v10  ;;  %v1100_v41 = vld [vmem:[#allocation5 + $0x1bb8] sm:$0xff]  ;;  %v14339_v59 = vcombine.high %v844_v38, %v852_v12  ;;  %v14338_v58 = vcombine.low %v844_v38, %v852_v12 }
 0x419   :  { %8585 = vmatpush2.bf16.msra.mxu1 %v14130_v27  ;;  %v1108_v8 = vld [vmem:[#allocation5 + $0x1bf8] sm:$0xff]  ;;  %v17303_v27 = vpop.f32.mrf.mxu1 }
 0x41a   :  { %8586 = vmatprep.subr.bf16.mxu1 %v14115_v31  ;;  %v14595_v2 = vcombine.high %v1100_v41, %v1108_v8  ;;  %v828_v4 = vld [vmem:[#allocation5 + $0x1338] sm:$0xff]  ;;  %v14594_v28 = vcombine.low %v1100_v41, %v1108_v8 }
 0x41b   :  { %8514 = vmatpush2.bf16.msra.mxu0 %v13858_v55  ;;  %v836_v19 = vld [vmem:[#allocation5 + $0x1378] sm:$0xff] }
 0x41c   :  { %8515 = vmatprep.subr.bf16.mxu0 %v13843_v36  ;;  %v1084_v63 = vld [vmem:[#allocation5 + $0x1b38] sm:$0xff]  ;;  %v14323_v57 = vcombine.high %v828_v4, %v836_v19  ;;  %v14322_v36 = vcombine.low %v828_v4, %v836_v19 }
 0x41d   :  { %8587 = vmatpush2.bf16.msra.mxu1 %v14114_v18  ;;  %v1092_v35 = vld [vmem:[#allocation5 + $0x1b78] sm:$0xff] }
 0x41e   :  { %8588 = vmatprep.subr.bf16.mxu1 %v14099_v44  ;;  %v14579_v10 = vcombine.high %v1084_v63, %v1092_v35  ;;  %v812_v31 = vld [vmem:[#allocation5 + $0x12b8] sm:$0xff]  ;;  %v14578_v38 = vcombine.low %v1084_v63, %v1092_v35 }
 0x41f   :  { %8516 = vmatpush2.bf16.msra.mxu0 %v13842_v6  ;;  %v820_v22 = vld [vmem:[#allocation5 + $0x12f8] sm:$0xff] }
 0x420   :  { %8631 = vmatprep.subr.bf16.mxu0 %v14339_v59  ;;  %v1068_v14 = vld [vmem:[#allocation5 + $0x1ab8] sm:$0xff]  ;;  %v14307_v12 = vcombine.high %v812_v31, %v820_v22  ;;  %v14306_v35 = vcombine.low %v812_v31, %v820_v22 }
 0x421   :  { %8589 = vmatpush2.bf16.msra.mxu1 %v14098_v56  ;;  %v1076_v29 = vld [vmem:[#allocation5 + $0x1af8] sm:$0xff] }
 0x422   :  { %8704 = vmatprep.subr.bf16.mxu1 %v14595_v2  ;;  %v8081_v39 = vpop.f32.mrf.mxu0  ;;  %8518 = vmatmul.mubr.bf16.vlgmr.msra.gmra.mxu0 %v16431_v21  ;;  %v14563_v21 = vcombine.high %v1068_v14, %v1076_v29  ;;  %v796_v56 = vld [vmem:[#allocation5 + $0x1238] sm:$0xff] }
 0x423   :  { %v8082_v55 = vadd.f32 %v8081_v39, %v17240_v9  ;;  %8632 = vmatpush1.bf16.msra.mxu0 %v14338_v58  ;;  %v804_v59 = vld [vmem:[#allocation5 + $0x1278] sm:$0xff]  ;;  %8527 = vmatprep.mubr.bf16.mxu0 %v16435_v34  ;;  %v14562_v58 = vcombine.low %v1068_v14, %v1076_v29 }
 0x424   :  { %v8154_v18 = vpop.f32.mrf.mxu1  ;;  %8591 = vmatmul.mubr.bf16.vlgmr.msra.gmra.mxu1 %v16433_v25  ;;  %v8083_v44 = vpop.f32.mrf.mxu0  ;;  %8633 = vmatprep.subr.bf16.mxu0 %v14323_v57  ;;  %v1052_v2 = vld [vmem:[#allocation5 + $0x1a38] sm:$0xff]  ;;  %v14290_v14 = vcombine.low %v796_v56, %v804_v59 }
 0x425   :  { %8705 = vmatpush1.bf16.msra.mxu1 %v14594_v28  ;;  %v8155_v41 = vadd.f32 %v8154_v18, %v8082_v55  ;;  %v8084_v8 = vadd.f32 %v8083_v44, %v17245_v60  ;;  %v1060_v25 = vld [vmem:[#allocation5 + $0x1a78] sm:$0xff]  ;;  %8600 = vmatprep.mubr.bf16.mxu1 %v16438_v37  ;;  %v14291_v28 = vcombine.high %v796_v56, %v804_v59 }
 0x426   :  { %v8156_v6 = vpop.f32.mrf.mxu1  ;;  %8706 = vmatprep.subr.bf16.mxu1 %v14579_v10  ;;  %v8085_v9 = vpop.f32.mrf.mxu0  ;;  %v780_v57 = vld [vmem:[#allocation5 + $0x11b8] sm:$0xff]  ;;  %v14547_v39 = vcombine.high %v1052_v2, %v1060_v25 }
 0x427   :  { %v17311_v4 = vadd.f32 %v8156_v6, %v8084_v8  ;;  %v8086_v19 = vadd.f32 %v8085_v9, %v17250_v46  ;;  %8634 = vmatpush1.bf16.msra.mxu0 %v14322_v36  ;;  %v788_v37 = vld [vmem:[#allocation5 + $0x11f8] sm:$0xff]  ;;  %v8787_v46 = vmax.f32 %v8155_v41, 0.0 }
 0x428   :  { %v8158_v63 = vpop.f32.mrf.mxu1  ;;  %v17314_v60 = vpop.f32.mrf.mxu0  ;;  %8635 = vmatprep.subr.bf16.mxu0 %v14307_v12  ;;  %v1036_v55 = vld [vmem:[#allocation5 + $0x19b8] sm:$0xff]  ;;  %v14275_v12 = vcombine.high %v780_v57, %v788_v37 }
 0x429   :  { %8707 = vmatpush1.bf16.msra.mxu1 %v14578_v38  ;;  %v8159_v34 = vadd.f32 %v8158_v63, %v8086_v19  ;;  %v1044_v18 = vld [vmem:[#allocation5 + $0x19f8] sm:$0xff]  ;;  %v14546_v38 = vcombine.low %v1052_v2, %v1060_v25  ;;  %v14274_v63 = vcombine.low %v780_v57, %v788_v37 }
 0x42a   :  { %v17316_v10 = vpop.f32.mrf.mxu1  ;;  %8708 = vmatprep.subr.bf16.mxu1 %v14563_v21  ;;  %v8091_v44 = vpop.f32.mrf.mxu0  ;;  %8528 = vmatmul.mubr.bf16.gmra.mxu0 %v16442_v50  ;;  %v14531_v8 = vcombine.high %v1036_v55, %v1044_v18  ;;  %v764_v9 = vld [vmem:[#allocation5 + $0x1138] sm:$0xff] }
 0x42b   :  { %v8803_v31 = vmax.f32 %v8159_v34, 0.0  ;;  %v8092_v22 = vadd.f32 %v8091_v44, %v17259_v23  ;;  %8636 = vmatpush1.bf16.msra.mxu0 %v14306_v35  ;;  %v772_v23 = vld [vmem:[#allocation5 + $0x1178] sm:$0xff]  ;;  %8537 = vmatprep.mubr.bf16.mxu0 %v16447_v0  ;;  %v14530_v35 = vcombine.low %v1036_v55, %v1044_v18 }
 0x42c   :  { %v8164_v36 = vpop.f32.mrf.mxu1  ;;  %8601 = vmatmul.mubr.bf16.gmra.mxu1 %v16445_v54  ;;  %v8093_v29 = vpop.f32.mrf.mxu0  ;;  %8637 = vmatprep.subr.bf16.mxu0 %v14291_v28  ;;  %v1020_v59 = vld [vmem:[#allocation5 + $0x1938] sm:$0xff]  ;;  %v14258_v55 = vcombine.low %v764_v9, %v772_v23 }
 0x42d   :  { %8709 = vmatpush1.bf16.msra.mxu1 %v14562_v58  ;;  %v17321_v6 = vpack.c.bf16 %v8803_v31, %v8787_v46  ;;  %v8094_v21 = vadd.f32 %v8093_v29, %v17263_v32  ;;  %v8165_v50 = vadd.f32 %v8164_v36, %v8092_v22  ;;  %v1028_v54 = vld [vmem:[#allocation5 + $0x1978] sm:$0xff]  ;;  %8610 = vmatprep.mubr.bf16.mxu1 %v16450_v3 }
 0x42e   :  { %v8166_v41 = vpop.f32.mrf.mxu1  ;;  %8710 = vmatprep.subr.bf16.mxu1 %v14547_v39  ;;  %v8095_v56 = vpop.f32.mrf.mxu0  ;;  %v14259_v58 = vcombine.high %v764_v9, %v772_v23  ;;  %v748_v28 = vld [vmem:[#allocation5 + $0x10b8] sm:$0xff]  ;;  %v14515_v39 = vcombine.high %v1020_v59, %v1028_v54  ;;  %v14514_v36 = vcombine.low %v1020_v59, %v1028_v54 }
 0x42f   :  { %v8096_v2 = vadd.f32 %v8095_v56, %v17267_v45  ;;  %v17327_v25 = vadd.f32 %v8166_v41, %v8094_v21  ;;  %8638 = vmatpush1.bf16.msra.mxu0 %v14290_v14  ;;  %v756_v3 = vld [vmem:[#allocation5 + $0x10f8] sm:$0xff]  ;;  %v8819_v31 = vmax.f32 %v8165_v50, 0.0 }
 0x430   :  { %v8168_v19 = vpop.f32.mrf.mxu1  ;;  %v17329_v32 = vpop.f32.mrf.mxu0  ;;  %8639 = vmatprep.subr.bf16.mxu0 %v14275_v12  ;;  %v1004_v44 = vld [vmem:[#allocation5 + $0x18b8] sm:$0xff]  ;;  %v14243_v14 = vcombine.high %v748_v28, %v756_v3  ;;  %v14242_v59 = vcombine.low %v748_v28, %v756_v3 }
 0x431   :  { %8711 = vmatpush1.bf16.msra.mxu1 %v14546_v38  ;;  %v8169_v0 = vadd.f32 %v8168_v19, %v8096_v2  ;;  %v1012_v45 = vld [vmem:[#allocation5 + $0x18f8] sm:$0xff] }
 0x432   :  { %v17331_v34 = vpop.f32.mrf.mxu1  ;;  %8712 = vmatprep.subr.bf16.mxu1 %v14531_v8  ;;  %v8101_v46 = vpop.f32.mrf.mxu0  ;;  %8538 = vmatmul.mubr.bf16.gmra.mxu0 %v16454_v16  ;;  %v14499_v29 = vcombine.high %v1004_v44, %v1012_v45  ;;  %v732_v21 = vld [vmem:[#allocation5 + $0x1038] sm:$0xff]  ;;  %v14498_v54 = vcombine.low %v1004_v44, %v1012_v45 }
 0x433   :  { %v8835_v57 = vmax.f32 %v8169_v0, 0.0  ;;  %v8102_v37 = vadd.f32 %v8101_v46, %v17276_v11  ;;  %8640 = vmatpush1.bf16.msra.mxu0 %v14274_v63  ;;  %v740_v11 = vld [vmem:[#allocation5 + $0x1078] sm:$0xff]  ;;  %8547 = vmatprep.mubr.bf16.mxu0 %v16459_v30 }
 0x434   :  { %v8174_v22 = vpop.f32.mrf.mxu1  ;;  %8611 = vmatmul.mubr.bf16.gmra.mxu1 %v16457_v20  ;;  %v8103_v18 = vpop.f32.mrf.mxu0  ;;  %8641 = vmatprep.subr.bf16.mxu0 %v14259_v58  ;;  %v988_v41 = vld [vmem:[#allocation5 + $0x1838] sm:$0xff]  ;;  %v14227_v2 = vcombine.high %v732_v21, %v740_v11  ;;  %v14226_v44 = vcombine.low %v732_v21, %v740_v11 }
 0x435   :  { %8713 = vmatpush1.bf16.msra.mxu1 %v14530_v35  ;;  %v17336_v38 = vpack.c.bf16 %v8835_v57, %v8819_v31  ;;  %v8104_v12 = vadd.f32 %v8103_v18, %v17280_v43  ;;  %v8175_v16 = vadd.f32 %v8174_v22, %v8102_v37  ;;  %v996_v20 = vld [vmem:[#allocation5 + $0x1878] sm:$0xff]  ;;  %8620 = vmatprep.mubr.bf16.mxu1 %v16462_v33 }
 0x436   :  { %v8176_v8 = vpop.f32.mrf.mxu1  ;;  %8714 = vmatprep.subr.bf16.mxu1 %v14515_v39  ;;  %v8105_v50 = vpop.f32.mrf.mxu0  ;;  %v972_v19 = vld [vmem:[#allocation5 + $0x17b8] sm:$0xff]  ;;  %v14483_v35 = vcombine.high %v988_v41, %v996_v20  ;;  %v14482_v31 = vcombine.low %v988_v41, %v996_v20 }
 0x437   :  { %v8106_v9 = vadd.f32 %v8105_v50, %v17284_v24  ;;  %v17342_v23 = vadd.f32 %v8176_v8, %v8104_v12  ;;  %8642 = vmatpush1.bf16.msra.mxu0 %v14258_v55  ;;  %v980_v33 = vld [vmem:[#allocation5 + $0x17f8] sm:$0xff]  ;;  %v8851_v39 = vmax.f32 %v8175_v16, 0.0 }
 0x438   :  { %v8178_v56 = vpop.f32.mrf.mxu1  ;;  %v17344_v43 = vpop.f32.mrf.mxu0  ;;  %8643 = vmatprep.subr.bf16.mxu0 %v14243_v14  ;;  %v1228_v58 = vld [vmem:[#allocation5 + $0x1fb8] sm:$0xff]  ;;  %v14467_v57 = vcombine.high %v972_v19, %v980_v33  ;;  %v14466_v21 = vcombine.low %v972_v19, %v980_v33 }
 0x439   :  { %8715 = vmatpush1.bf16.msra.mxu1 %v14514_v36  ;;  %v8179_v30 = vadd.f32 %v8178_v56, %v8106_v9  ;;  %v1236_v24 = vld [vmem:[#allocation5 + $0x1ff8] sm:$0xff] }
 0x43a   :  { %v17346_v63 = vpop.f32.mrf.mxu1  ;;  %8716 = vmatprep.subr.bf16.mxu1 %v14499_v29  ;;  %v8111_v0 = vpop.f32.mrf.mxu0  ;;  %8548 = vmatmul.mubr.bf16.gmra.mxu0 %v16466_v48  ;;  %v14723_v37 = vcombine.high %v1228_v58, %v1236_v24  ;;  %v956_v36 = vld [vmem:[#allocation5 + $0x1738] sm:$0xff] }
 0x43b   :  { %v8867_v28 = vmax.f32 %v8179_v30, 0.0  ;;  %v8112_v3 = vadd.f32 %v8111_v0, %v17292_v47  ;;  %8644 = vmatpush1.bf16.msra.mxu0 %v14242_v59  ;;  %v964_v47 = vld [vmem:[#allocation5 + $0x1778] sm:$0xff]  ;;  %8663 = vmatprep.mubr.bf16.mxu0 %v16471_v1 }
 0x43c   :  { %v8184_v46 = vpop.f32.mrf.mxu1  ;;  %8621 = vmatmul.mubr.bf16.gmra.mxu1 %v16469_v53  ;;  %v8113_v45 = vpop.f32.mrf.mxu0  ;;  %8645 = vmatprep.subr.bf16.mxu0 %v14227_v2  ;;  %v1212_v29 = vld [vmem:[#allocation5 + $0x1f38] sm:$0xff]  ;;  %v14451_v11 = vcombine.high %v956_v36, %v964_v47 }
 0x43d   :  { %8717 = vmatpush1.bf16.msra.mxu1 %v14498_v54  ;;  %v17351_v22 = vpack.c.bf16 %v8867_v28, %v8851_v39  ;;  %v8114_v55 = vadd.f32 %v8113_v45, %v17297_v40  ;;  %v8185_v48 = vadd.f32 %v8184_v46, %v8112_v3  ;;  %v1220_v53 = vld [vmem:[#allocation5 + $0x1f78] sm:$0xff]  ;;  %8736 = vmatprep.mubr.bf16.mxu1 %v16474_v5 }
 0x43e   :  { %v8186_v18 = vpop.f32.mrf.mxu1  ;;  %8718 = vmatprep.subr.bf16.mxu1 %v14483_v35  ;;  %v8115_v14 = vpop.f32.mrf.mxu0  ;;  %v14722_v40 = vcombine.low %v1228_v58, %v1236_v24  ;;  %v14707_v41 = vcombine.high %v1212_v29, %v1220_v53  ;;  %v940_v1 = vld [vmem:[#allocation5 + $0x16b8] sm:$0xff]  ;;  %v14706_v54 = vcombine.low %v1212_v29, %v1220_v53 }
 0x43f   :  { %v8116_v12 = vadd.f32 %v8115_v14, %v17299_v42  ;;  %v17357_v16 = vadd.f32 %v8186_v18, %v8114_v55  ;;  %8646 = vmatpush1.bf16.msra.mxu0 %v14226_v44  ;;  %v948_v20 = vld [vmem:[#allocation5 + $0x16f8] sm:$0xff]  ;;  %v8883_v59 = vmax.f32 %v8185_v48, 0.0  ;;  %v14450_v42 = vcombine.low %v956_v36, %v964_v47 }
 0x440   :  { %v8188_v8 = vpop.f32.mrf.mxu1  ;;  %8647 = vmatprep.subr.bf16.mxu0 %v14467_v57  ;;  %v1196_v9 = vld [vmem:[#allocation5 + $0x1eb8] sm:$0xff]  ;;  %v14435_v2 = vcombine.high %v940_v1, %v948_v20  ;;  %v14434_v0 = vcombine.low %v940_v1, %v948_v20 }
 0x441   :  { %8719 = vmatpush1.bf16.msra.mxu1 %v14482_v31  ;;  %v8189_v50 = vadd.f32 %v8188_v8, %v8116_v12  ;;  %v1204_v56 = vld [vmem:[#allocation5 + $0x1ef8] sm:$0xff] }
 0x442   :  { %8720 = vmatprep.subr.bf16.mxu1 %v14723_v37  ;;  %v14691_v30 = vcombine.high %v1196_v9, %v1204_v56  ;;  %v924_v35 = vld [vmem:[#allocation5 + $0x1638] sm:$0xff]  ;;  %v14690_v39 = vcombine.low %v1196_v9, %v1204_v56 }
 0x443   :  { %v8899_v5 = vmax.f32 %v8189_v50, 0.0  ;;  %8648 = vmatpush2.bf16.msra.mxu0 %v14466_v21  ;;  %v932_v33 = vld [vmem:[#allocation5 + $0x1678] sm:$0xff] }
 0x444   :  { %8649 = vmatprep.subr.bf16.mxu0 %v14451_v11  ;;  %v1180_v58 = vld [vmem:[#allocation5 + $0x1e38] sm:$0xff]  ;;  %v14419_v28 = vcombine.high %v924_v35, %v932_v33  ;;  %v14418_v57 = vcombine.low %v924_v35, %v932_v33 }
 0x445   :  { %8721 = vmatpush2.bf16.msra.mxu1 %v14722_v40  ;;  %v17359_v19 = vpack.c.bf16 %v8899_v5, %v8883_v59  ;;  %v1188_v24 = vld [vmem:[#allocation5 + $0x1e78] sm:$0xff] }
 0x446   :  { %8722 = vmatprep.subr.bf16.mxu1 %v14707_v41  ;;  %v14675_v3 = vcombine.high %v1180_v58, %v1188_v24  ;;  %v908_v46 = vld [vmem:[#allocation5 + $0x15b8] sm:$0xff]  ;;  %v14674_v37 = vcombine.low %v1180_v58, %v1188_v24  ;;  %v15366_v24 = vld [vmem:[#allocation8 + $0xe4] ss:$16 sps:$4 sm:$0xff]  }
 0x447   :  { %18804 = vst [vmem:[#allocation20_spill] sm:$0xff] %v17359_v19  ;;  %8650 = vmatpush2.bf16.msra.mxu0 %v14450_v42  ;;  %v916_v44 = vld [vmem:[#allocation5 + $0x15f8] sm:$0xff] }
 0x448   :  { %8651 = vmatprep.subr.bf16.mxu0 %v14435_v2  ;;  %v1164_v45 = vld [vmem:[#allocation5 + $0x1db8] sm:$0xff]  ;;  %v14403_v55 = vcombine.high %v908_v46, %v916_v44  ;;  %v14402_v29 = vcombine.low %v908_v46, %v916_v44  ;;  %v15364_v44 = vld [vmem:[#allocation8 + $0xe0] ss:$16 sps:$4 sm:$0xff]  }
 0x449   :  { %8723 = vmatpush2.bf16.msra.mxu1 %v14706_v54  ;;  %v1172_v31 = vld [vmem:[#allocation5 + $0x1df8] sm:$0xff] }
 0x44a   :  { %8724 = vmatprep.subr.bf16.mxu1 %v14691_v30  ;;  %v14659_v48 = vcombine.high %v1164_v45, %v1172_v31  ;;  %v892_v18 = vld [vmem:[#allocation5 + $0x1538] sm:$0xff]  ;;  %v14658_v53 = vcombine.low %v1164_v45, %v1172_v31  ;;  %v17368_v45 = vpop.f32.mrf.mxu0  ;;  %v15367_v31 = vld [vmem:[#allocation8 + $0x2e0] ss:$16 sps:$4 sm:$0xff]  }
 0x44b   :  { %8652 = vmatpush2.bf16.msra.mxu0 %v14434_v0  ;;  %v900_v36 = vld [vmem:[#allocation5 + $0x1578] sm:$0xff]  ;;  %v15369_v0 = vld [vmem:[#allocation8 + $0x2e4] ss:$16 sps:$4 sm:$0xff]  }
 0x44c   :  { %8653 = vmatprep.subr.bf16.mxu0 %v14419_v28  ;;  %v1148_v47 = vld [vmem:[#allocation5 + $0x1d38] sm:$0xff]  ;;  %v14387_v12 = vcombine.high %v892_v18, %v900_v36  ;;  %v14386_v41 = vcombine.low %v892_v18, %v900_v36  ;;  %v18805_v28 = vld [vmem:[#allocation30_spill] sm:$0xff] }
 0x44d   :  { %8725 = vmatpush2.bf16.msra.mxu1 %v14690_v39  ;;  %v1156_v14 = vld [vmem:[#allocation5 + $0x1d78] sm:$0xff]  ;;  %v17361_v39 = vld [vmem:[#allocation7 + $0x8] sm:$0xff]  ;;  %v15375_v18 = vld [vmem:[#allocation8 + $0x2c4] ss:$16 sps:$4 sm:$0xff]  }
 0x44e   :  { %8726 = vmatprep.subr.bf16.mxu1 %v14675_v3  ;;  %v14643_v8 = vcombine.high %v1148_v47, %v1156_v14  ;;  %v876_v21 = vld [vmem:[#allocation5 + $0x14b8] sm:$0xff]  ;;  %v14642_v1 = vcombine.low %v1148_v47, %v1156_v14  ;;  %v18806_v3 = vsub.s32 4, %v18805_v28 }
 0x44f   :  { %8654 = vmatpush2.bf16.msra.mxu0 %v14418_v57  ;;  %v884_v40 = vld [vmem:[#allocation5 + $0x14f8] sm:$0xff]  ;;  %v15372_v57 = vld [vmem:[#allocation8 + $0xc4] ss:$16 sps:$4 sm:$0xff]  }
 0x450   :  { %8655 = vmatprep.subr.bf16.mxu0 %v14403_v55  ;;  %v1132_v11 = vld [vmem:[#allocation5 + $0x1cb8] sm:$0xff]  ;;  %v14371_v20 = vcombine.high %v876_v21, %v884_v40  ;;  %v14370_v54 = vcombine.low %v876_v21, %v884_v40  ;;  %v17366_v46 = vrot.slane %v17361_v39, %v18806_v3  ;;  %v18807_v55 = vsub.s32 5, %v18805_v28 }
 0x451   :  { %8727 = vmatpush2.bf16.msra.mxu1 %v14674_v37  ;;  %v1140_v50 = vld [vmem:[#allocation5 + $0x1cf8] sm:$0xff]  ;;  %v17370_v37 = vpop.f32.mrf.mxu1 }
 0x452   :  { %8728 = vmatprep.subr.bf16.mxu1 %v14659_v48  ;;  %v14627_v9 = vcombine.high %v1132_v11, %v1140_v50  ;;  %v860_v56 = vld [vmem:[#allocation5 + $0x1438] sm:$0xff]  ;;  %v14626_v2 = vcombine.low %v1132_v11, %v1140_v50  ;;  %v17375_v48 = vrot.slane %v17361_v39, %v18807_v55  ;;  %v15390_v55 = vld [vmem:[#allocation8 + $0x64] ss:$16 sps:$4 sm:$0xff]  }
 0x453   :  { %8656 = vmatpush2.bf16.msra.mxu0 %v14402_v29  ;;  %v868_v59 = vld [vmem:[#allocation5 + $0x1478] sm:$0xff]  ;;  %v15370_v29 = vld [vmem:[#allocation8 + $0xc0] ss:$16 sps:$4 sm:$0xff]  }
 0x454   :  { %8657 = vmatprep.subr.bf16.mxu0 %v14387_v12  ;;  %v1116_v5 = vld [vmem:[#allocation5 + $0x1c38] sm:$0xff]  ;;  %v14355_v30 = vcombine.high %v860_v56, %v868_v59  ;;  %v14354_v33 = vcombine.low %v860_v56, %v868_v59  ;;  %v15373_v12 = vld [vmem:[#allocation8 + $0x2c0] ss:$16 sps:$4 sm:$0xff]   ;;  %v18809_v56 = vld [vmem:[#allocation34_spill] sm:$0xff] }
 0x455   :  { %8729 = vmatpush2.bf16.msra.mxu1 %v14658_v53  ;;  %v1124_v42 = vld [vmem:[#allocation5 + $0x1c78] sm:$0xff] }
 0x456   :  { %8730 = vmatprep.subr.bf16.mxu1 %v14643_v8  ;;  %v14611_v35 = vcombine.high %v1116_v5, %v1124_v42  ;;  %v14610_v58 = vcombine.low %v1116_v5, %v1124_v42  ;;  %v15378_v8 = vld [vmem:[#allocation8 + $0xa4] ss:$16 sps:$4 sm:$0xff]   ;;  %v15379_v42 = vld [vmem:[#allocation8 + $0x2a0] ss:$16 sps:$4 sm:$0xff]  }
 0x457   :  { %8658 = vmatpush2.bf16.msra.mxu0 %v14386_v41 }
 0x458   :  { %8659 = vmatprep.subr.bf16.mxu0 %v14371_v20  ;;  %v15376_v20 = vld [vmem:[#allocation8 + $0xa0] ss:$16 sps:$4 sm:$0xff]  }
 0x459   :  { %8731 = vmatpush2.bf16.msra.mxu1 %v14642_v1 }
 0x45a   :  { %8732 = vmatprep.subr.bf16.mxu1 %v14627_v9  ;;  %v18808_v9 = vld [vmem:[#allocation33_spill] sm:$0xff] }
 0x45b   :  { %8660 = vmatpush2.bf16.msra.mxu0 %v14370_v54  ;;  %v6482_v59 = vadd.f32 %v18809_v56, %v18808_v9  ;;  %v18810_v54 = vld [vmem:[#allocation60_spill] sm:$0xff] }
 0x45c   :  { %8661 = vmatprep.subr.bf16.mxu0 %v14355_v30 }
 0x45d   :  { %8733 = vmatpush2.bf16.msra.mxu1 %v14626_v2  ;;  %v18811_v2 = vld [vmem:[#allocation61_spill] sm:$0xff] }
 0x45e   :  { %8734 = vmatprep.subr.bf16.mxu1 %v14611_v35  ;;  %v6774_v30 = vadd.f32 %v18811_v2, %v18810_v54 }
 0x45f   :  { %8662 = vmatpush2.bf16.msra.mxu0 %v14354_v33  ;;  %v15387_v33 = vld [vmem:[#allocation8 + $0x284] ss:$16 sps:$4 sm:$0xff]  }
 0x460   :  { %12063 = vmatprep.subr.bf16.mxu0 %v15366_v24  ;;  %v15382_v24 = vld [vmem:[#allocation8 + $0x80] ss:$16 sps:$4 sm:$0xff]  }
 0x461   :  { %8735 = vmatpush2.bf16.msra.mxu1 %v14610_v58 }
 0x462   :  { %12136 = vmatprep.subr.bf16.mxu1 %v15369_v0  ;;  %v8227_v36 = vpop.f32.mrf.mxu0  ;;  %8664 = vmatmul.mubr.bf16.vlgmr.msra.gmra.mxu0 %v16479_v49  ;;  %v15381_v49 = vld [vmem:[#allocation8 + $0x2a4] ss:$16 sps:$4 sm:$0xff]  }
 0x463   :  { %v8228_v47 = vadd.f32 %v8227_v36, %v17366_v46  ;;  %12064 = vmatpush1.bf16.msra.mxu0 %v15364_v44  ;;  %8673 = vmatprep.mubr.bf16.mxu0 %v16483_v61  ;;  %v15384_v61 = vld [vmem:[#allocation8 + $0x84] ss:$16 sps:$4 sm:$0xff]  }
 0x464   :  { %v8300_v14 = vpop.f32.mrf.mxu1  ;;  %8737 = vmatmul.mubr.bf16.vlgmr.msra.gmra.mxu1 %v16481_v51  ;;  %v8229_v53 = vpop.f32.mrf.mxu0  ;;  %12065 = vmatprep.subr.bf16.mxu0 %v15372_v57  ;;  %v18812_v44 = vld [vmem:[#allocation35_spill] sm:$0xff]  ;;  %v18813_v36 = vld [vmem:[#allocation62_spill] sm:$0xff] }
 0x465   :  { %12137 = vmatpush1.bf16.msra.mxu1 %v15367_v31  ;;  %v17380_v21 = vadd.f32 %v8300_v14, %v8228_v47  ;;  %v8230_v40 = vadd.f32 %v8229_v53, %v17375_v48  ;;  %8746 = vmatprep.mubr.bf16.mxu1 %v16486_v7  ;;  %v6555_v31 = vadd.f32 %v18812_v44, %v6482_v59  ;;  %v15385_v57 = vld [vmem:[#allocation8 + $0x280] ss:$16 sps:$4 sm:$0xff]   ;;  %v15399_v59 = vld [vmem:[#allocation8 + $0x244] ss:$16 sps:$4 sm:$0xff]  }
 0x466   :  { %v8302_v11 = vpop.f32.mrf.mxu1  ;;  %12138 = vmatprep.subr.bf16.mxu1 %v15375_v18  ;;  %v8231_v50 = vpop.f32.mrf.mxu0  ;;  %v6847_v47 = vadd.f32 %v18813_v36, %v6774_v30  ;;  %v18814_v53 = vld [vmem:[#allocation43_spill] sm:$0xff] }
 0x467   :  { %v17385_v51 = vadd.f32 %v8302_v11, %v8230_v40  ;;  %v8232_v41 = vadd.f32 %v8231_v50, %v17366_v46  ;;  %12066 = vmatpush1.bf16.msra.mxu0 %v15370_v29  ;;  %v18815_v40 = vld [vmem:[#allocation67_spill] sm:$0xff] }
 0x468   :  { %v8304_v1 = vpop.f32.mrf.mxu1  ;;  %v17390_v5 = vpop.f32.mrf.mxu0  ;;  %12067 = vmatprep.subr.bf16.mxu0 %v15378_v8  ;;  %v6920_v11 = vadd.f32 %v18815_v40, %v6847_v47  ;;  %v15405_v36 = vld [vmem:[#allocation8 + $0x224] ss:$16 sps:$4 sm:$0xff]  }
 0x469   :  { %12139 = vmatpush1.bf16.msra.mxu1 %v15373_v12  ;;  %v17394_v7 = vadd.f32 %v8304_v1, %v8232_v41  ;;  %v6628_v12 = vadd.f32 %v18814_v53, %v6555_v31  ;;  %v15391_v1 = vld [vmem:[#allocation8 + $0x260] ss:$16 sps:$4 sm:$0xff]  }
 0x46a   :  { %v17396_v35 = vpop.f32.mrf.mxu1  ;;  %12140 = vmatprep.subr.bf16.mxu1 %v15381_v49  ;;  %8674 = vmatmul.mubr.bf16.gmra.mxu0 %v16490_v26  ;;  %v8237_v58 = vpop.f32.mrf.mxu0  ;;  %v15393_v26 = vld [vmem:[#allocation8 + $0x264] ss:$16 sps:$4 sm:$0xff]   ;;  %v15388_v49 = vld [vmem:[#allocation8 + $0x60] ss:$16 sps:$4 sm:$0xff]  }
 0x46b   :  { %12068 = vmatpush1.bf16.msra.mxu0 %v15376_v20  ;;  %v8238_v0 = vadd.f32 %v8237_v58, %v17366_v46  ;;  %8683 = vmatprep.mubr.bf16.mxu0 %v18664_v15  ;;  %v15396_v20 = vld [vmem:[#allocation8 + $0x44] ss:$16 sps:$4 sm:$0xff]   ;;  %v15397_v31 = vld [vmem:[#allocation8 + $0x240] ss:$16 sps:$4 sm:$0xff]  }
 0x46c   :  { %8747 = vmatmul.mubr.bf16.gmra.mxu1 %v18663_v17  ;;  %v8310_v3 = vpop.f32.mrf.mxu1  ;;  %12069 = vmatprep.subr.bf16.mxu0 %v15384_v61  ;;  %v8239_v18 = vpop.f32.mrf.mxu0  ;;  %v18818_v61 = vld [vmem:[#allocation44_spill] sm:$0xff] }
 0x46d   :  { %12141 = vmatpush1.bf16.msra.mxu1 %v15379_v42  ;;  %v8240_v17 = vadd.f32 %v8239_v18, %v17375_v48  ;;  %v17405_v14 = vadd.f32 %v8310_v3, %v8238_v0  ;;  %8756 = vmatprep.mubr.bf16.mxu1 %v18665_v62  ;;  %v6701_v2 = vadd.f32 %v18818_v61, %v6628_v12  ;;  %v15394_v0 = vld [vmem:[#allocation8 + $0x40] ss:$16 sps:$4 sm:$0xff]   ;;  %v18821_v18 = vld [vmem:[#allocation26_spill] sm:$0xff] }
 0x46e   :  { %12142 = vmatprep.subr.bf16.mxu1 %v15387_v33  ;;  %v8312_v29 = vpop.f32.mrf.mxu1  ;;  %v8241_v8 = vpop.f32.mrf.mxu0  ;;  %v18819_v33 = vld [vmem:[#allocation68_spill] sm:$0xff] }
 0x46f   :  { %12070 = vmatpush1.bf16.msra.mxu0 %v15382_v24  ;;  %v8242_v50 = vadd.f32 %v8241_v8, %v17366_v46  ;;  %v17411_v41 = vadd.f32 %v8312_v29, %v8240_v17  ;;  %v6993_v58 = vadd.f32 %v18819_v33, %v6920_v11  ;;  %v18820_v24 = vld [vmem:[#allocation25_spill] sm:$0xff]  ;;  %v8794_v17 = vmax.f32 %v6701_v2, 0.0  ;;  %v18822_v29 = vld [vmem:[#allocation27_spill] sm:$0xff] }
 0x470   :  { %v8314_v15 = vpop.f32.mrf.mxu1  ;;  %12071 = vmatprep.subr.bf16.mxu0 %v15390_v55  ;;  %v17413_v56 = vpop.f32.mrf.mxu0  ;;  %v15400_v8 = vld [vmem:[#allocation8 + $0x20] ss:$16 sps:$4 sm:$0xff]   ;;  %v15408_v2 = vld [vmem:[#allocation8 + $0x4] ss:$16 sps:$4 sm:$0xff]  }
 0x471   :  { %12143 = vmatpush1.bf16.msra.mxu1 %v15385_v57  ;;  %18816 = vst [vmem:[#allocation30_spill] sm:$0xff] %v17413_v56  ;;  %v17415_v42 = vadd.f32 %v8314_v15, %v8242_v50  ;;  %v15402_v57 = vld [vmem:[#allocation8 + $0x24] ss:$16 sps:$4 sm:$0xff]   ;;  %v8796_v12 = vmax.f32 %v6993_v58, 0.0 }
 0x472   :  { %12144 = vmatprep.subr.bf16.mxu1 %v15393_v26  ;;  %v17417_v62 = vpop.f32.mrf.mxu1  ;;  %8684 = vmatmul.mubr.bf16.gmra.mxu0 %v18729_v13  ;;  %v8247_v30 = vpop.f32.mrf.mxu0  ;;  %v18823_v50 = vld [vmem:[#allocation42_spill] sm:$0xff]  ;;  %v18827_v58 = vld [vmem:[#allocation28_spill] sm:$0xff] }
 0x473   :  { %18817 = vst [vmem:[#allocation33_spill] sm:$0xff] %v17417_v62  ;;  %12072 = vmatpush1.bf16.msra.mxu0 %v15388_v49  ;;  %v8248_v3 = vadd.f32 %v8247_v30, %v17366_v46  ;;  %8693 = vmatprep.mubr.bf16.mxu0 %v18821_v18  ;;  %v8778_v15 = vmax.f32 %v18823_v50, 0.0 }
 0x474   :  { %8757 = vmatmul.mubr.bf16.gmra.mxu1 %v18820_v24  ;;  %v8320_v44 = vpop.f32.mrf.mxu1  ;;  %12073 = vmatprep.subr.bf16.mxu0 %v15396_v20  ;;  %v8249_v55 = vpop.f32.mrf.mxu0 }
 0x475   :  { %12145 = vmatpush1.bf16.msra.mxu1 %v15391_v1  ;;  %v8250_v13 = vadd.f32 %v8249_v55, %v17375_v48  ;;  %v17426_v47 = vadd.f32 %v8320_v44, %v8248_v3  ;;  %8766 = vmatprep.mubr.bf16.mxu1 %v18822_v29  ;;  %v15403_v1 = vld [vmem:[#allocation8 + $0x220] ss:$16 sps:$4 sm:$0xff]   ;;  %v17441_v24 = vpack.c.bf16 %v8794_v17, %v8778_v15  ;;  %v15417_v17 = vld [vmem:[#allocation8 + $0x3e4] ss:$16 sps:$4 sm:$0xff]  }
 0x476   :  { %12146 = vmatprep.subr.bf16.mxu1 %v15399_v59  ;;  %v8322_v26 = vpop.f32.mrf.mxu1  ;;  %v8251_v53 = vpop.f32.mrf.mxu0  ;;  %v18825_v59 = vld [vmem:[#allocation66_spill] sm:$0xff]  ;;  %v18829_v44 = vld [vmem:[#allocation29_spill] sm:$0xff] }
 0x477   :  { %12074 = vmatpush1.bf16.msra.mxu0 %v15394_v0  ;;  %v8252_v40 = vadd.f32 %v8251_v53, %v17366_v46  ;;  %v17430_v11 = vadd.f32 %v8322_v26, %v8250_v13  ;;  %v8780_v61 = vmax.f32 %v18825_v59, 0.0  ;;  %18828 = vst [vmem:[#allocation61_spill] sm:$0xff] %v17441_v24  ;;  %v15411_v0 = vld [vmem:[#allocation8 + $0x204] ss:$16 sps:$4 sm:$0xff]   ;;  %v15415_v15 = vld [vmem:[#allocation8 + $0x3e0] ss:$16 sps:$4 sm:$0xff]  }
 0x478   :  { %v8324_v49 = vpop.f32.mrf.mxu1  ;;  %12075 = vmatprep.subr.bf16.mxu0 %v15402_v57  ;;  %v17433_v20 = vpop.f32.mrf.mxu0  ;;  %v15406_v57 = vld [vmem:[#allocation8] ss:$16 sps:$4 sm:$0xff]   ;;  %v15414_v13 = vld [vmem:[#allocation8 + $0x1e4] ss:$16 sps:$4 sm:$0xff]  }
 0x479   :  { %12147 = vmatpush1.bf16.msra.mxu1 %v15397_v31  ;;  %18824 = vst [vmem:[#allocation34_spill] sm:$0xff] %v17433_v20  ;;  %v17436_v30 = vadd.f32 %v8324_v49, %v8252_v40  ;;  %v17444_v31 = vpack.c.bf16 %v8796_v12, %v8780_v61  ;;  %v15412_v40 = vld [vmem:[#allocation8 + $0x1e0] ss:$16 sps:$4 sm:$0xff]   ;;  %v15423_v61 = vld [vmem:[#allocation8 + $0x3c4] ss:$16 sps:$4 sm:$0xff]  }
 0x47a   :  { %12148 = vmatprep.subr.bf16.mxu1 %v15405_v36  ;;  %v17438_v33 = vpop.f32.mrf.mxu1  ;;  %8694 = vmatmul.mubr.bf16.gmra.mxu0 %v18827_v58  ;;  %v8257_v3 = vpop.f32.mrf.mxu0  ;;  %v15409_v36 = vld [vmem:[#allocation8 + $0x200] ss:$16 sps:$4 sm:$0xff]  }
 0x47b   :  { %18826 = vst [vmem:[#allocation60_spill] sm:$0xff] %v17438_v33  ;;  %12076 = vmatpush1.bf16.msra.mxu0 %v15400_v8  ;;  %18830 = vst [vmem:[#allocation35_spill] sm:$0xff] %v17444_v31  ;;  %v8258_v55 = vadd.f32 %v8257_v3, %v17366_v46  ;;  %12095 = vmatprep.mubr.bf16.mxu0 %v17441_v24  ;;  %v15418_v58 = vld [vmem:[#allocation8 + $0x1c0] ss:$16 sps:$4 sm:$0xff]   ;;  %v15426_v3 = vld [vmem:[#allocation8 + $0x1a4] ss:$16 sps:$4 sm:$0xff]  }
 0x47c   :  { %8767 = vmatmul.mubr.bf16.gmra.mxu1 %v18829_v44  ;;  %v8330_v18 = vpop.f32.mrf.mxu1  ;;  %v8259_v26 = vpop.f32.mrf.mxu0  ;;  %12077 = vmatprep.subr.bf16.mxu0 %v15408_v2  ;;  %v15429_v44 = vld [vmem:[#allocation8 + $0x3a4] ss:$16 sps:$4 sm:$0xff]  }
 0x47d   :  { %12149 = vmatpush1.bf16.msra.mxu1 %v15403_v1  ;;  %12168 = vmatprep.mubr.bf16.mxu1 %v17444_v31  ;;  %v8260_v29 = vadd.f32 %v8259_v26, %v17375_v48  ;;  %v17450_v53 = vadd.f32 %v8330_v18, %v8258_v55  ;;  %v15420_v1 = vld [vmem:[#allocation8 + $0x1c4] ss:$16 sps:$4 sm:$0xff]   ;;  %v15457_v31 = vld [vmem:[#allocation8 + $0x300] ss:$16 sps:$4 sm:$0xff]  }
 0x47e   :  { %v8332_v12 = vpop.f32.mrf.mxu1  ;;  %12150 = vmatprep.subr.bf16.mxu1 %v15411_v0  ;;  %v8261_v8 = vpop.f32.mrf.mxu0  ;;  %v15421_v0 = vld [vmem:[#allocation8 + $0x3c0] ss:$16 sps:$4 sm:$0xff]   ;;  %v15432_v55 = vld [vmem:[#allocation8 + $0x184] ss:$16 sps:$4 sm:$0xff]  }
 0x47f   :  { %12078 = vmatpush1.bf16.msra.mxu0 %v15406_v57  ;;  %v8262_v49 = vadd.f32 %v8261_v8, %v17366_v46  ;;  %v17453_v50 = vadd.f32 %v8332_v12, %v8260_v29  ;;  %v15424_v46 = vld [vmem:[#allocation8 + $0x1a0] ss:$16 sps:$4 sm:$0xff]   ;;  %v15435_v18 = vld [vmem:[#allocation8 + $0x384] ss:$16 sps:$4 sm:$0xff]  }
 0x480   :  { %12079 = vmatprep.subr.bf16.mxu0 %v15414_v13  ;;  %v8334_v59 = vpop.f32.mrf.mxu1  ;;  %v15427_v57 = vld [vmem:[#allocation8 + $0x3a0] ss:$16 sps:$4 sm:$0xff]   ;;  %v15438_v26 = vld [vmem:[#allocation8 + $0x164] ss:$16 sps:$4 sm:$0xff]  }
 0x481   :  { %12151 = vmatpush1.bf16.msra.mxu1 %v15409_v36  ;;  %v17455_v2 = vadd.f32 %v8334_v59, %v8262_v49  ;;  %v15430_v36 = vld [vmem:[#allocation8 + $0x180] ss:$16 sps:$4 sm:$0xff]   ;;  %v18831_v29 = vld [vmem:[#allocation36_spill] sm:$0xff] }
 0x482   :  { %12152 = vmatprep.subr.bf16.mxu1 %v15417_v17  ;;  %v15433_v13 = vld [vmem:[#allocation8 + $0x380] ss:$16 sps:$4 sm:$0xff]   ;;  %v15441_v17 = vld [vmem:[#allocation8 + $0x364] ss:$16 sps:$4 sm:$0xff]   ;;  %v6492_v12 = vadd.f32 %v18831_v29, %v18808_v9 }
 0x483   :  { %12080 = vmatpush2.bf16.msra.mxu0 %v15412_v40  ;;  %v15436_v8 = vld [vmem:[#allocation8 + $0x160] ss:$16 sps:$4 sm:$0xff]   ;;  %v15447_v59 = vld [vmem:[#allocation8 + $0x344] ss:$16 sps:$4 sm:$0xff]  }
 0x484   :  { %12081 = vmatprep.subr.bf16.mxu0 %v15420_v1  ;;  %v18832_v40 = vld [vmem:[#allocation21_spill] sm:$0xff]  ;;  %v18837_v29 = vld [vmem:[#allocation38_spill] sm:$0xff] }
 0x485   :  { %12153 = vmatpush2.bf16.msra.mxu1 %v15415_v15  ;;  %v6784_v49 = vadd.f32 %v18832_v40, %v18810_v54  ;;  %v15439_v15 = vld [vmem:[#allocation8 + $0x360] ss:$16 sps:$4 sm:$0xff]   ;;  %v15444_v1 = vld [vmem:[#allocation8 + $0x144] ss:$16 sps:$4 sm:$0xff]  }
 0x486   :  { %12154 = vmatprep.subr.bf16.mxu1 %v15423_v61  ;;  %v18833_v61 = vld [vmem:[#allocation37_spill] sm:$0xff] }
 0x487   :  { %12082 = vmatpush2.bf16.msra.mxu0 %v15418_v58  ;;  %v6565_v58 = vadd.f32 %v18833_v61, %v6492_v12  ;;  %v15448_v40 = vld [vmem:[#allocation8 + $0x120] ss:$16 sps:$4 sm:$0xff]   ;;  %v15465_v33 = vld [vmem:[#allocation8 + $0x6e4] ss:$16 sps:$4 sm:$0xff]  }
 0x488   :  { %12083 = vmatprep.subr.bf16.mxu0 %v15426_v3  ;;  %v18834_v3 = vld [vmem:[#allocation22_spill] sm:$0xff]  ;;  %v18838_v12 = vld [vmem:[#allocation23_spill] sm:$0xff] }
 0x489   :  { %12155 = vmatpush2.bf16.msra.mxu1 %v15421_v0  ;;  %v15442_v0 = vld [vmem:[#allocation8 + $0x140] ss:$16 sps:$4 sm:$0xff]  }
 0x48a   :  { %12156 = vmatprep.subr.bf16.mxu1 %v15429_v44  ;;  %v6857_v44 = vadd.f32 %v18834_v3, %v6784_v49  ;;  %v15451_v49 = vld [vmem:[#allocation8 + $0x320] ss:$16 sps:$4 sm:$0xff]  }
 0x48b   :  { %12084 = vmatpush2.bf16.msra.mxu0 %v15424_v46  ;;  %v15445_v46 = vld [vmem:[#allocation8 + $0x340] ss:$16 sps:$4 sm:$0xff]  }
 0x48c   :  { %12085 = vmatprep.subr.bf16.mxu0 %v15432_v55  ;;  %v18835_v55 = vld [vmem:[#allocation47_spill] sm:$0xff] }
 0x48d   :  { %12157 = vmatpush2.bf16.msra.mxu1 %v15427_v57  ;;  %v15450_v57 = vld [vmem:[#allocation8 + $0x124] ss:$16 sps:$4 sm:$0xff]  }
 0x48e   :  { %12158 = vmatprep.subr.bf16.mxu1 %v15435_v18  ;;  %v6638_v18 = vadd.f32 %v18835_v55, %v6565_v58  ;;  %v15459_v58 = vld [vmem:[#allocation8 + $0x304] ss:$16 sps:$4 sm:$0xff]  }
 0x48f   :  { %12086 = vmatpush2.bf16.msra.mxu0 %v15430_v36  ;;  %v15453_v36 = vld [vmem:[#allocation8 + $0x324] ss:$16 sps:$4 sm:$0xff]  }
 0x490   :  { %12087 = vmatprep.subr.bf16.mxu0 %v15438_v26  ;;  %v18841_v55 = vld [vmem:[#allocation39_spill] sm:$0xff] }
 0x491   :  { %12159 = vmatpush2.bf16.msra.mxu1 %v15433_v13  ;;  %v18836_v13 = vld [vmem:[#allocation71_spill] sm:$0xff] }
 0x492   :  { %12160 = vmatprep.subr.bf16.mxu1 %v15441_v17  ;;  %v6930_v26 = vadd.f32 %v18836_v13, %v6857_v44  ;;  %v6502_v17 = vadd.f32 %v18837_v29, %v18808_v9  ;;  %v15454_v13 = vld [vmem:[#allocation8 + $0x100] ss:$16 sps:$4 sm:$0xff]  }
 0x493   :  { %12088 = vmatpush2.bf16.msra.mxu0 %v15436_v8  ;;  %v6794_v8 = vadd.f32 %v18838_v12, %v18810_v54  ;;  %v18842_v29 = vld [vmem:[#allocation63_spill] sm:$0xff] }
 0x494   :  { %12089 = vmatprep.subr.bf16.mxu0 %v15444_v1  ;;  %v18839_v1 = vld [vmem:[#allocation48_spill] sm:$0xff]  ;;  %v6575_v44 = vadd.f32 %v18841_v55, %v6502_v17  ;;  %v18846_v17 = vld [vmem:[#allocation46_spill] sm:$0xff] }
 0x495   :  { %12161 = vmatpush2.bf16.msra.mxu1 %v15439_v15  ;;  %v15456_v15 = vld [vmem:[#allocation8 + $0x104] ss:$16 sps:$4 sm:$0xff]   ;;  %v6711_v61 = vadd.f32 %v18839_v1, %v6638_v18 }
 0x496   :  { %12162 = vmatprep.subr.bf16.mxu1 %v15447_v59  ;;  %v18840_v59 = vld [vmem:[#allocation72_spill] sm:$0xff] }
 0x497   :  { %12090 = vmatpush2.bf16.msra.mxu0 %v15442_v0  ;;  %v7003_v3 = vadd.f32 %v18840_v59, %v6930_v26  ;;  %v6867_v0 = vadd.f32 %v18842_v29, %v6794_v8  ;;  %v15462_v12 = vld [vmem:[#allocation8 + $0x4e4] ss:$16 sps:$4 sm:$0xff]   ;;  %v17481_v29 = vpop.f32.mrf.mxu0 }
 0x498   :  { %12091 = vmatprep.subr.bf16.mxu0 %v15450_v57  ;;  %v18843_v57 = vld [vmem:[#allocation51_spill] sm:$0xff]  ;;  %v18845_v26 = vld [vmem:[#allocation40_spill] sm:$0xff]  ;;  %18849 = vst [vmem:[#allocation62_spill] sm:$0xff] %v17481_v29 }
 0x499   :  { %12163 = vmatpush2.bf16.msra.mxu1 %v15445_v46  ;;  %v8826_v46 = vmax.f32 %v6711_v61, 0.0  ;;  %v6648_v24 = vadd.f32 %v18843_v57, %v6575_v44  ;;  %v8828_v18 = vmax.f32 %v7003_v3, 0.0  ;;  %v6512_v59 = vadd.f32 %v18845_v26, %v18808_v9  ;;  %v18847_v8 = vld [vmem:[#allocation64_spill] sm:$0xff]  ;;  %v15460_v61 = vld [vmem:[#allocation8 + $0x4e0] ss:$16 sps:$4 sm:$0xff]   ;;  %v17484_v44 = vpop.f32.mrf.mxu1 }
 0x49a   :  { %12164 = vmatprep.subr.bf16.mxu1 %v15453_v36  ;;  %v18844_v36 = vld [vmem:[#allocation75_spill] sm:$0xff]  ;;  %18851 = vst [vmem:[#allocation43_spill] sm:$0xff] %v17484_v44 }
 0x49b   :  { %12092 = vmatpush2.bf16.msra.mxu0 %v15448_v40  ;;  %v6940_v1 = vadd.f32 %v18844_v36, %v6867_v0  ;;  %v8810_v40 = vmax.f32 %v18846_v17, 0.0  ;;  %v15463_v0 = vld [vmem:[#allocation8 + $0x6e0] ss:$16 sps:$4 sm:$0xff]   ;;  %v15468_v57 = vld [vmem:[#allocation8 + $0x4c4] ss:$16 sps:$4 sm:$0xff]  }
 0x49c   :  { %12093 = vmatprep.subr.bf16.mxu0 %v15456_v15  ;;  %v18848_v15 = vld [vmem:[#allocation70_spill] sm:$0xff] }
 0x49d   :  { %12165 = vmatpush2.bf16.msra.mxu1 %v15451_v49  ;;  %v6804_v49 = vadd.f32 %v18847_v8, %v18810_v54  ;;  %v8812_v55 = vmax.f32 %v18848_v15, 0.0  ;;  %v17486_v9 = vpack.c.bf16 %v8826_v46, %v8810_v40  ;;  %v18854_v54 = vld [vmem:[#allocation45_spill] sm:$0xff] }
 0x49e   :  { %12166 = vmatprep.subr.bf16.mxu1 %v15459_v58  ;;  %v18850_v58 = vld [vmem:[#allocation52_spill] sm:$0xff]  ;;  %v15466_v40 = vld [vmem:[#allocation8 + $0x4c0] ss:$16 sps:$4 sm:$0xff]  }
 0x49f   :  { %12094 = vmatpush2.bf16.msra.mxu0 %v15454_v13  ;;  %v6721_v3 = vadd.f32 %v18850_v58, %v6648_v24  ;;  %18852 = vst [vmem:[#allocation67_spill] sm:$0xff] %v17486_v9  ;;  %v18853_v13 = vld [vmem:[#allocation76_spill] sm:$0xff]  ;;  %v17490_v17 = vpack.c.bf16 %v8828_v18, %v8812_v55  ;;  %v18857_v58 = vld [vmem:[#allocation69_spill] sm:$0xff]  ;;  %v18859_v18 = vld [vmem:[#allocation58_spill] sm:$0xff] }
 0x4a0   :  { %12209 = vmatprep.subr.bf16.mxu0 %v15462_v12  ;;  %v7013_v36 = vadd.f32 %v18853_v13, %v6940_v1  ;;  %v15471_v8 = vld [vmem:[#allocation8 + $0x6c4] ss:$16 sps:$4 sm:$0xff]  }
 0x4a1   :  { %12167 = vmatpush2.bf16.msra.mxu1 %v15457_v31  ;;  %18855 = vst [vmem:[#allocation44_spill] sm:$0xff] %v17490_v17  ;;  %v18856_v31 = vld [vmem:[#allocation41_spill] sm:$0xff]  ;;  %v8858_v13 = vmax.f32 %v6721_v3, 0.0  ;;  %v18863_v3 = vld [vmem:[#allocation50_spill] sm:$0xff] }
 0x4a2   :  { %12282 = vmatprep.subr.bf16.mxu1 %v15465_v33  ;;  %v8373_v26 = vpop.f32.mrf.mxu0  ;;  %12096 = vmatmul.mubr.bf16.vlgmr.msra.gmra.mxu0 %v18854_v54  ;;  %v6585_v15 = vadd.f32 %v18856_v31, %v6512_v59  ;;  %v18858_v33 = vld [vmem:[#allocation65_spill] sm:$0xff]  ;;  %v8842_v20 = vmax.f32 %v18863_v3, 0.0 }
 0x4a3   :  { %v8374_v12 = vadd.f32 %v8373_v26, %v17380_v21  ;;  %12105 = vmatprep.mubr.bf16.mxu0 %v17486_v9  ;;  %v6877_v46 = vadd.f32 %v18858_v33, %v6804_v49  ;;  %12210 = vmatpush1.bf16.msra.mxu0 %v15460_v61  ;;  %v15469_v26 = vld [vmem:[#allocation8 + $0x6c0] ss:$16 sps:$4 sm:$0xff]   ;;  %v15474_v31 = vld [vmem:[#allocation8 + $0x4a4] ss:$16 sps:$4 sm:$0xff]  }
 0x4a4   :  { %v8446_v24 = vpop.f32.mrf.mxu1  ;;  %12169 = vmatmul.mubr.bf16.vlgmr.msra.gmra.mxu1 %v18857_v58  ;;  %v8375_v1 = vpop.f32.mrf.mxu0  ;;  %v6658_v55 = vadd.f32 %v18859_v18, %v6585_v15  ;;  %12211 = vmatprep.subr.bf16.mxu0 %v15468_v57  ;;  %v8860_v58 = vmax.f32 %v7013_v36, 0.0  ;;  %v18860_v9 = vld [vmem:[#allocation80_spill] sm:$0xff]  ;;  %v18861_v49 = vld [vmem:[#allocation82_spill] sm:$0xff]  ;;  %v18862_v33 = vld [vmem:[#allocation83_spill] sm:$0xff] }
 0x4a5   :  { %12178 = vmatprep.mubr.bf16.mxu1 %v17490_v17  ;;  %v8447_v54 = vadd.f32 %v8446_v24, %v8374_v12  ;;  %12283 = vmatpush1.bf16.msra.mxu1 %v15463_v0  ;;  %v8376_v59 = vadd.f32 %v8375_v1, %v17385_v51  ;;  %v6950_v44 = vadd.f32 %v18860_v9, %v6877_v46  ;;  %v15477_v29 = vld [vmem:[#allocation8 + $0x6a4] ss:$16 sps:$4 sm:$0xff]   ;;  %v15472_v46 = vld [vmem:[#allocation8 + $0x4a0] ss:$16 sps:$4 sm:$0xff]  }
 0x4a6   :  { %v8448_v21 = vpop.f32.mrf.mxu1  ;;  %v7066_v17 = vadd.f32 %v18862_v33, %v18861_v49  ;;  %v8377_v61 = vpop.f32.mrf.mxu0  ;;  %12284 = vmatprep.subr.bf16.mxu1 %v15471_v8  ;;  %v18864_v12 = vld [vmem:[#allocation74_spill] sm:$0xff]  ;;  %v18865_v24 = vld [vmem:[#allocation107_spill] sm:$0xff]  ;;  %v18866_v1 = vld [vmem:[#allocation108_spill] sm:$0xff] }
 0x4a7   :  { %v17504_v15 = vadd.f32 %v8448_v21, %v8376_v59  ;;  %v8378_v0 = vadd.f32 %v8377_v61, %v17394_v7  ;;  %v8844_v57 = vmax.f32 %v18864_v12, 0.0  ;;  %v7358_v36 = vadd.f32 %v18866_v1, %v18865_v24  ;;  %12212 = vmatpush1.bf16.msra.mxu0 %v15466_v40  ;;  %v18867_v18 = vld [vmem:[#allocation59_spill] sm:$0xff]  ;;  %v18869_v61 = vld [vmem:[#allocation81_spill] sm:$0xff]  ;;  %v18870_v12 = vld [vmem:[#allocation84_spill] sm:$0xff] }
 0x4a8   :  { %v8450_v51 = vpop.f32.mrf.mxu1  ;;  %v17510_v9 = vpop.f32.mrf.mxu0  ;;  %v6731_v33 = vadd.f32 %v18867_v18, %v6658_v55  ;;  %12213 = vmatprep.subr.bf16.mxu0 %v15474_v31  ;;  %v15475_v59 = vld [vmem:[#allocation8 + $0x6a0] ss:$16 sps:$4 sm:$0xff]   ;;  %v17515_v21 = vpack.c.bf16 %v8858_v13, %v8842_v20  ;;  %v15480_v7 = vld [vmem:[#allocation8 + $0x484] ss:$16 sps:$4 sm:$0xff]   ;;  %v7023_v3 = vadd.f32 %v18869_v61, %v6950_v44  ;;  %v7139_v56 = vadd.f32 %v18870_v12, %v7066_v17 }
 0x4a9   :  { %v8451_v8 = vadd.f32 %v8450_v51, %v8378_v0  ;;  %12285 = vmatpush1.bf16.msra.mxu1 %v15469_v26  ;;  %v18871_v40 = vld [vmem:[#allocation49_spill] sm:$0xff]  ;;  %v17520_v19 = vpack.c.bf16 %v8860_v58, %v8844_v57  ;;  %v8789_v0 = vmax.f32 %v8447_v54, 0.0  ;;  %v18874_v13 = vld [vmem:[#allocation92_spill] sm:$0xff] }
 0x4aa   :  { %v17513_v62 = vpop.f32.mrf.mxu1  ;;  %18868 = vst [vmem:[#allocation68_spill] sm:$0xff] %v17515_v21  ;;  %v8383_v1 = vpop.f32.mrf.mxu0  ;;  %12106 = vmatmul.mubr.bf16.gmra.mxu0 %v18871_v40  ;;  %12286 = vmatprep.subr.bf16.mxu1 %v15477_v29  ;;  %v15483_v55 = vld [vmem:[#allocation8 + $0x684] ss:$16 sps:$4 sm:$0xff]   ;;  %v7212_v44 = vadd.f32 %v18874_v13, %v7139_v56  ;;  %v15478_v58 = vld [vmem:[#allocation8 + $0x480] ss:$16 sps:$4 sm:$0xff]   ;;  %v8890_v57 = vmax.f32 %v6731_v33, 0.0 }
 0x4ab   :  { %18872 = vst [vmem:[#allocation25_spill] sm:$0xff] %v17520_v19  ;;  %v8805_v26 = vmax.f32 %v8451_v8, 0.0  ;;  %v8384_v51 = vadd.f32 %v8383_v1, %v17405_v14  ;;  %v18873_v31 = vld [vmem:[#allocation73_spill] sm:$0xff]  ;;  %12115 = vmatprep.mubr.bf16.mxu0 %v17515_v21  ;;  %12214 = vmatpush1.bf16.msra.mxu0 %v15472_v46  ;;  %v8892_v21 = vmax.f32 %v7023_v3, 0.0  ;;  %v18877_v56 = vld [vmem:[#allocation116_spill] sm:$0xff]  ;;  %v18878_v46 = vld [vmem:[#allocation54_spill] sm:$0xff] }
 0x4ac   :  { %12179 = vmatmul.mubr.bf16.gmra.mxu1 %v18873_v31  ;;  %v8456_v20 = vpop.f32.mrf.mxu1  ;;  %v18875_v18 = vld [vmem:[#allocation109_spill] sm:$0xff]  ;;  %v8385_v29 = vpop.f32.mrf.mxu0  ;;  %12215 = vmatprep.subr.bf16.mxu0 %v15480_v7  ;;  %v18927_v40 = vld [vmem:[#allocation118_spill] sm:$0xff] }
 0x4ad   :  { %v7431_v17 = vadd.f32 %v18875_v18, %v7358_v36  ;;  %12188 = vmatprep.mubr.bf16.mxu1 %v17520_v19  ;;  %v17528_v61 = vpack.c.bf16 %v8805_v26, %v8789_v0  ;;  %12287 = vmatpush1.bf16.msra.mxu1 %v15475_v59  ;;  %v8386_v14 = vadd.f32 %v8385_v29, %v17411_v41  ;;  %v15481_v12 = vld [vmem:[#allocation8 + $0x680] ss:$16 sps:$4 sm:$0xff]   ;;  %v15486_v1 = vld [vmem:[#allocation8 + $0x464] ss:$16 sps:$4 sm:$0xff]   ;;  %v8874_v19 = vmax.f32 %v18878_v46, 0.0 }
 0x4ae   :  { %v8457_v54 = vadd.f32 %v8456_v20, %v8384_v51  ;;  %v8458_v8 = vpop.f32.mrf.mxu1  ;;  %v8387_v36 = vpop.f32.mrf.mxu0  ;;  %12288 = vmatprep.subr.bf16.mxu1 %v15483_v55  ;;  %v15489_v18 = vld [vmem:[#allocation8 + $0x664] ss:$16 sps:$4 sm:$0xff]   ;;  %v15484_v7 = vld [vmem:[#allocation8 + $0x460] ss:$16 sps:$4 sm:$0xff]  }
 0x4af   :  { %18876 = vst [vmem:[#allocation26_spill] sm:$0xff] %v17528_v61  ;;  %v7504_v13 = vadd.f32 %v18877_v56, %v7431_v17  ;;  %v8388_v33 = vadd.f32 %v8387_v36, %v17415_v42  ;;  %v17534_v0 = vadd.f32 %v8458_v8, %v8386_v14  ;;  %v18880_v26 = vld [vmem:[#allocation78_spill] sm:$0xff]  ;;  %12216 = vmatpush1.bf16.msra.mxu0 %v15478_v58  ;;  %v18881_v20 = vld [vmem:[#allocation93_spill] sm:$0xff] }
 0x4b0   :  { %v8460_v59 = vpop.f32.mrf.mxu1  ;;  %v8876_v41 = vmax.f32 %v18880_v26, 0.0  ;;  %v17537_v51 = vpop.f32.mrf.mxu0  ;;  %v7285_v3 = vadd.f32 %v18881_v20, %v7212_v44  ;;  %12217 = vmatprep.subr.bf16.mxu0 %v15486_v1  ;;  %v15487_v55 = vld [vmem:[#allocation8 + $0x660] ss:$16 sps:$4 sm:$0xff]   ;;  %v17542_v56 = vpack.c.bf16 %v8890_v57, %v8874_v19  ;;  %v15492_v42 = vld [vmem:[#allocation8 + $0x444] ss:$16 sps:$4 sm:$0xff]   ;;  %v8821_v31 = vmax.f32 %v8457_v54, 0.0 }
 0x4b1   :  { %18879 = vst [vmem:[#allocation27_spill] sm:$0xff] %v17534_v0  ;;  %12289 = vmatpush1.bf16.msra.mxu1 %v15481_v12  ;;  %v8461_v17 = vadd.f32 %v8460_v59, %v8388_v33  ;;  %v18883_v14 = vld [vmem:[#allocation117_spill] sm:$0xff]  ;;  %v18951_v61 = vld [vmem:[#allocation102_spill] sm:$0xff] }
 0x4b2   :  { %v17540_v29 = vpop.f32.mrf.mxu1  ;;  %18882 = vst [vmem:[#allocation42_spill] sm:$0xff] %v17542_v56  ;;  %v7577_v8 = vadd.f32 %v18883_v14, %v7504_v13  ;;  %v8393_v36 = vpop.f32.mrf.mxu0  ;;  %v18884_v46 = vld [vmem:[#allocation53_spill] sm:$0xff]  ;;  %12290 = vmatprep.subr.bf16.mxu1 %v15489_v18  ;;  %v17546_v58 = vpack.c.bf16 %v8892_v21, %v8876_v41  ;;  %v8798_v13 = vmax.f32 %v7285_v3, 0.0  ;;  %v18890_v3 = vld [vmem:[#allocation115_spill] sm:$0xff] }
 0x4b3   :  { %12116 = vmatmul.mubr.bf16.gmra.mxu0 %v18884_v46  ;;  %v15495_v26 = vld [vmem:[#allocation8 + $0x644] ss:$16 sps:$4 sm:$0xff]   ;;  %v8837_v44 = vmax.f32 %v8461_v17, 0.0  ;;  %v8394_v12 = vadd.f32 %v8393_v36, %v17426_v47  ;;  %v15490_v1 = vld [vmem:[#allocation8 + $0x440] ss:$16 sps:$4 sm:$0xff]  }
 0x4b4   :  { %18885 = vst [vmem:[#allocation66_spill] sm:$0xff] %v17546_v58  ;;  %v18886_v33 = vld [vmem:[#allocation77_spill] sm:$0xff]  ;;  %12125 = vmatprep.mubr.bf16.mxu0 %v17542_v56  ;;  %v8466_v19 = vpop.f32.mrf.mxu1  ;;  %12218 = vmatpush1.bf16.msra.mxu0 %v15484_v7  ;;  %v8395_v57 = vpop.f32.mrf.mxu0  ;;  %v8800_v20 = vmax.f32 %v7577_v8, 0.0  ;;  %v18888_v36 = vld [vmem:[#allocation91_spill] sm:$0xff] }
 0x4b5   :  { %12189 = vmatmul.mubr.bf16.gmra.mxu1 %v18886_v33  ;;  %v17552_v59 = vpack.c.bf16 %v8837_v44, %v8821_v31  ;;  %v8396_v21 = vadd.f32 %v8395_v57, %v17430_v11  ;;  %v8467_v54 = vadd.f32 %v8466_v19, %v8394_v12  ;;  %12219 = vmatprep.subr.bf16.mxu0 %v15492_v42  ;;  %v15493_v47 = vld [vmem:[#allocation8 + $0x640] ss:$16 sps:$4 sm:$0xff]   ;;  %v15498_v41 = vld [vmem:[#allocation8 + $0x424] ss:$16 sps:$4 sm:$0xff]  }
 0x4b6   :  { %12198 = vmatprep.mubr.bf16.mxu1 %v17546_v58  ;;  %12291 = vmatpush1.bf16.msra.mxu1 %v15487_v55  ;;  %v8468_v18 = vpop.f32.mrf.mxu1  ;;  %v8397_v17 = vpop.f32.mrf.mxu0  ;;  %v15501_v14 = vld [vmem:[#allocation8 + $0x624] ss:$16 sps:$4 sm:$0xff]   ;;  %v8782_v58 = vmax.f32 %v18888_v36, 0.0  ;;  %v8784_v55 = vmax.f32 %v18890_v3, 0.0  ;;  %v15496_v44 = vld [vmem:[#allocation8 + $0x420] ss:$16 sps:$4 sm:$0xff]  }
 0x4b7   :  { %18887 = vst [vmem:[#allocation28_spill] sm:$0xff] %v17552_v59  ;;  %12292 = vmatprep.subr.bf16.mxu1 %v15495_v26  ;;  %v8398_v7 = vadd.f32 %v8397_v17, %v17436_v30  ;;  %v17557_v56 = vadd.f32 %v8468_v18, %v8396_v21  ;;  %v15499_v8 = vld [vmem:[#allocation8 + $0x620] ss:$16 sps:$4 sm:$0xff]   ;;  %v15504_v19 = vld [vmem:[#allocation8 + $0x404] ss:$16 sps:$4 sm:$0xff]  }
 0x4b8   :  { %v8470_v31 = vpop.f32.mrf.mxu1  ;;  %12220 = vmatpush1.bf16.msra.mxu0 %v15490_v1  ;;  %v17560_v11 = vpop.f32.mrf.mxu0  ;;  %v17564_v26 = vpack.c.bf16 %v8798_v13, %v8782_v58  ;;  %v18894_v30 = vld [vmem:[#allocation55_spill] sm:$0xff]  ;;  %v17567_v21 = vpack.c.bf16 %v8800_v20, %v8784_v55  ;;  %v8853_v1 = vmax.f32 %v8467_v54, 0.0  ;;  %v18913_v33 = vld [vmem:[#allocation124_spill] sm:$0xff] }
 0x4b9   :  { %18889 = vst [vmem:[#allocation29_spill] sm:$0xff] %v17557_v56  ;;  %18891 = vst [vmem:[#allocation36_spill] sm:$0xff] %v17560_v11  ;;  %v8471_v42 = vadd.f32 %v8470_v31, %v8398_v7  ;;  %12221 = vmatprep.subr.bf16.mxu0 %v15498_v41  ;;  %v15507_v18 = vld [vmem:[#allocation8 + $0x604] ss:$16 sps:$4 sm:$0xff]   ;;  %v15502_v13 = vld [vmem:[#allocation8 + $0x400] ss:$16 sps:$4 sm:$0xff]  }
 0x4ba   :  { %12293 = vmatpush1.bf16.msra.mxu1 %v15493_v47  ;;  %v17562_v12 = vpop.f32.mrf.mxu1  ;;  %18893 = vst [vmem:[#allocation37_spill] sm:$0xff] %v17564_v26  ;;  %v8403_v57 = vpop.f32.mrf.mxu0  ;;  %18895 = vst [vmem:[#allocation22_spill] sm:$0xff] %v17567_v21  ;;  %v18896_v47 = vld [vmem:[#allocation79_spill] sm:$0xff]  ;;  %v18940_v56 = vld [vmem:[#allocation130_spill] sm:$0xff] }
 0x4bb   :  { %18892 = vst [vmem:[#allocation21_spill] sm:$0xff] %v17562_v12  ;;  %12126 = vmatmul.mubr.bf16.gmra.mxu0 %v18894_v30  ;;  %12294 = vmatprep.subr.bf16.mxu1 %v15501_v14  ;;  %v8869_v17 = vmax.f32 %v8471_v42, 0.0  ;;  %v8404_v36 = vadd.f32 %v8403_v57, %v17450_v53  ;;  %v15505_v31 = vld [vmem:[#allocation8 + $0x600] ss:$16 sps:$4 sm:$0xff]   ;;  %v15510_v53 = vld [vmem:[#allocation8 + $0x5e4] ss:$16 sps:$4 sm:$0xff]  }
 0x4bc   :  { %12241 = vmatprep.mubr.bf16.mxu0 %v17564_v26  ;;  %v8476_v41 = vpop.f32.mrf.mxu1  ;;  %12222 = vmatpush1.bf16.msra.mxu0 %v15496_v44  ;;  %v8405_v58 = vpop.f32.mrf.mxu0  ;;  %v15513_v55 = vld [vmem:[#allocation8 + $0x7e4] ss:$16 sps:$4 sm:$0xff]  }
 0x4bd   :  { %12199 = vmatmul.mubr.bf16.gmra.mxu1 %v18896_v47  ;;  %v17573_v7 = vpack.c.bf16 %v8869_v17, %v8853_v1  ;;  %v8406_v20 = vadd.f32 %v8405_v58, %v17453_v50  ;;  %v8477_v14 = vadd.f32 %v8476_v41, %v8404_v36  ;;  %12223 = vmatprep.subr.bf16.mxu0 %v15504_v19  ;;  %v15516_v50 = vld [vmem:[#allocation8 + $0x5c4] ss:$16 sps:$4 sm:$0xff]   ;;  %v15514_v41 = vld [vmem:[#allocation8 + $0x5c0] ss:$16 sps:$4 sm:$0xff]  }
 0x4be   :  { %12314 = vmatprep.mubr.bf16.mxu1 %v17567_v21  ;;  %12295 = vmatpush1.bf16.msra.mxu1 %v15499_v8  ;;  %v8478_v54 = vpop.f32.mrf.mxu1  ;;  %v8407_v3 = vpop.f32.mrf.mxu0  ;;  %v15508_v21 = vld [vmem:[#allocation8 + $0x5e0] ss:$16 sps:$4 sm:$0xff]   ;;  %v15519_v17 = vld [vmem:[#allocation8 + $0x7c4] ss:$16 sps:$4 sm:$0xff]  }
 0x4bf   :  { %18897 = vst [vmem:[#allocation47_spill] sm:$0xff] %v17573_v7  ;;  %12296 = vmatprep.subr.bf16.mxu1 %v15507_v18  ;;  %v8408_v42 = vadd.f32 %v8407_v3, %v17455_v2  ;;  %v17577_v44 = vadd.f32 %v8478_v54, %v8406_v20  ;;  %v15511_v8 = vld [vmem:[#allocation8 + $0x7e0] ss:$16 sps:$4 sm:$0xff]   ;;  %v8885_v19 = vmax.f32 %v8477_v14, 0.0  ;;  %v15522_v58 = vld [vmem:[#allocation8 + $0x5a4] ss:$16 sps:$4 sm:$0xff]  }
 0x4c0   :  { %v8480_v57 = vpop.f32.mrf.mxu1  ;;  %12224 = vmatpush1.bf16.msra.mxu0 %v15502_v13  ;;  %v15517_v2 = vld [vmem:[#allocation8 + $0x7c0] ss:$16 sps:$4 sm:$0xff]   ;;  %v15525_v13 = vld [vmem:[#allocation8 + $0x7a4] ss:$16 sps:$4 sm:$0xff]  }
 0x4c1   :  { %18898 = vst [vmem:[#allocation71_spill] sm:$0xff] %v17577_v44  ;;  %v8481_v1 = vadd.f32 %v8480_v57, %v8408_v42  ;;  %12225 = vmatprep.subr.bf16.mxu0 %v15510_v53  ;;  %v15520_v20 = vld [vmem:[#allocation8 + $0x5a0] ss:$16 sps:$4 sm:$0xff]   ;;  %v15531_v53 = vld [vmem:[#allocation8 + $0x784] ss:$16 sps:$4 sm:$0xff]  }
 0x4c2   :  { %12297 = vmatpush1.bf16.msra.mxu1 %v15505_v31  ;;  %v15523_v54 = vld [vmem:[#allocation8 + $0x7a0] ss:$16 sps:$4 sm:$0xff]   ;;  %v15528_v31 = vld [vmem:[#allocation8 + $0x584] ss:$16 sps:$4 sm:$0xff]  }
 0x4c3   :  { %12298 = vmatprep.subr.bf16.mxu1 %v15513_v55  ;;  %v8901_v36 = vmax.f32 %v8481_v1, 0.0  ;;  %v15526_v14 = vld [vmem:[#allocation8 + $0x580] ss:$16 sps:$4 sm:$0xff]   ;;  %v15534_v3 = vld [vmem:[#allocation8 + $0x564] ss:$16 sps:$4 sm:$0xff]  }
 0x4c4   :  { %12226 = vmatpush2.bf16.msra.mxu0 %v15508_v21  ;;  %v15529_v21 = vld [vmem:[#allocation8 + $0x780] ss:$16 sps:$4 sm:$0xff]   ;;  %v15537_v55 = vld [vmem:[#allocation8 + $0x764] ss:$16 sps:$4 sm:$0xff]  }
 0x4c5   :  { %v17579_v18 = vpack.c.bf16 %v8901_v36, %v8885_v19  ;;  %12227 = vmatprep.subr.bf16.mxu0 %v15516_v50  ;;  %v18900_v42 = vld [vmem:[#allocation85_spill] sm:$0xff]  ;;  %v18907_v26 = vld [vmem:[#allocation24_spill] sm:$0xff]  ;;  %v18953_v12 = vld [vmem:[#allocation126_spill] sm:$0xff] }
 0x4c6   :  { %12299 = vmatpush2.bf16.msra.mxu1 %v15511_v8  ;;  %v7076_v57 = vadd.f32 %v18900_v42, %v18861_v49  ;;  %v15532_v1 = vld [vmem:[#allocation8 + $0x560] ss:$16 sps:$4 sm:$0xff]   ;;  %v18901_v8 = vld [vmem:[#allocation110_spill] sm:$0xff]  ;;  %v18934_v7 = vld [vmem:[#allocation132_spill] sm:$0xff] }
 0x4c7   :  { %18899 = vst [vmem:[#allocation38_spill] sm:$0xff] %v17579_v18  ;;  %12300 = vmatprep.subr.bf16.mxu1 %v15519_v17  ;;  %v7368_v50 = vadd.f32 %v18901_v8, %v18865_v24  ;;  %v15535_v17 = vld [vmem:[#allocation8 + $0x760] ss:$16 sps:$4 sm:$0xff]   ;;  %v15540_v19 = vld [vmem:[#allocation8 + $0x544] ss:$16 sps:$4 sm:$0xff]  }
 0x4c8   :  { %12228 = vmatpush2.bf16.msra.mxu0 %v15514_v41  ;;  %v15543_v36 = vld [vmem:[#allocation8 + $0x744] ss:$16 sps:$4 sm:$0xff]  }
 0x4c9   :  { %12229 = vmatprep.subr.bf16.mxu0 %v15522_v58  ;;  %v18902_v41 = vld [vmem:[#allocation86_spill] sm:$0xff]  ;;  %v15538_v58 = vld [vmem:[#allocation8 + $0x540] ss:$16 sps:$4 sm:$0xff]  }
 0x4ca   :  { %12301 = vmatpush2.bf16.msra.mxu1 %v15517_v2  ;;  %v7149_v2 = vadd.f32 %v18902_v41, %v7076_v57  ;;  %v15549_v42 = vld [vmem:[#allocation8 + $0x724] ss:$16 sps:$4 sm:$0xff]   ;;  %v7378_v57 = vadd.f32 %v18907_v26, %v18865_v24  ;;  %v15553_v26 = vld [vmem:[#allocation8 + $0x700] ss:$16 sps:$4 sm:$0xff]  }
 0x4cb   :  { %12302 = vmatprep.subr.bf16.mxu1 %v15525_v13  ;;  %v18903_v13 = vld [vmem:[#allocation111_spill] sm:$0xff] }
 0x4cc   :  { %12230 = vmatpush2.bf16.msra.mxu0 %v15520_v20  ;;  %v7441_v20 = vadd.f32 %v18903_v13, %v7368_v50  ;;  %v18906_v8 = vld [vmem:[#allocation87_spill] sm:$0xff] }
 0x4cd   :  { %12231 = vmatprep.subr.bf16.mxu0 %v15528_v31  ;;  %v15546_v31 = vld [vmem:[#allocation8 + $0x524] ss:$16 sps:$4 sm:$0xff]   ;;  %v15547_v50 = vld [vmem:[#allocation8 + $0x720] ss:$16 sps:$4 sm:$0xff]  }
 0x4ce   :  { %12303 = vmatpush2.bf16.msra.mxu1 %v15523_v54  ;;  %v15541_v54 = vld [vmem:[#allocation8 + $0x740] ss:$16 sps:$4 sm:$0xff]   ;;  %v15657_v11 = vld [vmem:[#allocation8 + $0xee4] ss:$16 sps:$4 sm:$0xff]  }
 0x4cf   :  { %12304 = vmatprep.subr.bf16.mxu1 %v15531_v53  ;;  %v18904_v53 = vld [vmem:[#allocation96_spill] sm:$0xff] }
 0x4d0   :  { %12232 = vmatpush2.bf16.msra.mxu0 %v15526_v14  ;;  %v7222_v14 = vadd.f32 %v18904_v53, %v7149_v2  ;;  %v15555_v2 = vld [vmem:[#allocation8 + $0x704] ss:$16 sps:$4 sm:$0xff]  }
 0x4d1   :  { %12233 = vmatprep.subr.bf16.mxu0 %v15534_v3  ;;  %v18910_v53 = vld [vmem:[#allocation88_spill] sm:$0xff] }
 0x4d2   :  { %12305 = vmatpush2.bf16.msra.mxu1 %v15529_v21  ;;  %v18905_v21 = vld [vmem:[#allocation120_spill] sm:$0xff] }
 0x4d3   :  { %12306 = vmatprep.subr.bf16.mxu1 %v15537_v55  ;;  %v7514_v3 = vadd.f32 %v18905_v21, %v7441_v20  ;;  %v7086_v55 = vadd.f32 %v18906_v8, %v18861_v49  ;;  %v18911_v21 = vld [vmem:[#allocation112_spill] sm:$0xff]  ;;  %v15550_v8 = vld [vmem:[#allocation8 + $0x500] ss:$16 sps:$4 sm:$0xff]  }
 0x4d4   :  { %12234 = vmatpush2.bf16.msra.mxu0 %v15532_v1  ;;  %v15544_v1 = vld [vmem:[#allocation8 + $0x520] ss:$16 sps:$4 sm:$0xff]   ;;  %v7451_v47 = vadd.f32 %v18911_v21, %v7378_v57 }
 0x4d5   :  { %12235 = vmatprep.subr.bf16.mxu0 %v15540_v19  ;;  %v18908_v19 = vld [vmem:[#allocation97_spill] sm:$0xff]  ;;  %v7159_v20 = vadd.f32 %v18910_v53, %v7086_v55 }
 0x4d6   :  { %12307 = vmatpush2.bf16.msra.mxu1 %v15535_v17  ;;  %v15552_v17 = vld [vmem:[#allocation8 + $0x504] ss:$16 sps:$4 sm:$0xff]   ;;  %v7295_v41 = vadd.f32 %v18908_v19, %v7222_v14  ;;  %v7524_v46 = vadd.f32 %v18913_v33, %v7451_v47  ;;  %v17607_v19 = vpop.f32.mrf.mxu0 }
 0x4d7   :  { %12308 = vmatprep.subr.bf16.mxu1 %v15543_v36  ;;  %v18909_v36 = vld [vmem:[#allocation121_spill] sm:$0xff]  ;;  %18917 = vst [vmem:[#allocation23_spill] sm:$0xff] %v17607_v19  ;;  %v18919_v33 = vld [vmem:[#allocation119_spill] sm:$0xff] }
 0x4d8   :  { %12236 = vmatpush2.bf16.msra.mxu0 %v15538_v58  ;;  %v7587_v13 = vadd.f32 %v18909_v36, %v7514_v3  ;;  %v15558_v58 = vld [vmem:[#allocation8 + $0x8e4] ss:$16 sps:$4 sm:$0xff]   ;;  %v18914_v3 = vsub.s32 6, %v18805_v28  ;;  %v8816_v47 = vmax.f32 %v18919_v33, 0.0 }
 0x4d9   :  { %12237 = vmatprep.subr.bf16.mxu0 %v15546_v31  ;;  %v18912_v31 = vld [vmem:[#allocation100_spill] sm:$0xff]  ;;  %v18915_v57 = vld [vmem:[#allocation89_spill] sm:$0xff]  ;;  %v18926_v33 = vld [vmem:[#allocation90_spill] sm:$0xff] }
 0x4da   :  { %12309 = vmatpush2.bf16.msra.mxu1 %v15541_v54  ;;  %v8830_v54 = vmax.f32 %v7295_v41, 0.0  ;;  %v7232_v30 = vadd.f32 %v18912_v31, %v7159_v20  ;;  %v15561_v14 = vld [vmem:[#allocation8 + $0xae4] ss:$16 sps:$4 sm:$0xff]   ;;  %v17602_v55 = vrot.slane %v17361_v39, %v18914_v3  ;;  %v15559_v31 = vld [vmem:[#allocation8 + $0xae0] ss:$16 sps:$4 sm:$0xff]  }
 0x4db   :  { %12310 = vmatprep.subr.bf16.mxu1 %v15549_v42  ;;  %v8832_v42 = vmax.f32 %v7587_v13, 0.0  ;;  %v18918_v41 = vld [vmem:[#allocation113_spill] sm:$0xff] }
 0x4dc   :  { %12238 = vmatpush2.bf16.msra.mxu0 %v15544_v1  ;;  %v7096_v1 = vadd.f32 %v18915_v57, %v18861_v49  ;;  %v7388_v36 = vadd.f32 %v18918_v41, %v18865_v24  ;;  %v15556_v13 = vld [vmem:[#allocation8 + $0x8e0] ss:$16 sps:$4 sm:$0xff]  }
 0x4dd   :  { %12239 = vmatprep.subr.bf16.mxu0 %v15552_v17  ;;  %v18921_v39 = vld [vmem:[#allocation101_spill] sm:$0xff]  ;;  %v17620_v41 = vpack.c.bf16 %v8832_v42, %v8816_v47 }
 0x4de   :  { %12311 = vmatpush2.bf16.msra.mxu1 %v15547_v50  ;;  %v18916_v50 = vld [vmem:[#allocation95_spill] sm:$0xff]  ;;  %v7305_v53 = vadd.f32 %v18921_v39, %v7232_v30  ;;  %v18922_v20 = vld [vmem:[#allocation125_spill] sm:$0xff]  ;;  %v18928_v30 = vld [vmem:[#allocation114_spill] sm:$0xff] }
 0x4df   :  { %12312 = vmatprep.subr.bf16.mxu1 %v15555_v2  ;;  %v8814_v17 = vmax.f32 %v18916_v50, 0.0  ;;  %v17612_v2 = vpop.f32.mrf.mxu1  ;;  %v7597_v21 = vadd.f32 %v18922_v20, %v7524_v46  ;;  %v18924_v50 = vld [vmem:[#allocation94_spill] sm:$0xff]  ;;  %18925 = vst [vmem:[#allocation39_spill] sm:$0xff] %v17620_v41  ;;  %v15562_v42 = vld [vmem:[#allocation8 + $0x8c0] ss:$16 sps:$4 sm:$0xff]  }
 0x4e0   :  { %12240 = vmatpush2.bf16.msra.mxu0 %v15550_v8  ;;  %18920 = vst [vmem:[#allocation48_spill] sm:$0xff] %v17612_v2  ;;  %v15564_v8 = vld [vmem:[#allocation8 + $0x8c4] ss:$16 sps:$4 sm:$0xff]   ;;  %v8862_v47 = vmax.f32 %v7305_v53, 0.0 }
 0x4e1   :  { %12355 = vmatprep.subr.bf16.mxu0 %v15558_v58  ;;  %v17616_v3 = vpack.c.bf16 %v8830_v54, %v8814_v17  ;;  %v7169_v58 = vadd.f32 %v18926_v33, %v7096_v1  ;;  %v7461_v54 = vadd.f32 %v18928_v30, %v7388_v36  ;;  %v18929_v39 = vld [vmem:[#allocation105_spill] sm:$0xff]  ;;  %v8864_v1 = vmax.f32 %v7597_v21, 0.0  ;;  %v18933_v53 = vld [vmem:[#allocation131_spill] sm:$0xff] }
 0x4e2   :  { %12313 = vmatpush2.bf16.msra.mxu1 %v15553_v26  ;;  %v8519_v49 = vpop.f32.mrf.mxu0  ;;  %v15567_v26 = vld [vmem:[#allocation8 + $0xac4] ss:$16 sps:$4 sm:$0xff]   ;;  %v15565_v33 = vld [vmem:[#allocation8 + $0xac0] ss:$16 sps:$4 sm:$0xff]  }
 0x4e3   :  { %12428 = vmatprep.subr.bf16.mxu1 %v15561_v14  ;;  %18923 = vst [vmem:[#allocation72_spill] sm:$0xff] %v17616_v3  ;;  %v8520_v57 = vadd.f32 %v8519_v49, %v17602_v55  ;;  %12242 = vmatmul.mubr.bf16.vlgmr.msra.gmra.mxu0 %v18924_v50  ;;  %v7242_v20 = vadd.f32 %v18929_v39, %v7169_v58 }
 0x4e4   :  { %v8592_v24 = vpop.f32.mrf.mxu1  ;;  %12251 = vmatprep.mubr.bf16.mxu0 %v17616_v3  ;;  %v17625_v46 = vpop.f32.mrf.mxu0  ;;  %12356 = vmatpush1.bf16.msra.mxu0 %v15556_v13  ;;  %v15570_v3 = vld [vmem:[#allocation8 + $0x8a4] ss:$16 sps:$4 sm:$0xff]   ;;  %v7650_v58 = vadd.f32 %v18934_v7, %v18933_v53 }
 0x4e5   :  { %12315 = vmatmul.mubr.bf16.vlgmr.msra.gmra.mxu1 %v18927_v40  ;;  %v17628_v14 = vadd.f32 %v8592_v24, %v8520_v57  ;;  %12357 = vmatprep.subr.bf16.mxu0 %v15564_v8  ;;  %v18930_v40 = vld [vmem:[#allocation129_spill] sm:$0xff]  ;;  %v18931_v13 = vld [vmem:[#allocation99_spill] sm:$0xff] }
 0x4e6   :  { %12324 = vmatprep.mubr.bf16.mxu1 %v17620_v41  ;;  %v17631_v17 = vpop.f32.mrf.mxu1  ;;  %12429 = vmatpush1.bf16.msra.mxu1 %v15559_v31  ;;  %v8523_v49 = vpop.f32.mrf.mxu0  ;;  %v7534_v50 = vadd.f32 %v18930_v40, %v7461_v54  ;;  %v15573_v24 = vld [vmem:[#allocation8 + $0xaa4] ss:$16 sps:$4 sm:$0xff]   ;;  %v8846_v30 = vmax.f32 %v18931_v13, 0.0  ;;  %v15568_v54 = vld [vmem:[#allocation8 + $0x8a0] ss:$16 sps:$4 sm:$0xff]  }
 0x4e7   :  { %v8524_v36 = vadd.f32 %v8523_v49, %v17602_v55  ;;  %12430 = vmatprep.subr.bf16.mxu1 %v15567_v26  ;;  %v18932_v41 = vld [vmem:[#allocation123_spill] sm:$0xff]  ;;  %v18935_v31 = vld [vmem:[#allocation156_spill] sm:$0xff]  ;;  %v18936_v8 = vld [vmem:[#allocation157_spill] sm:$0xff] }
 0x4e8   :  { %v8596_v57 = vpop.f32.mrf.mxu1  ;;  %v8848_v18 = vmax.f32 %v18932_v41, 0.0  ;;  %v17640_v21 = vpop.f32.mrf.mxu0  ;;  %v7942_v39 = vadd.f32 %v18936_v8, %v18935_v31  ;;  %12358 = vmatpush1.bf16.msra.mxu0 %v15562_v42  ;;  %v18937_v26 = vld [vmem:[#allocation106_spill] sm:$0xff]  ;;  %v15571_v13 = vld [vmem:[#allocation8 + $0xaa0] ss:$16 sps:$4 sm:$0xff]   ;;  %v17649_v41 = vpack.c.bf16 %v8862_v47, %v8846_v30  ;;  %v7607_v19 = vadd.f32 %v18940_v56, %v7534_v50 }
 0x4e9   :  { %v17644_v44 = vadd.f32 %v8596_v57, %v8524_v36  ;;  %v7315_v49 = vadd.f32 %v18937_v26, %v7242_v20  ;;  %12359 = vmatprep.subr.bf16.mxu0 %v15570_v3  ;;  %v15576_v7 = vld [vmem:[#allocation8 + $0x884] ss:$16 sps:$4 sm:$0xff]   ;;  %v16169_v8 = vld [vmem:[#allocation7 + $0x8] sm:$0xff]  ;;  %v18941_v36 = vsub.s32 7, %v18805_v28  ;;  %v15574_v28 = vld [vmem:[#allocation8 + $0x880] ss:$16 sps:$4 sm:$0xff]  }
 0x4ea   :  { %v17646_v40 = vpop.f32.mrf.mxu1  ;;  %12431 = vmatpush1.bf16.msra.mxu1 %v15565_v33  ;;  %18938 = vst [vmem:[#allocation63_spill] sm:$0xff] %v17649_v41  ;;  %v17651_v59 = vpack.c.bf16 %v8864_v1, %v8848_v18  ;;  %v8529_v2 = vpop.f32.mrf.mxu0  ;;  %v18942_v57 = vld [vmem:[#allocation98_spill] sm:$0xff]  ;;  %v18943_v47 = vld [vmem:[#allocation133_spill] sm:$0xff] }
 0x4eb   :  { %v17656_v42 = vrot.slane %v16169_v8, %v18941_v36  ;;  %12252 = vmatmul.mubr.bf16.gmra.mxu0 %v18942_v57  ;;  %12432 = vmatprep.subr.bf16.mxu1 %v15573_v24  ;;  %v15579_v20 = vld [vmem:[#allocation8 + $0xa84] ss:$16 sps:$4 sm:$0xff]   ;;  %v8530_v3 = vadd.f32 %v8529_v2, %v17602_v55  ;;  %v7723_v30 = vadd.f32 %v18943_v47, %v7650_v58  ;;  %v8894_v2 = vmax.f32 %v7315_v49, 0.0  ;;  %v15577_v58 = vld [vmem:[#allocation8 + $0xa80] ss:$16 sps:$4 sm:$0xff]  }
 0x4ec   :  { %18939 = vst [vmem:[#allocation51_spill] sm:$0xff] %v17651_v59  ;;  %v8602_v33 = vpop.f32.mrf.mxu1  ;;  %v18944_v18 = vld [vmem:[#allocation122_spill] sm:$0xff]  ;;  %12261 = vmatprep.mubr.bf16.mxu0 %v17649_v41  ;;  %v8531_v1 = vpop.f32.mrf.mxu0  ;;  %12360 = vmatpush1.bf16.msra.mxu0 %v15568_v54  ;;  %v18946_v36 = vld [vmem:[#allocation141_spill] sm:$0xff] }
 0x4ed   :  { %12325 = vmatmul.mubr.bf16.gmra.mxu1 %v18944_v18  ;;  %v18945_v56 = vld [vmem:[#allocation158_spill] sm:$0xff]  ;;  %v8532_v26 = vadd.f32 %v8531_v1, %v17656_v42  ;;  %v17666_v24 = vadd.f32 %v8602_v33, %v8530_v3  ;;  %v7796_v57 = vadd.f32 %v18946_v36, %v7723_v30  ;;  %12361 = vmatprep.subr.bf16.mxu0 %v15576_v7  ;;  %v8896_v18 = vmax.f32 %v7607_v19, 0.0  ;;  %v18947_v33 = vld [vmem:[#allocation103_spill] sm:$0xff] }
 0x4ee   :  { %v8015_v50 = vadd.f32 %v18945_v56, %v7942_v39  ;;  %12334 = vmatprep.mubr.bf16.mxu1 %v17651_v59  ;;  %v8604_v8 = vpop.f32.mrf.mxu1  ;;  %12433 = vmatpush1.bf16.msra.mxu1 %v15571_v13  ;;  %v15582_v47 = vld [vmem:[#allocation8 + $0x864] ss:$16 sps:$4 sm:$0xff]   ;;  %v8533_v41 = vpop.f32.mrf.mxu0  ;;  %v8878_v1 = vmax.f32 %v18947_v33, 0.0  ;;  %v15580_v7 = vld [vmem:[#allocation8 + $0x860] ss:$16 sps:$4 sm:$0xff]  }
 0x4ef   :  { %12434 = vmatprep.subr.bf16.mxu1 %v15579_v20  ;;  %v15585_v56 = vld [vmem:[#allocation8 + $0xa64] ss:$16 sps:$4 sm:$0xff]   ;;  %v8534_v54 = vadd.f32 %v8533_v41, %v17602_v55  ;;  %v17671_v59 = vadd.f32 %v8604_v8, %v8532_v26  ;;  %v15583_v41 = vld [vmem:[#allocation8 + $0xa60] ss:$16 sps:$4 sm:$0xff]  }
 0x4f0   :  { %v8088_v39 = vadd.f32 %v17314_v60, %v8015_v50  ;;  %v8606_v3 = vpop.f32.mrf.mxu1  ;;  %v17674_v49 = vpop.f32.mrf.mxu0  ;;  %v18948_v30 = vld [vmem:[#allocation127_spill] sm:$0xff]  ;;  %12362 = vmatpush1.bf16.msra.mxu0 %v15574_v28  ;;  %v18949_v60 = vld [vmem:[#allocation142_spill] sm:$0xff]  ;;  %v17682_v50 = vpack.c.bf16 %v8894_v2, %v8878_v1 }
 0x4f1   :  { %v8880_v13 = vmax.f32 %v18948_v30, 0.0  ;;  %v17677_v36 = vadd.f32 %v8606_v3, %v8534_v54  ;;  %v7869_v20 = vadd.f32 %v18949_v60, %v7796_v57  ;;  %12363 = vmatprep.subr.bf16.mxu0 %v15582_v47  ;;  %v15588_v26 = vld [vmem:[#allocation8 + $0x844] ss:$16 sps:$4 sm:$0xff]   ;;  %v15586_v2 = vld [vmem:[#allocation8 + $0x840] ss:$16 sps:$4 sm:$0xff]  }
 0x4f2   :  { %v17679_v19 = vpop.f32.mrf.mxu1  ;;  %12435 = vmatpush1.bf16.msra.mxu1 %v15577_v58  ;;  %18950 = vst [vmem:[#allocation75_spill] sm:$0xff] %v17682_v50  ;;  %v8539_v8 = vpop.f32.mrf.mxu0  ;;  %v8161_v33 = vadd.f32 %v17316_v10, %v8088_v39  ;;  %v15591_v54 = vld [vmem:[#allocation8 + $0xa44] ss:$16 sps:$4 sm:$0xff]   ;;  %v15589_v39 = vld [vmem:[#allocation8 + $0xa40] ss:$16 sps:$4 sm:$0xff]  }
 0x4f3   :  { %12262 = vmatmul.mubr.bf16.gmra.mxu0 %v18951_v61  ;;  %12436 = vmatprep.subr.bf16.mxu1 %v15585_v56  ;;  %v17686_v28 = vpack.c.bf16 %v8896_v18, %v8880_v13  ;;  %v8540_v3 = vadd.f32 %v8539_v8, %v17602_v55  ;;  %v8802_v18 = vmax.f32 %v7869_v20, 0.0  ;;  %v15594_v56 = vld [vmem:[#allocation8 + $0x824] ss:$16 sps:$4 sm:$0xff]   ;;  %v15592_v20 = vld [vmem:[#allocation8 + $0x820] ss:$16 sps:$4 sm:$0xff]  }
 0x4f4   :  { %v8612_v30 = vpop.f32.mrf.mxu1  ;;  %12271 = vmatprep.mubr.bf16.mxu0 %v17682_v50  ;;  %v8541_v57 = vpop.f32.mrf.mxu0  ;;  %12364 = vmatpush1.bf16.msra.mxu0 %v15580_v7  ;;  %v8804_v13 = vmax.f32 %v8161_v33, 0.0  ;;  %v15597_v60 = vld [vmem:[#allocation8 + $0xa24] ss:$16 sps:$4 sm:$0xff]   ;;  %v15595_v33 = vld [vmem:[#allocation8 + $0xa20] ss:$16 sps:$4 sm:$0xff]  }
 0x4f5   :  { %18952 = vst [vmem:[#allocation40_spill] sm:$0xff] %v17686_v28  ;;  %12335 = vmatmul.mubr.bf16.gmra.mxu1 %v18953_v12  ;;  %v8542_v10 = vadd.f32 %v8541_v57, %v17656_v42  ;;  %v17693_v58 = vadd.f32 %v8612_v30, %v8540_v3  ;;  %12365 = vmatprep.subr.bf16.mxu0 %v15588_v26  ;;  %v8788_v3 = vmax.f32 %v17311_v4, 0.0  ;;  %v15600_v30 = vld [vmem:[#allocation8 + $0x804] ss:$16 sps:$4 sm:$0xff]  }
 0x4f6   :  { %12344 = vmatprep.mubr.bf16.mxu1 %v17686_v28  ;;  %v8614_v47 = vpop.f32.mrf.mxu1  ;;  %12437 = vmatpush1.bf16.msra.mxu1 %v15583_v41  ;;  %v8543_v1 = vpop.f32.mrf.mxu0  ;;  %v18955_v28 = vld [vmem:[#allocation140_spill] sm:$0xff]  ;;  %v18965_v61 = vld [vmem:[#allocation145_spill] sm:$0xff] }
 0x4f7   :  { %12438 = vmatprep.subr.bf16.mxu1 %v15591_v54  ;;  %v8544_v8 = vadd.f32 %v8543_v1, %v17602_v55  ;;  %v17696_v50 = vadd.f32 %v8614_v47, %v8542_v10  ;;  %v8786_v12 = vmax.f32 %v18955_v28, 0.0  ;;  %v18957_v47 = vld [vmem:[#allocation104_spill] sm:$0xff]  ;;  %v17709_v28 = vpack.c.bf16 %v8804_v13, %v8788_v3  ;;  %v15601_v13 = vld [vmem:[#allocation8 + $0xa00] ss:$16 sps:$4 sm:$0xff]  }
 0x4f8   :  { %v8616_v7 = vpop.f32.mrf.mxu1  ;;  %v17699_v57 = vpop.f32.mrf.mxu0  ;;  %12366 = vmatpush1.bf16.msra.mxu0 %v15586_v2  ;;  %v15603_v1 = vld [vmem:[#allocation8 + $0xa04] ss:$16 sps:$4 sm:$0xff]  }
 0x4f9   :  { %18954 = vst [vmem:[#allocation46_spill] sm:$0xff] %v17696_v50  ;;  %v17702_v41 = vadd.f32 %v8616_v7, %v8544_v8  ;;  %12367 = vmatprep.subr.bf16.mxu0 %v15594_v56  ;;  %v17706_v54 = vpack.c.bf16 %v8802_v18, %v8786_v12  ;;  %18958 = vst [vmem:[#allocation70_spill] sm:$0xff] %v17709_v28  ;;  %v18959_v8 = vld [vmem:[#allocation128_spill] sm:$0xff]  ;;  %v15598_v12 = vld [vmem:[#allocation8 + $0x800] ss:$16 sps:$4 sm:$0xff]  }
 0x4fa   :  { %v17704_v26 = vpop.f32.mrf.mxu1  ;;  %12439 = vmatpush1.bf16.msra.mxu1 %v15589_v39  ;;  %v8549_v10 = vpop.f32.mrf.mxu0  ;;  %v15606_v7 = vld [vmem:[#allocation8 + $0x9e4] ss:$16 sps:$4 sm:$0xff]   ;;  %v15640_v50 = vld [vmem:[#allocation8 + $0x920] ss:$16 sps:$4 sm:$0xff]  }
 0x4fb   :  { %18956 = vst [vmem:[#allocation64_spill] sm:$0xff] %v17706_v54  ;;  %12272 = vmatmul.mubr.bf16.gmra.mxu0 %v18957_v47  ;;  %12440 = vmatprep.subr.bf16.mxu1 %v15597_v60  ;;  %v8550_v4 = vadd.f32 %v8549_v10, %v17602_v55  ;;  %v15609_v10 = vld [vmem:[#allocation8 + $0xbe4] ss:$16 sps:$4 sm:$0xff]  }
 0x4fc   :  { %v8622_v2 = vpop.f32.mrf.mxu1  ;;  %12387 = vmatprep.mubr.bf16.mxu0 %v17706_v54  ;;  %v8551_v39 = vpop.f32.mrf.mxu0  ;;  %12368 = vmatpush1.bf16.msra.mxu0 %v15592_v20 }
 0x4fd   :  { %12345 = vmatmul.mubr.bf16.gmra.mxu1 %v18959_v8  ;;  %v8552_v18 = vadd.f32 %v8551_v39, %v17656_v42  ;;  %v17716_v56 = vadd.f32 %v8622_v2, %v8550_v4  ;;  %12369 = vmatprep.subr.bf16.mxu0 %v15600_v30  ;;  %v15607_v4 = vld [vmem:[#allocation8 + $0xbe0] ss:$16 sps:$4 sm:$0xff]   ;;  %v15612_v2 = vld [vmem:[#allocation8 + $0x9c4] ss:$16 sps:$4 sm:$0xff]  }
 0x4fe   :  { %12460 = vmatprep.mubr.bf16.mxu1 %v17709_v28  ;;  %v8624_v60 = vpop.f32.mrf.mxu1  ;;  %12441 = vmatpush1.bf16.msra.mxu1 %v15595_v33  ;;  %v8553_v3 = vpop.f32.mrf.mxu0  ;;  %v15604_v28 = vld [vmem:[#allocation8 + $0x9e0] ss:$16 sps:$4 sm:$0xff]   ;;  %v15615_v33 = vld [vmem:[#allocation8 + $0xbc4] ss:$16 sps:$4 sm:$0xff]  }
 0x4ff   :  { %12442 = vmatprep.subr.bf16.mxu1 %v15603_v1  ;;  %v8554_v8 = vadd.f32 %v8553_v3, %v17602_v55  ;;  %v17719_v54 = vadd.f32 %v8624_v60, %v8552_v18  ;;  %v15610_v30 = vld [vmem:[#allocation8 + $0x9c0] ss:$16 sps:$4 sm:$0xff]   ;;  %v15618_v39 = vld [vmem:[#allocation8 + $0x9a4] ss:$16 sps:$4 sm:$0xff]  }
 0x500   :  { %v8626_v20 = vpop.f32.mrf.mxu1  ;;  %12370 = vmatpush1.bf16.msra.mxu0 %v15598_v12  ;;  %v15613_v1 = vld [vmem:[#allocation8 + $0xbc0] ss:$16 sps:$4 sm:$0xff]   ;;  %v15621_v55 = vld [vmem:[#allocation8 + $0xba4] ss:$16 sps:$4 sm:$0xff]  }
 0x501   :  { %18960 = vst [vmem:[#allocation52_spill] sm:$0xff] %v17719_v54  ;;  %v17721_v47 = vadd.f32 %v8626_v20, %v8554_v8  ;;  %12371 = vmatprep.subr.bf16.mxu0 %v15606_v7  ;;  %v15616_v18 = vld [vmem:[#allocation8 + $0x9a0] ss:$16 sps:$4 sm:$0xff]   ;;  %v15624_v12 = vld [vmem:[#allocation8 + $0x984] ss:$16 sps:$4 sm:$0xff]  }
 0x502   :  { %12443 = vmatpush1.bf16.msra.mxu1 %v15601_v13  ;;  %v15619_v8 = vld [vmem:[#allocation8 + $0xba0] ss:$16 sps:$4 sm:$0xff]   ;;  %v15627_v60 = vld [vmem:[#allocation8 + $0xb84] ss:$16 sps:$4 sm:$0xff]  }
 0x503   :  { %12444 = vmatprep.subr.bf16.mxu1 %v15609_v10  ;;  %v15622_v13 = vld [vmem:[#allocation8 + $0x980] ss:$16 sps:$4 sm:$0xff]   ;;  %v15630_v7 = vld [vmem:[#allocation8 + $0x964] ss:$16 sps:$4 sm:$0xff]  }
 0x504   :  { %12372 = vmatpush2.bf16.msra.mxu0 %v15604_v28  ;;  %v15625_v28 = vld [vmem:[#allocation8 + $0xb80] ss:$16 sps:$4 sm:$0xff]   ;;  %v15633_v3 = vld [vmem:[#allocation8 + $0xb64] ss:$16 sps:$4 sm:$0xff]  }
 0x505   :  { %12373 = vmatprep.subr.bf16.mxu0 %v15612_v2  ;;  %v18961_v10 = vld [vmem:[#allocation134_spill] sm:$0xff]  ;;  %v18962_v2 = vld [vmem:[#allocation159_spill] sm:$0xff] }
 0x506   :  { %12445 = vmatpush2.bf16.msra.mxu1 %v15607_v4  ;;  %v7660_v20 = vadd.f32 %v18961_v10, %v18933_v53  ;;  %v15628_v4 = vld [vmem:[#allocation8 + $0x960] ss:$16 sps:$4 sm:$0xff]  }
 0x507   :  { %12446 = vmatprep.subr.bf16.mxu1 %v15615_v33  ;;  %v7952_v33 = vadd.f32 %v18962_v2, %v18935_v31  ;;  %v15637_v10 = vld [vmem:[#allocation8 + $0xb40] ss:$16 sps:$4 sm:$0xff]   ;;  %v15645_v2 = vld [vmem:[#allocation8 + $0xb24] ss:$16 sps:$4 sm:$0xff]  }
 0x508   :  { %12374 = vmatpush2.bf16.msra.mxu0 %v15610_v30  ;;  %v15631_v30 = vld [vmem:[#allocation8 + $0xb60] ss:$16 sps:$4 sm:$0xff]  }
 0x509   :  { %12375 = vmatprep.subr.bf16.mxu0 %v15618_v39  ;;  %v15639_v39 = vld [vmem:[#allocation8 + $0xb44] ss:$16 sps:$4 sm:$0xff]  }
 0x50a   :  { %12447 = vmatpush2.bf16.msra.mxu1 %v15613_v1  ;;  %v15636_v1 = vld [vmem:[#allocation8 + $0x944] ss:$16 sps:$4 sm:$0xff]  }
 0x50b   :  { %12448 = vmatprep.subr.bf16.mxu1 %v15621_v55  ;;  %v18963_v55 = vld [vmem:[#allocation135_spill] sm:$0xff] }
 0x50c   :  { %12376 = vmatpush2.bf16.msra.mxu0 %v15616_v18  ;;  %v7733_v18 = vadd.f32 %v18963_v55, %v7660_v20  ;;  %v18967_v20 = vld [vmem:[#allocation161_spill] sm:$0xff] }
 0x50d   :  { %12377 = vmatprep.subr.bf16.mxu0 %v15624_v12  ;;  %v18964_v12 = vld [vmem:[#allocation160_spill] sm:$0xff] }
 0x50e   :  { %12449 = vmatpush2.bf16.msra.mxu1 %v15619_v8  ;;  %v15634_v8 = vld [vmem:[#allocation8 + $0x940] ss:$16 sps:$4 sm:$0xff]   ;;  %v7806_v54 = vadd.f32 %v18965_v61, %v7733_v18  ;;  %v15651_v61 = vld [vmem:[#allocation8 + $0xb04] ss:$16 sps:$4 sm:$0xff]  }
 0x50f   :  { %12450 = vmatprep.subr.bf16.mxu1 %v15627_v60  ;;  %v8025_v60 = vadd.f32 %v18964_v12, %v7952_v33  ;;  %v15643_v33 = vld [vmem:[#allocation8 + $0xb20] ss:$16 sps:$4 sm:$0xff]  }
 0x510   :  { %12378 = vmatpush2.bf16.msra.mxu0 %v15622_v13  ;;  %v15642_v13 = vld [vmem:[#allocation8 + $0x924] ss:$16 sps:$4 sm:$0xff]   ;;  %v15646_v12 = vld [vmem:[#allocation8 + $0x900] ss:$16 sps:$4 sm:$0xff]  }
 0x511   :  { %12379 = vmatprep.subr.bf16.mxu0 %v15630_v7  ;;  %v18966_v7 = vld [vmem:[#allocation136_spill] sm:$0xff]  ;;  %v18969_v18 = vld [vmem:[#allocation137_spill] sm:$0xff] }
 0x512   :  { %12451 = vmatpush2.bf16.msra.mxu1 %v15625_v28  ;;  %v8098_v28 = vadd.f32 %v17329_v32, %v8025_v60  ;;  %v18970_v60 = vld [vmem:[#allocation162_spill] sm:$0xff] }
 0x513   :  { %12452 = vmatprep.subr.bf16.mxu1 %v15633_v3  ;;  %v7670_v3 = vadd.f32 %v18966_v7, %v18933_v53  ;;  %v15649_v7 = vld [vmem:[#allocation8 + $0xb00] ss:$16 sps:$4 sm:$0xff]  }
 0x514   :  { %12380 = vmatpush2.bf16.msra.mxu0 %v15628_v4  ;;  %v7962_v4 = vadd.f32 %v18967_v20, %v18935_v31  ;;  %v15654_v20 = vld [vmem:[#allocation8 + $0xce4] ss:$16 sps:$4 sm:$0xff]  }
 0x515   :  { %12381 = vmatprep.subr.bf16.mxu0 %v15636_v1  ;;  %v18968_v1 = vld [vmem:[#allocation146_spill] sm:$0xff]  ;;  %v7743_v32 = vadd.f32 %v18969_v18, %v7670_v3 }
 0x516   :  { %12453 = vmatpush2.bf16.msra.mxu1 %v15631_v30  ;;  %v15648_v30 = vld [vmem:[#allocation8 + $0x904] ss:$16 sps:$4 sm:$0xff]   ;;  %v7879_v55 = vadd.f32 %v18968_v1, %v7806_v54 }
 0x517   :  { %12454 = vmatprep.subr.bf16.mxu1 %v15639_v39  ;;  %v8171_v39 = vadd.f32 %v17331_v34, %v8098_v28  ;;  %v18972_v54 = vld [vmem:[#allocation138_spill] sm:$0xff]  ;;  %v17743_v28 = vpop.f32.mrf.mxu0 }
 0x518   :  { %12382 = vmatpush2.bf16.msra.mxu0 %v15634_v8  ;;  %v8035_v8 = vadd.f32 %v18970_v60, %v7962_v4  ;;  %v17746_v4 = vpop.f32.mrf.mxu1 }
 0x519   :  { %12383 = vmatprep.subr.bf16.mxu0 %v15642_v13  ;;  %v18971_v13 = vld [vmem:[#allocation149_spill] sm:$0xff]  ;;  %v8836_v1 = vmax.f32 %v8171_v39, 0.0 }
 0x51a   :  { %12455 = vmatpush2.bf16.msra.mxu1 %v15637_v10  ;;  %v8834_v10 = vmax.f32 %v7879_v55, 0.0  ;;  %v7816_v0 = vadd.f32 %v18971_v13, %v7743_v32  ;;  %v8108_v34 = vadd.f32 %v17344_v43, %v8035_v8  ;;  %v15655_v32 = vld [vmem:[#allocation8 + $0xee0] ss:$16 sps:$4 sm:$0xff]   ;;  %v15660_v8 = vld [vmem:[#allocation8 + $0xcc4] ss:$16 sps:$4 sm:$0xff]  }
 0x51b   :  { %12456 = vmatprep.subr.bf16.mxu1 %v15645_v2  ;;  %v7680_v2 = vadd.f32 %v18972_v54, %v18933_v53  ;;  %v18974_v53 = vld [vmem:[#allocation150_spill] sm:$0xff]  ;;  %v15658_v54 = vld [vmem:[#allocation8 + $0xcc0] ss:$16 sps:$4 sm:$0xff]  }
 0x51c   :  { %12384 = vmatpush2.bf16.msra.mxu0 %v15640_v50  ;;  %v18973_v50 = vld [vmem:[#allocation144_spill] sm:$0xff]  ;;  %v7889_v39 = vadd.f32 %v18974_v53, %v7816_v0 }
 0x51d   :  { %12385 = vmatprep.subr.bf16.mxu0 %v15648_v30  ;;  %v8818_v3 = vmax.f32 %v18973_v50, 0.0  ;;  %v8820_v30 = vmax.f32 %v17327_v25, 0.0 }
 0x51e   :  { %12457 = vmatpush2.bf16.msra.mxu1 %v15643_v33  ;;  %v7972_v33 = vadd.f32 %v17301_v52, %v18935_v31  ;;  %v8181_v52 = vadd.f32 %v17346_v63, %v8108_v34  ;;  %v18976_v31 = vld [vmem:[#allocation143_spill] sm:$0xff] }
 0x51f   :  { %12458 = vmatprep.subr.bf16.mxu1 %v15651_v61  ;;  %v15652_v61 = vld [vmem:[#allocation8 + $0xce0] ss:$16 sps:$4 sm:$0xff]   ;;  %v17753_v60 = vpack.c.bf16 %v8834_v10, %v8818_v3  ;;  %v17758_v25 = vpack.c.bf16 %v8836_v1, %v8820_v30  ;;  %v15666_v30 = vld [vmem:[#allocation8 + $0xca4] ss:$16 sps:$4 sm:$0xff]  }
 0x520   :  { %12386 = vmatpush2.bf16.msra.mxu0 %v15646_v12  ;;  %v18975_v12 = vld [vmem:[#allocation139_spill] sm:$0xff]  ;;  %v8045_v10 = vadd.f32 %v17303_v27, %v7972_v33  ;;  %v18978_v33 = vld [vmem:[#allocation148_spill] sm:$0xff] }
 0x521   :  { %12501 = vmatprep.subr.bf16.mxu0 %v15654_v20  ;;  %v7753_v13 = vadd.f32 %v18975_v12, %v7680_v2  ;;  %v15663_v20 = vld [vmem:[#allocation8 + $0xec4] ss:$16 sps:$4 sm:$0xff]   ;;  %v8866_v2 = vmax.f32 %v7889_v39, 0.0  ;;  %v15661_v3 = vld [vmem:[#allocation8 + $0xec0] ss:$16 sps:$4 sm:$0xff]  }
 0x522   :  { %12459 = vmatpush2.bf16.msra.mxu1 %v15649_v7  ;;  %v8665_v55 = vpop.f32.mrf.mxu0  ;;  %v8118_v53 = vadd.f32 %v17368_v45, %v8045_v10  ;;  %v15669_v27 = vld [vmem:[#allocation8 + $0xea4] ss:$16 sps:$4 sm:$0xff]  }
 0x523   :  { %v8666_v43 = vadd.f32 %v8665_v55, %v17628_v14  ;;  %12574 = vmatprep.subr.bf16.mxu1 %v15657_v11  ;;  %12388 = vmatmul.mubr.bf16.vlgmr.msra.gmra.mxu0 %v18976_v31  ;;  %v18977_v11 = vld [vmem:[#allocation154_spill] sm:$0xff]  ;;  %v8868_v55 = vmax.f32 %v8181_v52, 0.0  ;;  %v15664_v52 = vld [vmem:[#allocation8 + $0xca0] ss:$16 sps:$4 sm:$0xff]  }
 0x524   :  { %v8738_v18 = vpop.f32.mrf.mxu1  ;;  %v17760_v7 = vpop.f32.mrf.mxu0  ;;  %12397 = vmatprep.mubr.bf16.mxu0 %v17753_v60  ;;  %v7826_v14 = vadd.f32 %v18977_v11, %v7753_v13  ;;  %12502 = vmatpush1.bf16.msra.mxu0 %v15652_v61  ;;  %v8850_v13 = vmax.f32 %v18978_v33, 0.0  ;;  %v8234_v61 = vadd.f32 %v17390_v5, %v17375_v48  ;;  %v15667_v5 = vld [vmem:[#allocation8 + $0xea0] ss:$16 sps:$4 sm:$0xff]  }
 0x525   :  { %12461 = vmatmul.mubr.bf16.vlgmr.msra.gmra.mxu1 %v17321_v6  ;;  %v8739_v1 = vadd.f32 %v8738_v18, %v8666_v43  ;;  %12503 = vmatprep.subr.bf16.mxu0 %v15660_v8  ;;  %v18979_v18 = vld [vmem:[#allocation155_spill] sm:$0xff]  ;;  %v8526_v8 = vadd.f32 %v17640_v21, %v17656_v42 }
 0x526   :  { %v17764_v0 = vpop.f32.mrf.mxu1  ;;  %12470 = vmatprep.mubr.bf16.mxu1 %v17758_v25  ;;  %v8669_v63 = vpop.f32.mrf.mxu0  ;;  %12575 = vmatpush1.bf16.msra.mxu1 %v15655_v32  ;;  %v8852_v32 = vmax.f32 %v17342_v23, 0.0  ;;  %v8522_v23 = vadd.f32 %v17625_v46, %v17656_v42  ;;  %v18980_v21 = vld [vmem:[#allocation147_spill] sm:$0xff] }
 0x527   :  { %v8670_v34 = vadd.f32 %v8669_v63, %v17644_v44  ;;  %12576 = vmatprep.subr.bf16.mxu1 %v15663_v20  ;;  %v7899_v44 = vadd.f32 %v18979_v18, %v7826_v14  ;;  %v8791_v20 = vmax.f32 %v8739_v1, 0.0  ;;  %v17781_v63 = vpack.c.bf16 %v8866_v2, %v8850_v13  ;;  %v15673_v13 = vld [vmem:[#allocation8 + $0xe80] ss:$16 sps:$4 sm:$0xff]   ;;  %v18981_v18 = vld [vmem:[#allocation152_spill] sm:$0xff] }
 0x528   :  { %v8742_v50 = vpop.f32.mrf.mxu1  ;;  %v8671_v12 = vpop.f32.mrf.mxu0  ;;  %12504 = vmatpush1.bf16.msra.mxu0 %v15658_v54  ;;  %v8191_v14 = vadd.f32 %v17370_v37, %v8118_v53  ;;  %v17787_v54 = vpack.c.bf16 %v8868_v55, %v8852_v32  ;;  %v8599_v46 = vadd.f32 %v17646_v40, %v8526_v8  ;;  %v15670_v53 = vld [vmem:[#allocation8 + $0xc80] ss:$16 sps:$4 sm:$0xff]   ;;  %v8882_v32 = vmax.f32 %v18981_v18, 0.0  ;;  %v15690_v18 = vld [vmem:[#allocation8 + $0xc24] ss:$16 sps:$4 sm:$0xff]  }
 0x529   :  { %v8743_v39 = vadd.f32 %v8742_v50, %v8670_v34  ;;  %12505 = vmatprep.subr.bf16.mxu0 %v15666_v30  ;;  %v15672_v50 = vld [vmem:[#allocation8 + $0xc84] ss:$16 sps:$4 sm:$0xff]   ;;  %v8898_v2 = vmax.f32 %v7899_v44, 0.0  ;;  %v8595_v40 = vadd.f32 %v17631_v17, %v8522_v23  ;;  %v15679_v23 = vld [vmem:[#allocation8 + $0xe60] ss:$16 sps:$4 sm:$0xff]  }
 0x52a   :  { %v17774_v43 = vpop.f32.mrf.mxu1  ;;  %v8675_v45 = vpop.f32.mrf.mxu0  ;;  %12577 = vmatpush1.bf16.msra.mxu1 %v15661_v3  ;;  %v15675_v3 = vld [vmem:[#allocation8 + $0xe84] ss:$16 sps:$4 sm:$0xff]   ;;  %v8900_v44 = vmax.f32 %v8191_v14, 0.0  ;;  %v8672_v8 = vadd.f32 %v8671_v12, %v8599_v46 }
 0x52b   :  { %v8807_v11 = vmax.f32 %v8743_v39, 0.0  ;;  %v8676_v10 = vadd.f32 %v8675_v45, %v17666_v24  ;;  %12398 = vmatmul.mubr.bf16.gmra.mxu0 %v18980_v21  ;;  %12578 = vmatprep.subr.bf16.mxu1 %v15669_v27  ;;  %v8307_v24 = vadd.f32 %v17396_v35, %v8234_v61  ;;  %v15678_v39 = vld [vmem:[#allocation8 + $0xc64] ss:$16 sps:$4 sm:$0xff]  }
 0x52c   :  { %v8748_v34 = vpop.f32.mrf.mxu1  ;;  %v17789_v1 = vpop.f32.mrf.mxu0  ;;  %12407 = vmatprep.mubr.bf16.mxu0 %v17781_v63  ;;  %12506 = vmatpush1.bf16.msra.mxu0 %v15664_v52  ;;  %v15681_v52 = vld [vmem:[#allocation8 + $0xe64] ss:$16 sps:$4 sm:$0xff]  }
 0x52d   :  { %v17792_v30 = vpack.c.bf16 %v8807_v11, %v8791_v20  ;;  %12471 = vmatmul.mubr.bf16.gmra.mxu1 %v17336_v38  ;;  %v8380_v27 = vadd.f32 %v17510_v9, %v8307_v24  ;;  %v8749_v35 = vadd.f32 %v8748_v34, %v8676_v10  ;;  %12507 = vmatprep.subr.bf16.mxu0 %v15672_v50  ;;  %v8884_v11 = vmax.f32 %v17357_v16, 0.0  ;;  %v15684_v24 = vld [vmem:[#allocation8 + $0xc44] ss:$16 sps:$4 sm:$0xff]  }
 0x52e   :  { %v17796_v37 = vpop.f32.mrf.mxu1  ;;  %12480 = vmatprep.mubr.bf16.mxu1 %v17787_v54  ;;  %v8679_v55 = vpop.f32.mrf.mxu0  ;;  %12579 = vmatpush1.bf16.msra.mxu1 %v15667_v5  ;;  %v15676_v5 = vld [vmem:[#allocation8 + $0xc60] ss:$16 sps:$4 sm:$0xff]   ;;  %v17810_v34 = vpack.c.bf16 %v8898_v2, %v8882_v32  ;;  %v8745_v16 = vadd.f32 %v17774_v43, %v8672_v8 }
 0x52f   :  { %v8680_v33 = vadd.f32 %v8679_v55, %v17677_v36  ;;  %12580 = vmatprep.subr.bf16.mxu1 %v15675_v3  ;;  %v8668_v36 = vadd.f32 %v17760_v7, %v8595_v40  ;;  %v8453_v50 = vadd.f32 %v17513_v62, %v8380_v27  ;;  %v8823_v17 = vmax.f32 %v8749_v35, 0.0  ;;  %v18982_v46 = vld [vmem:[#allocation151_spill] sm:$0xff] }
 0x530   :  { %v8752_v61 = vpop.f32.mrf.mxu1  ;;  %v17804_v45 = vpop.f32.mrf.mxu0  ;;  %12508 = vmatpush1.bf16.msra.mxu0 %v15670_v53  ;;  %v17816_v7 = vpack.c.bf16 %v8900_v44, %v8884_v11  ;;  %v15687_v55 = vld [vmem:[#allocation8 + $0xe44] ss:$16 sps:$4 sm:$0xff]   ;;  %v15682_v27 = vld [vmem:[#allocation8 + $0xc40] ss:$16 sps:$4 sm:$0xff]   ;;  %v8808_v32 = vmax.f32 %v8745_v16, 0.0 }
 0x531   :  { %v8753_v20 = vadd.f32 %v8752_v61, %v8680_v33  ;;  %12509 = vmatprep.subr.bf16.mxu0 %v15678_v39  ;;  %v8741_v53 = vadd.f32 %v17764_v0, %v8668_v36  ;;  %v8806_v35 = vmax.f32 %v8453_v50, 0.0  ;;  %v15685_v61 = vld [vmem:[#allocation8 + $0xe40] ss:$16 sps:$4 sm:$0xff]   ;;  %v15693_v40 = vld [vmem:[#allocation8 + $0xe24] ss:$16 sps:$4 sm:$0xff]   ;;  %v8790_v0 = vmax.f32 %v17504_v15, 0.0 }
 0x532   :  { %v17806_v9 = vpop.f32.mrf.mxu1  ;;  %v8685_v10 = vpop.f32.mrf.mxu0  ;;  %12581 = vmatpush1.bf16.msra.mxu1 %v15673_v13  ;;  %v15688_v36 = vld [vmem:[#allocation8 + $0xc20] ss:$16 sps:$4 sm:$0xff]  }
 0x533   :  { %v8839_v12 = vmax.f32 %v8753_v20, 0.0  ;;  %v8686_v14 = vadd.f32 %v8685_v10, %v17693_v58  ;;  %12408 = vmatmul.mubr.bf16.gmra.mxu0 %v18982_v46  ;;  %12582 = vmatprep.subr.bf16.mxu1 %v15681_v52  ;;  %v8792_v20 = vmax.f32 %v8741_v53, 0.0  ;;  %v15691_v50 = vld [vmem:[#allocation8 + $0xe20] ss:$16 sps:$4 sm:$0xff]  }
 0x534   :  { %v8758_v3 = vpop.f32.mrf.mxu1  ;;  %v17818_v2 = vpop.f32.mrf.mxu0  ;;  %12417 = vmatprep.mubr.bf16.mxu0 %v17810_v34  ;;  %12510 = vmatpush1.bf16.msra.mxu0 %v15676_v5 }
 0x535   :  { %v17820_v62 = vpack.c.bf16 %v8839_v12, %v8823_v17  ;;  %12481 = vmatmul.mubr.bf16.gmra.mxu1 %v17351_v22  ;;  %v8759_v33 = vadd.f32 %v8758_v3, %v8686_v14  ;;  %12511 = vmatprep.subr.bf16.mxu0 %v15684_v24  ;;  %v17835_v17 = vpack.c.bf16 %v8806_v35, %v8790_v0  ;;  %v15696_v14 = vld [vmem:[#allocation8 + $0xc04] ss:$16 sps:$4 sm:$0xff]  }
 0x536   :  { %v17824_v58 = vpop.f32.mrf.mxu1  ;;  %12490 = vmatprep.mubr.bf16.mxu1 %v17816_v7  ;;  %v8689_v43 = vpop.f32.mrf.mxu0  ;;  %12583 = vmatpush1.bf16.msra.mxu1 %v15679_v23  ;;  %v18984_v23 = vld [vmem:[#allocation153_spill] sm:$0xff]  ;;  %v17838_v15 = vpack.c.bf16 %v8808_v32, %v8792_v20 }
 0x537   :  { %18983 = vst [vmem:[#allocation76_spill] sm:$0xff] %v17820_v62  ;;  %v8690_v13 = vadd.f32 %v8689_v43, %v17702_v41  ;;  %12584 = vmatprep.subr.bf16.mxu1 %v15687_v55  ;;  %v8855_v10 = vmax.f32 %v8759_v33, 0.0  ;;  %v15699_v24 = vld [vmem:[#allocation8 + $0xe04] ss:$16 sps:$4 sm:$0xff]   ;;  %v15694_v43 = vld [vmem:[#allocation8 + $0xc00] ss:$16 sps:$4 sm:$0xff]  }
 0x538   :  { %v8762_v39 = vpop.f32.mrf.mxu1  ;;  %v17829_v44 = vpop.f32.mrf.mxu0  ;;  %12512 = vmatpush1.bf16.msra.mxu0 %v15682_v27  ;;  %v18986_v55 = vld [vmem:[#allocation20_spill] sm:$0xff]  ;;  %v15697_v33 = vld [vmem:[#allocation8 + $0xe00] ss:$16 sps:$4 sm:$0xff]  }
 0x539   :  { %v8763_v8 = vadd.f32 %v8762_v39, %v8690_v13  ;;  %12513 = vmatprep.subr.bf16.mxu0 %v15690_v18  ;;  %v15705_v39 = vld [vmem:[#allocation8 + $0xfe4] ss:$16 sps:$4 sm:$0xff]   ;;  %v15700_v32 = vld [vmem:[#allocation8 + $0xde0] ss:$16 sps:$4 sm:$0xff]  }
 0x53a   :  { %v17832_v52 = vpop.f32.mrf.mxu1  ;;  %v8695_v11 = vpop.f32.mrf.mxu0  ;;  %12585 = vmatpush1.bf16.msra.mxu1 %v15685_v61  ;;  %v15702_v61 = vld [vmem:[#allocation8 + $0xde4] ss:$16 sps:$4 sm:$0xff]  }
 0x53b   :  { %v8871_v41 = vmax.f32 %v8763_v8, 0.0  ;;  %v8696_v5 = vadd.f32 %v8695_v11, %v17716_v56  ;;  %12418 = vmatmul.mubr.bf16.gmra.mxu0 %v18984_v23  ;;  %12586 = vmatprep.subr.bf16.mxu1 %v15693_v40  ;;  %v15703_v8 = vld [vmem:[#allocation8 + $0xfe0] ss:$16 sps:$4 sm:$0xff]   ;;  %v15708_v20 = vld [vmem:[#allocation8 + $0xdc4] ss:$16 sps:$4 sm:$0xff]  }
 0x53c   :  { %v8768_v12 = vpop.f32.mrf.mxu1  ;;  %v17840_v3 = vpop.f32.mrf.mxu0  ;;  %12533 = vmatprep.mubr.bf16.mxu0 %v17835_v17  ;;  %12514 = vmatpush1.bf16.msra.mxu0 %v15688_v36  ;;  %v15711_v11 = vld [vmem:[#allocation8 + $0xfc4] ss:$16 sps:$4 sm:$0xff]  }
 0x53d   :  { %v17842_v16 = vpack.c.bf16 %v8871_v41, %v8855_v10  ;;  %12491 = vmatmul.mubr.bf16.gmra.mxu1 %v18986_v55  ;;  %v8769_v27 = vadd.f32 %v8768_v12, %v8696_v5  ;;  %12515 = vmatprep.subr.bf16.mxu0 %v15696_v14  ;;  %v15709_v10 = vld [vmem:[#allocation8 + $0xfc0] ss:$16 sps:$4 sm:$0xff]   ;;  %v15714_v41 = vld [vmem:[#allocation8 + $0xda4] ss:$16 sps:$4 sm:$0xff]  }
 0x53e   :  { %v17846_v56 = vpop.f32.mrf.mxu1  ;;  %12606 = vmatprep.mubr.bf16.mxu1 %v17838_v15  ;;  %v8699_v53 = vpop.f32.mrf.mxu0  ;;  %12587 = vmatpush1.bf16.msra.mxu1 %v15691_v50  ;;  %v15717_v5 = vld [vmem:[#allocation8 + $0xfa4] ss:$16 sps:$4 sm:$0xff]   ;;  %v15712_v50 = vld [vmem:[#allocation8 + $0xda0] ss:$16 sps:$4 sm:$0xff]  }
 0x53f   :  { %18985 = vst [vmem:[#allocation41_spill] sm:$0xff] %v17842_v16  ;;  %v8700_v35 = vadd.f32 %v8699_v53, %v17721_v47  ;;  %12588 = vmatprep.subr.bf16.mxu1 %v15699_v24  ;;  %v8887_v40 = vmax.f32 %v8769_v27, 0.0  ;;  %v15706_v47 = vld [vmem:[#allocation8 + $0xdc0] ss:$16 sps:$4 sm:$0xff]   ;;  %v15720_v14 = vld [vmem:[#allocation8 + $0xd84] ss:$16 sps:$4 sm:$0xff]  }
 0x540   :  { %v8772_v13 = vpop.f32.mrf.mxu1  ;;  %12516 = vmatpush1.bf16.msra.mxu0 %v15694_v43  ;;  %v15715_v12 = vld [vmem:[#allocation8 + $0xfa0] ss:$16 sps:$4 sm:$0xff]   ;;  %v15723_v24 = vld [vmem:[#allocation8 + $0xf84] ss:$16 sps:$4 sm:$0xff]  }
 0x541   :  { %v8773_v18 = vadd.f32 %v8772_v13, %v8700_v35  ;;  %12517 = vmatprep.subr.bf16.mxu0 %v15702_v61  ;;  %v15718_v53 = vld [vmem:[#allocation8 + $0xd80] ss:$16 sps:$4 sm:$0xff]   ;;  %v15726_v27 = vld [vmem:[#allocation8 + $0xd64] ss:$16 sps:$4 sm:$0xff]  }
 0x542   :  { %12589 = vmatpush1.bf16.msra.mxu1 %v15697_v33  ;;  %v15721_v43 = vld [vmem:[#allocation8 + $0xf80] ss:$16 sps:$4 sm:$0xff]   ;;  %v15729_v35 = vld [vmem:[#allocation8 + $0xf64] ss:$16 sps:$4 sm:$0xff]  }
 0x543   :  { %v8903_v0 = vmax.f32 %v8773_v18, 0.0  ;;  %12590 = vmatprep.subr.bf16.mxu1 %v15705_v39  ;;  %v18988_v33 = vld [vmem:[#allocation30_spill] sm:$0xff]  ;;  %v15724_v61 = vld [vmem:[#allocation8 + $0xd60] ss:$16 sps:$4 sm:$0xff]   ;;  %v8536_v39 = vadd.f32 %v17674_v49, %v17656_v42 }
 0x544   :  { %12518 = vmatpush2.bf16.msra.mxu0 %v15700_v32  ;;  %v8244_v13 = vadd.f32 %v18988_v33, %v17375_v48  ;;  %v15727_v18 = vld [vmem:[#allocation8 + $0xf60] ss:$16 sps:$4 sm:$0xff]   ;;  %v15732_v32 = vld [vmem:[#allocation8 + $0xd44] ss:$16 sps:$4 sm:$0xff]  }
 0x545   :  { %v17850_v36 = vpack.c.bf16 %v8903_v0, %v8887_v40  ;;  %12519 = vmatprep.subr.bf16.mxu0 %v15708_v20  ;;  %v15735_v40 = vld [vmem:[#allocation8 + $0xf44] ss:$16 sps:$4 sm:$0xff]   ;;  %v15730_v20 = vld [vmem:[#allocation8 + $0xd40] ss:$16 sps:$4 sm:$0xff]  }
 0x546   :  { %12591 = vmatpush2.bf16.msra.mxu1 %v15703_v8  ;;  %v18989_v0 = vld [vmem:[#allocation33_spill] sm:$0xff]  ;;  %v18991_v33 = vld [vmem:[#allocation60_spill] sm:$0xff] }
 0x547   :  { %18987 = vst [vmem:[#allocation65_spill] sm:$0xff] %v17850_v36  ;;  %12592 = vmatprep.subr.bf16.mxu1 %v15711_v11  ;;  %v8317_v8 = vadd.f32 %v18989_v0, %v8244_v13  ;;  %v8609_v11 = vadd.f32 %v17679_v19, %v8536_v39  ;;  %v15741_v49 = vld [vmem:[#allocation8 + $0xf24] ss:$16 sps:$4 sm:$0xff]   ;;  %v8678_v19 = vadd.f32 %v17789_v1, %v17671_v59  ;;  %v15745_v59 = vld [vmem:[#allocation8 + $0xf00] ss:$16 sps:$4 sm:$0xff]  }
 0x548   :  { %12520 = vmatpush2.bf16.msra.mxu0 %v15706_v47  ;;  %v15733_v47 = vld [vmem:[#allocation8 + $0xf40] ss:$16 sps:$4 sm:$0xff]  }
 0x549   :  { %12521 = vmatprep.subr.bf16.mxu0 %v15714_v41  ;;  %v8390_v41 = vadd.f32 %v17537_v51, %v8317_v8  ;;  %v8751_v39 = vadd.f32 %v17796_v37, %v8678_v19  ;;  %v18992_v1 = vld [vmem:[#allocation31_spill] sm:$0xff]  ;;  %v8701_v8 = vpop.f32.mrf.mxu0 }
 0x54a   :  { %12593 = vmatpush2.bf16.msra.mxu1 %v15709_v10  ;;  %v15738_v10 = vld [vmem:[#allocation8 + $0xd24] ss:$16 sps:$4 sm:$0xff]  }
 0x54b   :  { %12594 = vmatprep.subr.bf16.mxu1 %v15717_v5  ;;  %v8682_v5 = vadd.f32 %v17804_v45, %v8609_v11  ;;  %v8463_v51 = vadd.f32 %v17540_v29, %v8390_v41  ;;  %v9481_v45 = vld [vmem:[#allocation10] sm:$0xf]  ;;  %v15750_v29 = vld [vmem:[#allocation8 + $0xec] ss:$16 sps:$4 sm:$0xff]   ;;  %v17876_v11 = vpop.f32.mrf.mxu1 }
 0x54c   :  { %12522 = vmatpush2.bf16.msra.mxu0 %v15712_v50  ;;  %v18990_v50 = vld [vmem:[#allocation34_spill] sm:$0xff] }
 0x54d   :  { %12523 = vmatprep.subr.bf16.mxu0 %v15720_v14  ;;  %v8546_v14 = vadd.f32 %v17699_v57, %v17656_v42 }
 0x54e   :  { %12595 = vmatpush2.bf16.msra.mxu1 %v15715_v12  ;;  %v8254_v12 = vadd.f32 %v18990_v50, %v17375_v48  ;;  %v18997_v50 = vld [vmem:[#allocation46_spill] sm:$0xff] }
 0x54f   :  { %12596 = vmatprep.subr.bf16.mxu1 %v15723_v24  ;;  %v15736_v24 = vld [vmem:[#allocation8 + $0xd20] ss:$16 sps:$4 sm:$0xff]   ;;  %v8619_v57 = vadd.f32 %v17704_v26, %v8546_v14 }
 0x550   :  { %12524 = vmatpush2.bf16.msra.mxu0 %v15718_v53  ;;  %v15739_v53 = vld [vmem:[#allocation8 + $0xf20] ss:$16 sps:$4 sm:$0xff]   ;;  %v8327_v13 = vadd.f32 %v18991_v33, %v8254_v12  ;;  %v8688_v12 = vadd.f32 %v17818_v2, %v18997_v50  ;;  %v15756_v33 = vld [vmem:[#allocation8 + $0xcc] ss:$16 sps:$4 sm:$0xff]  }
 0x551   :  { %12525 = vmatprep.subr.bf16.mxu0 %v15726_v27  ;;  %v15747_v27 = vld [vmem:[#allocation8 + $0xf04] ss:$16 sps:$4 sm:$0xff]  }
 0x552   :  { %12597 = vmatpush2.bf16.msra.mxu1 %v15721_v43  ;;  %v15744_v43 = vld [vmem:[#allocation8 + $0xd04] ss:$16 sps:$4 sm:$0xff]  }
 0x553   :  { %12598 = vmatprep.subr.bf16.mxu1 %v15729_v35  ;;  %v8755_v35 = vadd.f32 %v17806_v9, %v8682_v5  ;;  %v8692_v9 = vadd.f32 %v17829_v44, %v8619_v57  ;;  %v8556_v44 = vadd.f32 %v17743_v28, %v17656_v42  ;;  %v18999_v42 = vld [vmem:[#allocation26_spill] sm:$0xff] }
 0x554   :  { %12526 = vmatpush2.bf16.msra.mxu0 %v15724_v61  ;;  %v15742_v61 = vld [vmem:[#allocation8 + $0xd00] ss:$16 sps:$4 sm:$0xff]  }
 0x555   :  { %12527 = vmatprep.subr.bf16.mxu0 %v15732_v32  ;;  %v8838_v32 = vmax.f32 %v8463_v51, 0.0  ;;  %v8840_v26 = vmax.f32 %v8755_v35, 0.0  ;;  %v18998_v51 = vld [vmem:[#allocation21_spill] sm:$0xff] }
 0x556   :  { %12599 = vmatpush2.bf16.msra.mxu1 %v15727_v18  ;;  %v17872_v18 = vrot.slane %v9481_v45, %v18992_v1 }
 0x557   :  { %12600 = vmatprep.subr.bf16.mxu1 %v15735_v40  ;;  %v18993_v40 = vld [vmem:[#allocation36_spill] sm:$0xff] }
 0x558   :  { %12528 = vmatpush2.bf16.msra.mxu0 %v15730_v20  ;;  %v8400_v0 = vadd.f32 %v18993_v40, %v8327_v13  ;;  %v15753_v20 = vld [vmem:[#allocation8 + $0x2ec] ss:$16 sps:$4 sm:$0xff]  }
 0x559   :  { %12529 = vmatprep.subr.bf16.mxu0 %v15738_v10  ;;  %v18995_v10 = vld [vmem:[#allocation62_spill] sm:$0xff] }
 0x55a   :  { %12601 = vmatpush2.bf16.msra.mxu1 %v15733_v47  ;;  %v18994_v47 = vld [vmem:[#allocation32_spill] sm:$0xff]  ;;  %v8264_v41 = vadd.f32 %v18995_v10, %v17375_v48  ;;  %v8765_v48 = vadd.f32 %v17832_v52, %v8692_v9  ;;  %v8761_v52 = vadd.f32 %v17824_v58, %v8688_v12 }
 0x55b   :  { %12602 = vmatprep.subr.bf16.mxu1 %v15741_v49  ;;  %v17879_v37 = vrot.slane %v9481_v45, %v18994_v47  ;;  %v18996_v49 = vld [vmem:[#allocation27_spill] sm:$0xff]  ;;  %v15751_v45 = vld [vmem:[#allocation8 + $0x2e8] ss:$16 sps:$4 sm:$0xff]  }
 0x55c   :  { %12530 = vmatpush2.bf16.msra.mxu0 %v15736_v24  ;;  %v8822_v5 = vmax.f32 %v18996_v49, 0.0  ;;  %v8824_v24 = vmax.f32 %v8751_v39, 0.0  ;;  %v15759_v39 = vld [vmem:[#allocation8 + $0x2cc] ss:$16 sps:$4 sm:$0xff]   ;;  %v8872_v58 = vmax.f32 %v8765_v48, 0.0 }
 0x55d   :  { %12531 = vmatprep.subr.bf16.mxu0 %v15744_v43  ;;  %v15748_v43 = vld [vmem:[#allocation8 + $0xe8] ss:$16 sps:$4 sm:$0xff]   ;;  %v19002_v47 = vld [vmem:[#allocation23_spill] sm:$0xff] }
 0x55e   :  { %12603 = vmatpush2.bf16.msra.mxu1 %v15739_v53  ;;  %v17891_v35 = vpack.c.bf16 %v8838_v32, %v8822_v5  ;;  %v17896_v28 = vpack.c.bf16 %v8840_v26, %v8824_v24  ;;  %v8629_v32 = vadd.f32 %v17746_v4, %v8556_v44  ;;  %v15762_v5 = vld [vmem:[#allocation8 + $0xac] ss:$16 sps:$4 sm:$0xff]  }
 0x55f   :  { %12604 = vmatprep.subr.bf16.mxu1 %v15747_v27  ;;  %v8473_v27 = vadd.f32 %v18998_v51, %v8400_v0  ;;  %v19003_v44 = vld [vmem:[#allocation29_spill] sm:$0xff] }
 0x560   :  { %12532 = vmatpush2.bf16.msra.mxu0 %v15742_v61  ;;  %19000 = vst [vmem:[#allocation58_spill] sm:$0xff] %v17896_v28  ;;  %v8702_v4 = vadd.f32 %v8701_v8, %v8629_v32  ;;  %v8854_v24 = vmax.f32 %v19003_v44, 0.0 }
 0x561   :  { %12647 = vmatprep.subr.bf16.mxu0 %v15750_v29  ;;  %v8870_v26 = vmax.f32 %v8473_v27, 0.0 }
 0x562   :  { %v12097_v14 = vpop.f32.mrf.mxu0  ;;  %12605 = vmatpush2.bf16.msra.mxu1 %v15745_v59  ;;  %v19001_v59 = vld [vmem:[#allocation43_spill] sm:$0xff] }
 0x563   :  { %v12098_v19 = vadd.f32 %v12097_v14, %v17872_v18  ;;  %12720 = vmatprep.subr.bf16.mxu1 %v15753_v20  ;;  %12534 = vmatmul.mubr.bf16.vlgmr.msra.gmra.mxu0 %v18999_v42  ;;  %v8337_v1 = vadd.f32 %v19001_v59, %v8264_v41  ;;  %v15754_v20 = vld [vmem:[#allocation8 + $0xc8] ss:$16 sps:$4 sm:$0xff]   ;;  %v15765_v14 = vld [vmem:[#allocation8 + $0x2ac] ss:$16 sps:$4 sm:$0xff]  }
 0x564   :  { %v12170_v53 = vpop.f32.mrf.mxu1  ;;  %v12099_v2 = vpop.f32.mrf.mxu0  ;;  %12543 = vmatprep.mubr.bf16.mxu0 %v17891_v35  ;;  %12648 = vmatpush1.bf16.msra.mxu0 %v15748_v43  ;;  %v15757_v41 = vld [vmem:[#allocation8 + $0x2c8] ss:$16 sps:$4 sm:$0xff]   ;;  %v15768_v59 = vld [vmem:[#allocation8 + $0x8c] ss:$16 sps:$4 sm:$0xff]  }
 0x565   :  { %v17893_v13 = vadd.f32 %v12170_v53, %v12098_v19  ;;  %v12100_v57 = vadd.f32 %v12099_v2, %v17879_v37  ;;  %12607 = vmatmul.mubr.bf16.vlgmr.msra.gmra.mxu1 %v17792_v30  ;;  %v8410_v10 = vadd.f32 %v19002_v47, %v8337_v1  ;;  %12649 = vmatprep.subr.bf16.mxu0 %v15756_v33  ;;  %v8856_v19 = vmax.f32 %v8761_v52, 0.0  ;;  %v19004_v43 = vld [vmem:[#allocation52_spill] sm:$0xff] }
 0x566   :  { %v12172_v61 = vpop.f32.mrf.mxu1  ;;  %v12101_v29 = vpop.f32.mrf.mxu0  ;;  %12616 = vmatprep.mubr.bf16.mxu1 %v17896_v28  ;;  %12721 = vmatpush1.bf16.msra.mxu1 %v15751_v45  ;;  %v8698_v51 = vadd.f32 %v17840_v3, %v19004_v43  ;;  %v15760_v45 = vld [vmem:[#allocation8 + $0xa8] ss:$16 sps:$4 sm:$0xff]   ;;  %v8775_v1 = vadd.f32 %v17876_v11, %v8702_v4  ;;  %v15774_v4 = vld [vmem:[#allocation8 + $0x6c] ss:$16 sps:$4 sm:$0xff]  }
 0x567   :  { %v17905_v40 = vadd.f32 %v12172_v61, %v12100_v57  ;;  %v12102_v0 = vadd.f32 %v12101_v29, %v17872_v18  ;;  %12722 = vmatprep.subr.bf16.mxu1 %v15759_v39  ;;  %v19005_v2 = vld [vmem:[#allocation48_spill] sm:$0xff]  ;;  %v17920_v57 = vpack.c.bf16 %v8870_v26, %v8854_v24  ;;  %v17922_v61 = vpack.c.bf16 %v8872_v58, %v8856_v19  ;;  %v19011_v19 = vld [vmem:[#allocation71_spill] sm:$0xff] }
 0x568   :  { %v12174_v9 = vpop.f32.mrf.mxu1  ;;  %v17909_v49 = vpop.f32.mrf.mxu0  ;;  %12650 = vmatpush1.bf16.msra.mxu0 %v15754_v20  ;;  %v8483_v8 = vadd.f32 %v19005_v2, %v8410_v10  ;;  %v15763_v33 = vld [vmem:[#allocation8 + $0x2a8] ss:$16 sps:$4 sm:$0xff]   ;;  %v8771_v20 = vadd.f32 %v17846_v56, %v8698_v51  ;;  %v15777_v24 = vld [vmem:[#allocation8 + $0x26c] ss:$16 sps:$4 sm:$0xff]  }
 0x569   :  { %v17911_v50 = vadd.f32 %v12174_v9, %v12102_v0  ;;  %12651 = vmatprep.subr.bf16.mxu0 %v15762_v5  ;;  %19006 = vst [vmem:[#allocation80_spill] sm:$0xff] %v17920_v57  ;;  %19007 = vst [vmem:[#allocation82_spill] sm:$0xff] %v17922_v61  ;;  %v19008_v3 = vld [vmem:[#allocation28_spill] sm:$0xff] }
 0x56a   :  { %v17913_v12 = vpop.f32.mrf.mxu1  ;;  %v12107_v53 = vpop.f32.mrf.mxu0  ;;  %12723 = vmatpush1.bf16.msra.mxu1 %v15757_v41  ;;  %v15771_v0 = vld [vmem:[#allocation8 + $0x28c] ss:$16 sps:$4 sm:$0xff]   ;;  %v15766_v10 = vld [vmem:[#allocation8 + $0x88] ss:$16 sps:$4 sm:$0xff]   ;;  %v8902_v58 = vmax.f32 %v8483_v8, 0.0  ;;  %v8888_v51 = vmax.f32 %v8771_v20, 0.0 }
 0x56b   :  { %v12108_v27 = vadd.f32 %v12107_v53, %v17872_v18  ;;  %12544 = vmatmul.mubr.bf16.gmra.mxu0 %v19008_v3  ;;  %12724 = vmatprep.subr.bf16.mxu1 %v15765_v14  ;;  %v15769_v41 = vld [vmem:[#allocation8 + $0x288] ss:$16 sps:$4 sm:$0xff]   ;;  %v8904_v14 = vmax.f32 %v8775_v1, 0.0  ;;  %v8886_v53 = vmax.f32 %v19011_v19, 0.0  ;;  %v19013_v1 = vld [vmem:[#allocation47_spill] sm:$0xff] }
 0x56c   :  { %v12180_v48 = vpop.f32.mrf.mxu1  ;;  %v12109_v39 = vpop.f32.mrf.mxu0  ;;  %12553 = vmatprep.mubr.bf16.mxu0 %v17920_v57  ;;  %12652 = vmatpush1.bf16.msra.mxu0 %v15760_v45  ;;  %v15772_v45 = vld [vmem:[#allocation8 + $0x68] ss:$16 sps:$4 sm:$0xff]  }
 0x56d   :  { %v17925_v52 = vadd.f32 %v12180_v48, %v12108_v27  ;;  %v12110_v29 = vadd.f32 %v12109_v39, %v17879_v37  ;;  %12617 = vmatmul.mubr.bf16.gmra.mxu1 %v17820_v62  ;;  %12653 = vmatprep.subr.bf16.mxu0 %v15768_v59  ;;  %v15775_v2 = vld [vmem:[#allocation8 + $0x268] ss:$16 sps:$4 sm:$0xff]   ;;  %v17944_v8 = vpack.c.bf16 %v8902_v58, %v8886_v53  ;;  %v15780_v39 = vld [vmem:[#allocation8 + $0x4c] ss:$16 sps:$4 sm:$0xff]  }
 0x56e   :  { %v12182_v32 = vpop.f32.mrf.mxu1  ;;  %v12111_v9 = vpop.f32.mrf.mxu0  ;;  %12626 = vmatprep.mubr.bf16.mxu1 %v17922_v61  ;;  %12725 = vmatpush1.bf16.msra.mxu1 %v15763_v33  ;;  %v15778_v58 = vld [vmem:[#allocation8 + $0x48] ss:$16 sps:$4 sm:$0xff]   ;;  %v15789_v53 = vld [vmem:[#allocation8 + $0x22c] ss:$16 sps:$4 sm:$0xff]  }
 0x56f   :  { %v17933_v11 = vadd.f32 %v12182_v32, %v12110_v29  ;;  %v12112_v26 = vadd.f32 %v12111_v9, %v17872_v18  ;;  %12726 = vmatprep.subr.bf16.mxu1 %v15771_v0  ;;  %19012 = vst [vmem:[#allocation74_spill] sm:$0xff] %v17944_v8  ;;  %v17949_v29 = vpack.c.bf16 %v8904_v14, %v8888_v51  ;;  %v15783_v9 = vld [vmem:[#allocation8 + $0x24c] ss:$16 sps:$4 sm:$0xff]   ;;  %v15964_v61 = vld [vmem:[#allocation8 + $0x868] ss:$16 sps:$4 sm:$0xff]  }
 0x570   :  { %v12184_v47 = vpop.f32.mrf.mxu1  ;;  %v17936_v5 = vpop.f32.mrf.mxu0  ;;  %12654 = vmatpush1.bf16.msra.mxu0 %v15766_v10  ;;  %v15786_v14 = vld [vmem:[#allocation8 + $0x2c] ss:$16 sps:$4 sm:$0xff]   ;;  %v15976_v62 = vld [vmem:[#allocation8 + $0x828] ss:$16 sps:$4 sm:$0xff]  }
 0x571   :  { %19009 = vst [vmem:[#allocation83_spill] sm:$0xff] %v17933_v11  ;;  %v17938_v44 = vadd.f32 %v12184_v47, %v12112_v26  ;;  %12655 = vmatprep.subr.bf16.mxu0 %v15774_v4  ;;  %19014 = vst [vmem:[#allocation107_spill] sm:$0xff] %v17949_v29  ;;  %v19069_v11 = vld [vmem:[#allocation40_spill] sm:$0xff] }
 0x572   :  { %v17940_v56 = vpop.f32.mrf.mxu1  ;;  %12727 = vmatpush1.bf16.msra.mxu1 %v15769_v41  ;;  %v15781_v41 = vld [vmem:[#allocation8 + $0x248] ss:$16 sps:$4 sm:$0xff]  }
 0x573   :  { %19010 = vst [vmem:[#allocation50_spill] sm:$0xff] %v17940_v56  ;;  %v12117_v43 = vpop.f32.mrf.mxu0  ;;  %12554 = vmatmul.mubr.bf16.gmra.mxu0 %v19013_v1  ;;  %12728 = vmatprep.subr.bf16.mxu1 %v15777_v24 }
 0x574   :  { %v12118_v27 = vadd.f32 %v12117_v43, %v17872_v18  ;;  %12563 = vmatprep.mubr.bf16.mxu0 %v17944_v8  ;;  %12656 = vmatpush1.bf16.msra.mxu0 %v15772_v45  ;;  %v15787_v45 = vld [vmem:[#allocation8 + $0x228] ss:$16 sps:$4 sm:$0xff]  }
 0x575   :  { %v12190_v48 = vpop.f32.mrf.mxu1  ;;  %v12119_v33 = vpop.f32.mrf.mxu0  ;;  %12627 = vmatmul.mubr.bf16.gmra.mxu1 %v17842_v16  ;;  %12657 = vmatprep.subr.bf16.mxu0 %v15780_v39  ;;  %v19033_v16 = vld [vmem:[#allocation73_spill] sm:$0xff] }
 0x576   :  { %v17946_v59 = vadd.f32 %v12190_v48, %v12118_v27  ;;  %v12120_v32 = vadd.f32 %v12119_v33, %v17879_v37  ;;  %12636 = vmatprep.mubr.bf16.mxu1 %v17949_v29  ;;  %12729 = vmatpush1.bf16.msra.mxu1 %v15775_v2  ;;  %v15784_v48 = vld [vmem:[#allocation8 + $0x28] ss:$16 sps:$4 sm:$0xff]   ;;  %v15792_v33 = vld [vmem:[#allocation8 + $0xc] ss:$16 sps:$4 sm:$0xff]  }
 0x577   :  { %v12192_v0 = vpop.f32.mrf.mxu1  ;;  %v12121_v20 = vpop.f32.mrf.mxu0  ;;  %12730 = vmatprep.subr.bf16.mxu1 %v15783_v9 }
 0x578   :  { %v17955_v26 = vadd.f32 %v12192_v0, %v12120_v32  ;;  %v12122_v47 = vadd.f32 %v12121_v20, %v17872_v18  ;;  %12658 = vmatpush1.bf16.msra.mxu0 %v15778_v58  ;;  %v19018_v32 = vld [vmem:[#allocation38_spill] sm:$0xff]  ;;  %v19020_v58 = vld [vmem:[#allocation35_spill] sm:$0xff] }
 0x579   :  { %v12194_v10 = vpop.f32.mrf.mxu1  ;;  %v17958_v4 = vpop.f32.mrf.mxu0  ;;  %12659 = vmatprep.subr.bf16.mxu0 %v15786_v14  ;;  %v15795_v20 = vld [vmem:[#allocation8 + $0x20c] ss:$16 sps:$4 sm:$0xff]  }
 0x57a   :  { %19015 = vst [vmem:[#allocation108_spill] sm:$0xff] %v17955_v26  ;;  %19016 = vst [vmem:[#allocation59_spill] sm:$0xff] %v17958_v4  ;;  %v17960_v24 = vadd.f32 %v12194_v10, %v12122_v47  ;;  %12731 = vmatpush1.bf16.msra.mxu1 %v15781_v41  ;;  %v19019_v47 = vld [vmem:[#allocation61_spill] sm:$0xff]  ;;  %v15862_v26 = vld [vmem:[#allocation8 + $0x488] ss:$16 sps:$4 sm:$0xff]  }
 0x57b   :  { %v17962_v19 = vpop.f32.mrf.mxu1  ;;  %v12127_v43 = vpop.f32.mrf.mxu0  ;;  %12564 = vmatmul.mubr.bf16.gmra.mxu0 %v19018_v32  ;;  %12732 = vmatprep.subr.bf16.mxu1 %v15789_v53  ;;  %v15793_v53 = vld [vmem:[#allocation8 + $0x208] ss:$16 sps:$4 sm:$0xff]  }
 0x57c   :  { %19017 = vst [vmem:[#allocation81_spill] sm:$0xff] %v17962_v19  ;;  %v12128_v51 = vadd.f32 %v12127_v43, %v17872_v18  ;;  %12679 = vmatprep.mubr.bf16.mxu0 %v19019_v47  ;;  %12660 = vmatpush1.bf16.msra.mxu0 %v15784_v48  ;;  %v15790_v43 = vld [vmem:[#allocation8 + $0x8] ss:$16 sps:$4 sm:$0xff]  }
 0x57d   :  { %v12200_v27 = vpop.f32.mrf.mxu1  ;;  %v12129_v2 = vpop.f32.mrf.mxu0  ;;  %12637 = vmatmul.mubr.bf16.gmra.mxu1 %v17850_v36  ;;  %12661 = vmatprep.subr.bf16.mxu0 %v15792_v33  ;;  %v15801_v36 = vld [vmem:[#allocation8 + $0x3ec] ss:$16 sps:$4 sm:$0xff]   ;;  %v15796_v47 = vld [vmem:[#allocation8 + $0x1e8] ss:$16 sps:$4 sm:$0xff]  }
 0x57e   :  { %v17965_v39 = vadd.f32 %v12200_v27, %v12128_v51  ;;  %v12130_v0 = vadd.f32 %v12129_v2, %v17879_v37  ;;  %12752 = vmatprep.mubr.bf16.mxu1 %v19020_v58  ;;  %12733 = vmatpush1.bf16.msra.mxu1 %v15787_v45  ;;  %v15798_v27 = vld [vmem:[#allocation8 + $0x1ec] ss:$16 sps:$4 sm:$0xff]   ;;  %v15799_v48 = vld [vmem:[#allocation8 + $0x3e8] ss:$16 sps:$4 sm:$0xff]  }
 0x57f   :  { %v12202_v9 = vpop.f32.mrf.mxu1  ;;  %v12131_v10 = vpop.f32.mrf.mxu0  ;;  %12734 = vmatprep.subr.bf16.mxu1 %v15795_v20  ;;  %v15804_v58 = vld [vmem:[#allocation8 + $0x1cc] ss:$16 sps:$4 sm:$0xff]   ;;  %v15805_v45 = vld [vmem:[#allocation8 + $0x3c8] ss:$16 sps:$4 sm:$0xff]  }
 0x580   :  { %v17972_v41 = vadd.f32 %v12202_v9, %v12130_v0  ;;  %v12132_v14 = vadd.f32 %v12131_v10, %v17872_v18  ;;  %12662 = vmatpush1.bf16.msra.mxu0 %v15790_v43  ;;  %v15807_v0 = vld [vmem:[#allocation8 + $0x3cc] ss:$16 sps:$4 sm:$0xff]   ;;  %v15802_v18 = vld [vmem:[#allocation8 + $0x1c8] ss:$16 sps:$4 sm:$0xff]  }
 0x581   :  { %v12204_v51 = vpop.f32.mrf.mxu1  ;;  %12663 = vmatprep.subr.bf16.mxu0 %v15798_v27  ;;  %v15810_v33 = vld [vmem:[#allocation8 + $0x1ac] ss:$16 sps:$4 sm:$0xff]   ;;  %v15808_v10 = vld [vmem:[#allocation8 + $0x1a8] ss:$16 sps:$4 sm:$0xff]  }
 0x582   :  { %19021 = vst [vmem:[#allocation84_spill] sm:$0xff] %v17972_v41  ;;  %v17975_v2 = vadd.f32 %v12204_v51, %v12132_v14  ;;  %12735 = vmatpush1.bf16.msra.mxu1 %v15793_v53  ;;  %v15813_v9 = vld [vmem:[#allocation8 + $0x3ac] ss:$16 sps:$4 sm:$0xff]   ;;  %v15811_v20 = vld [vmem:[#allocation8 + $0x3a8] ss:$16 sps:$4 sm:$0xff]  }
 0x583   :  { %12736 = vmatprep.subr.bf16.mxu1 %v15801_v36  ;;  %v15816_v14 = vld [vmem:[#allocation8 + $0x18c] ss:$16 sps:$4 sm:$0xff]   ;;  %v15814_v51 = vld [vmem:[#allocation8 + $0x188] ss:$16 sps:$4 sm:$0xff]  }
 0x584   :  { %12664 = vmatpush2.bf16.msra.mxu0 %v15796_v47  ;;  %v15819_v43 = vld [vmem:[#allocation8 + $0x38c] ss:$16 sps:$4 sm:$0xff]   ;;  %v15817_v36 = vld [vmem:[#allocation8 + $0x388] ss:$16 sps:$4 sm:$0xff]  }
 0x585   :  { %12665 = vmatprep.subr.bf16.mxu0 %v15804_v58  ;;  %v15822_v53 = vld [vmem:[#allocation8 + $0x16c] ss:$16 sps:$4 sm:$0xff]   ;;  %v15820_v47 = vld [vmem:[#allocation8 + $0x168] ss:$16 sps:$4 sm:$0xff]  }
 0x586   :  { %12737 = vmatpush2.bf16.msra.mxu1 %v15799_v48  ;;  %v15825_v27 = vld [vmem:[#allocation8 + $0x36c] ss:$16 sps:$4 sm:$0xff]   ;;  %v15823_v48 = vld [vmem:[#allocation8 + $0x368] ss:$16 sps:$4 sm:$0xff]  }
 0x587   :  { %12738 = vmatprep.subr.bf16.mxu1 %v15807_v0  ;;  %v15828_v58 = vld [vmem:[#allocation8 + $0x14c] ss:$16 sps:$4 sm:$0xff]   ;;  %v15850_v32 = vld [vmem:[#allocation8 + $0x4c8] ss:$16 sps:$4 sm:$0xff]  }
 0x588   :  { %12666 = vmatpush2.bf16.msra.mxu0 %v15802_v18  ;;  %v15831_v0 = vld [vmem:[#allocation8 + $0x34c] ss:$16 sps:$4 sm:$0xff]   ;;  %v15826_v18 = vld [vmem:[#allocation8 + $0x148] ss:$16 sps:$4 sm:$0xff]  }
 0x589   :  { %12667 = vmatprep.subr.bf16.mxu0 %v15810_v33  ;;  %v15834_v33 = vld [vmem:[#allocation8 + $0x12c] ss:$16 sps:$4 sm:$0xff]   ;;  %v15988_v4 = vld [vmem:[#allocation8 + $0x9e8] ss:$16 sps:$4 sm:$0xff]  }
 0x58a   :  { %12739 = vmatpush2.bf16.msra.mxu1 %v15805_v45  ;;  %v15829_v45 = vld [vmem:[#allocation8 + $0x348] ss:$16 sps:$4 sm:$0xff]   ;;  %v15855_v41 = vld [vmem:[#allocation8 + $0x6cc] ss:$16 sps:$4 sm:$0xff]  }
 0x58b   :  { %12740 = vmatprep.subr.bf16.mxu1 %v15813_v9  ;;  %v15837_v9 = vld [vmem:[#allocation8 + $0x32c] ss:$16 sps:$4 sm:$0xff]  }
 0x58c   :  { %12668 = vmatpush2.bf16.msra.mxu0 %v15808_v10  ;;  %v15832_v10 = vld [vmem:[#allocation8 + $0x128] ss:$16 sps:$4 sm:$0xff]  }
 0x58d   :  { %12669 = vmatprep.subr.bf16.mxu0 %v15816_v14  ;;  %v15840_v14 = vld [vmem:[#allocation8 + $0x10c] ss:$16 sps:$4 sm:$0xff]  }
 0x58e   :  { %12741 = vmatpush2.bf16.msra.mxu1 %v15811_v20  ;;  %v15835_v20 = vld [vmem:[#allocation8 + $0x328] ss:$16 sps:$4 sm:$0xff]  }
 0x58f   :  { %12742 = vmatprep.subr.bf16.mxu1 %v15819_v43  ;;  %v15843_v43 = vld [vmem:[#allocation8 + $0x30c] ss:$16 sps:$4 sm:$0xff]  }
 0x590   :  { %12670 = vmatpush2.bf16.msra.mxu0 %v15814_v51  ;;  %v15838_v51 = vld [vmem:[#allocation8 + $0x108] ss:$16 sps:$4 sm:$0xff]  }
 0x591   :  { %12671 = vmatprep.subr.bf16.mxu0 %v15822_v53  ;;  %v15846_v53 = vld [vmem:[#allocation8 + $0x4ec] ss:$16 sps:$4 sm:$0xff]  }
 0x592   :  { %12743 = vmatpush2.bf16.msra.mxu1 %v15817_v36  ;;  %v15841_v36 = vld [vmem:[#allocation8 + $0x308] ss:$16 sps:$4 sm:$0xff]  }
 0x593   :  { %12744 = vmatprep.subr.bf16.mxu1 %v15825_v27  ;;  %v17977_v27 = vpop.f32.mrf.mxu0 }
 0x594   :  { %12672 = vmatpush2.bf16.msra.mxu0 %v15820_v47  ;;  %19022 = vst [vmem:[#allocation92_spill] sm:$0xff] %v17977_v27  ;;  %v15849_v47 = vld [vmem:[#allocation8 + $0x6ec] ss:$16 sps:$4 sm:$0xff]  }
 0x595   :  { %12673 = vmatprep.subr.bf16.mxu0 %v15828_v58 }
 0x596   :  { %12745 = vmatpush2.bf16.msra.mxu1 %v15823_v48  ;;  %v17979_v48 = vpop.f32.mrf.mxu1 }
 0x597   :  { %12746 = vmatprep.subr.bf16.mxu1 %v15831_v0  ;;  %19023 = vst [vmem:[#allocation109_spill] sm:$0xff] %v17979_v48 }
 0x598   :  { %12674 = vmatpush2.bf16.msra.mxu0 %v15826_v18 }
 0x599   :  { %12675 = vmatprep.subr.bf16.mxu0 %v15834_v33  ;;  %v15847_v33 = vld [vmem:[#allocation8 + $0x6e8] ss:$16 sps:$4 sm:$0xff]  }
 0x59a   :  { %12747 = vmatpush2.bf16.msra.mxu1 %v15829_v45  ;;  %v15844_v45 = vld [vmem:[#allocation8 + $0x4e8] ss:$16 sps:$4 sm:$0xff]  }
 0x59b   :  { %12748 = vmatprep.subr.bf16.mxu1 %v15837_v9 }
 0x59c   :  { %12676 = vmatpush2.bf16.msra.mxu0 %v15832_v10  ;;  %v15852_v10 = vld [vmem:[#allocation8 + $0x4cc] ss:$16 sps:$4 sm:$0xff]  }
 0x59d   :  { %12677 = vmatprep.subr.bf16.mxu0 %v15840_v14  ;;  %v19024_v14 = vld [vmem:[#allocation45_spill] sm:$0xff] }
 0x59e   :  { %12749 = vmatpush2.bf16.msra.mxu1 %v15835_v20 }
 0x59f   :  { %12750 = vmatprep.subr.bf16.mxu1 %v15843_v43 }
 0x5a0   :  { %12678 = vmatpush2.bf16.msra.mxu0 %v15838_v51  ;;  %v19026_v51 = vld [vmem:[#allocation69_spill] sm:$0xff] }
 0x5a1   :  { %12793 = vmatprep.subr.bf16.mxu0 %v15846_v53 }
 0x5a2   :  { %12751 = vmatpush2.bf16.msra.mxu1 %v15841_v36  ;;  %v19027_v36 = vld [vmem:[#allocation67_spill] sm:$0xff] }
 0x5a3   :  { %v12243_v58 = vpop.f32.mrf.mxu0  ;;  %12866 = vmatprep.subr.bf16.mxu1 %v15849_v47  ;;  %12680 = vmatmul.mubr.bf16.vlgmr.msra.gmra.mxu0 %v19024_v14  ;;  %v15858_v14 = vld [vmem:[#allocation8 + $0x4ac] ss:$16 sps:$4 sm:$0xff]  }
 0x5a4   :  { %v12244_v0 = vadd.f32 %v12243_v58, %v17893_v13  ;;  %12689 = vmatprep.mubr.bf16.mxu0 %v19027_v36  ;;  %v19028_v58 = vld [vmem:[#allocation44_spill] sm:$0xff]  ;;  %12794 = vmatpush1.bf16.msra.mxu0 %v15844_v45 }
 0x5a5   :  { %v12316_v18 = vpop.f32.mrf.mxu1  ;;  %v17982_v9 = vpop.f32.mrf.mxu0  ;;  %12753 = vmatmul.mubr.bf16.vlgmr.msra.gmra.mxu1 %v19026_v51  ;;  %12795 = vmatprep.subr.bf16.mxu0 %v15852_v10  ;;  %v15861_v36 = vld [vmem:[#allocation8 + $0x6ac] ss:$16 sps:$4 sm:$0xff]  }
 0x5a6   :  { %v17984_v20 = vadd.f32 %v12316_v18, %v12244_v0  ;;  %12762 = vmatprep.mubr.bf16.mxu1 %v19028_v58  ;;  %12867 = vmatpush1.bf16.msra.mxu1 %v15847_v33  ;;  %v15853_v0 = vld [vmem:[#allocation8 + $0x6c8] ss:$16 sps:$4 sm:$0xff]  }
 0x5a7   :  { %v17987_v43 = vpop.f32.mrf.mxu1  ;;  %v12247_v13 = vpop.f32.mrf.mxu0  ;;  %12868 = vmatprep.subr.bf16.mxu1 %v15855_v41  ;;  %v15859_v33 = vld [vmem:[#allocation8 + $0x6a8] ss:$16 sps:$4 sm:$0xff]  }
 0x5a8   :  { %19025 = vst [vmem:[#allocation116_spill] sm:$0xff] %v17987_v43  ;;  %v12248_v53 = vadd.f32 %v12247_v13, %v17911_v50  ;;  %12796 = vmatpush1.bf16.msra.mxu0 %v15850_v32  ;;  %v15856_v50 = vld [vmem:[#allocation8 + $0x4a8] ss:$16 sps:$4 sm:$0xff]   ;;  %v15864_v13 = vld [vmem:[#allocation8 + $0x48c] ss:$16 sps:$4 sm:$0xff]  }
 0x5a9   :  { %v12320_v47 = vpop.f32.mrf.mxu1  ;;  %v17993_v18 = vpop.f32.mrf.mxu0  ;;  %12797 = vmatprep.subr.bf16.mxu0 %v15858_v14  ;;  %v19034_v32 = vld [vmem:[#allocation68_spill] sm:$0xff] }
 0x5aa   :  { %v17995_v48 = vadd.f32 %v12320_v47, %v12248_v53  ;;  %12869 = vmatpush1.bf16.msra.mxu1 %v15853_v0  ;;  %v19031_v53 = vld [vmem:[#allocation49_spill] sm:$0xff] }
 0x5ab   :  { %v17997_v51 = vpop.f32.mrf.mxu1  ;;  %v12253_v29 = vpop.f32.mrf.mxu0  ;;  %12690 = vmatmul.mubr.bf16.gmra.mxu0 %v19031_v53  ;;  %12870 = vmatprep.subr.bf16.mxu1 %v15861_v36  ;;  %v15867_v47 = vld [vmem:[#allocation8 + $0x68c] ss:$16 sps:$4 sm:$0xff]  }
 0x5ac   :  { %19029 = vst [vmem:[#allocation54_spill] sm:$0xff] %v17997_v51  ;;  %v12254_v45 = vadd.f32 %v12253_v29, %v17925_v52  ;;  %12699 = vmatprep.mubr.bf16.mxu0 %v19034_v32  ;;  %v19035_v29 = vld [vmem:[#allocation25_spill] sm:$0xff]  ;;  %12798 = vmatpush1.bf16.msra.mxu0 %v15856_v50 }
 0x5ad   :  { %v12326_v58 = vpop.f32.mrf.mxu1  ;;  %v18000_v10 = vpop.f32.mrf.mxu0  ;;  %12763 = vmatmul.mubr.bf16.gmra.mxu1 %v19033_v16  ;;  %12799 = vmatprep.subr.bf16.mxu0 %v15864_v13  ;;  %v15870_v36 = vld [vmem:[#allocation8 + $0x46c] ss:$16 sps:$4 sm:$0xff]  }
 0x5ae   :  { %19030 = vst [vmem:[#allocation78_spill] sm:$0xff] %v18000_v10  ;;  %v18002_v8 = vadd.f32 %v12326_v58, %v12254_v45  ;;  %12772 = vmatprep.mubr.bf16.mxu1 %v19035_v29  ;;  %12871 = vmatpush1.bf16.msra.mxu1 %v15859_v33  ;;  %v15865_v45 = vld [vmem:[#allocation8 + $0x688] ss:$16 sps:$4 sm:$0xff]   ;;  %v15873_v32 = vld [vmem:[#allocation8 + $0x66c] ss:$16 sps:$4 sm:$0xff]  }
 0x5af   :  { %v18005_v41 = vpop.f32.mrf.mxu1  ;;  %v12257_v52 = vpop.f32.mrf.mxu0  ;;  %12872 = vmatprep.subr.bf16.mxu1 %v15867_v47  ;;  %v15871_v33 = vld [vmem:[#allocation8 + $0x668] ss:$16 sps:$4 sm:$0xff]  }
 0x5b0   :  { %19032 = vst [vmem:[#allocation93_spill] sm:$0xff] %v18005_v41  ;;  %v12258_v0 = vadd.f32 %v12257_v52, %v17938_v44  ;;  %12800 = vmatpush1.bf16.msra.mxu0 %v15862_v26  ;;  %v15868_v44 = vld [vmem:[#allocation8 + $0x468] ss:$16 sps:$4 sm:$0xff]   ;;  %v15876_v52 = vld [vmem:[#allocation8 + $0x44c] ss:$16 sps:$4 sm:$0xff]  }
 0x5b1   :  { %v12330_v14 = vpop.f32.mrf.mxu1  ;;  %v18011_v58 = vpop.f32.mrf.mxu0  ;;  %12801 = vmatprep.subr.bf16.mxu0 %v15870_v36  ;;  %v19041_v41 = vld [vmem:[#allocation77_spill] sm:$0xff]  ;;  %v19042_v26 = vld [vmem:[#allocation42_spill] sm:$0xff] }
 0x5b2   :  { %19036 = vst [vmem:[#allocation117_spill] sm:$0xff] %v18011_v58  ;;  %v18013_v53 = vadd.f32 %v12330_v14, %v12258_v0  ;;  %12873 = vmatpush1.bf16.msra.mxu1 %v15865_v45  ;;  %v19039_v0 = vld [vmem:[#allocation53_spill] sm:$0xff] }
 0x5b3   :  { %v18015_v16 = vpop.f32.mrf.mxu1  ;;  %v12263_v27 = vpop.f32.mrf.mxu0  ;;  %12700 = vmatmul.mubr.bf16.gmra.mxu0 %v19039_v0  ;;  %12874 = vmatprep.subr.bf16.mxu1 %v15873_v32  ;;  %v15879_v14 = vld [vmem:[#allocation8 + $0x64c] ss:$16 sps:$4 sm:$0xff]  }
 0x5b4   :  { %19037 = vst [vmem:[#allocation91_spill] sm:$0xff] %v18015_v16  ;;  %v12264_v50 = vadd.f32 %v12263_v27, %v17946_v59  ;;  %12709 = vmatprep.mubr.bf16.mxu0 %v19042_v26  ;;  %v19043_v27 = vld [vmem:[#allocation66_spill] sm:$0xff]  ;;  %12802 = vmatpush1.bf16.msra.mxu0 %v15868_v44  ;;  %v19063_v16 = vld [vmem:[#allocation51_spill] sm:$0xff] }
 0x5b5   :  { %v12336_v29 = vpop.f32.mrf.mxu1  ;;  %v18018_v13 = vpop.f32.mrf.mxu0  ;;  %12773 = vmatmul.mubr.bf16.gmra.mxu1 %v19041_v41  ;;  %12803 = vmatprep.subr.bf16.mxu0 %v15876_v52  ;;  %v15882_v32 = vld [vmem:[#allocation8 + $0x42c] ss:$16 sps:$4 sm:$0xff]  }
 0x5b6   :  { %19038 = vst [vmem:[#allocation115_spill] sm:$0xff] %v18018_v13  ;;  %v18020_v1 = vadd.f32 %v12336_v29, %v12264_v50  ;;  %12782 = vmatprep.mubr.bf16.mxu1 %v19043_v27  ;;  %v15874_v13 = vld [vmem:[#allocation8 + $0x448] ss:$16 sps:$4 sm:$0xff]   ;;  %12875 = vmatpush1.bf16.msra.mxu1 %v15871_v33  ;;  %v15885_v26 = vld [vmem:[#allocation8 + $0x62c] ss:$16 sps:$4 sm:$0xff]  }
 0x5b7   :  { %v18023_v47 = vpop.f32.mrf.mxu1  ;;  %v12267_v59 = vpop.f32.mrf.mxu0  ;;  %v15877_v50 = vld [vmem:[#allocation8 + $0x648] ss:$16 sps:$4 sm:$0xff]   ;;  %12876 = vmatprep.subr.bf16.mxu1 %v15879_v14 }
 0x5b8   :  { %19040 = vst [vmem:[#allocation85_spill] sm:$0xff] %v18023_v47  ;;  %v12268_v45 = vadd.f32 %v12267_v59, %v17960_v24  ;;  %12804 = vmatpush1.bf16.msra.mxu0 %v15874_v13  ;;  %v15880_v24 = vld [vmem:[#allocation8 + $0x428] ss:$16 sps:$4 sm:$0xff]   ;;  %v15888_v59 = vld [vmem:[#allocation8 + $0x40c] ss:$16 sps:$4 sm:$0xff]  }
 0x5b9   :  { %v12340_v36 = vpop.f32.mrf.mxu1  ;;  %v18029_v29 = vpop.f32.mrf.mxu0  ;;  %12805 = vmatprep.subr.bf16.mxu0 %v15882_v32  ;;  %v15883_v33 = vld [vmem:[#allocation8 + $0x628] ss:$16 sps:$4 sm:$0xff]   ;;  %v19050_v13 = vld [vmem:[#allocation37_spill] sm:$0xff] }
 0x5ba   :  { %19044 = vst [vmem:[#allocation110_spill] sm:$0xff] %v18029_v29  ;;  %v18031_v0 = vadd.f32 %v12340_v36, %v12268_v45  ;;  %12877 = vmatpush1.bf16.msra.mxu1 %v15877_v50  ;;  %v19047_v45 = vld [vmem:[#allocation55_spill] sm:$0xff]  ;;  %v15886_v32 = vld [vmem:[#allocation8 + $0x408] ss:$16 sps:$4 sm:$0xff]  }
 0x5bb   :  { %v18033_v41 = vpop.f32.mrf.mxu1  ;;  %v12273_v47 = vpop.f32.mrf.mxu0  ;;  %12710 = vmatmul.mubr.bf16.gmra.mxu0 %v19047_v45  ;;  %12878 = vmatprep.subr.bf16.mxu1 %v15885_v26  ;;  %v15891_v36 = vld [vmem:[#allocation8 + $0x60c] ss:$16 sps:$4 sm:$0xff]  }
 0x5bc   :  { %19045 = vst [vmem:[#allocation86_spill] sm:$0xff] %v18033_v41  ;;  %v12274_v44 = vadd.f32 %v12273_v47, %v17965_v39  ;;  %v19049_v41 = vld [vmem:[#allocation79_spill] sm:$0xff]  ;;  %12825 = vmatprep.mubr.bf16.mxu0 %v19050_v13  ;;  %12806 = vmatpush1.bf16.msra.mxu0 %v15880_v24  ;;  %v19051_v47 = vld [vmem:[#allocation22_spill] sm:$0xff] }
 0x5bd   :  { %v12346_v27 = vpop.f32.mrf.mxu1  ;;  %v18036_v52 = vpop.f32.mrf.mxu0  ;;  %12783 = vmatmul.mubr.bf16.gmra.mxu1 %v19049_v41  ;;  %12807 = vmatprep.subr.bf16.mxu0 %v15888_v59  ;;  %v15894_v45 = vld [vmem:[#allocation8 + $0x5ec] ss:$16 sps:$4 sm:$0xff]   ;;  %v15892_v41 = vld [vmem:[#allocation8 + $0x5e8] ss:$16 sps:$4 sm:$0xff]  }
 0x5be   :  { %19046 = vst [vmem:[#allocation111_spill] sm:$0xff] %v18036_v52  ;;  %v18038_v29 = vadd.f32 %v12346_v27, %v12274_v44  ;;  %12898 = vmatprep.mubr.bf16.mxu1 %v19051_v47  ;;  %12879 = vmatpush1.bf16.msra.mxu1 %v15883_v33  ;;  %v15889_v27 = vld [vmem:[#allocation8 + $0x608] ss:$16 sps:$4 sm:$0xff]   ;;  %v15900_v24 = vld [vmem:[#allocation8 + $0x5cc] ss:$16 sps:$4 sm:$0xff]  }
 0x5bf   :  { %v18041_v14 = vpop.f32.mrf.mxu1  ;;  %v12277_v39 = vpop.f32.mrf.mxu0  ;;  %12880 = vmatprep.subr.bf16.mxu1 %v15891_v36  ;;  %v15895_v13 = vld [vmem:[#allocation8 + $0x7e8] ss:$16 sps:$4 sm:$0xff]   ;;  %v15903_v47 = vld [vmem:[#allocation8 + $0x7cc] ss:$16 sps:$4 sm:$0xff]  }
 0x5c0   :  { %19048 = vst [vmem:[#allocation96_spill] sm:$0xff] %v18041_v14  ;;  %v12278_v50 = vadd.f32 %v12277_v39, %v17975_v2  ;;  %v15897_v14 = vld [vmem:[#allocation8 + $0x7ec] ss:$16 sps:$4 sm:$0xff]   ;;  %12808 = vmatpush1.bf16.msra.mxu0 %v15886_v32  ;;  %v15898_v2 = vld [vmem:[#allocation8 + $0x5c8] ss:$16 sps:$4 sm:$0xff]  }
 0x5c1   :  { %v12350_v44 = vpop.f32.mrf.mxu1  ;;  %12809 = vmatprep.subr.bf16.mxu0 %v15894_v45  ;;  %v15901_v33 = vld [vmem:[#allocation8 + $0x7c8] ss:$16 sps:$4 sm:$0xff]   ;;  %v15906_v59 = vld [vmem:[#allocation8 + $0x5ac] ss:$16 sps:$4 sm:$0xff]  }
 0x5c2   :  { %v18047_v26 = vadd.f32 %v12350_v44, %v12278_v50  ;;  %12881 = vmatpush1.bf16.msra.mxu1 %v15889_v27  ;;  %v15909_v39 = vld [vmem:[#allocation8 + $0x7ac] ss:$16 sps:$4 sm:$0xff]   ;;  %v15904_v50 = vld [vmem:[#allocation8 + $0x5a8] ss:$16 sps:$4 sm:$0xff]  }
 0x5c3   :  { %12882 = vmatprep.subr.bf16.mxu1 %v15897_v14  ;;  %v15907_v36 = vld [vmem:[#allocation8 + $0x7a8] ss:$16 sps:$4 sm:$0xff]   ;;  %v15912_v32 = vld [vmem:[#allocation8 + $0x58c] ss:$16 sps:$4 sm:$0xff]  }
 0x5c4   :  { %12810 = vmatpush2.bf16.msra.mxu0 %v15892_v41  ;;  %v15915_v44 = vld [vmem:[#allocation8 + $0x78c] ss:$16 sps:$4 sm:$0xff]   ;;  %v15910_v27 = vld [vmem:[#allocation8 + $0x588] ss:$16 sps:$4 sm:$0xff]  }
 0x5c5   :  { %12811 = vmatprep.subr.bf16.mxu0 %v15900_v24  ;;  %v15913_v14 = vld [vmem:[#allocation8 + $0x788] ss:$16 sps:$4 sm:$0xff]   ;;  %v15918_v45 = vld [vmem:[#allocation8 + $0x56c] ss:$16 sps:$4 sm:$0xff]  }
 0x5c6   :  { %12883 = vmatpush2.bf16.msra.mxu1 %v15895_v13  ;;  %v15921_v41 = vld [vmem:[#allocation8 + $0x76c] ss:$16 sps:$4 sm:$0xff]   ;;  %v15916_v13 = vld [vmem:[#allocation8 + $0x568] ss:$16 sps:$4 sm:$0xff]  }
 0x5c7   :  { %12884 = vmatprep.subr.bf16.mxu1 %v15903_v47  ;;  %v15919_v24 = vld [vmem:[#allocation8 + $0x768] ss:$16 sps:$4 sm:$0xff]   ;;  %v15924_v47 = vld [vmem:[#allocation8 + $0x54c] ss:$16 sps:$4 sm:$0xff]  }
 0x5c8   :  { %12812 = vmatpush2.bf16.msra.mxu0 %v15898_v2  ;;  %v15927_v2 = vld [vmem:[#allocation8 + $0x74c] ss:$16 sps:$4 sm:$0xff]  }
 0x5c9   :  { %12813 = vmatprep.subr.bf16.mxu0 %v15906_v59  ;;  %v15925_v59 = vld [vmem:[#allocation8 + $0x748] ss:$16 sps:$4 sm:$0xff]   ;;  %v15957_v52 = vld [vmem:[#allocation8 + $0xaac] ss:$16 sps:$4 sm:$0xff]  }
 0x5ca   :  { %12885 = vmatpush2.bf16.msra.mxu1 %v15901_v33  ;;  %v15922_v33 = vld [vmem:[#allocation8 + $0x548] ss:$16 sps:$4 sm:$0xff]  }
 0x5cb   :  { %12886 = vmatprep.subr.bf16.mxu1 %v15909_v39  ;;  %v15930_v39 = vld [vmem:[#allocation8 + $0x52c] ss:$16 sps:$4 sm:$0xff]  }
 0x5cc   :  { %12814 = vmatpush2.bf16.msra.mxu0 %v15904_v50  ;;  %v15933_v50 = vld [vmem:[#allocation8 + $0x72c] ss:$16 sps:$4 sm:$0xff]  }
 0x5cd   :  { %12815 = vmatprep.subr.bf16.mxu0 %v15912_v32  ;;  %v15931_v32 = vld [vmem:[#allocation8 + $0x728] ss:$16 sps:$4 sm:$0xff]  }
 0x5ce   :  { %12887 = vmatpush2.bf16.msra.mxu1 %v15907_v36  ;;  %v15928_v36 = vld [vmem:[#allocation8 + $0x528] ss:$16 sps:$4 sm:$0xff]  }
 0x5cf   :  { %12888 = vmatprep.subr.bf16.mxu1 %v15915_v44  ;;  %v15936_v44 = vld [vmem:[#allocation8 + $0x50c] ss:$16 sps:$4 sm:$0xff]  }
 0x5d0   :  { %12816 = vmatpush2.bf16.msra.mxu0 %v15910_v27  ;;  %v15939_v27 = vld [vmem:[#allocation8 + $0x70c] ss:$16 sps:$4 sm:$0xff]  }
 0x5d1   :  { %12817 = vmatprep.subr.bf16.mxu0 %v15918_v45  ;;  %v15937_v45 = vld [vmem:[#allocation8 + $0x708] ss:$16 sps:$4 sm:$0xff]  }
 0x5d2   :  { %12889 = vmatpush2.bf16.msra.mxu1 %v15913_v14  ;;  %v15934_v14 = vld [vmem:[#allocation8 + $0x508] ss:$16 sps:$4 sm:$0xff]  }
 0x5d3   :  { %12890 = vmatprep.subr.bf16.mxu1 %v15921_v41  ;;  %v15942_v41 = vld [vmem:[#allocation8 + $0x8ec] ss:$16 sps:$4 sm:$0xff]  }
 0x5d4   :  { %12818 = vmatpush2.bf16.msra.mxu0 %v15916_v13  ;;  %v15945_v13 = vld [vmem:[#allocation8 + $0xaec] ss:$16 sps:$4 sm:$0xff]  }
 0x5d5   :  { %12819 = vmatprep.subr.bf16.mxu0 %v15924_v47  ;;  %v15940_v47 = vld [vmem:[#allocation8 + $0x8e8] ss:$16 sps:$4 sm:$0xff]  }
 0x5d6   :  { %12891 = vmatpush2.bf16.msra.mxu1 %v15919_v24  ;;  %v18049_v24 = vpop.f32.mrf.mxu0 }
 0x5d7   :  { %12892 = vmatprep.subr.bf16.mxu1 %v15927_v2  ;;  %19052 = vst [vmem:[#allocation120_spill] sm:$0xff] %v18049_v24  ;;  %v18051_v2 = vpop.f32.mrf.mxu1  ;;  %v15952_v24 = vld [vmem:[#allocation8 + $0x8a8] ss:$16 sps:$4 sm:$0xff]  }
 0x5d8   :  { %12820 = vmatpush2.bf16.msra.mxu0 %v15922_v33  ;;  %19053 = vst [vmem:[#allocation87_spill] sm:$0xff] %v18051_v2  ;;  %v15943_v33 = vld [vmem:[#allocation8 + $0xae8] ss:$16 sps:$4 sm:$0xff]  }
 0x5d9   :  { %12821 = vmatprep.subr.bf16.mxu0 %v15930_v39 }
 0x5da   :  { %12893 = vmatpush2.bf16.msra.mxu1 %v15925_v59  ;;  %v15948_v59 = vld [vmem:[#allocation8 + $0x8cc] ss:$16 sps:$4 sm:$0xff]  }
 0x5db   :  { %12894 = vmatprep.subr.bf16.mxu1 %v15933_v50  ;;  %v19054_v50 = vld [vmem:[#allocation94_spill] sm:$0xff] }
 0x5dc   :  { %12822 = vmatpush2.bf16.msra.mxu0 %v15928_v36  ;;  %v15951_v36 = vld [vmem:[#allocation8 + $0xacc] ss:$16 sps:$4 sm:$0xff]  }
 0x5dd   :  { %12823 = vmatprep.subr.bf16.mxu0 %v15936_v44  ;;  %v19055_v44 = vld [vmem:[#allocation118_spill] sm:$0xff] }
 0x5de   :  { %12895 = vmatpush2.bf16.msra.mxu1 %v15931_v32 }
 0x5df   :  { %12896 = vmatprep.subr.bf16.mxu1 %v15939_v27  ;;  %v19056_v27 = vld [vmem:[#allocation72_spill] sm:$0xff] }
 0x5e0   :  { %12824 = vmatpush2.bf16.msra.mxu0 %v15934_v14  ;;  %v19057_v14 = vld [vmem:[#allocation39_spill] sm:$0xff] }
 0x5e1   :  { %12939 = vmatprep.subr.bf16.mxu0 %v15942_v41  ;;  %v15949_v41 = vld [vmem:[#allocation8 + $0xac8] ss:$16 sps:$4 sm:$0xff]  }
 0x5e2   :  { %12897 = vmatpush2.bf16.msra.mxu1 %v15937_v45  ;;  %v15946_v45 = vld [vmem:[#allocation8 + $0x8c8] ss:$16 sps:$4 sm:$0xff]  }
 0x5e3   :  { %13012 = vmatprep.subr.bf16.mxu1 %v15945_v13  ;;  %v18053_v39 = vpop.f32.mrf.mxu0  ;;  %12826 = vmatmul.mubr.bf16.vlgmr.msra.gmra.mxu0 %v19054_v50  ;;  %v15954_v13 = vld [vmem:[#allocation8 + $0x8ac] ss:$16 sps:$4 sm:$0xff]  }
 0x5e4   :  { %12835 = vmatprep.mubr.bf16.mxu0 %v19056_v27  ;;  %12940 = vmatpush1.bf16.msra.mxu0 %v15940_v47  ;;  %v15960_v27 = vld [vmem:[#allocation8 + $0x88c] ss:$16 sps:$4 sm:$0xff]  }
 0x5e5   :  { %v18056_v32 = vpop.f32.mrf.mxu1  ;;  %12899 = vmatmul.mubr.bf16.vlgmr.msra.gmra.mxu1 %v19055_v44  ;;  %12941 = vmatprep.subr.bf16.mxu0 %v15948_v59  ;;  %v18061_v2 = vpop.f32.mrf.mxu0  ;;  %v15955_v44 = vld [vmem:[#allocation8 + $0xaa8] ss:$16 sps:$4 sm:$0xff]  }
 0x5e6   :  { %12908 = vmatprep.mubr.bf16.mxu1 %v19057_v14  ;;  %13013 = vmatpush1.bf16.msra.mxu1 %v15943_v33  ;;  %19058 = vst [vmem:[#allocation24_spill] sm:$0xff] %v18061_v2  ;;  %v19060_v47 = vld [vmem:[#allocation98_spill] sm:$0xff] }
 0x5e7   :  { %13014 = vmatprep.subr.bf16.mxu1 %v15951_v36  ;;  %v18063_v50 = vpop.f32.mrf.mxu1  ;;  %v18065_v19 = vpop.f32.mrf.mxu0  ;;  %v15963_v33 = vld [vmem:[#allocation8 + $0xa8c] ss:$16 sps:$4 sm:$0xff]  }
 0x5e8   :  { %19059 = vst [vmem:[#allocation97_spill] sm:$0xff] %v18063_v50  ;;  %12942 = vmatpush1.bf16.msra.mxu0 %v15946_v45  ;;  %v19061_v14 = vld [vmem:[#allocation122_spill] sm:$0xff]  ;;  %v19062_v36 = vld [vmem:[#allocation63_spill] sm:$0xff] }
 0x5e9   :  { %12943 = vmatprep.subr.bf16.mxu0 %v15954_v13  ;;  %v18068_v59 = vpop.f32.mrf.mxu1  ;;  %v15958_v45 = vld [vmem:[#allocation8 + $0x888] ss:$16 sps:$4 sm:$0xff]   ;;  %v15966_v13 = vld [vmem:[#allocation8 + $0x86c] ss:$16 sps:$4 sm:$0xff]   ;;  %v18073_v50 = vpop.f32.mrf.mxu0 }
 0x5ea   :  { %13015 = vmatpush1.bf16.msra.mxu1 %v15949_v41  ;;  %v15961_v41 = vld [vmem:[#allocation8 + $0xa88] ss:$16 sps:$4 sm:$0xff]   ;;  %19064 = vst [vmem:[#allocation121_spill] sm:$0xff] %v18073_v50 }
 0x5eb   :  { %12836 = vmatmul.mubr.bf16.gmra.mxu0 %v19060_v47  ;;  %13016 = vmatprep.subr.bf16.mxu1 %v15957_v52  ;;  %v15969_v47 = vld [vmem:[#allocation8 + $0xa6c] ss:$16 sps:$4 sm:$0xff]   ;;  %v18075_v52 = vpop.f32.mrf.mxu1  ;;  %v18077_v10 = vpop.f32.mrf.mxu0 }
 0x5ec   :  { %12845 = vmatprep.mubr.bf16.mxu0 %v19062_v36  ;;  %12944 = vmatpush1.bf16.msra.mxu0 %v15952_v24  ;;  %19065 = vst [vmem:[#allocation88_spill] sm:$0xff] %v18075_v52  ;;  %v15972_v36 = vld [vmem:[#allocation8 + $0x84c] ss:$16 sps:$4 sm:$0xff]  }
 0x5ed   :  { %12909 = vmatmul.mubr.bf16.gmra.mxu1 %v19061_v14  ;;  %12945 = vmatprep.subr.bf16.mxu0 %v15960_v27  ;;  %v15967_v14 = vld [vmem:[#allocation8 + $0xa68] ss:$16 sps:$4 sm:$0xff]   ;;  %v15975_v24 = vld [vmem:[#allocation8 + $0xa4c] ss:$16 sps:$4 sm:$0xff]   ;;  %v18085_v57 = vpop.f32.mrf.mxu0 }
 0x5ee   :  { %12918 = vmatprep.mubr.bf16.mxu1 %v19063_v16  ;;  %13017 = vmatpush1.bf16.msra.mxu1 %v15955_v44  ;;  %v19066_v16 = vld [vmem:[#allocation102_spill] sm:$0xff]  ;;  %v18080_v44 = vpop.f32.mrf.mxu1  ;;  %19070 = vst [vmem:[#allocation112_spill] sm:$0xff] %v18085_v57 }
 0x5ef   :  { %13018 = vmatprep.subr.bf16.mxu1 %v15963_v33  ;;  %v19067_v27 = vld [vmem:[#allocation126_spill] sm:$0xff]  ;;  %v19068_v33 = vld [vmem:[#allocation75_spill] sm:$0xff]  ;;  %v18089_v52 = vpop.f32.mrf.mxu0 }
 0x5f0   :  { %12946 = vmatpush1.bf16.msra.mxu0 %v15958_v45  ;;  %v15970_v45 = vld [vmem:[#allocation8 + $0x848] ss:$16 sps:$4 sm:$0xff]  }
 0x5f1   :  { %12947 = vmatprep.subr.bf16.mxu0 %v15966_v13  ;;  %v15978_v13 = vld [vmem:[#allocation8 + $0x82c] ss:$16 sps:$4 sm:$0xff]   ;;  %v18097_v57 = vpop.f32.mrf.mxu0 }
 0x5f2   :  { %13019 = vmatpush1.bf16.msra.mxu1 %v15961_v41  ;;  %v15973_v41 = vld [vmem:[#allocation8 + $0xa48] ss:$16 sps:$4 sm:$0xff]   ;;  %19076 = vst [vmem:[#allocation124_spill] sm:$0xff] %v18097_v57  ;;  %v16002_v57 = vld [vmem:[#allocation8 + $0x9ac] ss:$16 sps:$4 sm:$0xff]  }
 0x5f3   :  { %12846 = vmatmul.mubr.bf16.gmra.mxu0 %v19066_v16  ;;  %13020 = vmatprep.subr.bf16.mxu1 %v15969_v47  ;;  %v15981_v16 = vld [vmem:[#allocation8 + $0xa2c] ss:$16 sps:$4 sm:$0xff]   ;;  %v18087_v47 = vpop.f32.mrf.mxu1 }
 0x5f4   :  { %12855 = vmatprep.mubr.bf16.mxu0 %v19068_v33  ;;  %12948 = vmatpush1.bf16.msra.mxu0 %v15964_v61  ;;  %19071 = vst [vmem:[#allocation100_spill] sm:$0xff] %v18087_v47  ;;  %v15984_v33 = vld [vmem:[#allocation8 + $0x80c] ss:$16 sps:$4 sm:$0xff]  }
 0x5f5   :  { %12919 = vmatmul.mubr.bf16.gmra.mxu1 %v19067_v27  ;;  %12949 = vmatprep.subr.bf16.mxu0 %v15972_v36  ;;  %v15979_v27 = vld [vmem:[#allocation8 + $0xa28] ss:$16 sps:$4 sm:$0xff]  }
 0x5f6   :  { %12928 = vmatprep.mubr.bf16.mxu1 %v19069_v11  ;;  %13021 = vmatpush1.bf16.msra.mxu1 %v15967_v14  ;;  %v19072_v61 = vld [vmem:[#allocation104_spill] sm:$0xff]  ;;  %v18092_v14 = vpop.f32.mrf.mxu1  ;;  %v19075_v47 = vld [vmem:[#allocation70_spill] sm:$0xff] }
 0x5f7   :  { %13022 = vmatprep.subr.bf16.mxu1 %v15975_v24  ;;  %v15987_v11 = vld [vmem:[#allocation8 + $0xa0c] ss:$16 sps:$4 sm:$0xff]  }
 0x5f8   :  { %12950 = vmatpush1.bf16.msra.mxu0 %v15970_v45  ;;  %v19073_v36 = vld [vmem:[#allocation128_spill] sm:$0xff] }
 0x5f9   :  { %12951 = vmatprep.subr.bf16.mxu0 %v15978_v13  ;;  %v19074_v24 = vld [vmem:[#allocation64_spill] sm:$0xff] }
 0x5fa   :  { %13023 = vmatpush1.bf16.msra.mxu1 %v15973_v41  ;;  %v15982_v45 = vld [vmem:[#allocation8 + $0x808] ss:$16 sps:$4 sm:$0xff]   ;;  %v15990_v13 = vld [vmem:[#allocation8 + $0x9ec] ss:$16 sps:$4 sm:$0xff]  }
 0x5fb   :  { %12856 = vmatmul.mubr.bf16.gmra.mxu0 %v19072_v61  ;;  %13024 = vmatprep.subr.bf16.mxu1 %v15981_v16  ;;  %v15985_v41 = vld [vmem:[#allocation8 + $0xa08] ss:$16 sps:$4 sm:$0xff]   ;;  %v15993_v61 = vld [vmem:[#allocation8 + $0xbec] ss:$16 sps:$4 sm:$0xff]   ;;  %v18099_v16 = vpop.f32.mrf.mxu1 }
 0x5fc   :  { %12971 = vmatprep.mubr.bf16.mxu0 %v19074_v24  ;;  %12952 = vmatpush1.bf16.msra.mxu0 %v15976_v62  ;;  %19077 = vst [vmem:[#allocation89_spill] sm:$0xff] %v18099_v16  ;;  %v15996_v24 = vld [vmem:[#allocation8 + $0x9cc] ss:$16 sps:$4 sm:$0xff]   ;;  %v18101_v62 = vpop.f32.mrf.mxu0 }
 0x5fd   :  { %12929 = vmatmul.mubr.bf16.gmra.mxu1 %v19073_v36  ;;  %12953 = vmatprep.subr.bf16.mxu0 %v15984_v33  ;;  %v15991_v36 = vld [vmem:[#allocation8 + $0xbe8] ss:$16 sps:$4 sm:$0xff]   ;;  %v16008_v16 = vld [vmem:[#allocation8 + $0x98c] ss:$16 sps:$4 sm:$0xff]  }
 0x5fe   :  { %13044 = vmatprep.mubr.bf16.mxu1 %v19075_v47  ;;  %13025 = vmatpush1.bf16.msra.mxu1 %v15979_v27  ;;  %v15999_v47 = vld [vmem:[#allocation8 + $0xbcc] ss:$16 sps:$4 sm:$0xff]   ;;  %v18103_v27 = vpop.f32.mrf.mxu1  ;;  %v15994_v33 = vld [vmem:[#allocation8 + $0x9c8] ss:$16 sps:$4 sm:$0xff]   ;;  %v18105_v3 = vpop.f32.mrf.mxu0 }
 0x5ff   :  { %13026 = vmatprep.subr.bf16.mxu1 %v15987_v11  ;;  %v15997_v11 = vld [vmem:[#allocation8 + $0xbc8] ss:$16 sps:$4 sm:$0xff]   ;;  %19078 = vst [vmem:[#allocation95_spill] sm:$0xff] %v18105_v3  ;;  %v16014_v3 = vld [vmem:[#allocation8 + $0x96c] ss:$16 sps:$4 sm:$0xff]  }
 0x600   :  { %12954 = vmatpush1.bf16.msra.mxu0 %v15982_v45  ;;  %v16005_v45 = vld [vmem:[#allocation8 + $0xbac] ss:$16 sps:$4 sm:$0xff]   ;;  %v18109_v58 = vpop.f32.mrf.mxu0 }
 0x601   :  { %12955 = vmatprep.subr.bf16.mxu0 %v15990_v13  ;;  %v16000_v13 = vld [vmem:[#allocation8 + $0x9a8] ss:$16 sps:$4 sm:$0xff]  }
 0x602   :  { %13027 = vmatpush1.bf16.msra.mxu1 %v15985_v41  ;;  %v18107_v41 = vpop.f32.mrf.mxu1  ;;  %v18113_v2 = vpop.f32.mrf.mxu0 }
 0x603   :  { %13028 = vmatprep.subr.bf16.mxu1 %v15993_v61  ;;  %19079 = vst [vmem:[#allocation113_spill] sm:$0xff] %v18107_v41  ;;  %v16003_v61 = vld [vmem:[#allocation8 + $0xba8] ss:$16 sps:$4 sm:$0xff]   ;;  %19080 = vst [vmem:[#allocation119_spill] sm:$0xff] %v18113_v2  ;;  %v16020_v41 = vld [vmem:[#allocation8 + $0x94c] ss:$16 sps:$4 sm:$0xff]  }
 0x604   :  { %12956 = vmatpush2.bf16.msra.mxu0 %v15988_v4  ;;  %v16011_v4 = vld [vmem:[#allocation8 + $0xb8c] ss:$16 sps:$4 sm:$0xff]   ;;  %v18117_v56 = vpop.f32.mrf.mxu0 }
 0x605   :  { %12957 = vmatprep.subr.bf16.mxu0 %v15996_v24  ;;  %v16006_v24 = vld [vmem:[#allocation8 + $0x988] ss:$16 sps:$4 sm:$0xff]   ;;  %v16026_v2 = vld [vmem:[#allocation8 + $0x92c] ss:$16 sps:$4 sm:$0xff]  }
 0x606   :  { %13029 = vmatpush2.bf16.msra.mxu1 %v15991_v36  ;;  %v18111_v36 = vpop.f32.mrf.mxu1  ;;  %v18121_v50 = vpop.f32.mrf.mxu0 }
 0x607   :  { %13030 = vmatprep.subr.bf16.mxu1 %v15999_v47  ;;  %v16009_v47 = vld [vmem:[#allocation8 + $0xb88] ss:$16 sps:$4 sm:$0xff]   ;;  %19082 = vst [vmem:[#allocation125_spill] sm:$0xff] %v18121_v50 }
 0x608   :  { %12958 = vmatpush2.bf16.msra.mxu0 %v15994_v33  ;;  %v16017_v33 = vld [vmem:[#allocation8 + $0xb6c] ss:$16 sps:$4 sm:$0xff]   ;;  %v18125_v43 = vpop.f32.mrf.mxu0 }
 0x609   :  { %12959 = vmatprep.subr.bf16.mxu0 %v16002_v57  ;;  %v16012_v57 = vld [vmem:[#allocation8 + $0x968] ss:$16 sps:$4 sm:$0xff]  }
 0x60a   :  { %13031 = vmatpush2.bf16.msra.mxu1 %v15997_v11  ;;  %v18115_v11 = vpop.f32.mrf.mxu1  ;;  %v18131_v50 = vpop.f32.mrf.mxu0 }
 0x60b   :  { %13032 = vmatprep.subr.bf16.mxu1 %v16005_v45  ;;  %19081 = vst [vmem:[#allocation101_spill] sm:$0xff] %v18115_v11  ;;  %v16015_v45 = vld [vmem:[#allocation8 + $0xb68] ss:$16 sps:$4 sm:$0xff]   ;;  %v16032_v11 = vld [vmem:[#allocation8 + $0x90c] ss:$16 sps:$4 sm:$0xff]   ;;  %19084 = vst [vmem:[#allocation114_spill] sm:$0xff] %v18131_v50 }
 0x60c   :  { %12960 = vmatpush2.bf16.msra.mxu0 %v16000_v13  ;;  %v16023_v13 = vld [vmem:[#allocation8 + $0xb4c] ss:$16 sps:$4 sm:$0xff]  }
 0x60d   :  { %12961 = vmatprep.subr.bf16.mxu0 %v16008_v16  ;;  %v16018_v16 = vld [vmem:[#allocation8 + $0x948] ss:$16 sps:$4 sm:$0xff]  }
 0x60e   :  { %13033 = vmatpush2.bf16.msra.mxu1 %v16003_v61  ;;  %v18119_v61 = vpop.f32.mrf.mxu1 }
 0x60f   :  { %13034 = vmatprep.subr.bf16.mxu1 %v16011_v4  ;;  %v16021_v4 = vld [vmem:[#allocation8 + $0xb48] ss:$16 sps:$4 sm:$0xff]  }
 0x610   :  { %12962 = vmatpush2.bf16.msra.mxu0 %v16006_v24  ;;  %v16029_v24 = vld [vmem:[#allocation8 + $0xb2c] ss:$16 sps:$4 sm:$0xff]  }
 0x611   :  { %12963 = vmatprep.subr.bf16.mxu0 %v16014_v3  ;;  %v16024_v3 = vld [vmem:[#allocation8 + $0x928] ss:$16 sps:$4 sm:$0xff]  }
 0x612   :  { %13035 = vmatpush2.bf16.msra.mxu1 %v16009_v47  ;;  %v18123_v47 = vpop.f32.mrf.mxu1 }
 0x613   :  { %13036 = vmatprep.subr.bf16.mxu1 %v16017_v33  ;;  %19083 = vst [vmem:[#allocation90_spill] sm:$0xff] %v18123_v47  ;;  %v16027_v33 = vld [vmem:[#allocation8 + $0xb28] ss:$16 sps:$4 sm:$0xff]  }
 0x614   :  { %12964 = vmatpush2.bf16.msra.mxu0 %v16012_v57  ;;  %v16035_v57 = vld [vmem:[#allocation8 + $0xb0c] ss:$16 sps:$4 sm:$0xff]   ;;  %v16033_v47 = vld [vmem:[#allocation8 + $0xb08] ss:$16 sps:$4 sm:$0xff]  }
 0x615   :  { %12965 = vmatprep.subr.bf16.mxu0 %v16020_v41  ;;  %v12390_v41 = vadd.f32 %v18053_v39, %v17984_v20 }
 0x616   :  { %13037 = vmatpush2.bf16.msra.mxu1 %v16015_v45  ;;  %v18129_v45 = vpop.f32.mrf.mxu1 }
 0x617   :  { %13038 = vmatprep.subr.bf16.mxu1 %v16023_v13  ;;  %v16030_v13 = vld [vmem:[#allocation8 + $0x908] ss:$16 sps:$4 sm:$0xff]  }
 0x618   :  { %12966 = vmatpush2.bf16.msra.mxu0 %v16018_v16  ;;  %v16038_v16 = vld [vmem:[#allocation8 + $0xcec] ss:$16 sps:$4 sm:$0xff]   ;;  %v18136_v51 = vpop.f32.mrf.mxu1 }
 0x619   :  { %12967 = vmatprep.subr.bf16.mxu0 %v16026_v2  ;;  %v16041_v2 = vld [vmem:[#allocation8 + $0xeec] ss:$16 sps:$4 sm:$0xff]  }
 0x61a   :  { %13039 = vmatpush2.bf16.msra.mxu1 %v16021_v4  ;;  %v12463_v4 = vadd.f32 %v18056_v32, %v12390_v41  ;;  %v12400_v32 = vadd.f32 %v18077_v10, %v18002_v8  ;;  %v16045_v8 = vld [vmem:[#allocation8 + $0xec8] ss:$16 sps:$4 sm:$0xff]  }
 0x61b   :  { %13040 = vmatprep.subr.bf16.mxu1 %v16029_v24  ;;  %v12394_v24 = vadd.f32 %v18065_v19, %v17995_v48  ;;  %v16047_v48 = vld [vmem:[#allocation8 + $0xecc] ss:$16 sps:$4 sm:$0xff]  }
 0x61c   :  { %12968 = vmatpush2.bf16.msra.mxu0 %v16024_v3 }
 0x61d   :  { %12969 = vmatprep.subr.bf16.mxu0 %v16032_v11  ;;  %v16039_v11 = vld [vmem:[#allocation8 + $0xee8] ss:$16 sps:$4 sm:$0xff]   ;;  %v12467_v50 = vadd.f32 %v18068_v59, %v12394_v24 }
 0x61e   :  { %13041 = vmatpush2.bf16.msra.mxu1 %v16027_v33  ;;  %v16036_v33 = vld [vmem:[#allocation8 + $0xce8] ss:$16 sps:$4 sm:$0xff]  }
 0x61f   :  { %13042 = vmatprep.subr.bf16.mxu1 %v16035_v57  ;;  %v16044_v57 = vld [vmem:[#allocation8 + $0xccc] ss:$16 sps:$4 sm:$0xff]   ;;  %v16042_v59 = vld [vmem:[#allocation8 + $0xcc8] ss:$16 sps:$4 sm:$0xff]  }
 0x620   :  { %12970 = vmatpush2.bf16.msra.mxu0 %v16030_v13 }
 0x621   :  { %13085 = vmatprep.subr.bf16.mxu0 %v16038_v16 }
 0x622   :  { %13043 = vmatpush2.bf16.msra.mxu1 %v16033_v47 }
 0x623   :  { %v12535_v20 = vpop.f32.mrf.mxu0  ;;  %13158 = vmatprep.subr.bf16.mxu1 %v16041_v2  ;;  %12972 = vmatmul.mubr.bf16.vlgmr.msra.gmra.mxu0 %v18976_v31  ;;  %v16050_v31 = vld [vmem:[#allocation8 + $0xcac] ss:$16 sps:$4 sm:$0xff]   ;;  %v12473_v2 = vadd.f32 %v18080_v44, %v12400_v32 }
 0x624   :  { %v12536_v39 = vadd.f32 %v12535_v20, %v12463_v4  ;;  %12981 = vmatprep.mubr.bf16.mxu0 %v17753_v60  ;;  %13086 = vmatpush1.bf16.msra.mxu0 %v16036_v33  ;;  %v16048_v33 = vld [vmem:[#allocation8 + $0xca8] ss:$16 sps:$4 sm:$0xff]   ;;  %v16056_v44 = vld [vmem:[#allocation8 + $0xc8c] ss:$16 sps:$4 sm:$0xff]  }
 0x625   :  { %v12608_v3 = vpop.f32.mrf.mxu1  ;;  %v18138_v28 = vpop.f32.mrf.mxu0  ;;  %13045 = vmatmul.mubr.bf16.vlgmr.msra.gmra.mxu1 %v17321_v6  ;;  %13087 = vmatprep.subr.bf16.mxu0 %v16044_v57  ;;  %v12404_v6 = vadd.f32 %v18089_v52, %v18013_v53  ;;  %v12410_v52 = vadd.f32 %v18101_v62, %v18020_v1  ;;  %v16054_v1 = vld [vmem:[#allocation8 + $0xc88] ss:$16 sps:$4 sm:$0xff]  }
 0x626   :  { %v12609_v41 = vadd.f32 %v12608_v3, %v12536_v39  ;;  %13054 = vmatprep.mubr.bf16.mxu1 %v17758_v25  ;;  %13159 = vmatpush1.bf16.msra.mxu1 %v16039_v11  ;;  %v16053_v25 = vld [vmem:[#allocation8 + $0xeac] ss:$16 sps:$4 sm:$0xff]   ;;  %v16051_v11 = vld [vmem:[#allocation8 + $0xea8] ss:$16 sps:$4 sm:$0xff]  }
 0x627   :  { %v18144_v19 = vpop.f32.mrf.mxu1  ;;  %v12539_v47 = vpop.f32.mrf.mxu0  ;;  %13160 = vmatprep.subr.bf16.mxu1 %v16047_v48  ;;  %v12477_v53 = vadd.f32 %v18092_v14, %v12404_v6  ;;  %v16057_v62 = vld [vmem:[#allocation8 + $0xe88] ss:$16 sps:$4 sm:$0xff]  }
 0x628   :  { %v12540_v13 = vadd.f32 %v12539_v47, %v12467_v50  ;;  %v13231_v50 = vmax.f32 %v12609_v41, 0.0  ;;  %13088 = vmatpush1.bf16.msra.mxu0 %v16042_v59  ;;  %v16059_v47 = vld [vmem:[#allocation8 + $0xe8c] ss:$16 sps:$4 sm:$0xff]  }
 0x629   :  { %v12612_v16 = vpop.f32.mrf.mxu1  ;;  %v18149_v10 = vpop.f32.mrf.mxu0  ;;  %13089 = vmatprep.subr.bf16.mxu0 %v16050_v31  ;;  %v16062_v59 = vld [vmem:[#allocation8 + $0xc6c] ss:$16 sps:$4 sm:$0xff]  }
 0x62a   :  { %v12613_v60 = vadd.f32 %v12612_v16, %v12540_v13  ;;  %13161 = vmatpush1.bf16.msra.mxu1 %v16045_v8  ;;  %v12483_v8 = vadd.f32 %v18103_v27, %v12410_v52  ;;  %v16068_v27 = vld [vmem:[#allocation8 + $0xc4c] ss:$16 sps:$4 sm:$0xff]  }
 0x62b   :  { %v18154_v4 = vpop.f32.mrf.mxu1  ;;  %v12545_v24 = vpop.f32.mrf.mxu0  ;;  %12982 = vmatmul.mubr.bf16.gmra.mxu0 %v18980_v21  ;;  %13162 = vmatprep.subr.bf16.mxu1 %v16053_v25 }
 0x62c   :  { %v13235_v20 = vmax.f32 %v12613_v60, 0.0  ;;  %v12546_v39 = vadd.f32 %v12545_v24, %v12473_v2  ;;  %12991 = vmatprep.mubr.bf16.mxu0 %v17781_v63  ;;  %13090 = vmatpush1.bf16.msra.mxu0 %v16048_v33 }
 0x62d   :  { %v12618_v3 = vpop.f32.mrf.mxu1  ;;  %v18156_v57 = vpop.f32.mrf.mxu0  ;;  %13055 = vmatmul.mubr.bf16.gmra.mxu1 %v17336_v38  ;;  %13091 = vmatprep.subr.bf16.mxu0 %v16056_v44  ;;  %v12414_v38 = vadd.f32 %v18109_v58, %v18031_v0  ;;  %v12420_v0 = vadd.f32 %v18117_v56, %v18038_v29  ;;  %v16066_v56 = vld [vmem:[#allocation8 + $0xc48] ss:$16 sps:$4 sm:$0xff]  }
 0x62e   :  { %v18161_v32 = vpack.c.bf16 %v13235_v20, %v13231_v50  ;;  %v12619_v13 = vadd.f32 %v12618_v3, %v12546_v39  ;;  %13064 = vmatprep.mubr.bf16.mxu1 %v17787_v54  ;;  %13163 = vmatpush1.bf16.msra.mxu1 %v16051_v11  ;;  %v16065_v54 = vld [vmem:[#allocation8 + $0xe6c] ss:$16 sps:$4 sm:$0xff]   ;;  %v16060_v50 = vld [vmem:[#allocation8 + $0xc68] ss:$16 sps:$4 sm:$0xff]  }
 0x62f   :  { %v18164_v48 = vpop.f32.mrf.mxu1  ;;  %v12549_v41 = vpop.f32.mrf.mxu0  ;;  %13164 = vmatprep.subr.bf16.mxu1 %v16059_v47  ;;  %v16063_v20 = vld [vmem:[#allocation8 + $0xe68] ss:$16 sps:$4 sm:$0xff]   ;;  %v12487_v58 = vadd.f32 %v18111_v36, %v12414_v38  ;;  %v16071_v11 = vld [vmem:[#allocation8 + $0xe4c] ss:$16 sps:$4 sm:$0xff]  }
 0x630   :  { %v12550_v14 = vadd.f32 %v12549_v41, %v12477_v53  ;;  %v13239_v6 = vmax.f32 %v12619_v13, 0.0  ;;  %13092 = vmatpush1.bf16.msra.mxu0 %v16054_v1  ;;  %v16069_v29 = vld [vmem:[#allocation8 + $0xe48] ss:$16 sps:$4 sm:$0xff]   ;;  %v16074_v47 = vld [vmem:[#allocation8 + $0xc2c] ss:$16 sps:$4 sm:$0xff]   ;;  %v12493_v41 = vadd.f32 %v18119_v61, %v12420_v0 }
 0x631   :  { %v12622_v16 = vpop.f32.mrf.mxu1  ;;  %v18169_v21 = vpop.f32.mrf.mxu0  ;;  %13093 = vmatprep.subr.bf16.mxu0 %v16062_v59  ;;  %v16075_v38 = vld [vmem:[#allocation8 + $0xe28] ss:$16 sps:$4 sm:$0xff]   ;;  %v16080_v61 = vld [vmem:[#allocation8 + $0xc0c] ss:$16 sps:$4 sm:$0xff]  }
 0x632   :  { %v12623_v63 = vadd.f32 %v12622_v16, %v12550_v14  ;;  %13165 = vmatpush1.bf16.msra.mxu1 %v16057_v62 }
 0x633   :  { %v18174_v31 = vpop.f32.mrf.mxu1  ;;  %v12555_v2 = vpop.f32.mrf.mxu0  ;;  %12992 = vmatmul.mubr.bf16.gmra.mxu0 %v18982_v46  ;;  %13166 = vmatprep.subr.bf16.mxu1 %v16065_v54 }
 0x634   :  { %v13243_v60 = vmax.f32 %v12623_v63, 0.0  ;;  %v12556_v25 = vadd.f32 %v12555_v2, %v12483_v8  ;;  %13001 = vmatprep.mubr.bf16.mxu0 %v17810_v34  ;;  %13094 = vmatpush1.bf16.msra.mxu0 %v16060_v50  ;;  %v16072_v8 = vld [vmem:[#allocation8 + $0xc28] ss:$16 sps:$4 sm:$0xff]   ;;  %v16083_v2 = vld [vmem:[#allocation8 + $0xe0c] ss:$16 sps:$4 sm:$0xff]  }
 0x635   :  { %v12628_v24 = vpop.f32.mrf.mxu1  ;;  %v18176_v39 = vpop.f32.mrf.mxu0  ;;  %13065 = vmatmul.mubr.bf16.gmra.mxu1 %v17351_v22  ;;  %13095 = vmatprep.subr.bf16.mxu0 %v16068_v27  ;;  %v12424_v22 = vadd.f32 %v18125_v43, %v18047_v26  ;;  %v16081_v50 = vld [vmem:[#allocation8 + $0xe08] ss:$16 sps:$4 sm:$0xff]   ;;  %v16089_v27 = vld [vmem:[#allocation8 + $0xfec] ss:$16 sps:$4 sm:$0xff]  }
 0x636   :  { %v18181_v3 = vpack.c.bf16 %v13243_v60, %v13239_v6  ;;  %v12629_v53 = vadd.f32 %v12628_v24, %v12556_v25  ;;  %13074 = vmatprep.mubr.bf16.mxu1 %v17816_v7  ;;  %13167 = vmatpush1.bf16.msra.mxu1 %v16063_v20  ;;  %v16077_v7 = vld [vmem:[#allocation8 + $0xe2c] ss:$16 sps:$4 sm:$0xff]   ;;  %v16078_v24 = vld [vmem:[#allocation8 + $0xc08] ss:$16 sps:$4 sm:$0xff]  }
 0x637   :  { %v18184_v33 = vpop.f32.mrf.mxu1  ;;  %v12559_v44 = vpop.f32.mrf.mxu0  ;;  %13168 = vmatprep.subr.bf16.mxu1 %v16071_v11  ;;  %v12497_v43 = vadd.f32 %v18129_v45, %v12424_v22  ;;  %v16092_v11 = vld [vmem:[#allocation8 + $0xdcc] ss:$16 sps:$4 sm:$0xff]  }
 0x638   :  { %v12560_v36 = vadd.f32 %v12559_v44, %v12487_v58  ;;  %v13247_v16 = vmax.f32 %v12629_v53, 0.0  ;;  %13096 = vmatpush1.bf16.msra.mxu0 %v16066_v56  ;;  %v16090_v53 = vld [vmem:[#allocation8 + $0xdc8] ss:$16 sps:$4 sm:$0xff]   ;;  %v16101_v56 = vld [vmem:[#allocation8 + $0xfac] ss:$16 sps:$4 sm:$0xff]  }
 0x639   :  { %v12632_v52 = vpop.f32.mrf.mxu1  ;;  %v18189_v46 = vpop.f32.mrf.mxu0  ;;  %13097 = vmatprep.subr.bf16.mxu0 %v16074_v47  ;;  %v16099_v47 = vld [vmem:[#allocation8 + $0xfa8] ss:$16 sps:$4 sm:$0xff]   ;;  %v16107_v22 = vld [vmem:[#allocation8 + $0xf8c] ss:$16 sps:$4 sm:$0xff]  }
 0x63a   :  { %v12633_v34 = vadd.f32 %v12632_v52, %v12560_v36  ;;  %13169 = vmatpush1.bf16.msra.mxu1 %v16069_v29  ;;  %v16093_v36 = vld [vmem:[#allocation8 + $0xfc8] ss:$16 sps:$4 sm:$0xff]   ;;  %v16098_v52 = vld [vmem:[#allocation8 + $0xdac] ss:$16 sps:$4 sm:$0xff]  }
 0x63b   :  { %v18194_v13 = vpop.f32.mrf.mxu1  ;;  %v12565_v14 = vpop.f32.mrf.mxu0  ;;  %13002 = vmatmul.mubr.bf16.gmra.mxu0 %v18984_v23  ;;  %13170 = vmatprep.subr.bf16.mxu1 %v16077_v7  ;;  %v16086_v23 = vld [vmem:[#allocation8 + $0xdec] ss:$16 sps:$4 sm:$0xff]   ;;  %v16096_v29 = vld [vmem:[#allocation8 + $0xda8] ss:$16 sps:$4 sm:$0xff]  }
 0x63c   :  { %v13251_v1 = vmax.f32 %v12633_v34, 0.0  ;;  %v12566_v62 = vadd.f32 %v12565_v14, %v12493_v41  ;;  %13117 = vmatprep.mubr.bf16.mxu0 %v17835_v17  ;;  %13098 = vmatpush1.bf16.msra.mxu0 %v16072_v8  ;;  %v16087_v17 = vld [vmem:[#allocation8 + $0xfe8] ss:$16 sps:$4 sm:$0xff]   ;;  %v16104_v41 = vld [vmem:[#allocation8 + $0xd8c] ss:$16 sps:$4 sm:$0xff]  }
 0x63d   :  { %v12638_v59 = vpop.f32.mrf.mxu1  ;;  %v18196_v63 = vpop.f32.mrf.mxu0  ;;  %13075 = vmatmul.mubr.bf16.gmra.mxu1 %v18986_v55  ;;  %13099 = vmatprep.subr.bf16.mxu0 %v16080_v61  ;;  %v16084_v55 = vld [vmem:[#allocation8 + $0xde8] ss:$16 sps:$4 sm:$0xff]   ;;  %v16110_v14 = vld [vmem:[#allocation8 + $0xd6c] ss:$16 sps:$4 sm:$0xff]  }
 0x63e   :  { %v18199_v26 = vpack.c.bf16 %v13251_v1, %v13247_v16  ;;  %v12639_v60 = vadd.f32 %v12638_v59, %v12566_v62  ;;  %13190 = vmatprep.mubr.bf16.mxu1 %v17838_v15  ;;  %13171 = vmatpush1.bf16.msra.mxu1 %v16075_v38  ;;  %v16095_v15 = vld [vmem:[#allocation8 + $0xfcc] ss:$16 sps:$4 sm:$0xff]   ;;  %v16102_v34 = vld [vmem:[#allocation8 + $0xd88] ss:$16 sps:$4 sm:$0xff]  }
 0x63f   :  { %v18202_v54 = vpop.f32.mrf.mxu1  ;;  %v12569_v6 = vpop.f32.mrf.mxu0  ;;  %13172 = vmatprep.subr.bf16.mxu1 %v16083_v2  ;;  %v16105_v7 = vld [vmem:[#allocation8 + $0xf88] ss:$16 sps:$4 sm:$0xff]   ;;  %v16113_v16 = vld [vmem:[#allocation8 + $0xf6c] ss:$16 sps:$4 sm:$0xff]  }
 0x640   :  { %v12570_v25 = vadd.f32 %v12569_v6, %v12497_v43  ;;  %v13255_v58 = vmax.f32 %v12639_v60, 0.0  ;;  %13100 = vmatpush1.bf16.msra.mxu0 %v16078_v24  ;;  %v16108_v1 = vld [vmem:[#allocation8 + $0xd68] ss:$16 sps:$4 sm:$0xff]   ;;  %v16116_v59 = vld [vmem:[#allocation8 + $0xd4c] ss:$16 sps:$4 sm:$0xff]  }
 0x641   :  { %v12642_v45 = vpop.f32.mrf.mxu1  ;;  %13101 = vmatprep.subr.bf16.mxu0 %v16086_v23  ;;  %v16111_v62 = vld [vmem:[#allocation8 + $0xf68] ss:$16 sps:$4 sm:$0xff]   ;;  %v16119_v8 = vld [vmem:[#allocation8 + $0xf4c] ss:$16 sps:$4 sm:$0xff]  }
 0x642   :  { %v12643_v20 = vadd.f32 %v12642_v45, %v12570_v25  ;;  %13173 = vmatpush1.bf16.msra.mxu1 %v16081_v50  ;;  %v16114_v38 = vld [vmem:[#allocation8 + $0xd48] ss:$16 sps:$4 sm:$0xff]   ;;  %v16122_v43 = vld [vmem:[#allocation8 + $0xd2c] ss:$16 sps:$4 sm:$0xff]   ;;  %v12104_v45 = vadd.f32 %v17909_v49, %v17879_v37 }
 0x643   :  { %13174 = vmatprep.subr.bf16.mxu1 %v16089_v27  ;;  %v16117_v61 = vld [vmem:[#allocation8 + $0xf48] ss:$16 sps:$4 sm:$0xff]   ;;  %v16125_v2 = vld [vmem:[#allocation8 + $0xf2c] ss:$16 sps:$4 sm:$0xff]  }
 0x644   :  { %v13259_v0 = vmax.f32 %v12643_v20, 0.0  ;;  %13102 = vmatpush2.bf16.msra.mxu0 %v16084_v55  ;;  %v16120_v6 = vld [vmem:[#allocation8 + $0xd28] ss:$16 sps:$4 sm:$0xff]   ;;  %v16128_v25 = vld [vmem:[#allocation8 + $0xd0c] ss:$16 sps:$4 sm:$0xff]   ;;  %v18214_v55 = vpop.f32.mrf.mxu0  ;;  %v12177_v49 = vadd.f32 %v17913_v12, %v12104_v45  ;;  %v12246_v12 = vadd.f32 %v17982_v9, %v17905_v40 }
 0x645   :  { %13103 = vmatprep.subr.bf16.mxu0 %v16092_v11  ;;  %v16123_v60 = vld [vmem:[#allocation8 + $0xf28] ss:$16 sps:$4 sm:$0xff]   ;;  %v16131_v24 = vld [vmem:[#allocation8 + $0xf0c] ss:$16 sps:$4 sm:$0xff]   ;;  %v16170_v20 = vld [vmem:[#allocation10] sm:$0xf] }
 0x646   :  { %v18207_v44 = vpack.c.bf16 %v13259_v0, %v13255_v58  ;;  %13175 = vmatpush2.bf16.msra.mxu1 %v16087_v17  ;;  %v16126_v50 = vld [vmem:[#allocation8 + $0xd08] ss:$16 sps:$4 sm:$0xff]   ;;  %v16132_v0 = vld [vmem:[#allocation11 + $0x78] sm:$0xff]   ;;  %v18216_v17 = vpop.f32.mrf.mxu1  ;;  %v19086_v11 = vld [vmem:[#allocation57_spill] sm:$0xff] }
 0x647   :  { %13176 = vmatprep.subr.bf16.mxu1 %v16095_v15  ;;  %v16129_v23 = vld [vmem:[#allocation8 + $0xf08] ss:$16 sps:$4 sm:$0xff]   ;;  %v18219_v15 = vrot.slane %v16170_v20, %v19086_v11 }
 0x648   :  { %13104 = vmatpush2.bf16.msra.mxu0 %v16090_v53  ;;  %v19085_v27 = vld [vmem:[#allocation56_spill] sm:$0xff] }
 0x649   :  { %13105 = vmatprep.subr.bf16.mxu0 %v16098_v52  ;;  %v18212_v58 = vrot.slane %v16170_v20, %v19085_v27  ;;  %v16137_v20 = vld [vmem:[#allocation11 + $0x28] sm:$0xff]  }
 0x64a   :  { %13177 = vmatpush2.bf16.msra.mxu1 %v16093_v36  ;;  %v19092_v27 = vld [vmem:[#allocation24_spill] sm:$0xff] }
 0x64b   :  { %13178 = vmatprep.subr.bf16.mxu1 %v16101_v56  ;;  %v16133_v56 = vld [vmem:[#allocation11 + $0x38] sm:$0xff]  }
 0x64c   :  { %13106 = vmatpush2.bf16.msra.mxu0 %v16096_v29  ;;  %v12250_v29 = vadd.f32 %v17993_v18, %v12177_v49  ;;  %v12114_v18 = vadd.f32 %v17936_v5, %v17879_v37  ;;  %v19089_v5 = vld [vmem:[#allocation116_spill] sm:$0xff] }
 0x64d   :  { %13107 = vmatprep.subr.bf16.mxu0 %v16104_v41  ;;  %v16134_v41 = vld [vmem:[#allocation11 + $0x70] sm:$0xff]   ;;  %v16138_v49 = vld [vmem:[#allocation11 + $0x60] sm:$0xff]  }
 0x64e   :  { %13179 = vmatpush2.bf16.msra.mxu1 %v16099_v47 }
 0x64f   :  { %13180 = vmatprep.subr.bf16.mxu1 %v16107_v22 }
 0x650   :  { %13108 = vmatpush2.bf16.msra.mxu0 %v16102_v34 }
 0x651   :  { %13109 = vmatprep.subr.bf16.mxu0 %v16110_v14 }
 0x652   :  { %13181 = vmatpush2.bf16.msra.mxu1 %v16105_v7 }
 0x653   :  { %13182 = vmatprep.subr.bf16.mxu1 %v16113_v16  ;;  %v19087_v16 = vld [vmem:[#allocation58_spill] sm:$0xff] }
 0x654   :  { %13110 = vmatpush2.bf16.msra.mxu0 %v16108_v1 }
 0x655   :  { %13111 = vmatprep.subr.bf16.mxu0 %v16116_v59  ;;  %v16135_v59 = vld [vmem:[#allocation11 + $0x30] sm:$0xff]  }
 0x656   :  { %13183 = vmatpush2.bf16.msra.mxu1 %v16111_v62 }
 0x657   :  { %13184 = vmatprep.subr.bf16.mxu1 %v16119_v8  ;;  %v19088_v8 = vld [vmem:[#allocation54_spill] sm:$0xff] }
 0x658   :  { %13112 = vmatpush2.bf16.msra.mxu0 %v16114_v38  ;;  %v12323_v38 = vadd.f32 %v19088_v8, %v12250_v29  ;;  %v19101_v8 = vld [vmem:[#allocation82_spill] sm:$0xff] }
 0x659   :  { %13113 = vmatprep.subr.bf16.mxu0 %v16122_v43  ;;  %v12319_v43 = vadd.f32 %v19089_v5, %v12246_v12 }
 0x65a   :  { %13185 = vmatpush2.bf16.msra.mxu1 %v16117_v61 }
 0x65b   :  { %13186 = vmatprep.subr.bf16.mxu1 %v16125_v2  ;;  %v19090_v2 = vld [vmem:[#allocation121_spill] sm:$0xff] }
 0x65c   :  { %13114 = vmatpush2.bf16.msra.mxu0 %v16120_v6  ;;  %v12396_v6 = vadd.f32 %v19090_v2, %v12323_v38 }
 0x65d   :  { %13115 = vmatprep.subr.bf16.mxu0 %v16128_v25  ;;  %v19091_v25 = vld [vmem:[#allocation50_spill] sm:$0xff] }
 0x65e   :  { %13187 = vmatpush2.bf16.msra.mxu1 %v16123_v60 }
 0x65f   :  { %13188 = vmatprep.subr.bf16.mxu1 %v16131_v24  ;;  %v12187_v24 = vadd.f32 %v19091_v25, %v12114_v18  ;;  %v19098_v18 = vld [vmem:[#allocation80_spill] sm:$0xff] }
 0x660   :  { %13116 = vmatpush2.bf16.msra.mxu0 %v16126_v50 }
 0x661   :  { %15269 = vmatprep.subr.bf16.mxu0 %v16132_v0  ;;  %v12392_v0 = vadd.f32 %v19092_v27, %v12319_v43 }
 0x662   :  { %13189 = vmatpush2.bf16.msra.mxu1 %v16129_v23 }
 0x663   :  { %v12681_v53 = vpop.f32.mrf.mxu0  ;;  %13118 = vmatmul.mubr.bf16.vlgmr.msra.gmra.mxu0 %v18999_v42 }
 0x664   :  { %v12682_v36 = vadd.f32 %v12681_v53, %v18212_v58  ;;  %13127 = vmatprep.mubr.bf16.mxu0 %v17891_v35  ;;  %15270 = vmatpush3.bf16.msra.mxu0 %v16133_v56  ;;  %v19093_v53 = vld [vmem:[#allocation117_spill] sm:$0xff]  ;;  %v19094_v56 = vld [vmem:[#allocation28_spill] sm:$0xff] }
 0x665   :  { %v12754_v52 = vpop.f32.mrf.mxu1  ;;  %v12683_v47 = vpop.f32.mrf.mxu0  ;;  %13191 = vmatmul.mubr.bf16.vlgmr.msra.gmra.mxu1 %v17792_v30  ;;  %15271 = vmatprep.subr.bf16.mxu0 %v16134_v41  ;;  %v16136_v30 = vld [vmem:[#allocation11 + $0x68] sm:$0xff]   ;;  %v19095_v41 = vld [vmem:[#allocation59_spill] sm:$0xff] }
 0x666   :  { %v18224_v22 = vadd.f32 %v12754_v52, %v12682_v36  ;;  %v12684_v34 = vadd.f32 %v12683_v47, %v18219_v15  ;;  %13200 = vmatprep.mubr.bf16.mxu1 %v19087_v16  ;;  %v12260_v36 = vadd.f32 %v19093_v53, %v12187_v24 }
 0x667   :  { %v12756_v7 = vpop.f32.mrf.mxu1  ;;  %v12685_v14 = vpop.f32.mrf.mxu0 }
 0x668   :  { %v18235_v1 = vadd.f32 %v12756_v7, %v12684_v34  ;;  %v12686_v42 = vadd.f32 %v12685_v14, %v18212_v58  ;;  %15272 = vmatpush3.bf16.msra.mxu0 %v16135_v59  ;;  %v12124_v34 = vadd.f32 %v19095_v41, %v17879_v37  ;;  %v19096_v7 = vld [vmem:[#allocation88_spill] sm:$0xff]  ;;  %v16141_v41 = vld [vmem:[#allocation11 + $0x18] sm:$0xff]  }
 0x669   :  { %v12758_v62 = vpop.f32.mrf.mxu1  ;;  %v12687_v40 = vpop.f32.mrf.mxu0  ;;  %15273 = vmatprep.subr.bf16.mxu0 %v16136_v30  ;;  %v12469_v12 = vadd.f32 %v19096_v7, %v12396_v6  ;;  %v19097_v14 = vld [vmem:[#allocation76_spill] sm:$0xff]  ;;  %v16140_v6 = vld [vmem:[#allocation11 + $0x58] sm:$0xff]  }
 0x66a   :  { %v18239_v9 = vadd.f32 %v12758_v62, %v12686_v42  ;;  %v12688_v35 = vadd.f32 %v12687_v40, %v18219_v15  ;;  %v19099_v42 = vld [vmem:[#allocation83_spill] sm:$0xff]  ;;  %v19100_v62 = vld [vmem:[#allocation78_spill] sm:$0xff] }
 0x66b   :  { %v12760_v61 = vpop.f32.mrf.mxu1  ;;  %v12691_v60 = vpop.f32.mrf.mxu0  ;;  %13128 = vmatmul.mubr.bf16.gmra.mxu0 %v19094_v56  ;;  %v12256_v59 = vadd.f32 %v19100_v62, %v19099_v42  ;;  %v12542_v43 = vadd.f32 %v18149_v10, %v12469_v12  ;;  %v19105_v56 = vld [vmem:[#allocation93_spill] sm:$0xff]  ;;  %v19107_v7 = vld [vmem:[#allocation110_spill] sm:$0xff]  ;;  %v19109_v62 = vld [vmem:[#allocation47_spill] sm:$0xff] }
 0x66c   :  { %v18245_v45 = vadd.f32 %v12760_v61, %v12688_v35  ;;  %v12692_v50 = vadd.f32 %v12691_v60, %v18212_v58  ;;  %13137 = vmatprep.mubr.bf16.mxu0 %v19098_v18  ;;  %15274 = vmatpush3.bf16.msra.mxu0 %v16137_v20  ;;  %v16139_v35 = vld [vmem:[#allocation11 + $0x20] sm:$0xff]   ;;  %v19102_v61 = vld [vmem:[#allocation97_spill] sm:$0xff] }
 0x66d   :  { %v12764_v23 = vpop.f32.mrf.mxu1  ;;  %v12693_v11 = vpop.f32.mrf.mxu0  ;;  %13201 = vmatmul.mubr.bf16.gmra.mxu1 %v19097_v14  ;;  %v12465_v5 = vadd.f32 %v19102_v61, %v12392_v0  ;;  %15275 = vmatprep.subr.bf16.mxu0 %v16138_v49  ;;  %v19103_v60 = vld [vmem:[#allocation91_spill] sm:$0xff]  ;;  %v19104_v20 = vld [vmem:[#allocation81_spill] sm:$0xff]  ;;  %v19106_v0 = vld [vmem:[#allocation124_spill] sm:$0xff]  ;;  %v12615_v14 = vadd.f32 %v18154_v4, %v12542_v43 }
 0x66e   :  { %v18250_v52 = vadd.f32 %v12764_v23, %v12692_v50  ;;  %v12694_v29 = vadd.f32 %v12693_v11, %v18219_v15  ;;  %13210 = vmatprep.mubr.bf16.mxu1 %v19101_v8  ;;  %v12333_v25 = vadd.f32 %v19103_v60, %v12260_v36  ;;  %v12197_v27 = vadd.f32 %v19104_v20, %v12124_v34  ;;  %v16142_v18 = vld [vmem:[#allocation11 + $0x50] sm:$0xff]   ;;  %v19112_v61 = vld [vmem:[#allocation115_spill] sm:$0xff] }
 0x66f   :  { %v12766_v47 = vpop.f32.mrf.mxu1  ;;  %v12695_v16 = vpop.f32.mrf.mxu0  ;;  %v12538_v11 = vadd.f32 %v18138_v28, %v12465_v5  ;;  %v19108_v28 = vld [vmem:[#allocation112_spill] sm:$0xff]  ;;  %v19113_v43 = vld [vmem:[#allocation41_spill] sm:$0xff] }
 0x670   :  { %v18262_v38 = vadd.f32 %v12766_v47, %v12694_v29  ;;  %v12696_v40 = vadd.f32 %v12695_v16, %v18212_v58  ;;  %v12329_v29 = vadd.f32 %v19105_v56, %v12256_v59  ;;  %v12406_v47 = vadd.f32 %v19106_v0, %v12333_v25  ;;  %15276 = vmatpush3.bf16.msra.mxu0 %v16139_v35  ;;  %v19111_v35 = vld [vmem:[#allocation108_spill] sm:$0xff]  ;;  %v19115_v60 = vld [vmem:[#allocation89_spill] sm:$0xff] }
 0x671   :  { %v12768_v30 = vpop.f32.mrf.mxu1  ;;  %v12697_v2 = vpop.f32.mrf.mxu0  ;;  %v12270_v12 = vadd.f32 %v19107_v7, %v12197_v27  ;;  %15277 = vmatprep.subr.bf16.mxu0 %v16140_v6  ;;  %v12266_v5 = vadd.f32 %v19112_v61, %v19111_v35  ;;  %v12611_v4 = vadd.f32 %v18144_v19, %v12538_v11  ;;  %v16143_v27 = vld [vmem:[#allocation11 + $0x10] sm:$0xff]   ;;  %v16144_v11 = vld [vmem:[#allocation11 + $0x48] sm:$0xff]  }
 0x672   :  { %v18268_v24 = vadd.f32 %v12768_v30, %v12696_v40  ;;  %v12698_v50 = vadd.f32 %v12697_v2, %v18219_v15  ;;  %v12402_v16 = vadd.f32 %v19108_v28, %v12329_v29  ;;  %v19110_v40 = vld [vmem:[#allocation92_spill] sm:$0xff]  ;;  %v19114_v2 = vld [vmem:[#allocation74_spill] sm:$0xff]  ;;  %v12479_v25 = vadd.f32 %v19115_v60, %v12406_v47 }
 0x673   :  { %v12770_v23 = vpop.f32.mrf.mxu1  ;;  %v12701_v53 = vpop.f32.mrf.mxu0  ;;  %13138 = vmatmul.mubr.bf16.gmra.mxu0 %v19109_v62  ;;  %v12134_v30 = vadd.f32 %v19110_v40, %v17879_v37  ;;  %v13236_v29 = vmax.f32 %v12615_v14, 0.0  ;;  %v19118_v0 = vld [vmem:[#allocation100_spill] sm:$0xff]  ;;  %v19120_v62 = vld [vmem:[#allocation85_spill] sm:$0xff] }
 0x674   :  { %v18275_v10 = vadd.f32 %v12770_v23, %v12698_v50  ;;  %v12702_v49 = vadd.f32 %v12701_v53, %v18212_v58  ;;  %13147 = vmatprep.mubr.bf16.mxu0 %v19114_v2  ;;  %v19116_v50 = vld [vmem:[#allocation107_spill] sm:$0xff]  ;;  %15278 = vmatpush3.bf16.msra.mxu0 %v16141_v41  ;;  %v19117_v53 = vld [vmem:[#allocation86_spill] sm:$0xff]  ;;  %v16145_v61 = vld [vmem:[#allocation11 + $0x8] sm:$0xff]  }
 0x675   :  { %v12774_v36 = vpop.f32.mrf.mxu1  ;;  %v12703_v34 = vpop.f32.mrf.mxu0  ;;  %13211 = vmatmul.mubr.bf16.gmra.mxu1 %v19113_v43  ;;  %v12343_v56 = vadd.f32 %v19117_v53, %v12270_v12  ;;  %15279 = vmatprep.subr.bf16.mxu0 %v16142_v18  ;;  %v19121_v12 = vld [vmem:[#allocation119_spill] sm:$0xff]  ;;  %v19122_v43 = vld [vmem:[#allocation120_spill] sm:$0xff] }
 0x676   :  { %v18281_v42 = vadd.f32 %v12774_v36, %v12702_v49  ;;  %v12704_v59 = vadd.f32 %v12703_v34, %v18219_v15  ;;  %13220 = vmatprep.mubr.bf16.mxu1 %v19116_v50  ;;  %v12475_v49 = vadd.f32 %v19118_v0, %v12402_v16  ;;  %v12552_v36 = vadd.f32 %v18169_v21, %v12479_v25  ;;  %v19119_v34 = vld [vmem:[#allocation109_spill] sm:$0xff]  ;;  %v19126_v53 = vld [vmem:[#allocation111_spill] sm:$0xff] }
 0x677   :  { %v12776_v8 = vpop.f32.mrf.mxu1  ;;  %v12705_v6 = vpop.f32.mrf.mxu0  ;;  %v12207_v28 = vadd.f32 %v19119_v34, %v12134_v30  ;;  %v12416_v14 = vadd.f32 %v19121_v12, %v12343_v56  ;;  %v19130_v34 = vld [vmem:[#allocation87_spill] sm:$0xff] }
 0x678   :  { %v18294_v23 = vadd.f32 %v12776_v8, %v12704_v59  ;;  %v12706_v20 = vadd.f32 %v12705_v6, %v18212_v58  ;;  %v12339_v59 = vadd.f32 %v19120_v62, %v12266_v5  ;;  %v13232_v8 = vmax.f32 %v12611_v4, 0.0  ;;  %15280 = vmatpush3.bf16.msra.mxu0 %v16143_v27  ;;  %v19123_v6 = vld [vmem:[#allocation95_spill] sm:$0xff]  ;;  %v19125_v27 = vld [vmem:[#allocation84_spill] sm:$0xff]  ;;  %v19131_v62 = vld [vmem:[#allocation113_spill] sm:$0xff] }
 0x679   :  { %v12778_v37 = vpop.f32.mrf.mxu1  ;;  %v12707_v19 = vpop.f32.mrf.mxu0  ;;  %v12548_v18 = vadd.f32 %v18156_v57, %v12475_v49  ;;  %v12280_v2 = vadd.f32 %v19122_v43, %v12207_v28  ;;  %15281 = vmatprep.subr.bf16.mxu0 %v16144_v11  ;;  %v16146_v4 = vld [vmem:[#allocation11 + $0x40] sm:$0xff]   ;;  %v12625_v25 = vadd.f32 %v18174_v31, %v12552_v36  ;;  %v19124_v57 = vld [vmem:[#allocation38_spill] sm:$0xff]  ;;  %v12276_v56 = vadd.f32 %v19126_v53, %v19125_v27 }
 0x67a   :  { %v18300_v47 = vadd.f32 %v12778_v37, %v12706_v20  ;;  %v12708_v41 = vadd.f32 %v12707_v19, %v18219_v15  ;;  %v12412_v60 = vadd.f32 %v19123_v6, %v12339_v59  ;;  %v13264_v30 = vpack.c.bf16 %v13236_v29, %v13232_v8  ;;  %v19127_v19 = vld [vmem:[#allocation65_spill] sm:$0xff] }
 0x67b   :  { %v12780_v7 = vpop.f32.mrf.mxu1  ;;  %v12711_v40 = vpop.f32.mrf.mxu0  ;;  %13148 = vmatmul.mubr.bf16.gmra.mxu0 %v19124_v57  ;;  %v19128_v29 = vld [vmem:[#allocation101_spill] sm:$0xff]  ;;  %v12621_v49 = vadd.f32 %v18164_v48, %v12548_v18  ;;  %v12353_v28 = vadd.f32 %v19130_v34, %v12280_v2 }
 0x67c   :  { %v18307_v35 = vadd.f32 %v12780_v7, %v12708_v41  ;;  %v12712_v21 = vadd.f32 %v12711_v40, %v18212_v58  ;;  %13574 = vmatprep.mubr.bf16.mxu0 %v13264_v30  ;;  %v12489_v11 = vadd.f32 %v19128_v29, %v12416_v14  ;;  %15282 = vmatpush3.bf16.msra.mxu0 %v16145_v61  ;;  %v16147_v7 = vld [vmem:[#allocation11] sm:$0xff]   ;;  %v13244_v40 = vmax.f32 %v12625_v25, 0.0  ;;  %v19134_v61 = vld [vmem:[#allocation114_spill] sm:$0xff] }
 0x67d   :  { %v12784_v16 = vpop.f32.mrf.mxu1  ;;  %v12713_v5 = vpop.f32.mrf.mxu0  ;;  %13221 = vmatmul.mubr.bf16.gmra.mxu1 %v19127_v19  ;;  %v12485_v59 = vadd.f32 %v19131_v62, %v12412_v60  ;;  %15283 = vmatprep.subr.bf16.mxu0 %v16146_v4  ;;  %v19133_v14 = vld [vmem:[#allocation96_spill] sm:$0xff]  ;;  %v13240_v43 = vmax.f32 %v12621_v49, 0.0  ;;  %v19136_v60 = vld [vmem:[#allocation125_spill] sm:$0xff]  ;;  %v16148_v4 = vld [vmem:[#allocation11 + $0xf8] sm:$0xff]  }
 0x67e   :  { %v18313_v50 = vadd.f32 %v12784_v16, %v12712_v21  ;;  %v12714_v20 = vadd.f32 %v12713_v5, %v18219_v15  ;;  %v12562_v12 = vadd.f32 %v18189_v46, %v12489_v11  ;;  %v12349_v18 = vadd.f32 %v19133_v14, %v12276_v56  ;;  %v16149_v25 = vld [vmem:[#allocation11 + $0xb8] sm:$0xff]   ;;  %v16150_v57 = vld [vmem:[#allocation11 + $0xf0] sm:$0xff]   ;;  %15309 = vmatprep.subr.bf16.mxu1 %v16148_v4  ;;  %v16155_v49 = vld [vmem:[#allocation11 + $0xa0] sm:$0xff]  }
 0x67f   :  { %v12786_v37 = vpop.f32.mrf.mxu1  ;;  %v12715_v0 = vpop.f32.mrf.mxu0  ;;  %v12558_v6 = vadd.f32 %v18176_v39, %v12485_v59  ;;  %v13268_v5 = vpack.c.bf16 %v13244_v40, %v13240_v43  ;;  %15310 = vmatpush3.bf16.msra.mxu1 %v16149_v25  ;;  %v16151_v39 = vld [vmem:[#allocation11 + $0xb0] sm:$0xff]   ;;  %v16161_v59 = vld [vmem:[#allocation11 + $0x88] sm:$0xff]   ;;  %v16163_v40 = vld [vmem:[#allocation11 + $0x80] sm:$0xff]  }
 0x680   :  { %v18322_v31 = vadd.f32 %v12786_v37, %v12714_v20  ;;  %v12716_v36 = vadd.f32 %v12715_v0, %v18212_v58  ;;  %v12426_v58 = vadd.f32 %v19134_v61, %v12353_v28  ;;  %15284 = vmatpush3.bf16.msra.mxu0 %v16147_v7  ;;  %v12422_v30 = vadd.f32 %v19136_v60, %v12349_v18  ;;  %v19137_v37 = vld [vmem:[#allocation90_spill] sm:$0xff]  ;;  %v16160_v28 = vld [vmem:[#allocation11 + $0xc8] sm:$0xff]  }
 0x681   :  { %v12788_v41 = vpop.f32.mrf.mxu1  ;;  %v12717_v8 = vpop.f32.mrf.mxu0  ;;  %v12635_v46 = vadd.f32 %v18194_v13, %v12562_v12  ;;  %v12631_v20 = vadd.f32 %v18184_v33, %v12558_v6  ;;  %15311 = vmatprep.subr.bf16.mxu1 %v16150_v57  ;;  %v16152_v13 = vld [vmem:[#allocation11 + $0xe8] sm:$0xff]   ;;  %v16154_v33 = vld [vmem:[#allocation11 + $0xe0] sm:$0xff]  }
 0x682   :  { %19129 = vst [vmem:[#allocation105_spill] sm:$0xff] %v18322_v31  ;;  %v18328_v21 = vadd.f32 %v12788_v41, %v12716_v36  ;;  %v12718_v48 = vadd.f32 %v12717_v8, %v18219_v15  ;;  %v12499_v15 = vadd.f32 %v18136_v51, %v12426_v58  ;;  %v12495_v27 = vadd.f32 %v19137_v37, %v12422_v30  ;;  %v16156_v36 = vld [vmem:[#allocation11 + $0xd8] sm:$0xff]  }
 0x683   :  { %v12790_v16 = vpop.f32.mrf.mxu1  ;;  %13575 = vmatmul.mubr.bf16.vlgmr.msra.gmra.mxu0 %v18161_v32  ;;  %v13252_v53 = vmax.f32 %v12635_v46, 0.0  ;;  %v13248_v19 = vmax.f32 %v12631_v20, 0.0  ;;  %15312 = vmatpush3.bf16.msra.mxu1 %v16151_v39  ;;  %v16153_v32 = vld [vmem:[#allocation11 + $0xa8] sm:$0xff]  }
 0x684   :  { %19132 = vst [vmem:[#allocation129_spill] sm:$0xff] %v18328_v21  ;;  %v18334_v2 = vadd.f32 %v12790_v16, %v12718_v48  ;;  %13582 = vmatprep.mubr.bf16.mxu0 %v13268_v5  ;;  %v12572_v56 = vadd.f32 %v18214_v55, %v12499_v15  ;;  %v12568_v0 = vadd.f32 %v18196_v63, %v12495_v27 }
 0x685   :  { %v13272_v29 = vpack.c.bf16 %v13252_v53, %v13248_v19  ;;  %15313 = vmatprep.subr.bf16.mxu1 %v16152_v13 }
 0x686   :  { %19135 = vst [vmem:[#allocation99_spill] sm:$0xff] %v18334_v2  ;;  %v12645_v51 = vadd.f32 %v18216_v17, %v12572_v56  ;;  %v12641_v11 = vadd.f32 %v18202_v54, %v12568_v0  ;;  %v16157_v17 = vld [vmem:[#allocation11 + $0x98] sm:$0xff]   ;;  %v16159_v54 = vld [vmem:[#allocation11 + $0x90] sm:$0xff]  }
 0x687   :  { %15314 = vmatpush3.bf16.msra.mxu1 %v16153_v32 }
 0x688   :  { %v13260_v55 = vmax.f32 %v12645_v51, 0.0  ;;  %15315 = vmatprep.subr.bf16.mxu1 %v16154_v33  ;;  %v13256_v41 = vmax.f32 %v12641_v11, 0.0 }
 0x68a   :  { %v13276_v63 = vpack.c.bf16 %v13260_v55, %v13256_v41 }
 0x68b   :  { %13583 = vmatmul.mubr.bf16.gmra.mxu0 %v18181_v3  ;;  %15316 = vmatpush3.bf16.msra.mxu1 %v16155_v49  ;;  %v16158_v3 = vld [vmem:[#allocation11 + $0xd0] sm:$0xff]  }
 0x68c   :  { %13590 = vmatprep.mubr.bf16.mxu0 %v13272_v29  ;;  %15317 = vmatprep.subr.bf16.mxu1 %v16156_v36 }
 0x68f   :  { %15318 = vmatpush3.bf16.msra.mxu1 %v16157_v17 }
 0x690   :  { %15319 = vmatprep.subr.bf16.mxu1 %v16158_v3 }
 0x693   :  { %13591 = vmatmul.mubr.bf16.gmra.mxu0 %v18199_v26  ;;  %15320 = vmatpush3.bf16.msra.mxu1 %v16159_v54  ;;  %v16162_v26 = vld [vmem:[#allocation11 + $0xc0] sm:$0xff]  }
 0x694   :  { %13598 = vmatprep.mubr.bf16.mxu0 %v13276_v63  ;;  %15321 = vmatprep.subr.bf16.mxu1 %v16160_v28 }
 0x697   :  { %15322 = vmatpush3.bf16.msra.mxu1 %v16161_v59 }
 0x698   :  { %15323 = vmatprep.subr.bf16.mxu1 %v16162_v26 }
 0x69b   :  { %13599 = vmatmul.mubr.bf16.gmra.mxu0 %v18207_v44  ;;  %15324 = vmatpush3.bf16.msra.mxu1 %v16163_v40 }
 0x6a3   :  { %v18349_v7 = vpop.f32.mrf.mxu0 }
 0x6a5   :  { %v18351_v34 = vpop.f32.mrf.mxu1  ;;  %v18353_v62 = vpop.f32.mrf.mxu0 }
 0x6a7   :  { %v18355_v8 = vpop.f32.mrf.mxu1  ;;  %v12831_v44 = vpop.f32.mrf.mxu0 }
 0x6a9   :  { %v18357_v12 = vpop.f32.mrf.mxu1  ;;  %v12833_v48 = vpop.f32.mrf.mxu0 }
 0x6ab   :  { %v18359_v14 = vpop.f32.mrf.mxu1  ;;  %v12837_v18 = vpop.f32.mrf.mxu0 }
 0x6ad   :  { %v18361_v16 = vpop.f32.mrf.mxu1  ;;  %v12839_v61 = vpop.f32.mrf.mxu0 }
 0x6af   :  { %v18363_v58 = vpop.f32.mrf.mxu1  ;;  %v18365_v43 = vpop.f32.mrf.mxu0 }
 0x6b1   :  { %v18367_v6 = vpop.f32.mrf.mxu1  ;;  %v18369_v60 = vpop.f32.mrf.mxu0 }
 0x6b3   :  { %v18371_v30 = vpop.f32.mrf.mxu1  ;;  %v18373_v5 = vpop.f32.mrf.mxu0 }
 0x6b5   :  { %v18375_v46 = vpop.f32.mrf.mxu1  ;;  %v18377_v4 = vpop.f32.mrf.mxu0 }
 0x6b7   :  { %v18379_v25 = vpop.f32.mrf.mxu1  ;;  %v18381_v57 = vpop.f32.mrf.mxu0 }
 0x6b9   :  { %v18383_v15 = vpop.f32.mrf.mxu1  ;;  %v18385_v20 = vpop.f32.mrf.mxu0 }
 0x6bb   :  { %v18387_v39 = vpop.f32.mrf.mxu1  ;;  %v18389_v37 = vpop.f32.mrf.mxu0 }
 0x6bc   :  { %19138 = vst [vmem:[#allocation123_spill] sm:$0xff] %v18387_v39  ;;  %v12828_v39 = vadd.f32 %v18349_v7, %v18224_v22  ;;  %v12838_v7 = vadd.f32 %v12837_v18, %v18250_v52  ;;  %v12844_v18 = vadd.f32 %v18369_v60, %v18275_v10  ;;  %v12850_v10 = vadd.f32 %v18377_v4, %v18294_v23 }
 0x6bd   :  { %v18391_v27 = vpop.f32.mrf.mxu1  ;;  %v18393_v53 = vpop.f32.mrf.mxu0 }
 0x6be   :  { %19139 = vst [vmem:[#allocation131_spill] sm:$0xff] %v18391_v27  ;;  %19140 = vst [vmem:[#allocation132_spill] sm:$0xff] %v18393_v53 }
 0x6bf   :  { %v18395_v56 = vpop.f32.mrf.mxu1  ;;  %v18397_v13 = vpop.f32.mrf.mxu0 }
 0x6c0   :  { %19141 = vst [vmem:[#allocation156_spill] sm:$0xff] %v18395_v56  ;;  %19142 = vst [vmem:[#allocation157_spill] sm:$0xff] %v18397_v13 }
 0x6c1   :  { %v18399_v19 = vpop.f32.mrf.mxu1  ;;  %v18401_v0 = vpop.f32.mrf.mxu0 }
 0x6c2   :  { %19143 = vst [vmem:[#allocation106_spill] sm:$0xff] %v18399_v19  ;;  %19144 = vst [vmem:[#allocation130_spill] sm:$0xff] %v18401_v0 }
 0x6c3   :  { %v18403_v32 = vpop.f32.mrf.mxu1 }
 0x6c4   :  { %19145 = vst [vmem:[#allocation133_spill] sm:$0xff] %v18403_v32 }
 0x6e3   :  { %v12973_v29 = vpop.f32.mrf.mxu0 }
 0x6e5   :  { %v13046_v51 = vpop.f32.mrf.mxu1  ;;  %v12975_v33 = vpop.f32.mrf.mxu0 }
 0x6e7   :  { %v13048_v11 = vpop.f32.mrf.mxu1  ;;  %v12977_v49 = vpop.f32.mrf.mxu0 }
 0x6e9   :  { %v13050_v55 = vpop.f32.mrf.mxu1  ;;  %v12979_v36 = vpop.f32.mrf.mxu0 }
 0x6eb   :  { %v13052_v41 = vpop.f32.mrf.mxu1  ;;  %v12983_v63 = vpop.f32.mrf.mxu0 }
 0x6ed   :  { %v18405_v17 = vpop.f32.mrf.mxu1  ;;  %v12985_v3 = vpop.f32.mrf.mxu0 }
 0x6ef   :  { %v18407_v54 = vpop.f32.mrf.mxu1  ;;  %v12987_v28 = vpop.f32.mrf.mxu0 }
 0x6f1   :  { %v18409_v59 = vpop.f32.mrf.mxu1  ;;  %v18411_v26 = vpop.f32.mrf.mxu0 }
 0x6f3   :  { %v18413_v40 = vpop.f32.mrf.mxu1  ;;  %v18415_v32 = vpop.f32.mrf.mxu0 }
 0x6f4   :  { %19146 = vst [vmem:[#allocation158_spill] sm:$0xff] %v18413_v40 }
 0x6f5   :  { %v18417_v19 = vpop.f32.mrf.mxu1  ;;  %v18419_v0 = vpop.f32.mrf.mxu0 }
 0x6f6   :  { %19147 = vst [vmem:[#allocation141_spill] sm:$0xff] %v18417_v19  ;;  %19148 = vst [vmem:[#allocation103_spill] sm:$0xff] %v18419_v0 }
 0x6f7   :  { %v18421_v2 = vpop.f32.mrf.mxu1  ;;  %v18423_v56 = vpop.f32.mrf.mxu0 }
 0x6f8   :  { %19149 = vst [vmem:[#allocation127_spill] sm:$0xff] %v18421_v2  ;;  %19150 = vst [vmem:[#allocation142_spill] sm:$0xff] %v18423_v56  ;;  %v12830_v2 = vadd.f32 %v18353_v62, %v18235_v1  ;;  %v12840_v62 = vadd.f32 %v12839_v61, %v18262_v38 }
 0x6f9   :  { %v18425_v13 = vpop.f32.mrf.mxu1  ;;  %v18427_v21 = vpop.f32.mrf.mxu0 }
 0x6fa   :  { %19151 = vst [vmem:[#allocation140_spill] sm:$0xff] %v18425_v13  ;;  %19152 = vst [vmem:[#allocation134_spill] sm:$0xff] %v18427_v21  ;;  %v12901_v13 = vadd.f32 %v18351_v34, %v12828_v39  ;;  %v12832_v21 = vadd.f32 %v12831_v44, %v18239_v9  ;;  %v12913_v38 = vadd.f32 %v18363_v58, %v12840_v62 }
 0x6fb   :  { %v18429_v27 = vpop.f32.mrf.mxu1  ;;  %v18431_v53 = vpop.f32.mrf.mxu0  ;;  %v12917_v58 = vadd.f32 %v18371_v30, %v12844_v18  ;;  %v12854_v62 = vadd.f32 %v18385_v20, %v18307_v35  ;;  %v19160_v18 = vld [vmem:[#allocation105_spill] sm:$0xff] }
 0x6fc   :  { %19153 = vst [vmem:[#allocation159_spill] sm:$0xff] %v18429_v27  ;;  %19154 = vst [vmem:[#allocation135_spill] sm:$0xff] %v18431_v53  ;;  %v12903_v27 = vadd.f32 %v18355_v8, %v12830_v2  ;;  %v12974_v53 = vadd.f32 %v12973_v29, %v12901_v13  ;;  %v12905_v22 = vadd.f32 %v18357_v12, %v12832_v21 }
 0x6fd   :  { %v18433_v31 = vpop.f32.mrf.mxu1  ;;  %v18437_v19 = vpop.f32.mrf.mxu0  ;;  %v12911_v8 = vadd.f32 %v18361_v16, %v12838_v7  ;;  %v12986_v16 = vadd.f32 %v12985_v3, %v12913_v38  ;;  %v12990_v30 = vadd.f32 %v18411_v26, %v12917_v58 }
 0x6fe   :  { %19155 = vst [vmem:[#allocation160_spill] sm:$0xff] %v18433_v31  ;;  %v12834_v31 = vadd.f32 %v12833_v48, %v18245_v45  ;;  %v12976_v1 = vadd.f32 %v12975_v33, %v12903_v27  ;;  %v13047_v34 = vadd.f32 %v13046_v51, %v12974_v53  ;;  %v12978_v44 = vadd.f32 %v12977_v49, %v12905_v22 }
 0x6ff   :  { %v18441_v40 = vpop.f32.mrf.mxu1  ;;  %v18445_v56 = vpop.f32.mrf.mxu0  ;;  %v12842_v45 = vadd.f32 %v18365_v43, %v18268_v24  ;;  %v12984_v61 = vadd.f32 %v12983_v63, %v12911_v8  ;;  %v12848_v24 = vadd.f32 %v18373_v5, %v18281_v42  ;;  %v12852_v5 = vadd.f32 %v18381_v57, %v18300_v47  ;;  %v19157_v8 = vld [vmem:[#allocation103_spill] sm:$0xff] }
 0x700   :  { %19156 = vst [vmem:[#allocation145_spill] sm:$0xff] %v18441_v40  ;;  %v12907_v9 = vadd.f32 %v18359_v14, %v12834_v31  ;;  %v13049_v21 = vadd.f32 %v13048_v11, %v12976_v1  ;;  %v13051_v14 = vadd.f32 %v13050_v55, %v12978_v44  ;;  %v19167_v58 = vld [vmem:[#allocation127_spill] sm:$0xff] }
 0x701   :  { %v18449_v0 = vpop.f32.mrf.mxu1  ;;  %v18454_v40 = vpop.f32.mrf.mxu0  ;;  %v12915_v13 = vadd.f32 %v18367_v6, %v12842_v45  ;;  %v13057_v55 = vadd.f32 %v18405_v17, %v12984_v61  ;;  %v12921_v42 = vadd.f32 %v18375_v46, %v12848_v24  ;;  %v12923_v17 = vadd.f32 %v18379_v25, %v12850_v10  ;;  %v19162_v61 = vld [vmem:[#allocation142_spill] sm:$0xff] }
 0x702   :  { %v12980_v12 = vadd.f32 %v12979_v36, %v12907_v9  ;;  %v12925_v45 = vadd.f32 %v18383_v15, %v12852_v5  ;;  %v19169_v5 = vld [vmem:[#allocation156_spill] sm:$0xff] }
 0x703   :  { %v18457_v39 = vpop.f32.mrf.mxu1  ;;  %v12988_v60 = vadd.f32 %v12987_v28, %v12915_v13  ;;  %v12994_v9 = vadd.f32 %v18415_v32, %v12921_v42  ;;  %v12996_v25 = vadd.f32 %v19157_v8, %v12923_v17 }
 0x704   :  { %v13053_v29 = vadd.f32 %v13052_v41, %v12980_v12  ;;  %v13059_v41 = vadd.f32 %v18407_v54, %v12986_v16  ;;  %v19158_v12 = vld [vmem:[#allocation158_spill] sm:$0xff] }
 0x705   :  { %v13061_v46 = vadd.f32 %v18409_v59, %v12988_v60  ;;  %v13063_v35 = vadd.f32 %v19158_v12, %v12990_v30  ;;  %v13069_v10 = vadd.f32 %v19167_v58, %v12996_v25  ;;  %v19168_v60 = vld [vmem:[#allocation134_spill] sm:$0xff]  ;;  %v19170_v30 = vld [vmem:[#allocation99_spill] sm:$0xff] }
 0x723   :  { %v13119_v2 = vpop.f32.mrf.mxu0 }
 0x724   :  { %v13120_v52 = vadd.f32 %v13119_v2, %v13047_v34  ;;  %v12858_v2 = vadd.f32 %v18389_v37, %v18313_v50 }
 0x725   :  { %v13192_v48 = vpop.f32.mrf.mxu1  ;;  %v13121_v31 = vpop.f32.mrf.mxu0 }
 0x726   :  { %v13122_v27 = vadd.f32 %v13121_v31, %v13049_v21  ;;  %v13193_v51 = vadd.f32 %v13192_v48, %v13120_v52  ;;  %v19159_v48 = vld [vmem:[#allocation123_spill] sm:$0xff]  ;;  %v19161_v31 = vld [vmem:[#allocation132_spill] sm:$0xff] }
 0x727   :  { %v13194_v53 = vpop.f32.mrf.mxu1  ;;  %v13123_v43 = vpop.f32.mrf.mxu0  ;;  %v12927_v38 = vadd.f32 %v19159_v48, %v12854_v62 }
 0x728   :  { %v13124_v33 = vadd.f32 %v13123_v43, %v13051_v14  ;;  %v13195_v36 = vadd.f32 %v13194_v53, %v13122_v27  ;;  %v13233_v7 = vmax.f32 %v13193_v51, 0.0  ;;  %v12860_v14 = vadd.f32 %v19161_v31, %v19160_v18  ;;  %v19163_v53 = vld [vmem:[#allocation141_spill] sm:$0xff]  ;;  %v19164_v43 = vld [vmem:[#allocation131_spill] sm:$0xff] }
 0x729   :  { %v13196_v11 = vpop.f32.mrf.mxu1  ;;  %v13125_v49 = vpop.f32.mrf.mxu0  ;;  %v12998_v27 = vadd.f32 %v19162_v61, %v12925_v45  ;;  %v13067_v13 = vadd.f32 %v19163_v53, %v12994_v9  ;;  %v19165_v51 = vld [vmem:[#allocation129_spill] sm:$0xff]  ;;  %v19175_v45 = vld [vmem:[#allocation159_spill] sm:$0xff] }
 0x72a   :  { %v13197_v6 = vadd.f32 %v13196_v11, %v13124_v33  ;;  %v13126_v63 = vadd.f32 %v13125_v49, %v13053_v29  ;;  %v13234_v57 = vmax.f32 %v13195_v36, 0.0  ;;  %v12931_v29 = vadd.f32 %v19164_v43, %v12858_v2  ;;  %v19166_v33 = vld [vmem:[#allocation157_spill] sm:$0xff] }
 0x72b   :  { %v13198_v22 = vpop.f32.mrf.mxu1  ;;  %v13129_v3 = vpop.f32.mrf.mxu0  ;;  %v12862_v11 = vadd.f32 %v19166_v33, %v19165_v51  ;;  %v13000_v49 = vadd.f32 %v19168_v60, %v12927_v38 }
 0x72c   :  { %v13237_v23 = vmax.f32 %v13197_v6, 0.0  ;;  %v13199_v4 = vadd.f32 %v13198_v22, %v13126_v63  ;;  %v13130_v28 = vadd.f32 %v13129_v3, %v13057_v55  ;;  %v19171_v3 = vld [vmem:[#allocation130_spill] sm:$0xff] }
 0x72d   :  { %v13202_v1 = vpop.f32.mrf.mxu1  ;;  %v13131_v47 = vpop.f32.mrf.mxu0  ;;  %v13073_v2 = vadd.f32 %v19175_v45, %v13000_v49 }
 0x72e   :  { %v13265_v54 = vpack.c.bf16 %v13237_v23, %v13233_v7  ;;  %v13238_v34 = vmax.f32 %v13199_v4, 0.0  ;;  %v13132_v26 = vadd.f32 %v13131_v47, %v13059_v41  ;;  %v13203_v59 = vadd.f32 %v13202_v1, %v13130_v28  ;;  %v19172_v23 = vld [vmem:[#allocation140_spill] sm:$0xff]  ;;  %v19173_v28 = vld [vmem:[#allocation135_spill] sm:$0xff] }
 0x72f   :  { %v13204_v44 = vpop.f32.mrf.mxu1  ;;  %v13133_v21 = vpop.f32.mrf.mxu0  ;;  %v12933_v41 = vadd.f32 %v19169_v5, %v12860_v14  ;;  %v12864_v7 = vadd.f32 %v19171_v3, %v19170_v30  ;;  %v13071_v4 = vadd.f32 %v19172_v23, %v12998_v27  ;;  %v13004_v1 = vadd.f32 %v19173_v28, %v12931_v29 }
 0x730   :  { %v13266_v20 = vpack.c.bf16 %v13238_v34, %v13234_v57  ;;  %v13134_v52 = vadd.f32 %v13133_v21, %v13061_v46  ;;  %v13205_v50 = vadd.f32 %v13204_v44, %v13132_v26  ;;  %v13241_v36 = vmax.f32 %v13203_v59, 0.0 }
 0x731   :  { %v13206_v32 = vpop.f32.mrf.mxu1  ;;  %v13135_v15 = vpop.f32.mrf.mxu0  ;;  %v13006_v26 = vadd.f32 %v18437_v19, %v12933_v41  ;;  %v19178_v19 = vld [vmem:[#allocation145_spill] sm:$0xff] }
 0x732   :  { %v13207_v37 = vadd.f32 %v13206_v32, %v13134_v52  ;;  %v13136_v24 = vadd.f32 %v13135_v15, %v13063_v35  ;;  %13639 = vmatprep.mubr.bf16.mxu1 %v13266_v20  ;;  %v13242_v62 = vmax.f32 %v13205_v50, 0.0  ;;  %v19176_v35 = vld [vmem:[#allocation133_spill] sm:$0xff]  ;;  %v19177_v32 = vld [vmem:[#allocation160_spill] sm:$0xff] }
 0x733   :  { %v13208_v16 = vpop.f32.mrf.mxu1  ;;  %v13139_v55 = vpop.f32.mrf.mxu0  ;;  %13640 = vmatmul.mubr.bf16.vlgmr.msra.gmra.mxu1 %v13265_v54  ;;  %v19174_v54 = vld [vmem:[#allocation106_spill] sm:$0xff]  ;;  %v12937_v20 = vadd.f32 %v19176_v35, %v12864_v7  ;;  %v13077_v48 = vadd.f32 %v19177_v32, %v13004_v1  ;;  %v13079_v61 = vadd.f32 %v19178_v19, %v13006_v26 }
 0x734   :  { %v13245_v6 = vmax.f32 %v13207_v37, 0.0  ;;  %v13209_v63 = vadd.f32 %v13208_v16, %v13136_v24  ;;  %v13140_v22 = vadd.f32 %v13139_v55, %v13067_v13  ;;  %v12935_v34 = vadd.f32 %v19174_v54, %v12862_v11  ;;  %v15236_v54 = vld [vmem:[#allocation13] ss:$0 sm:$0xff] }
 0x735   :  { %v13212_v42 = vpop.f32.mrf.mxu1  ;;  %v13141_v17 = vpop.f32.mrf.mxu0  ;;  %v13010_v27 = vadd.f32 %v18454_v40, %v12937_v20 }
 0x736   :  { %v13269_v46 = vpack.c.bf16 %v13245_v6, %v13241_v36  ;;  %v13246_v9 = vmax.f32 %v13209_v63, 0.0  ;;  %v13142_v47 = vadd.f32 %v13141_v17, %v13069_v10  ;;  %v13213_v25 = vadd.f32 %v13212_v42, %v13140_v22 }
 0x737   :  { %v13214_v57 = vpop.f32.mrf.mxu1  ;;  %v13143_v44 = vpop.f32.mrf.mxu0  ;;  %v13008_v59 = vadd.f32 %v18445_v56, %v12935_v34  ;;  %v13083_v10 = vadd.f32 %v18457_v39, %v13010_v27 }
 0x738   :  { %v13270_v8 = vpack.c.bf16 %v13246_v9, %v13242_v62  ;;  %v13144_v21 = vadd.f32 %v13143_v44, %v13071_v4  ;;  %v13215_v38 = vadd.f32 %v13214_v57, %v13142_v47  ;;  %v13249_v53 = vmax.f32 %v13213_v25, 0.0 }
 0x739   :  { %v13216_v12 = vpop.f32.mrf.mxu1  ;;  %v13145_v52 = vpop.f32.mrf.mxu0  ;;  %v13081_v56 = vadd.f32 %v18449_v0, %v13008_v59 }
 0x73a   :  { %v13217_v18 = vadd.f32 %v13216_v12, %v13144_v21  ;;  %v13146_v31 = vadd.f32 %v13145_v52, %v13073_v2  ;;  %13647 = vmatprep.mubr.bf16.mxu1 %v13270_v8  ;;  %v13250_v43 = vmax.f32 %v13215_v38, 0.0 }
 0x73b   :  { %v13218_v14 = vpop.f32.mrf.mxu1  ;;  %v13149_v15 = vpop.f32.mrf.mxu0  ;;  %13648 = vmatmul.mubr.bf16.gmra.mxu1 %v13269_v46 }
 0x73c   :  { %v13253_v13 = vmax.f32 %v13217_v18, 0.0  ;;  %v13219_v50 = vadd.f32 %v13218_v14, %v13146_v31  ;;  %v13150_v37 = vadd.f32 %v13149_v15, %v13077_v48 }
 0x73d   :  { %v13222_v24 = vpop.f32.mrf.mxu1  ;;  %v13151_v16 = vpop.f32.mrf.mxu0 }
 0x73e   :  { %v13273_v29 = vpack.c.bf16 %v13253_v13, %v13249_v53  ;;  %v13254_v51 = vmax.f32 %v13219_v50, 0.0  ;;  %v13152_v33 = vadd.f32 %v13151_v16, %v13079_v61  ;;  %v13223_v40 = vadd.f32 %v13222_v24, %v13150_v37 }
 0x73f   :  { %v13224_v11 = vpop.f32.mrf.mxu1  ;;  %v13153_v58 = vpop.f32.mrf.mxu0 }
 0x740   :  { %v13274_v60 = vpack.c.bf16 %v13254_v51, %v13250_v43  ;;  %v13154_v49 = vadd.f32 %v13153_v58, %v13081_v56  ;;  %v13225_v6 = vadd.f32 %v13224_v11, %v13152_v33  ;;  %v13257_v0 = vmax.f32 %v13223_v40, 0.0 }
 0x741   :  { %v13226_v55 = vpop.f32.mrf.mxu1  ;;  %v13155_v36 = vpop.f32.mrf.mxu0 }
 0x742   :  { %v13227_v63 = vadd.f32 %v13226_v55, %v13154_v49  ;;  %v13156_v22 = vadd.f32 %v13155_v36, %v13083_v10  ;;  %13655 = vmatprep.mubr.bf16.mxu1 %v13274_v60  ;;  %v13258_v30 = vmax.f32 %v13225_v6, 0.0 }
 0x743   :  { %v13228_v42 = vpop.f32.mrf.mxu1  ;;  %13656 = vmatmul.mubr.bf16.gmra.mxu1 %v13273_v29  ;;  %v15285_v39 = vpop.f32.mrf.mxu0 }
 0x744   :  { %v13261_v5 = vmax.f32 %v13227_v63, 0.0  ;;  %v13229_v41 = vadd.f32 %v13228_v42, %v13156_v22 }
 0x745   :  { %v15286_v4 = vpop.f32.mrf.mxu0 }
 0x746   :  { %v13277_v3 = vpack.c.bf16 %v13261_v5, %v13257_v0  ;;  %v13262_v7 = vmax.f32 %v13229_v41, 0.0  ;;  %v15287_v57 = vadd.f32 %v15286_v4, %v15285_v39 }
 0x747   :  { %v15288_v28 = vpop.f32.mrf.mxu0 }
 0x748   :  { %v13278_v23 = vpack.c.bf16 %v13262_v7, %v13258_v30  ;;  %v13577_v45 = vadd.f32 %v15287_v57, %v15236_v54 }
 0x749   :  { %v15289_v1 = vpop.f32.mrf.mxu0 }
 0x74a   :  { %13663 = vmatprep.mubr.bf16.mxu1 %v13278_v23  ;;  %v15290_v2 = vadd.f32 %v15289_v1, %v15288_v28 }
 0x74b   :  { %13664 = vmatmul.mubr.bf16.gmra.mxu1 %v13277_v3  ;;  %v15291_v17 = vpop.f32.mrf.mxu0 }
 0x74c   :  { %v13580_v20 = vadd.f32 %v15290_v2, %v15236_v54 }
 0x74d   :  { %v15292_v62 = vpop.f32.mrf.mxu0 }
 0x74e   :  { %v15293_v59 = vadd.f32 %v15292_v62, %v15291_v17 }
 0x74f   :  { %v15294_v46 = vpop.f32.mrf.mxu0 }
 0x750   :  { %v13585_v31 = vadd.f32 %v15293_v59, %v15236_v54 }
 0x751   :  { %v15295_v9 = vpop.f32.mrf.mxu0 }
 0x752   :  { %v15296_v14 = vadd.f32 %v15295_v9, %v15294_v46 }
 0x753   :  { %v15297_v47 = vpop.f32.mrf.mxu0 }
 0x754   :  { %v13588_v13 = vadd.f32 %v15296_v14, %v15236_v54 }
 0x755   :  { %v15298_v34 = vpop.f32.mrf.mxu0 }
 0x756   :  { %v15299_v50 = vadd.f32 %v15298_v34, %v15297_v47 }
 0x757   :  { %v15300_v25 = vpop.f32.mrf.mxu0 }
 0x758   :  { %v13593_v29 = vadd.f32 %v15299_v50, %v15236_v54 }
 0x759   :  { %v15301_v32 = vpop.f32.mrf.mxu0 }
 0x75a   :  { %v15302_v51 = vadd.f32 %v15301_v32, %v15300_v25 }
 0x75b   :  { %v15303_v61 = vpop.f32.mrf.mxu0 }
 0x75c   :  { %v13596_v40 = vadd.f32 %v15302_v51, %v15236_v54 }
 0x75d   :  { %v15304_v24 = vpop.f32.mrf.mxu0 }
 0x75e   :  { %v15305_v49 = vadd.f32 %v15304_v24, %v15303_v61 }
 0x75f   :  { %v15306_v11 = vpop.f32.mrf.mxu0 }
 0x760   :  { %v13601_v42 = vadd.f32 %v15305_v49, %v15236_v54 }
 0x761   :  { %v15307_v36 = vpop.f32.mrf.mxu0 }
 0x762   :  { %v15308_v0 = vadd.f32 %v15307_v36, %v15306_v11 }
 0x764   :  { %v13604_v7 = vadd.f32 %v15308_v0, %v15236_v54 }
 0x7f3   :  { %v15325_v26 = vpop.f32.mrf.mxu1 }
 0x7f5   :  { %v15326_v44 = vpop.f32.mrf.mxu1 }
 0x7f6   :  { %v15327_v8 = vadd.f32 %v15326_v44, %v15325_v26 }
 0x7f7   :  { %v15328_v21 = vpop.f32.mrf.mxu1 }
 0x7f8   :  { %v13642_v12 = vadd.f32 %v15327_v8, %v13577_v45 }
 0x7f9   :  { %v15329_v35 = vpop.f32.mrf.mxu1 }
 0x7fa   :  { %13672 = vst [vmem:[#allocation14] sm:$0xff] %v13642_v12  ;;  %v15330_v52 = vadd.f32 %v15329_v35, %v15328_v21 }
 0x7fb   :  { %v15331_v48 = vpop.f32.mrf.mxu1 }
 0x7fc   :  { %v13645_v38 = vadd.f32 %v15330_v52, %v13580_v20 }
 0x7fd   :  { %v15332_v18 = vpop.f32.mrf.mxu1 }
 0x7fe   :  { %13673 = vst [vmem:[#allocation14 + $0x8] sm:$0xff] %v13645_v38  ;;  %v15333_v19 = vadd.f32 %v15332_v18, %v15331_v48 }
 0x7ff   :  { %v15334_v27 = vpop.f32.mrf.mxu1 }
 0x800   :  { %v13650_v15 = vadd.f32 %v15333_v19, %v13585_v31 }
 0x801   :  { %v15335_v53 = vpop.f32.mrf.mxu1 }
 0x802   :  { %13674 = vst [vmem:[#allocation14 + $0x10] sm:$0xff] %v13650_v15  ;;  %v15336_v37 = vadd.f32 %v15335_v53, %v15334_v27 }
 0x803   :  { %v15337_v56 = vpop.f32.mrf.mxu1 }
 0x804   :  { %v13653_v16 = vadd.f32 %v15336_v37, %v13588_v13 }
 0x805   :  { %v15338_v43 = vpop.f32.mrf.mxu1 }
 0x806   :  { %13675 = vst [vmem:[#allocation14 + $0x18] sm:$0xff] %v13653_v16  ;;  %v15339_v33 = vadd.f32 %v15338_v43, %v15337_v56 }
 0x807   :  { %v15340_v58 = vpop.f32.mrf.mxu1 }
 0x808   :  { %v13658_v10 = vadd.f32 %v15339_v33, %v13593_v29 }
 0x809   :  { %v15341_v60 = vpop.f32.mrf.mxu1 }
 0x80a   :  { %13676 = vst [vmem:[#allocation14 + $0x20] sm:$0xff] %v13658_v10  ;;  %v15342_v55 = vadd.f32 %v15341_v60, %v15340_v58 }
 0x80b   :  { %v15343_v6 = vpop.f32.mrf.mxu1 }
 0x80c   :  { %v13661_v63 = vadd.f32 %v15342_v55, %v13596_v40 }
 0x80d   :  { %v15344_v22 = vpop.f32.mrf.mxu1 }
 0x80e   :  { %13677 = vst [vmem:[#allocation14 + $0x28] sm:$0xff] %v13661_v63  ;;  %v15345_v5 = vadd.f32 %v15344_v22, %v15343_v6 }
 0x80f   :  { %v15346_v41 = vpop.f32.mrf.mxu1 }
 0x810   :  { %v13666_v30 = vadd.f32 %v15345_v5, %v13601_v42 }
 0x811   :  { %v15347_v3 = vpop.f32.mrf.mxu1 }
 0x812   :  { %13678 = vst [vmem:[#allocation14 + $0x30] sm:$0xff] %v13666_v30  ;;  %v15348_v23 = vadd.f32 %v15347_v3, %v15346_v41 }
 0x814   :  { %v13669_v39 = vadd.f32 %v15348_v23, %v13604_v7 }
 0x816   :  { %13679 = vst [vmem:[#allocation14 + $0x38] sm:$0xff] %v13669_v39 }
 0x817   :  { %16322 = shalt.err (!%p16319_p11)
}
 0x818   :  { %s16354_s15 = smov 128   ;;  %s16355_s16 = smov 8  }
 0x819   :  { %13691 = dma.vmem_to_hbm [thread:$0]  %s13686_s6, 1024, %s18522_s7, [#allocation4], %s16354_s15, %s16354_s15, %s16355_s16  }
 0x81a   :  { %16339 = dma.done.wait [#allocation4], 1024  }
 0x81b   :  { %16340 = vsyncadd [#allocation4], 4294966272 }
 0x81c   :  { %13695 = vsyncpa [#allocation3], 1 }
 0x81d   :  { %13696 = vsyncpa [#allocation6], 1 }
 0x81e   :  { %13697 = vsyncpa [#allocation9], 1 }
 0x81f   :  { %13698 = vsyncpa [#allocation12], 1 }
 0x820   :  { %13699 = vsyncpa [#allocation4], 1 }

</bundles_post_ra>
